<compile_context>
chip_gen: v6e
topology: v6e:2x2x1
jax: 0.10.0
libtpu: 0.0.40
codegen_flags: <defaults>
</compile_context>

<pallas_src>
import functools

import jax
import jax.numpy as jnp
from jax.experimental import pallas as pl
from jax.experimental.pallas import tpu as pltpu

COMPUTE_DTYPE = jnp.bfloat16   # MXU operand dtype; accumulation / epilogues stay float32.


# ----------------------------------------------------------------------------
# In-kernel helpers
# ----------------------------------------------------------------------------

def _write_padded(pad_ref, y_lc, H, W):
    """Store y (H*W, C) into the zero-padded (H+2, W+2, C) scratch, border included,
    as a single aligned full-ref store (no separate border / full re-zero pass)."""
    C = y_lc.shape[-1]
    y = y_lc.reshape(H, W, C).astype(pad_ref.dtype)
    zrow = jnp.zeros((1, W, C), pad_ref.dtype)
    zcol = jnp.zeros((H + 2, 1, C), pad_ref.dtype)
    yp = jnp.concatenate([zrow, y, zrow], axis=0)           # (H+2, W,   C)
    pad_ref[...] = jnp.concatenate([zcol, yp, zcol], axis=1)  # (H+2, W+2, C)


def _conv3x3_im2col(pad_ref, wflat_ref, H, W, cdt):
    """3x3 / stride-1 / pad-1 conv as ONE MXU matmul.

    Builds an in-VMEM (H*W, 9*Cin) im2col tile from the zero-padded scratch, casts it once
    to the compute dtype and multiplies by the flattened (9*Cin, Cout) weight.  Returns f32.
    """
    cin = pad_ref.shape[-1]
    taps = [pad_ref[dh:dh + H, dw:dw + W, :]                  # shifted tap (H, W, Cin)
            for dh in range(3) for dw in range(3)]
    cols = jnp.concatenate(taps, axis=-1).reshape(H * W, 9 * cin).astype(cdt)
    return jnp.dot(cols, wflat_ref[...], preferred_element_type=jnp.float32)


# ----------------------------------------------------------------------------
# Fused SEBottleneck kernel
# ----------------------------------------------------------------------------

def _se_bottleneck_kernel(x_ref,
                          w11_ref, s11_ref, t11_ref, w12_ref,
                          w21_ref, s21_ref, t21_ref, w22_ref, s22_ref, t22_ref, w23_ref,
                          scat1_ref, tcat1_ref, scat2_ref, tcat2_ref,
                          wc_ref, sbn_ref, tbn_ref,
                          wd_ref, bd_ref, wu_ref, bu_ref,
                          o_ref,
                          pad1_ref, pad2_ref, bcat_ref, gate_ref,
                          *, H, W, tl, cdt):
    l = pl.program_id(1)

    # ---- once per sample (row-tile 0): both branches + bn_concat + SE gate --------------
    @pl.when(l == 0)
    def _branches_and_se_gate():
        x = x_ref[0]                                                    # (L, cin) bf16

        # branch 1: conv1_1 (1x1) + bn1_1 + relu -> conv1_2 (3x3) -> bn_concat[:planes]+relu
        y = jnp.dot(x, w11_ref[...], preferred_element_type=jnp.float32)
        y = jnp.maximum(y * s11_ref[...] + t11_ref[...], 0.0)
        _write_padded(pad1_ref, y, H, W)
        y = _conv3x3_im2col(pad1_ref, w12_ref, H, W, cdt)
        b1 = jnp.maximum(y * scat1_ref[...] + tcat1_ref[...], 0.0)

        # branch 2: conv2_1+bn+relu -> conv2_2(3x3)+bn+relu -> conv2_3(3x3) -> bn_concat+relu
        y = jnp.dot(x, w21_ref[...], preferred_element_type=jnp.float32)
        y = jnp.maximum(y * s21_ref[...] + t21_ref[...], 0.0)
        _write_padded(pad2_ref, y, H, W)
        y = _conv3x3_im2col(pad2_ref, w22_ref, H, W, cdt)
        y = jnp.maximum(y * s22_ref[...] + t22_ref[...], 0.0)
        _write_padded(pad2_ref, y, H, W)                                # scratch reused
        y = _conv3x3_im2col(pad2_ref, w23_ref, H, W, cdt)
        b2 = jnp.maximum(y * scat2_ref[...] + tcat2_ref[...], 0.0)

        bcat = jnp.concatenate([b1, b2], axis=-1)                       # (L, planes+half) f32
        bcat_ref[...] = bcat.astype(bcat_ref.dtype)                     # stays in VMEM

        # SE gate: global_avg(bn(conv(cat))) == bn(mean(cat) @ Wc) by linearity, so the big
        # activation is never re-read for the pooling.
        pooled = jnp.mean(bcat, axis=0, keepdims=True)                  # (1, planes+half)
        pooled = jnp.dot(pooled, wc_ref[...].astype(jnp.float32),
                         preferred_element_type=jnp.float32)
        pooled = pooled * sbn_ref[...] + tbn_ref[...]
        d = jnp.maximum(jnp.dot(pooled, wd_ref[...],
                                preferred_element_type=jnp.float32) + bd_ref[...], 0.0)
        u = jnp.dot(d, wu_ref[...], preferred_element_type=jnp.float32) + bu_ref[...]
        gate_ref[...] = jax.nn.sigmoid(u)                               # (1, 4*planes)

    # ---- every row tile: concat + 1x1 expansion conv + bn + SE scale + residual + relu ---
    row0 = pl.multiple_of(l * tl, 8)
    b = bcat_ref[pl.ds(row0, tl), :]                                    # (tl, planes+half) bf16
    out = jnp.dot(b, wc_ref[...], preferred_element_type=jnp.float32)   # single big-K matmul
    out = out * sbn_ref[...] + tbn_ref[...]                             # conv + bn
    res = x_ref[0, pl.ds(row0, tl), :].astype(jnp.float32)              # residual (x, bf16)
    y = out * gate_ref[...] + res                                       # SE scale + residual
    o_ref[...] = jnp.maximum(y, 0.0).reshape(o_ref.shape).astype(o_ref.dtype)


# ----------------------------------------------------------------------------
# Wrapper
# ----------------------------------------------------------------------------

def _choose_row_tile(L, exp):
    """Largest multiple-of-8 divisor of L, capped so the double-buffered f32 output tile
    stays comfortably inside every generation's scoped-VMEM default (v5e: 16 MiB)."""
    cap = min(L, 1024, max(8, (4 * 1024 * 1024) // (2 * exp * 4)))
    cap -= cap % 8
    for t in range(cap, 7, -8):
        if L % t == 0:
            return t
    return L   # tiny / odd spatial sizes: one tile spanning the full extent


def _vmem_bytes_estimate(L, tl, cin, planes, half, exp, mid, H, W):
    bf, f4 = 2, 4
    cat = planes + half
    weights = ((cin * planes + 9 * planes * planes + cin * half + 2 * 9 * half * half
                + cat * exp) * bf
               + (exp * mid + mid * exp) * f4
               + (4 * planes + 6 * half + 3 * exp + mid) * f4)
    blocks = L * cin * bf + tl * exp * f4                               # x block + out tile
    scratch = (H + 2) * (W + 2) * (planes + half) * f4 + L * cat * bf + exp * f4
    live = L * (9 * planes * bf + 9 * half * bf + (2 * planes + 2 * half + cat) * f4)
    return 2 * (blocks + weights) + scratch + live


def se_bottleneck_forward(x_nchw, params, planes, stride=1, out_dtype=jnp.float32):
    """Forward pass matching SEBottleneck.forward (eval-mode BN, downsample=None,
    global average pool, i.e. ave_kernel == spatial size)."""
    N, cin, H, W = x_nchw.shape
    half = int(planes * 0.5)
    cat = planes + half
    exp = planes * 4
    mid = params["w_down"].shape[1]
    # TODO(synk): stride>1 and the optional downsample branch are not implemented; with
    # downsample=None the residual add requires stride==1 and inplanes == 4*planes.
    assert stride == 1 and cin == exp, "requires stride=1 and inplanes == 4*planes"
    L = H * W

    # bf16 channels-last activations: x doubles as the residual, so this halves the two
    # largest HBM streams the kernel reads.
    x_nlc = jnp.transpose(x_nchw, (0, 2, 3, 1)).reshape(N, L, cin).astype(COMPUTE_DTYPE)

    scat, tcat = params["bn_cat"]
    sbn, tbn = params["bn"]
    tl = _choose_row_tile(L, exp)

    weights = (params["w1_1"], *params["bn1_1"], params["w1_2"],
               params["w2_1"], *params["bn2_1"], params["w2_2"], *params["bn2_2"],
               params["w2_3"],
               scat[:, :planes], tcat[:, :planes], scat[:, planes:], tcat[:, planes:],
               params["wc"], sbn, tbn,
               params["w_down"], params["b_down"], params["w_up"], params["b_up"])

    def full2d(arr):
        return pl.BlockSpec(arr.shape, lambda n, l: (0, 0))

    in_specs = [pl.BlockSpec((1, L, cin), lambda n, l: (n, 0, 0))]      # x resident across l
    in_specs += [full2d(a) for a in weights]

    cp_kwargs = dict(dimension_semantics=("parallel", "arbitrary"))
    vmem_est = _vmem_bytes_estimate(L, tl, cin, planes, half, exp, mid, H, W)
    if vmem_est > 16 * 1024 * 1024:   # raise only when needed; never past v7x's 64 MiB part
        cp_kwargs["vmem_limit_bytes"] = int(min(max(vmem_est * 5 // 4, 32 * 1024 * 1024),
                                                60 * 1024 * 1024))

    kernel = functools.partial(_se_bottleneck_kernel, H=H, W=W, tl=tl, cdt=COMPUTE_DTYPE)

    y = pl.pallas_call(
        kernel,
        out_shape=jax.ShapeDtypeStruct((N, L, exp), out_dtype),
        grid_spec=pltpu.PrefetchScalarGridSpec(
            num_scalar_prefetch=0,
            grid=(N, L // tl),
            in_specs=in_specs,
            out_specs=pl.BlockSpec((1, tl, exp), lambda n, l: (n, l, 0)),
            scratch_shapes=[
                pltpu.VMEM((H + 2, W + 2, planes), jnp.float32),   # padded conv scratch, br.1
                pltpu.VMEM((H + 2, W + 2, half), jnp.float32),     # padded conv scratch, br.2
                pltpu.VMEM((L, cat), COMPUTE_DTYPE),               # fused b1|b2 (never in HBM)
                pltpu.VMEM((1, exp), jnp.float32),                 # SE gate
            ]),
        compiler_params=pltpu.CompilerParams(**cp_kwargs),
    )(x_nlc, *weights)

    return jnp.transpose(y.reshape(N, H, W, exp), (0, 3, 1, 2))         # back to NCHW


# ----------------------------------------------------------------------------
# Parameters (inference-mode folded BatchNorm)
# ----------------------------------------------------------------------------

def _folded_bn(key, c, eps=1e-5):
    k1, k2, k3 = jax.random.split(key, 3)
    gamma = 1.0 + 0.1 * jax.random.normal(k1, (c,), jnp.float32)
    beta = 0.1 * jax.random.normal(k2, (c,), jnp.float32)
    mean = 0.1 * jax.random.normal(k3, (c,), jnp.float32)
    var = jnp.ones((c,), jnp.float32)
    scale = gamma / jnp.sqrt(var + eps)
    shift = beta - mean * scale
    return scale.reshape(1, c), shift.reshape(1, c)


def init_params(key, inplanes, planes, compute_dtype=COMPUTE_DTYPE):
    half = int(planes * 0.5)
    mid = planes // 4
    exp = planes * 4
    cat = planes + half
    ks = jax.random.split(key, 16)

    def w(k, shape):
        fan_in = 1
        for s in shape[:-1]:
            fan_in *= s
        return jax.random.normal(k, shape, jnp.float32) / jnp.sqrt(float(fan_in))

    p = {}
    p["w1_1"] = w(ks[0], (inplanes, planes)).astype(compute_dtype)
    p["bn1_1"] = _folded_bn(ks[1], planes)
    # 3x3 weights stored flat as (9*Cin, Cout), tap order dh*3+dw
    # (== torch (Cout,Cin,3,3).transpose(2,3,1,0).reshape(9*Cin, Cout)).
    p["w1_2"] = w(ks[2], (3, 3, planes, planes)).reshape(9 * planes, planes).astype(compute_dtype)
    p["w2_1"] = w(ks[3], (inplanes, half)).astype(compute_dtype)
    p["bn2_1"] = _folded_bn(ks[4], half)
    p["w2_2"] = w(ks[5], (3, 3, half, half)).reshape(9 * half, half).astype(compute_dtype)
    p["bn2_2"] = _folded_bn(ks[6], half)
    p["w2_3"] = w(ks[7], (3, 3, half, half)).reshape(9 * half, half).astype(compute_dtype)
    p["bn_cat"] = _folded_bn(ks[8], cat)
    p["wc"] = w(ks[9], (cat, exp)).astype(compute_dtype)                # 1x1 expansion conv
    p["bn"] = _folded_bn(ks[10], exp)
    p["w_down"] = w(ks[11], (exp, mid))
    p["b_down"] = (0.1 * jax.random.normal(ks[12], (mid,), jnp.float32)).reshape(1, mid)
    p["w_up"] = w(ks[13], (mid, exp))
    p["b_up"] = (0.1 * jax.random.normal(ks[14], (exp,), jnp.float32)).reshape(1, exp)
    return p


# ----------------------------------------------------------------------------
# Plain-JAX f32 reference (self-test only)
# ----------------------------------------------------------------------------

def _reference_forward(x_nlc, params, planes, H, W):
    f32 = jnp.float32
    N, L, _ = x_nlc.shape
    x = x_nlc.astype(f32)
    relu = lambda v: jnp.maximum(v, 0.0)

    def bn(y, sb):
        s, t = sb
        return y * s + t

    def conv3x3(y, wflat):
        C = y.shape[-1]
        yp = jnp.pad(y.reshape(N, H, W, C), ((0, 0), (1, 1), (1, 1), (0, 0)))
        taps = [yp[:, dh:dh + H, dw:dw + W, :] for dh in range(3) for dw in range(3)]
        cols = jnp.concatenate(taps, axis=-1).reshape(N, L, 9 * C)
        return cols @ wflat.astype(f32)

    b1 = relu(bn(x @ params["w1_1"].astype(f32), params["bn1_1"]))
    b1 = conv3x3(b1, params["w1_2"])
    b2 = relu(bn(x @ params["w2_1"].astype(f32), params["bn2_1"]))
    b2 = conv3x3(b2, params["w2_2"])
    b2 = relu(bn(b2, params["bn2_2"]))
    b2 = conv3x3(b2, params["w2_3"])
    cat = relu(bn(jnp.concatenate([b1, b2], axis=-1), params["bn_cat"]))
    out = bn(cat @ params["wc"].astype(f32), params["bn"])
    se = jnp.mean(out, axis=1, keepdims=True)
    se = relu(se @ params["w_down"] + params["b_down"])
    se = jax.nn.sigmoid(se @ params["w_up"] + params["b_up"])
    return relu(out * se + x)


# ----------------------------------------------------------------------------
# main
# ----------------------------------------------------------------------------

if __name__ == "__main__":
    # inplanes = 4*planes so the residual add works with downsample=None; the global
    # average pool (ave_kernel) equals the post-branch spatial size.
    planes = 8
    inplanes = planes * 4        # 32
    N, H, W = 2, 16, 16

    key = jax.random.PRNGKey(0)
    kx, kp = jax.random.split(key)
    x = jax.random.normal(kx, (N, inplanes, H, W), jnp.float32)
    params = init_params(kp, inplanes, planes)

    fwd = jax.jit(functools.partial(se_bottleneck_forward, planes=planes))
    out = jax.block_until_ready(fwd(x, params))

    assert out.shape == (N, planes * 4, H, W), out.shape
    assert bool(jnp.all(jnp.isfinite(out)))
    assert bool(jnp.all(out >= 0.0))  # final relu

    # numeric check vs a plain-JAX f32 reference (only bf16 rounding of streamed operands
    # separates the two paths)
    x_nlc = jnp.transpose(x, (0, 2, 3, 1)).reshape(N, H * W, inplanes).astype(COMPUTE_DTYPE)
    ref = _reference_forward(x_nlc, params, planes, H, W)
    ref = jnp.transpose(ref.reshape(N, H, W, planes * 4), (0, 3, 1, 2))
    err = float(jnp.max(jnp.abs(out - ref)))
    assert err < 1e-1, f"max abs error {err}"

    print("KERNEL_OK")
</pallas_src>

<mosaic_0001>
module attributes {stable_mosaic.version = 11 : i64} {
  func.func @_se_bottleneck_kernel(%arg0: i32, %arg1: i32, %arg2: memref<1x256x32xbf16, #tpu.memory_space<vmem>>, %arg3: memref<32x8xbf16, #tpu.memory_space<vmem>>, %arg4: memref<1x8xf32, #tpu.memory_space<vmem>>, %arg5: memref<1x8xf32, #tpu.memory_space<vmem>>, %arg6: memref<72x8xbf16, #tpu.memory_space<vmem>>, %arg7: memref<32x4xbf16, #tpu.memory_space<vmem>>, %arg8: memref<1x4xf32, #tpu.memory_space<vmem>>, %arg9: memref<1x4xf32, #tpu.memory_space<vmem>>, %arg10: memref<36x4xbf16, #tpu.memory_space<vmem>>, %arg11: memref<1x4xf32, #tpu.memory_space<vmem>>, %arg12: memref<1x4xf32, #tpu.memory_space<vmem>>, %arg13: memref<36x4xbf16, #tpu.memory_space<vmem>>, %arg14: memref<1x8xf32, #tpu.memory_space<vmem>>, %arg15: memref<1x8xf32, #tpu.memory_space<vmem>>, %arg16: memref<1x4xf32, #tpu.memory_space<vmem>>, %arg17: memref<1x4xf32, #tpu.memory_space<vmem>>, %arg18: memref<12x32xbf16, #tpu.memory_space<vmem>>, %arg19: memref<1x32xf32, #tpu.memory_space<vmem>>, %arg20: memref<1x32xf32, #tpu.memory_space<vmem>>, %arg21: memref<32x2xf32, #tpu.memory_space<vmem>>, %arg22: memref<1x2xf32, #tpu.memory_space<vmem>>, %arg23: memref<2x32xf32, #tpu.memory_space<vmem>>, %arg24: memref<1x32xf32, #tpu.memory_space<vmem>>, %arg25: memref<1x256x32xf32, #tpu.memory_space<vmem>>, %arg26: memref<18x18x8xf32, #tpu.memory_space<vmem>>, %arg27: memref<18x18x4xf32, #tpu.memory_space<vmem>>, %arg28: memref<256x12xbf16, #tpu.memory_space<vmem>>, %arg29: memref<1x32xf32, #tpu.memory_space<vmem>>) attributes {dimension_semantics = [#tpu.dimension_semantics<parallel>, #tpu.dimension_semantics<arbitrary>], iteration_bounds = array<i64: 2, 1>, scalar_prefetch = 0 : i64, scratch_operands = 4 : i64, tpu.core_type = #tpu.core_type<tc>, window_params = [{transform_indices = @transform_0, window_bounds = array<i64: 1, 256, 32>}, {pipeline_mode = #tpu.pipeline_mode<synchronous>, transform_indices = @transform_1, window_bounds = array<i64: 32, 8>}, {pipeline_mode = #tpu.pipeline_mode<synchronous>, transform_indices = @transform_2, window_bounds = array<i64: 1, 8>}, {pipeline_mode = #tpu.pipeline_mode<synchronous>, transform_indices = @transform_3, window_bounds = array<i64: 1, 8>}, {pipeline_mode = #tpu.pipeline_mode<synchronous>, transform_indices = @transform_4, window_bounds = array<i64: 72, 8>}, {pipeline_mode = #tpu.pipeline_mode<synchronous>, transform_indices = @transform_5, window_bounds = array<i64: 32, 4>}, {pipeline_mode = #tpu.pipeline_mode<synchronous>, transform_indices = @transform_6, window_bounds = array<i64: 1, 4>}, {pipeline_mode = #tpu.pipeline_mode<synchronous>, transform_indices = @transform_7, window_bounds = array<i64: 1, 4>}, {pipeline_mode = #tpu.pipeline_mode<synchronous>, transform_indices = @transform_8, window_bounds = array<i64: 36, 4>}, {pipeline_mode = #tpu.pipeline_mode<synchronous>, transform_indices = @transform_9, window_bounds = array<i64: 1, 4>}, {pipeline_mode = #tpu.pipeline_mode<synchronous>, transform_indices = @transform_10, window_bounds = array<i64: 1, 4>}, {pipeline_mode = #tpu.pipeline_mode<synchronous>, transform_indices = @transform_11, window_bounds = array<i64: 36, 4>}, {pipeline_mode = #tpu.pipeline_mode<synchronous>, transform_indices = @transform_12, window_bounds = array<i64: 1, 8>}, {pipeline_mode = #tpu.pipeline_mode<synchronous>, transform_indices = @transform_13, window_bounds = array<i64: 1, 8>}, {pipeline_mode = #tpu.pipeline_mode<synchronous>, transform_indices = @transform_14, window_bounds = array<i64: 1, 4>}, {pipeline_mode = #tpu.pipeline_mode<synchronous>, transform_indices = @transform_15, window_bounds = array<i64: 1, 4>}, {pipeline_mode = #tpu.pipeline_mode<synchronous>, transform_indices = @transform_16, window_bounds = array<i64: 12, 32>}, {pipeline_mode = #tpu.pipeline_mode<synchronous>, transform_indices = @transform_17, window_bounds = array<i64: 1, 32>}, {pipeline_mode = #tpu.pipeline_mode<synchronous>, transform_indices = @transform_18, window_bounds = array<i64: 1, 32>}, {pipeline_mode = #tpu.pipeline_mode<synchronous>, transform_indices = @transform_19, window_bounds = array<i64: 32, 2>}, {pipeline_mode = #tpu.pipeline_mode<synchronous>, transform_indices = @transform_20, window_bounds = array<i64: 1, 2>}, {pipeline_mode = #tpu.pipeline_mode<synchronous>, transform_indices = @transform_21, window_bounds = array<i64: 2, 32>}, {pipeline_mode = #tpu.pipeline_mode<synchronous>, transform_indices = @transform_22, window_bounds = array<i64: 1, 32>}, {transform_indices = @transform_23, window_bounds = array<i64: 1, 256, 32>}]} {
    %c0_i32 = arith.constant 0 : i32
    %0 = arith.cmpi eq, %arg1, %c0_i32 : i32
    %1 = arith.extui %0 : i1 to i32
    %c0_i32_0 = arith.constant 0 : i32
    %2 = arith.cmpi ne, %1, %c0_i32_0 : i32
    scf.if %2 {
      %c0_15 = arith.constant 0 : index
      %c0_16 = arith.constant 0 : index
      %c0_17 = arith.constant 0 : index
      %27 = vector.load %arg2[%c0_15, %c0_16, %c0_17] : memref<1x256x32xbf16, #tpu.memory_space<vmem>>, vector<1x256x32xbf16>
      %28 = vector.shape_cast %27 : vector<1x256x32xbf16> to vector<256x32xbf16>
      %c0_18 = arith.constant 0 : index
      %c0_19 = arith.constant 0 : index
      %29 = vector.load %arg3[%c0_18, %c0_19] : memref<32x8xbf16, #tpu.memory_space<vmem>>, vector<32x8xbf16>
      %cst_20 = arith.constant dense<0.000000e+00> : vector<256x8xf32>
      %30 = tpu.matmul %28, %29, %cst_20 {dimension_numbers = #tpu.dot_dimension_numbers<[1], [0], [0], [1], [0, 0, 1, 1], [], []>} : vector<256x32xbf16>, vector<32x8xbf16>, vector<256x8xf32> -> vector<256x8xf32>
      %c0_21 = arith.constant 0 : index
      %c0_22 = arith.constant 0 : index
      %31 = vector.load %arg4[%c0_21, %c0_22] : memref<1x8xf32, #tpu.memory_space<vmem>>, vector<1x8xf32>
      %32 = vector.broadcast %31 : vector<1x8xf32> to vector<256x8xf32>
      %33 = arith.mulf %30, %32 : vector<256x8xf32>
      %c0_23 = arith.constant 0 : index
      %c0_24 = arith.constant 0 : index
      %34 = vector.load %arg5[%c0_23, %c0_24] : memref<1x8xf32, #tpu.memory_space<vmem>>, vector<1x8xf32>
      %35 = vector.broadcast %34 : vector<1x8xf32> to vector<256x8xf32>
      %36 = arith.addf %33, %35 : vector<256x8xf32>
      %cst_25 = arith.constant 0.000000e+00 : f32
      %37 = vector.broadcast %cst_25 : f32 to vector<256x8xf32>
      %38 = arith.maximumf %36, %37 : vector<256x8xf32>
      %39 = vector.shape_cast %38 : vector<256x8xf32> to vector<16x16x8xf32>
      %cst_26 = arith.constant 0.000000e+00 : f32
      %40 = vector.broadcast %cst_26 : f32 to vector<1x16x8xf32>
      %cst_27 = arith.constant 0.000000e+00 : f32
      %41 = vector.broadcast %cst_27 : f32 to vector<18x1x8xf32>
      %42 = tpu.concatenate %40, %39, %40 in 0 : vector<1x16x8xf32>, vector<16x16x8xf32>, vector<1x16x8xf32> -> vector<18x16x8xf32>
      %43 = tpu.concatenate %41, %42, %41 in 1 : vector<18x1x8xf32>, vector<18x16x8xf32>, vector<18x1x8xf32> -> vector<18x18x8xf32>
      %c0_28 = arith.constant 0 : index
      %c0_29 = arith.constant 0 : index
      %c0_30 = arith.constant 0 : index
      %44 = vector.load %arg26[%c0_28, %c0_29, %c0_30] : memref<18x18x8xf32, #tpu.memory_space<vmem>>, vector<18x18x8xf32>
      tpu.vector_store %arg26[%c0_28, %c0_29, %c0_30], %43 {strides = array<i32>} : memref<18x18x8xf32, #tpu.memory_space<vmem>>, vector<18x18x8xf32>,
      %c0_31 = arith.constant 0 : index
      %c0_32 = arith.constant 0 : index
      %c0_33 = arith.constant 0 : index
      %45 = vector.load %arg26[%c0_31, %c0_32, %c0_33] : memref<18x18x8xf32, #tpu.memory_space<vmem>>, vector<16x16x8xf32>
      %c0_34 = arith.constant 0 : index
      %c1 = arith.constant 1 : index
      %c0_35 = arith.constant 0 : index
      %46 = vector.load %arg26[%c0_34, %c1, %c0_35] : memref<18x18x8xf32, #tpu.memory_space<vmem>>, vector<16x16x8xf32>
      %c0_36 = arith.constant 0 : index
      %c2 = arith.constant 2 : index
      %c0_37 = arith.constant 0 : index
      %47 = vector.load %arg26[%c0_36, %c2, %c0_37] : memref<18x18x8xf32, #tpu.memory_space<vmem>>, vector<16x16x8xf32>
      %c1_38 = arith.constant 1 : index
      %c0_39 = arith.constant 0 : index
      %c0_40 = arith.constant 0 : index
      %48 = vector.load %arg26[%c1_38, %c0_39, %c0_40] : memref<18x18x8xf32, #tpu.memory_space<vmem>>, vector<16x16x8xf32>
      %c1_41 = arith.constant 1 : index
      %c1_42 = arith.constant 1 : index
      %c0_43 = arith.constant 0 : index
      %49 = vector.load %arg26[%c1_41, %c1_42, %c0_43] : memref<18x18x8xf32, #tpu.memory_space<vmem>>, vector<16x16x8xf32>
      %c1_44 = arith.constant 1 : index
      %c2_45 = arith.constant 2 : index
      %c0_46 = arith.constant 0 : index
      %50 = vector.load %arg26[%c1_44, %c2_45, %c0_46] : memref<18x18x8xf32, #tpu.memory_space<vmem>>, vector<16x16x8xf32>
      %c2_47 = arith.constant 2 : index
      %c0_48 = arith.constant 0 : index
      %c0_49 = arith.constant 0 : index
      %51 = vector.load %arg26[%c2_47, %c0_48, %c0_49] : memref<18x18x8xf32, #tpu.memory_space<vmem>>, vector<16x16x8xf32>
      %c2_50 = arith.constant 2 : index
      %c1_51 = arith.constant 1 : index
      %c0_52 = arith.constant 0 : index
      %52 = vector.load %arg26[%c2_50, %c1_51, %c0_52] : memref<18x18x8xf32, #tpu.memory_space<vmem>>, vector<16x16x8xf32>
      %c2_53 = arith.constant 2 : index
      %c2_54 = arith.constant 2 : index
      %c0_55 = arith.constant 0 : index
      %53 = vector.load %arg26[%c2_53, %c2_54, %c0_55] : memref<18x18x8xf32, #tpu.memory_space<vmem>>, vector<16x16x8xf32>
      %54 = tpu.concatenate %45, %46, %47, %48, %49, %50, %51, %52, %53 in 2 : vector<16x16x8xf32>, vector<16x16x8xf32>, vector<16x16x8xf32>, vector<16x16x8xf32>, vector<16x16x8xf32>, vector<16x16x8xf32>, vector<16x16x8xf32>, vector<16x16x8xf32>, vector<16x16x8xf32> -> vector<16x16x72xf32>
      %55 = vector.shape_cast %54 : vector<16x16x72xf32> to vector<256x72xf32>
      %56 = arith.truncf %55 : vector<256x72xf32> to vector<256x72xbf16>
      %c0_56 = arith.constant 0 : index
      %c0_57 = arith.constant 0 : index
      %57 = vector.load %arg6[%c0_56, %c0_57] : memref<72x8xbf16, #tpu.memory_space<vmem>>, vector<72x8xbf16>
      %cst_58 = arith.constant dense<0.000000e+00> : vector<256x8xf32>
      %58 = tpu.matmul %56, %57, %cst_58 {dimension_numbers = #tpu.dot_dimension_numbers<[1], [0], [0], [1], [0, 0, 1, 1], [], []>} : vector<256x72xbf16>, vector<72x8xbf16>, vector<256x8xf32> -> vector<256x8xf32>
      %c0_59 = arith.constant 0 : index
      %c0_60 = arith.constant 0 : index
      %59 = vector.load %arg14[%c0_59, %c0_60] : memref<1x8xf32, #tpu.memory_space<vmem>>, vector<1x8xf32>
      %60 = vector.broadcast %59 : vector<1x8xf32> to vector<256x8xf32>
      %61 = arith.mulf %58, %60 : vector<256x8xf32>
      %c0_61 = arith.constant 0 : index
      %c0_62 = arith.constant 0 : index
      %62 = vector.load %arg15[%c0_61, %c0_62] : memref<1x8xf32, #tpu.memory_space<vmem>>, vector<1x8xf32>
      %63 = vector.broadcast %62 : vector<1x8xf32> to vector<256x8xf32>
      %64 = arith.addf %61, %63 : vector<256x8xf32>
      %cst_63 = arith.constant 0.000000e+00 : f32
      %65 = vector.broadcast %cst_63 : f32 to vector<256x8xf32>
      %66 = arith.maximumf %64, %65 : vector<256x8xf32>
      %c0_64 = arith.constant 0 : index
      %c0_65 = arith.constant 0 : index
      %67 = vector.load %arg7[%c0_64, %c0_65] : memref<32x4xbf16, #tpu.memory_space<vmem>>, vector<32x4xbf16>
      %cst_66 = arith.constant dense<0.000000e+00> : vector<256x4xf32>
      %68 = tpu.matmul %28, %67, %cst_66 {dimension_numbers = #tpu.dot_dimension_numbers<[1], [0], [0], [1], [0, 0, 1, 1], [], []>} : vector<256x32xbf16>, vector<32x4xbf16>, vector<256x4xf32> -> vector<256x4xf32>
      %c0_67 = arith.constant 0 : index
      %c0_68 = arith.constant 0 : index
      %69 = vector.load %arg8[%c0_67, %c0_68] : memref<1x4xf32, #tpu.memory_space<vmem>>, vector<1x4xf32>
      %70 = vector.broadcast %69 : vector<1x4xf32> to vector<256x4xf32>
      %71 = arith.mulf %68, %70 : vector<256x4xf32>
      %c0_69 = arith.constant 0 : index
      %c0_70 = arith.constant 0 : index
      %72 = vector.load %arg9[%c0_69, %c0_70] : memref<1x4xf32, #tpu.memory_space<vmem>>, vector<1x4xf32>
      %73 = vector.broadcast %72 : vector<1x4xf32> to vector<256x4xf32>
      %74 = arith.addf %71, %73 : vector<256x4xf32>
      %cst_71 = arith.constant 0.000000e+00 : f32
      %75 = vector.broadcast %cst_71 : f32 to vector<256x4xf32>
      %76 = arith.maximumf %74, %75 : vector<256x4xf32>
      %77 = vector.shape_cast %76 : vector<256x4xf32> to vector<16x16x4xf32>
      %cst_72 = arith.constant 0.000000e+00 : f32
      %78 = vector.broadcast %cst_72 : f32 to vector<1x16x4xf32>
      %cst_73 = arith.constant 0.000000e+00 : f32
      %79 = vector.broadcast %cst_73 : f32 to vector<18x1x4xf32>
      %80 = tpu.concatenate %78, %77, %78 in 0 : vector<1x16x4xf32>, vector<16x16x4xf32>, vector<1x16x4xf32> -> vector<18x16x4xf32>
      %81 = tpu.concatenate %79, %80, %79 in 1 : vector<18x1x4xf32>, vector<18x16x4xf32>, vector<18x1x4xf32> -> vector<18x18x4xf32>
      %c0_74 = arith.constant 0 : index
      %c0_75 = arith.constant 0 : index
      %c0_76 = arith.constant 0 : index
      %82 = vector.load %arg27[%c0_74, %c0_75, %c0_76] : memref<18x18x4xf32, #tpu.memory_space<vmem>>, vector<18x18x4xf32>
      tpu.vector_store %arg27[%c0_74, %c0_75, %c0_76], %81 {strides = array<i32>} : memref<18x18x4xf32, #tpu.memory_space<vmem>>, vector<18x18x4xf32>,
      %c0_77 = arith.constant 0 : index
      %c0_78 = arith.constant 0 : index
      %c0_79 = arith.constant 0 : index
      %83 = vector.load %arg27[%c0_77, %c0_78, %c0_79] : memref<18x18x4xf32, #tpu.memory_space<vmem>>, vector<16x16x4xf32>
      %c0_80 = arith.constant 0 : index
      %c1_81 = arith.constant 1 : index
      %c0_82 = arith.constant 0 : index
      %84 = vector.load %arg27[%c0_80, %c1_81, %c0_82] : memref<18x18x4xf32, #tpu.memory_space<vmem>>, vector<16x16x4xf32>
      %c0_83 = arith.constant 0 : index
      %c2_84 = arith.constant 2 : index
      %c0_85 = arith.constant 0 : index
      %85 = vector.load %arg27[%c0_83, %c2_84, %c0_85] : memref<18x18x4xf32, #tpu.memory_space<vmem>>, vector<16x16x4xf32>
      %c1_86 = arith.constant 1 : index
      %c0_87 = arith.constant 0 : index
      %c0_88 = arith.constant 0 : index
      %86 = vector.load %arg27[%c1_86, %c0_87, %c0_88] : memref<18x18x4xf32, #tpu.memory_space<vmem>>, vector<16x16x4xf32>
      %c1_89 = arith.constant 1 : index
      %c1_90 = arith.constant 1 : index
      %c0_91 = arith.constant 0 : index
      %87 = vector.load %arg27[%c1_89, %c1_90, %c0_91] : memref<18x18x4xf32, #tpu.memory_space<vmem>>, vector<16x16x4xf32>
      %c1_92 = arith.constant 1 : index
      %c2_93 = arith.constant 2 : index
      %c0_94 = arith.constant 0 : index
      %88 = vector.load %arg27[%c1_92, %c2_93, %c0_94] : memref<18x18x4xf32, #tpu.memory_space<vmem>>, vector<16x16x4xf32>
      %c2_95 = arith.constant 2 : index
      %c0_96 = arith.constant 0 : index
      %c0_97 = arith.constant 0 : index
      %89 = vector.load %arg27[%c2_95, %c0_96, %c0_97] : memref<18x18x4xf32, #tpu.memory_space<vmem>>, vector<16x16x4xf32>
      %c2_98 = arith.constant 2 : index
      %c1_99 = arith.constant 1 : index
      %c0_100 = arith.constant 0 : index
      %90 = vector.load %arg27[%c2_98, %c1_99, %c0_100] : memref<18x18x4xf32, #tpu.memory_space<vmem>>, vector<16x16x4xf32>
      %c2_101 = arith.constant 2 : index
      %c2_102 = arith.constant 2 : index
      %c0_103 = arith.constant 0 : index
      %91 = vector.load %arg27[%c2_101, %c2_102, %c0_103] : memref<18x18x4xf32, #tpu.memory_space<vmem>>, vector<16x16x4xf32>
      %92 = tpu.concatenate %83, %84, %85, %86, %87, %88, %89, %90, %91 in 2 : vector<16x16x4xf32>, vector<16x16x4xf32>, vector<16x16x4xf32>, vector<16x16x4xf32>, vector<16x16x4xf32>, vector<16x16x4xf32>, vector<16x16x4xf32>, vector<16x16x4xf32>, vector<16x16x4xf32> -> vector<16x16x36xf32>
      %93 = vector.shape_cast %92 : vector<16x16x36xf32> to vector<256x36xf32>
      %94 = arith.truncf %93 : vector<256x36xf32> to vector<256x36xbf16>
      %c0_104 = arith.constant 0 : index
      %c0_105 = arith.constant 0 : index
      %95 = vector.load %arg10[%c0_104, %c0_105] : memref<36x4xbf16, #tpu.memory_space<vmem>>, vector<36x4xbf16>
      %cst_106 = arith.constant dense<0.000000e+00> : vector<256x4xf32>
      %96 = tpu.matmul %94, %95, %cst_106 {dimension_numbers = #tpu.dot_dimension_numbers<[1], [0], [0], [1], [0, 0, 1, 1], [], []>} : vector<256x36xbf16>, vector<36x4xbf16>, vector<256x4xf32> -> vector<256x4xf32>
      %c0_107 = arith.constant 0 : index
      %c0_108 = arith.constant 0 : index
      %97 = vector.load %arg11[%c0_107, %c0_108] : memref<1x4xf32, #tpu.memory_space<vmem>>, vector<1x4xf32>
      %98 = vector.broadcast %97 : vector<1x4xf32> to vector<256x4xf32>
      %99 = arith.mulf %96, %98 : vector<256x4xf32>
      %c0_109 = arith.constant 0 : index
      %c0_110 = arith.constant 0 : index
      %100 = vector.load %arg12[%c0_109, %c0_110] : memref<1x4xf32, #tpu.memory_space<vmem>>, vector<1x4xf32>
      %101 = vector.broadcast %100 : vector<1x4xf32> to vector<256x4xf32>
      %102 = arith.addf %99, %101 : vector<256x4xf32>
      %cst_111 = arith.constant 0.000000e+00 : f32
      %103 = vector.broadcast %cst_111 : f32 to vector<256x4xf32>
      %104 = arith.maximumf %102, %103 : vector<256x4xf32>
      %105 = vector.shape_cast %104 : vector<256x4xf32> to vector<16x16x4xf32>
      %cst_112 = arith.constant 0.000000e+00 : f32
      %106 = vector.broadcast %cst_112 : f32 to vector<1x16x4xf32>
      %cst_113 = arith.constant 0.000000e+00 : f32
      %107 = vector.broadcast %cst_113 : f32 to vector<18x1x4xf32>
      %108 = tpu.concatenate %106, %105, %106 in 0 : vector<1x16x4xf32>, vector<16x16x4xf32>, vector<1x16x4xf32> -> vector<18x16x4xf32>
      %109 = tpu.concatenate %107, %108, %107 in 1 : vector<18x1x4xf32>, vector<18x16x4xf32>, vector<18x1x4xf32> -> vector<18x18x4xf32>
      %c0_114 = arith.constant 0 : index
      %c0_115 = arith.constant 0 : index
      %c0_116 = arith.constant 0 : index
      %110 = vector.load %arg27[%c0_114, %c0_115, %c0_116] : memref<18x18x4xf32, #tpu.memory_space<vmem>>, vector<18x18x4xf32>
      tpu.vector_store %arg27[%c0_114, %c0_115, %c0_116], %109 {strides = array<i32>} : memref<18x18x4xf32, #tpu.memory_space<vmem>>, vector<18x18x4xf32>,
      %c0_117 = arith.constant 0 : index
      %c0_118 = arith.constant 0 : index
      %c0_119 = arith.constant 0 : index
      %111 = vector.load %arg27[%c0_117, %c0_118, %c0_119] : memref<18x18x4xf32, #tpu.memory_space<vmem>>, vector<16x16x4xf32>
      %c0_120 = arith.constant 0 : index
      %c1_121 = arith.constant 1 : index
      %c0_122 = arith.constant 0 : index
      %112 = vector.load %arg27[%c0_120, %c1_121, %c0_122] : memref<18x18x4xf32, #tpu.memory_space<vmem>>, vector<16x16x4xf32>
      %c0_123 = arith.constant 0 : index
      %c2_124 = arith.constant 2 : index
      %c0_125 = arith.constant 0 : index
      %113 = vector.load %arg27[%c0_123, %c2_124, %c0_125] : memref<18x18x4xf32, #tpu.memory_space<vmem>>, vector<16x16x4xf32>
      %c1_126 = arith.constant 1 : index
      %c0_127 = arith.constant 0 : index
      %c0_128 = arith.constant 0 : index
      %114 = vector.load %arg27[%c1_126, %c0_127, %c0_128] : memref<18x18x4xf32, #tpu.memory_space<vmem>>, vector<16x16x4xf32>
      %c1_129 = arith.constant 1 : index
      %c1_130 = arith.constant 1 : index
      %c0_131 = arith.constant 0 : index
      %115 = vector.load %arg27[%c1_129, %c1_130, %c0_131] : memref<18x18x4xf32, #tpu.memory_space<vmem>>, vector<16x16x4xf32>
      %c1_132 = arith.constant 1 : index
      %c2_133 = arith.constant 2 : index
      %c0_134 = arith.constant 0 : index
      %116 = vector.load %arg27[%c1_132, %c2_133, %c0_134] : memref<18x18x4xf32, #tpu.memory_space<vmem>>, vector<16x16x4xf32>
      %c2_135 = arith.constant 2 : index
      %c0_136 = arith.constant 0 : index
      %c0_137 = arith.constant 0 : index
      %117 = vector.load %arg27[%c2_135, %c0_136, %c0_137] : memref<18x18x4xf32, #tpu.memory_space<vmem>>, vector<16x16x4xf32>
      %c2_138 = arith.constant 2 : index
      %c1_139 = arith.constant 1 : index
      %c0_140 = arith.constant 0 : index
      %118 = vector.load %arg27[%c2_138, %c1_139, %c0_140] : memref<18x18x4xf32, #tpu.memory_space<vmem>>, vector<16x16x4xf32>
      %c2_141 = arith.constant 2 : index
      %c2_142 = arith.constant 2 : index
      %c0_143 = arith.constant 0 : index
      %119 = vector.load %arg27[%c2_141, %c2_142, %c0_143] : memref<18x18x4xf32, #tpu.memory_space<vmem>>, vector<16x16x4xf32>
      %120 = tpu.concatenate %111, %112, %113, %114, %115, %116, %117, %118, %119 in 2 : vector<16x16x4xf32>, vector<16x16x4xf32>, vector<16x16x4xf32>, vector<16x16x4xf32>, vector<16x16x4xf32>, vector<16x16x4xf32>, vector<16x16x4xf32>, vector<16x16x4xf32>, vector<16x16x4xf32> -> vector<16x16x36xf32>
      %121 = vector.shape_cast %120 : vector<16x16x36xf32> to vector<256x36xf32>
      %122 = arith.truncf %121 : vector<256x36xf32> to vector<256x36xbf16>
      %c0_144 = arith.constant 0 : index
      %c0_145 = arith.constant 0 : index
      %123 = vector.load %arg13[%c0_144, %c0_145] : memref<36x4xbf16, #tpu.memory_space<vmem>>, vector<36x4xbf16>
      %cst_146 = arith.constant dense<0.000000e+00> : vector<256x4xf32>
      %124 = tpu.matmul %122, %123, %cst_146 {dimension_numbers = #tpu.dot_dimension_numbers<[1], [0], [0], [1], [0, 0, 1, 1], [], []>} : vector<256x36xbf16>, vector<36x4xbf16>, vector<256x4xf32> -> vector<256x4xf32>
      %c0_147 = arith.constant 0 : index
      %c0_148 = arith.constant 0 : index
      %125 = vector.load %arg16[%c0_147, %c0_148] : memref<1x4xf32, #tpu.memory_space<vmem>>, vector<1x4xf32>
      %126 = vector.broadcast %125 : vector<1x4xf32> to vector<256x4xf32>
      %127 = arith.mulf %124, %126 : vector<256x4xf32>
      %c0_149 = arith.constant 0 : index
      %c0_150 = arith.constant 0 : index
      %128 = vector.load %arg17[%c0_149, %c0_150] : memref<1x4xf32, #tpu.memory_space<vmem>>, vector<1x4xf32>
      %129 = vector.broadcast %128 : vector<1x4xf32> to vector<256x4xf32>
      %130 = arith.addf %127, %129 : vector<256x4xf32>
      %cst_151 = arith.constant 0.000000e+00 : f32
      %131 = vector.broadcast %cst_151 : f32 to vector<256x4xf32>
      %132 = arith.maximumf %130, %131 : vector<256x4xf32>
      %133 = tpu.concatenate %66, %132 in 1 : vector<256x8xf32>, vector<256x4xf32> -> vector<256x12xf32>
      %134 = arith.truncf %133 : vector<256x12xf32> to vector<256x12xbf16>
      %c0_152 = arith.constant 0 : index
      %c0_153 = arith.constant 0 : index
      %135 = vector.load %arg28[%c0_152, %c0_153] : memref<256x12xbf16, #tpu.memory_space<vmem>>, vector<256x12xbf16>
      tpu.vector_store %arg28[%c0_152, %c0_153], %134 {strides = array<i32>} : memref<256x12xbf16, #tpu.memory_space<vmem>>, vector<256x12xbf16>,
      %cst_154 = arith.constant dense<0.000000e+00> : vector<12xf32>
      %136 = vector.multi_reduction <add>, %133, %cst_154 [0] : vector<256x12xf32> to vector<12xf32>
      %137 = vector.shape_cast %136 : vector<12xf32> to vector<1x12xf32>
      %cst_155 = arith.constant 2.560000e+02 : f32
      %138 = vector.broadcast %cst_155 : f32 to vector<1x12xf32>
      %139 = arith.divf %137, %138 : vector<1x12xf32>
      %c0_156 = arith.constant 0 : index
      %c0_157 = arith.constant 0 : index
      %140 = vector.load %arg18[%c0_156, %c0_157] : memref<12x32xbf16, #tpu.memory_space<vmem>>, vector<12x32xbf16>
      %141 = arith.extf %140 : vector<12x32xbf16> to vector<12x32xf32>
      %cst_158 = arith.constant dense<0.000000e+00> : vector<1x32xf32>
      %142 = tpu.matmul %139, %141, %cst_158 {dimension_numbers = #tpu.dot_dimension_numbers<[1], [0], [0], [1], [0, 0, 1, 1], [], []>} : vector<1x12xf32>, vector<12x32xf32>, vector<1x32xf32> -> vector<1x32xf32>
      %c0_159 = arith.constant 0 : index
      %c0_160 = arith.constant 0 : index
      %143 = vector.load %arg19[%c0_159, %c0_160] : memref<1x32xf32, #tpu.memory_space<vmem>>, vector<1x32xf32>
      %144 = arith.mulf %142, %143 : vector<1x32xf32>
      %c0_161 = arith.constant 0 : index
      %c0_162 = arith.constant 0 : index
      %145 = vector.load %arg20[%c0_161, %c0_162] : memref<1x32xf32, #tpu.memory_space<vmem>>, vector<1x32xf32>
      %146 = arith.addf %144, %145 : vector<1x32xf32>
      %c0_163 = arith.constant 0 : index
      %c0_164 = arith.constant 0 : index
      %147 = vector.load %arg21[%c0_163, %c0_164] : memref<32x2xf32, #tpu.memory_space<vmem>>, vector<32x2xf32>
      %cst_165 = arith.constant dense<0.000000e+00> : vector<1x2xf32>
      %148 = tpu.matmul %146, %147, %cst_165 {dimension_numbers = #tpu.dot_dimension_numbers<[1], [0], [0], [1], [0, 0, 1, 1], [], []>} : vector<1x32xf32>, vector<32x2xf32>, vector<1x2xf32> -> vector<1x2xf32>
      %c0_166 = arith.constant 0 : index
      %c0_167 = arith.constant 0 : index
      %149 = vector.load %arg22[%c0_166, %c0_167] : memref<1x2xf32, #tpu.memory_space<vmem>>, vector<1x2xf32>
      %150 = arith.addf %148, %149 : vector<1x2xf32>
      %cst_168 = arith.constant 0.000000e+00 : f32
      %151 = vector.broadcast %cst_168 : f32 to vector<1x2xf32>
      %152 = arith.maximumf %150, %151 : vector<1x2xf32>
      %c0_169 = arith.constant 0 : index
      %c0_170 = arith.constant 0 : index
      %153 = vector.load %arg23[%c0_169, %c0_170] : memref<2x32xf32, #tpu.memory_space<vmem>>, vector<2x32xf32>
      %cst_171 = arith.constant dense<0.000000e+00> : vector<1x32xf32>
      %154 = tpu.matmul %152, %153, %cst_171 {dimension_numbers = #tpu.dot_dimension_numbers<[1], [0], [0], [1], [0, 0, 1, 1], [], []>} : vector<1x2xf32>, vector<2x32xf32>, vector<1x32xf32> -> vector<1x32xf32>
      %c0_172 = arith.constant 0 : index
      %c0_173 = arith.constant 0 : index
      %155 = vector.load %arg24[%c0_172, %c0_173] : memref<1x32xf32, #tpu.memory_space<vmem>>, vector<1x32xf32>
      %156 = arith.addf %154, %155 : vector<1x32xf32>
      %157 = arith.negf %156 : vector<1x32xf32>
      %158 = math.exp %157 : vector<1x32xf32>
      %cst_174 = arith.constant 1.000000e+00 : f32
      %159 = vector.broadcast %cst_174 : f32 to vector<1x32xf32>
      %160 = arith.addf %159, %158 : vector<1x32xf32>
      %161 = arith.divf %159, %160 : vector<1x32xf32>
      %c0_175 = arith.constant 0 : index
      %c0_176 = arith.constant 0 : index
      %162 = vector.load %arg29[%c0_175, %c0_176] : memref<1x32xf32, #tpu.memory_space<vmem>>, vector<1x32xf32>
      tpu.vector_store %arg29[%c0_175, %c0_176], %161 {strides = array<i32>} : memref<1x32xf32, #tpu.memory_space<vmem>>, vector<1x32xf32>,
    } else {
    }
    %c256_i32 = arith.constant 256 : i32
    %3 = arith.muli %arg1, %c256_i32 : i32
    %4 = tpu.assume_multiple %3, 8 : i32
    %5 = arith.index_cast %4 : i32 to index
    %c0 = arith.constant 0 : index
    %6 = vector.load %arg28[%5, %c0] : memref<256x12xbf16, #tpu.memory_space<vmem>>, vector<256x12xbf16>
    %c0_1 = arith.constant 0 : index
    %c0_2 = arith.constant 0 : index
    %7 = vector.load %arg18[%c0_1, %c0_2] : memref<12x32xbf16, #tpu.memory_space<vmem>>, vector<12x32xbf16>
    %cst = arith.constant dense<0.000000e+00> : vector<256x32xf32>
    %8 = tpu.matmul %6, %7, %cst {dimension_numbers = #tpu.dot_dimension_numbers<[1], [0], [0], [1], [0, 0, 1, 1], [], []>} : vector<256x12xbf16>, vector<12x32xbf16>, vector<256x32xf32> -> vector<256x32xf32>
    %c0_3 = arith.constant 0 : index
    %c0_4 = arith.constant 0 : index
    %9 = vector.load %arg19[%c0_3, %c0_4] : memref<1x32xf32, #tpu.memory_space<vmem>>, vector<1x32xf32>
    %10 = vector.broadcast %9 : vector<1x32xf32> to vector<256x32xf32>
    %11 = arith.mulf %8, %10 : vector<256x32xf32>
    %c0_5 = arith.constant 0 : index
    %c0_6 = arith.constant 0 : index
    %12 = vector.load %arg20[%c0_5, %c0_6] : memref<1x32xf32, #tpu.memory_space<vmem>>, vector<1x32xf32>
    %13 = vector.broadcast %12 : vector<1x32xf32> to vector<256x32xf32>
    %14 = arith.addf %11, %13 : vector<256x32xf32>
    %c0_7 = arith.constant 0 : index
    %15 = arith.index_cast %4 : i32 to index
    %c0_8 = arith.constant 0 : index
    %16 = vector.load %arg2[%c0_7, %15, %c0_8] : memref<1x256x32xbf16, #tpu.memory_space<vmem>>, vector<1x256x32xbf16>
    %17 = vector.shape_cast %16 : vector<1x256x32xbf16> to vector<256x32xbf16>
    %18 = arith.extf %17 : vector<256x32xbf16> to vector<256x32xf32>
    %c0_9 = arith.constant 0 : index
    %c0_10 = arith.constant 0 : index
    %19 = vector.load %arg29[%c0_9, %c0_10] : memref<1x32xf32, #tpu.memory_space<vmem>>, vector<1x32xf32>
    %20 = vector.broadcast %19 : vector<1x32xf32> to vector<256x32xf32>
    %21 = arith.mulf %14, %20 : vector<256x32xf32>
    %22 = arith.addf %21, %18 : vector<256x32xf32>
    %cst_11 = arith.constant 0.000000e+00 : f32
    %23 = vector.broadcast %cst_11 : f32 to vector<256x32xf32>
    %24 = arith.maximumf %22, %23 : vector<256x32xf32>
    %25 = vector.shape_cast %24 : vector<256x32xf32> to vector<1x256x32xf32>
    %c0_12 = arith.constant 0 : index
    %c0_13 = arith.constant 0 : index
    %c0_14 = arith.constant 0 : index
    %26 = vector.load %arg25[%c0_12, %c0_13, %c0_14] : memref<1x256x32xf32, #tpu.memory_space<vmem>>, vector<1x256x32xf32>
    tpu.vector_store %arg25[%c0_12, %c0_13, %c0_14], %25 {strides = array<i32>} : memref<1x256x32xf32, #tpu.memory_space<vmem>>, vector<1x256x32xf32>,
    return
  }
  func.func @transform_0(%arg0: i32, %arg1: i32) -> (i32, i32, i32) {
    %c0_i32 = arith.constant 0 : i32
    %c0_i32_0 = arith.constant 0 : i32
    %c0_i32_1 = arith.constant 0 : i32
    return %arg0, %c0_i32, %c0_i32_0 : i32, i32, i32
  }
  func.func @transform_1(%arg0: i32, %arg1: i32) -> (i32, i32) {
    %c0_i32 = arith.constant 0 : i32
    %c0_i32_0 = arith.constant 0 : i32
    %c0_i32_1 = arith.constant 0 : i32
    return %c0_i32, %c0_i32_0 : i32, i32
  }
  func.func @transform_2(%arg0: i32, %arg1: i32) -> (i32, i32) {
    %c0_i32 = arith.constant 0 : i32
    %c0_i32_0 = arith.constant 0 : i32
    %c0_i32_1 = arith.constant 0 : i32
    return %c0_i32, %c0_i32_0 : i32, i32
  }
  func.func @transform_3(%arg0: i32, %arg1: i32) -> (i32, i32) {
    %c0_i32 = arith.constant 0 : i32
    %c0_i32_0 = arith.constant 0 : i32
    %c0_i32_1 = arith.constant 0 : i32
    return %c0_i32, %c0_i32_0 : i32, i32
  }
  func.func @transform_4(%arg0: i32, %arg1: i32) -> (i32, i32) {
    %c0_i32 = arith.constant 0 : i32
    %c0_i32_0 = arith.constant 0 : i32
    %c0_i32_1 = arith.constant 0 : i32
    return %c0_i32, %c0_i32_0 : i32, i32
  }
  func.func @transform_5(%arg0: i32, %arg1: i32) -> (i32, i32) {
    %c0_i32 = arith.constant 0 : i32
    %c0_i32_0 = arith.constant 0 : i32
    %c0_i32_1 = arith.constant 0 : i32
    return %c0_i32, %c0_i32_0 : i32, i32
  }
  func.func @transform_6(%arg0: i32, %arg1: i32) -> (i32, i32) {
    %c0_i32 = arith.constant 0 : i32
    %c0_i32_0 = arith.constant 0 : i32
    %c0_i32_1 = arith.constant 0 : i32
    return %c0_i32, %c0_i32_0 : i32, i32
  }
  func.func @transform_7(%arg0: i32, %arg1: i32) -> (i32, i32) {
    %c0_i32 = arith.constant 0 : i32
    %c0_i32_0 = arith.constant 0 : i32
    %c0_i32_1 = arith.constant 0 : i32
    return %c0_i32, %c0_i32_0 : i32, i32
  }
  func.func @transform_8(%arg0: i32, %arg1: i32) -> (i32, i32) {
    %c0_i32 = arith.constant 0 : i32
    %c0_i32_0 = arith.constant 0 : i32
    %c0_i32_1 = arith.constant 0 : i32
    return %c0_i32, %c0_i32_0 : i32, i32
  }
  func.func @transform_9(%arg0: i32, %arg1: i32) -> (i32, i32) {
    %c0_i32 = arith.constant 0 : i32
    %c0_i32_0 = arith.constant 0 : i32
    %c0_i32_1 = arith.constant 0 : i32
    return %c0_i32, %c0_i32_0 : i32, i32
  }
  func.func @transform_10(%arg0: i32, %arg1: i32) -> (i32, i32) {
    %c0_i32 = arith.constant 0 : i32
    %c0_i32_0 = arith.constant 0 : i32
    %c0_i32_1 = arith.constant 0 : i32
    return %c0_i32, %c0_i32_0 : i32, i32
  }
  func.func @transform_11(%arg0: i32, %arg1: i32) -> (i32, i32) {
    %c0_i32 = arith.constant 0 : i32
    %c0_i32_0 = arith.constant 0 : i32
    %c0_i32_1 = arith.constant 0 : i32
    return %c0_i32, %c0_i32_0 : i32, i32
  }
  func.func @transform_12(%arg0: i32, %arg1: i32) -> (i32, i32) {
    %c0_i32 = arith.constant 0 : i32
    %c0_i32_0 = arith.constant 0 : i32
    %c0_i32_1 = arith.constant 0 : i32
    return %c0_i32, %c0_i32_0 : i32, i32
  }
  func.func @transform_13(%arg0: i32, %arg1: i32) -> (i32, i32) {
    %c0_i32 = arith.constant 0 : i32
    %c0_i32_0 = arith.constant 0 : i32
    %c0_i32_1 = arith.constant 0 : i32
    return %c0_i32, %c0_i32_0 : i32, i32
  }
  func.func @transform_14(%arg0: i32, %arg1: i32) -> (i32, i32) {
    %c0_i32 = arith.constant 0 : i32
    %c0_i32_0 = arith.constant 0 : i32
    %c0_i32_1 = arith.constant 0 : i32
    return %c0_i32, %c0_i32_0 : i32, i32
  }
  func.func @transform_15(%arg0: i32, %arg1: i32) -> (i32, i32) {
    %c0_i32 = arith.constant 0 : i32
    %c0_i32_0 = arith.constant 0 : i32
    %c0_i32_1 = arith.constant 0 : i32
    return %c0_i32, %c0_i32_0 : i32, i32
  }
  func.func @transform_16(%arg0: i32, %arg1: i32) -> (i32, i32) {
    %c0_i32 = arith.constant 0 : i32
    %c0_i32_0 = arith.constant 0 : i32
    %c0_i32_1 = arith.constant 0 : i32
    return %c0_i32, %c0_i32_0 : i32, i32
  }
  func.func @transform_17(%arg0: i32, %arg1: i32) -> (i32, i32) {
    %c0_i32 = arith.constant 0 : i32
    %c0_i32_0 = arith.constant 0 : i32
    %c0_i32_1 = arith.constant 0 : i32
    return %c0_i32, %c0_i32_0 : i32, i32
  }
  func.func @transform_18(%arg0: i32, %arg1: i32) -> (i32, i32) {
    %c0_i32 = arith.constant 0 : i32
    %c0_i32_0 = arith.constant 0 : i32
    %c0_i32_1 = arith.constant 0 : i32
    return %c0_i32, %c0_i32_0 : i32, i32
  }
  func.func @transform_19(%arg0: i32, %arg1: i32) -> (i32, i32) {
    %c0_i32 = arith.constant 0 : i32
    %c0_i32_0 = arith.constant 0 : i32
    %c0_i32_1 = arith.constant 0 : i32
    return %c0_i32, %c0_i32_0 : i32, i32
  }
  func.func @transform_20(%arg0: i32, %arg1: i32) -> (i32, i32) {
    %c0_i32 = arith.constant 0 : i32
    %c0_i32_0 = arith.constant 0 : i32
    %c0_i32_1 = arith.constant 0 : i32
    return %c0_i32, %c0_i32_0 : i32, i32
  }
  func.func @transform_21(%arg0: i32, %arg1: i32) -> (i32, i32) {
    %c0_i32 = arith.constant 0 : i32
    %c0_i32_0 = arith.constant 0 : i32
    %c0_i32_1 = arith.constant 0 : i32
    return %c0_i32, %c0_i32_0 : i32, i32
  }
  func.func @transform_22(%arg0: i32, %arg1: i32) -> (i32, i32) {
    %c0_i32 = arith.constant 0 : i32
    %c0_i32_0 = arith.constant 0 : i32
    %c0_i32_1 = arith.constant 0 : i32
    return %c0_i32, %c0_i32_0 : i32, i32
  }
  func.func @transform_23(%arg0: i32, %arg1: i32) -> (i32, i32, i32) {
    %c0_i32 = arith.constant 0 : i32
    %c0_i32_0 = arith.constant 0 : i32
    return %arg0, %arg1, %c0_i32 : i32, i32, i32
  }
}

</mosaic_0001>

<bundles_post_ra>
// kernel: se_bottleneck_forward.1
= control target key start
LH: loop header
LB: loop body
LE: loop exit
PB: predicated region body
PF: predicated region fallthrough
CT: control target
= control target key end

     0   :  { %s16225_s0 = inlined_call_operand.vmem [shape: bf16[2,256,32], index: 0, kind: input, shape index: {}]   ;;  %s16226_s1 = inlined_call_operand.vmem [shape: bf16[32,8], index: 1, kind: input, shape index: {}]   ;;  %s16227_s2 = inlined_call_operand.vmem [shape: f32[1,8], index: 2, kind: input, shape index: {}]   ;;  %s16228_s3 = inlined_call_operand.vmem [shape: f32[1,8], index: 3, kind: input, shape index: {}]   ;;  %s16229_s4 = inlined_call_operand.vmem [shape: bf16[72,8], index: 4, kind: input, shape index: {}]   ;;  %s16230_s5 = inlined_call_operand.vmem [shape: bf16[32,4], index: 5, kind: input, shape index: {}]   ;;  %s16231_s6 = inlined_call_operand.vmem [shape: f32[1,4], index: 6, kind: input, shape index: {}]   ;;  %s16232_s7 = inlined_call_operand.vmem [shape: f32[1,4], index: 7, kind: input, shape index: {}]   ;;  %s16233_s8 = inlined_call_operand.vmem [shape: bf16[36,4], index: 8, kind: input, shape index: {}]   ;;  %s16234_s9 = inlined_call_operand.vmem [shape: f32[1,4], index: 9, kind: input, shape index: {}]   ;;  %s16235_s10 = inlined_call_operand.vmem [shape: f32[1,4], index: 10, kind: input, shape index: {}]   ;;  %s16236_s11 = inlined_call_operand.vmem [shape: bf16[36,4], index: 11, kind: input, shape index: {}]   ;;  %s16237_s12 = inlined_call_operand.vmem [shape: f32[1,8], index: 12, kind: input, shape index: {}]   ;;  %s16238_s13 = inlined_call_operand.vmem [shape: f32[1,8], index: 13, kind: input, shape index: {}]   ;;  %s16239_s14 = inlined_call_operand.vmem [shape: f32[1,4], index: 14, kind: input, shape index: {}]   ;;  %s16240_s15 = inlined_call_operand.vmem [shape: f32[1,4], index: 15, kind: input, shape index: {}]   ;;  %s16241_s16 = inlined_call_operand.vmem [shape: bf16[12,32], index: 16, kind: input, shape index: {}]   ;;  %s16242_s17 = inlined_call_operand.vmem [shape: f32[1,32], index: 17, kind: input, shape index: {}]   ;;  %s16243_s18 = inlined_call_operand.vmem [shape: f32[1,32], index: 18, kind: input, shape index: {}]   ;;  %s16244_s19 = inlined_call_operand.vmem [shape: f32[32,2], index: 19, kind: input, shape index: {}]   ;;  %s16245_s20 = inlined_call_operand.vmem [shape: f32[1,2], index: 20, kind: input, shape index: {}]   ;;  %s16246_s21 = inlined_call_operand.vmem [shape: f32[2,32], index: 21, kind: input, shape index: {}]   ;;  %s16247_s22 = inlined_call_operand.vmem [shape: f32[1,32], index: 22, kind: input, shape index: {}]   ;;  %s16248_s23 = inlined_call_operand.hbm [shape: f32[2,256,32], index: 23, kind: output, shape index: {}]  }
   0x1   :  { %16286 = sst [smem:[#allocation29_spill]] %s16225_s0 }
   0x2   :  { %16287 = sst [smem:[#allocation30_spill]] %s16226_s1 }
   0x3   :  { %16288 = sst [smem:[#allocation31_spill]] %s16227_s2 }
   0x4   :  { %16289 = sst [smem:[#allocation32_spill]] %s16228_s3 }
   0x5   :  { %16290 = sst [smem:[#allocation33_spill]] %s16229_s4 }
   0x6   :  { %16291 = sst [smem:[#allocation34_spill]] %s16230_s5 }
   0x7   :  { %16292 = sst [smem:[#allocation35_spill]] %s16231_s6 }
   0x8   :  { %16293 = sst [smem:[#allocation36_spill]] %s16232_s7 }
   0x9   :  { %16294 = sst [smem:[#allocation37_spill]] %s16233_s8 }
   0xa   :  { %16295 = sst [smem:[#allocation38_spill]] %s16234_s9 }
   0xb   :  { %16296 = sst [smem:[#allocation39_spill]] %s16248_s23 }
   0xc   :  { %28 = vsyncpa [#allocation7], 0 }
   0xd   :  { %30 = vsyncpa [#allocation7 + $0x1], 0  ;;  %s12267_s4 = smov 0   ;;  %s12269_s30 = smov 0  }
   0xe   :  { %s12271_s24 = smov 0   ;;  %s12273_s25 = smov 0  }
   0xf   :  { %s12275_s5 = smov 0   ;;  %s12277_s1 = smov 0  }
  0x10 LB: > { %16297 = sst [smem:[#allocation9_spill]] %s12109_s4  ;;  %s9282_s26 = sadd.s32 4294967295, %s12129_s1   ;;  %s12129_s1 = sphi %s12277_s1, %s36_s1   ;;  %s12125_s5 = sphi %s12275_s5, %s16381_s5   ;;  %s12121_s25 = sphi %s12273_s25, %s16380_s25   ;;  %s12117_s24 = sphi %s12271_s24, %s16379_s24   ;;  %s12113_s30 = sphi %s12269_s30, %s16383_s30   ;;  %s12109_s4 = sphi %s12267_s4, %s16382_s4  }
  0x11   : > { %16298 = sst [smem:[#allocation10_spill]] %s12117_s24  ;;  %s9283_s2 = sadd.s32 4294967294, %s12129_s1  }
  0x12   : > { %16299 = sst [smem:[#allocation11_spill]] %s12125_s5  ;;  %s48_s6 = sadd.s32 1, %s12125_s5 }
  0x13   : > { %s545_s27 = sadd.s32 1, %s12117_s24  ;;  %p50_p0 = scmp.ge.s32.totalorder %s48_s6, 2 }
  0x14   : > { %p555_p1 = scmp.ne.s32.totalorder %s12117_s24, %s12113_s30  ;;  %p556_p2 = scmp.eq.s32.totalorder %s9282_s26, 1 }
  0x15   : > { %p561_p3 = scmp.ne.s32.totalorder %s12113_s30, %s12109_s4  ;;  %s16385_s6 = smov (%p50_p0, %s48_s6), 0 }
  0x16   : > { %16300 = sst [smem:[#allocation12_spill]] %s16385_s6  ;;  %p12307_p4 = por %p556_p2, %p555_p1 }
  0x17   : > { %p562_p5 = scmp.eq.s32.totalorder %s9283_s2, 1  ;;  %s540_s28 = ssub.s32 %s12125_s5, %s16385_s6 }
  0x18   : > { %p9286_p6 = scmp.ge.s32.totalorder %s12129_s1, 1  ;;  %p543_p7 = scmp.eq.s32.totalorder %s540_s28, 0 }
  0x19   : > { %p12314_p8 = por %p562_p5, %p561_p3  ;;  %p654_p9 = scmp.lt.s32.totalorder %s12129_s1, 3 }
  0x1a   : > { %s12320_s3 = scalar_select %p543_p7, %s12117_s24, %s545_s27  }
  0x1b   : > { %s16302_s29 = scalar_select %p12314_p8, 1, 0 }
  0x1c   : > { %16304 = sst [smem:[#allocation14_spill]] %s12320_s3  ;;  %p655_p10 = pnand %p9286_p6, %p654_p9 }
  0x1d   : > { %16303 = sst [smem:[#allocation13_spill]] %s16302_s29 }
  0x1e   : > { %658 = sbr.rel (%p655_p10) target bundleno = 2434 (0x982), region = 112 }
  0x23   : > { %s16305_s4 = sld [smem:[#allocation30_spill]]  ;;  %p718_p11 = scmp.lt.s32.totalorder %s12121_s25, 1  ;;  %vm857_vm0 = vcmask 261120   ;;  %v16278_v16 = vmov 0.0   ;;  %vm1210_vm1 = vcmask 1040384   ;;  %vm1345_vm2 = vcmask 64512  }
  0x24   : > { %s16307_s24 = sld [smem:[#allocation29_spill]]  ;;  %v12364_v17 = vrot.slane %v16278_v16, 7  ;;  %vm1348_vm3 = vcmask 58368   ;;  %vm3800_vm4 = vcmask 31744   ;;  %vm3803_vm5 = vcmask 25600   ;;  %s16264_s6 = smov 56  }
  0x25   : > { %s719_s28 = scalar_select %p718_p11, %s12121_s25, 1  ;;  %vm3078_vm6 = vcmask 1043456   ;;  %vm2747_vm7 = vcmask 130048   ;;  %vm2780_vm8 = vcmask 195584   ;;  %vm2845_vm9 = vcmask 326656  }
  0x26   : > { %v12368_v18 = vsel %vm1210_vm1, 0.0, %v12364_v17  ;;  %v12372_v19 = vsel %vm1210_vm1, %v12364_v17, 0.0  ;;  %1347 = vst.msk [vmem:[#allocation2 + $0x8] sm:$0xff] %vm1345_vm2, %v12364_v17  ;;  %1399 = vst.msk [vmem:[#allocation2 + $0x1a0] sm:$0xff] %vm1345_vm2, %v12364_v17  ;;  %s16262_s3 = smov 64   ;;  %s16258_s0 = smov 4  }
  0x27   : > { %s9490_s5 = sshll.u32 %s719_s28, 7  ;;  %1346 = vst.msk [vmem:[#allocation2] sm:$0xff] %vm1345_vm2, %v12368_v18  ;;  %1398 = vst.msk [vmem:[#allocation2 + $0x198] sm:$0xff] %vm1345_vm2, %v12368_v18  ;;  %s16268_s26 = smov 24   ;;  %vm2878_vm10 = vcmask 392192   ;;  %vm2911_vm11 = vcmask 457728  }
  0x28   : > { %1349 = vst.msk [vmem:[#allocation2 + $0x10] sm:$0x3] %vm1348_vm3, %v12372_v19  ;;  %1400 = vst.msk [vmem:[#allocation2 + $0x1a8] sm:$0x3] %vm1348_vm3, %v12372_v19  ;;  %s16308_s27 = sld [smem:[#allocation33_spill]]  ;;  %s16313_s28 = smov 64  }
  0x29   : > { %s16306_s23 = smov %s16305_s4  ;;  %v11977_v0 = vld [vmem:[%s16305_s4 + $0x8] sm:$0xff]   ;;  %s16266_s4 = smov 8   ;;  %3801 = vst.msk [vmem:[#allocation3] sm:$0xff] %vm3800_vm4, %v12368_v18  ;;  %3802 = vst.msk [vmem:[#allocation3 + $0x8] sm:$0xff] %vm3800_vm4, %v12364_v17  ;;  %vm2944_vm12 = vcmask 523264   ;;  %vm3029_vm13 = vcmask 588800  }
  0x2a   : > { %v11978_v1 = vld [vmem:[%s16306_s23] sm:$0xff]   ;;  %9725 = vmatprep.subr.bf16.mxu0 %v11977_v0  ;;  %s12333_s29 = scalar_lea.vmem %s16307_s24, %s9490_s5  ;;  %s16260_s24 = smov 16   ;;  %3804 = vst.msk [vmem:[#allocation3 + $0x10] sm:$0x3] %vm3803_vm5, %v12372_v19  ;;  %3855 = vst.msk [vmem:[#allocation3 + $0x1a8] sm:$0x3] %vm3803_vm5, %v12372_v19 }
  0x2b   : > { %9726 = vmatpush3.bf16.msra.mxu0 %v11977_v0  ;;  %v11979_v2 = vld [vmem:[%s12333_s29] sm:$0xff]   ;;  %v11980_v3 = vld [vmem:[%s12333_s29 + $0x8] sm:$0xff]   ;;  %v11981_v4 = vld [vmem:[%s12333_s29 + $0x10] sm:$0xff]   ;;  %3853 = vst.msk [vmem:[#allocation3 + $0x198] sm:$0xff] %vm3800_vm4, %v12368_v18  ;;  %s16270_s5 = smov 48   ;;  %s16317_s23 = sld [smem:[#allocation34_spill]] }
  0x2c   : > { %9727 = vmatprep.subr.bf16.mxu0 %v11978_v1  ;;  %9729 = vmatprep.mubr.msk.bf16.mxu0 %vm857_vm0, %v11979_v2  ;;  %v11982_v5 = vld [vmem:[%s12333_s29 + $0x18] sm:$0xff]   ;;  %v11983_v6 = vld [vmem:[%s12333_s29 + $0x20] sm:$0xff]   ;;  %v11984_v7 = vld [vmem:[%s12333_s29 + $0x28] sm:$0xff]   ;;  %3854 = vst.msk [vmem:[#allocation3 + $0x1a0] sm:$0xff] %vm3800_vm4, %v12364_v17  ;;  %s16321_s2 = sld [smem:[#allocation36_spill]]  ;;  %vm5514_vm14 = vcmask 1041408  }
  0x2d   : > { %v11985_v8 = vld [vmem:[%s12333_s29 + $0x30] sm:$0xff]   ;;  %v11986_v9 = vld [vmem:[%s12333_s29 + $0x38] sm:$0xff]   ;;  %v11987_v10 = vld [vmem:[%s12333_s29 + $0x40] sm:$0xff]   ;;  %s16322_s8 = sld [smem:[#allocation37_spill]]  ;;  %vm5234_vm15 = vcmask 97280  }
  0x2e   : > { %v11988_v11 = vld [vmem:[%s12333_s29 + $0x48] sm:$0xff]   ;;  %v11989_v12 = vld [vmem:[%s12333_s29 + $0x50] sm:$0xff]   ;;  %v11990_v13 = vld [vmem:[%s12333_s29 + $0x58] sm:$0xff]   ;;  %s16338_s9 = sld [smem:[#allocation38_spill]] }
  0x2f   : > { %9728 = vmatpush3.bf16.msra.mxu0 %v11978_v1  ;;  %v11991_v14 = vld [vmem:[%s12333_s29 + $0x60] sm:$0xff]   ;;  %v11992_v15 = vld [vmem:[%s12333_s29 + $0x68] sm:$0xff]   ;;  %v1625_v26 = vld [vmem:[#allocation2 + $0x198] sm:$0xff] }
  0x30   : > { %v1433_v20 = vld [vmem:[#allocation2 + $0x1] sm:$0xff]  ;;  %v1434_v21 = vld [vmem:[#allocation2 + $0x9] sm:$0xff]  ;;  %v1657_v29 = vld [vmem:[#allocation2 + $0x199] sm:$0xff] }
  0x31   : > { %v10057_v22 = vpack.i.bf16 %v1434_v21, %v1433_v20  ;;  %v1465_v23 = vld [vmem:[#allocation2 + $0x2] sm:$0xff]  ;;  %v1466_v24 = vld [vmem:[#allocation2 + $0xa] sm:$0xff]  ;;  %v1689_v33 = vld [vmem:[#allocation2 + $0x19a] sm:$0xff] }
  0x32   : > { %9730 = vmatmul.mubr.msk.bf16.vlgmr.msra.gmra.mxu0 %vm857_vm0, %v11980_v3  ;;  %v10062_v25 = vpack.i.bf16 %v1466_v24, %v1465_v23  ;;  %v1626_v27 = vld [vmem:[#allocation2 + $0x1a0] sm:$0xff]  ;;  %v11993_v32 = vld [vmem:[%s12333_s29 + $0x70] sm:$0xff]   ;;  %v11994_v38 = vld [vmem:[%s12333_s29 + $0x78] sm:$0xff]  }
  0x33   : > { %9733 = vmatprep.mubr.msk.bf16.mxu0 %vm857_vm0, %v11981_v4  ;;  %10058 = vrot.lane.b32.xlu0 %v10057_v22, %s16266_s4  ;;  %v10067_v28 = vpack.i.bf16 %v1626_v27, %v1625_v26  ;;  %v1658_v30 = vld [vmem:[#allocation2 + $0x1a1] sm:$0xff]  ;;  %v3888_v36 = vld [vmem:[#allocation3 + $0x1] sm:$0xff]  ;;  %v3889_v37 = vld [vmem:[#allocation3 + $0x9] sm:$0xff] }
  0x34   : > { %10063 = vrot.lane.b32.xlu1 %v10062_v25, %s16260_s24  ;;  %v10072_v31 = vpack.i.bf16 %v1658_v30, %v1657_v29  ;;  %v1690_v34 = vld [vmem:[#allocation2 + $0x1a2] sm:$0xff]  ;;  %v10082_v39 = vpack.i.bf16 %v3889_v37, %v3888_v36  ;;  %v4081_v41 = vld [vmem:[#allocation3 + $0x1a0] sm:$0xff]  ;;  %v3921_v44 = vld [vmem:[#allocation3 + $0xa] sm:$0xff]  ;;  %s16314_s24 = smov 8  }
  0x35   : > { %v10077_v35 = vpack.i.bf16 %v1690_v34, %v1689_v33  ;;  %v4080_v40 = vld [vmem:[#allocation3 + $0x198] sm:$0xff]  ;;  %v3920_v42 = vld [vmem:[#allocation3 + $0x2] sm:$0xff]  ;;  %5951 = vst.msk [vmem:[#allocation3 + $0x10] sm:$0x3] %vm3803_vm5, %v12372_v19  ;;  %v11995_v46 = vld [vmem:[%s16308_s27 + $0x20] ss:$0 sps:$4 sm:$0xff]  }
  0x36   : > { %v10092_v43 = vpack.i.bf16 %v4081_v41, %v4080_v40  ;;  %v10087_v45 = vpack.i.bf16 %v3921_v44, %v3920_v42  ;;  %9982 = vmatprep.subr.msk.bf16.mxu0 %vm3078_vm6, %v11995_v46  ;;  %v3080_v47 = vsel %vm3078_vm6, %v11995_v46, 0  ;;  %9983 = vmatprep.subr.msk.bf16.mxu1 %vm3078_vm6, %v11995_v46  ;;  %v12428_v51 = vld [vmem:[#allocation3] sm:$0xff]  ;;  %v12430_v52 = vld [vmem:[#allocation3 + $0x8] sm:$0xff] }
  0x37   : > { %10083 = vrot.lane.b32.xlu0 %v10082_v39, %s16258_s0  ;;  %9762 = vmatpush3.bf16.msra.mxu0 %v3080_v47  ;;  %v11996_v53 = vld [vmem:[%s16308_s27 + $0x18] sm:$0xff]   ;;  %5949 = vst.msk [vmem:[#allocation3] sm:$0xff] %vm3800_vm4, %v12368_v18  ;;  %5950 = vst.msk [vmem:[#allocation3 + $0x8] sm:$0xff] %vm3800_vm4, %v12364_v17  ;;  %v11997_v34 = vld [vmem:[%s16308_s27 + $0x10] sm:$0xff]   ;;  %s16272_s0 = smov 32  }
  0x38   : > { %10068 = vrot.lane.b32.xlu1 %v10067_v28, %s16270_s5  ;;  %9977 = vmatpush3.bf16.msra.mxu1 %v3080_v47 }
  0x39   : > { %9763 = vmatprep.subr.bf16.mxu0 %v11996_v53  ;;  %9973 = vmatprep.subr.bf16.mxu1 %v11996_v53 }
  0x3a   : > { %9734 = vmatmul.mubr.msk.bf16.gmra.mxu0 %vm857_vm0, %v11982_v5 }
  0x3b   : > { %9737 = vmatprep.mubr.msk.bf16.mxu0 %vm857_vm0, %v11983_v6  ;;  %10088 = vrot.lane.b32.xlu0 %v10087_v45, %s16266_s4  ;;  %s16275_s4 = smov 40  }
  0x3c   : > { %10073 = vrot.lane.b32.xlu1 %v10072_v31, %s16264_s6  ;;  %9764 = vmatpush3.bf16.msra.mxu0 %v11996_v53  ;;  %s16311_s6 = smov 24  }
  0x3d   : > { %9978 = vmatpush3.bf16.msra.mxu1 %v11996_v53  ;;  %9765 = vmatprep.subr.bf16.mxu0 %v11997_v34 }
  0x3e   : > { %9974 = vmatprep.subr.bf16.mxu1 %v11997_v34 }
  0x40   : > { %10078 = vrot.lane.b32.xlu1 %v10077_v35, %s16262_s3  ;;  %s16309_s3 = sld [smem:[#allocation31_spill]]  ;;  %9766 = vmatpush3.bf16.msra.mxu0 %v11997_v34 }
  0x41   : > { %9979 = vmatpush3.bf16.msra.mxu1 %v11997_v34 }
  0x42   : > { %9738 = vmatmul.mubr.msk.bf16.gmra.mxu0 %vm857_vm0, %v11984_v7 }
  0x43   : > { %9741 = vmatprep.mubr.msk.bf16.mxu0 %vm857_vm0, %v11985_v8 }
  0x44   : > { %10093 = vrot.lane.b32.xlu1 %v10092_v43, %s16268_s26  ;;  %s16310_s26 = sld [smem:[#allocation32_spill]] }
  0x46   : > { %v12421_v48 = vld [vmem:[%s16309_s3] ss:$0 sm:$0xff]  ;;  %s16312_s3 = smov 56  }
  0x4a   : > { %9742 = vmatmul.mubr.msk.bf16.gmra.mxu0 %vm857_vm0, %v11986_v9  ;;  %v12426_v49 = vld [vmem:[%s16310_s26] ss:$0 sm:$0xff]  ;;  %s16315_s26 = smov 16  }
  0x4b   : > { %9745 = vmatprep.mubr.msk.bf16.mxu0 %vm857_vm0, %v11987_v10 }
  0x52   : > { %9746 = vmatmul.mubr.msk.bf16.gmra.mxu0 %vm857_vm0, %v11988_v11 }
  0x53   : > { %9749 = vmatprep.mubr.msk.bf16.mxu0 %vm857_vm0, %v11989_v12 }
  0x5a   : > { %9750 = vmatmul.mubr.msk.bf16.gmra.mxu0 %vm857_vm0, %v11990_v13 }
  0x5b   : > { %9753 = vmatprep.mubr.msk.bf16.mxu0 %vm857_vm0, %v11991_v14 }
  0x62   : > { %9754 = vmatmul.mubr.msk.bf16.gmra.mxu0 %vm857_vm0, %v11992_v15 }
  0x63   : > { %9757 = vmatprep.mubr.msk.bf16.mxu0 %vm857_vm0, %v11993_v32 }
  0x6a   : > { %9758 = vmatmul.mubr.msk.bf16.gmra.mxu0 %vm857_vm0, %v11994_v38 }
  0xf2   : > { %v9731_v50 = vpop.f32.mrf.mxu0 }
  0xf3   : > { %v1076_v54 = vmul.f32 %v9731_v50, %v12421_v48 }
  0xf4   : > { %v940_v55 = vpop.f32.mrf.mxu0 }
  0xf5   : > { %v1115_v56 = vadd.f32 %v12426_v49, %v1076_v54  ;;  %v1074_v57 = vmul.f32 %v12421_v48, %v940_v55 }
  0xf6   : > { %v9732_v58 = vpop.f32.mrf.mxu0 }
  0xf7   : > { %v1147_v59 = vmax.f32 %v1115_v56, 0.0  ;;  %v1113_v60 = vadd.f32 %v12426_v49, %v1074_v57  ;;  %v1077_v61 = vmul.f32 %v9732_v58, %v12421_v48 }
  0xf8   : > { %v943_v62 = vpop.f32.mrf.mxu0 }
  0xf9   : > { %v1216_v63 = vrot.slane %v1147_v59, 7  ;;  %v1145_v0 = vmax.f32 %v1113_v60, 0.0  ;;  %v1116_v1 = vadd.f32 %v12426_v49, %v1077_v61  ;;  %v1075_v2 = vmul.f32 %v12421_v48, %v943_v62 }
  0xfa   : > { %v9735_v3 = vpop.f32.mrf.mxu0 }
  0xfb   : > { %v1313_v4 = vsel %vm1210_vm1, 0.0, %v1216_v63  ;;  %v1213_v5 = vrot.slane %v1145_v0, 7  ;;  %v1148_v6 = vmax.f32 %v1116_v1, 0.0  ;;  %v1114_v7 = vadd.f32 %v12426_v49, %v1075_v2 }
  0xfc   : > { %1353 = vst.msk [vmem:[#allocation2 + $0x30] sm:$0xff] %vm1345_vm2, %v1313_v4  ;;  %v1080_v8 = vmul.f32 %v9735_v3, %v12421_v48  ;;  %v956_v9 = vpop.f32.mrf.mxu0 }
  0xfd   : > { %v1312_v10 = vsel %vm1210_vm1, 0.0, %v1213_v5  ;;  %v1217_v11 = vrot.slane %v1148_v6, 7  ;;  %v1146_v12 = vmax.f32 %v1114_v7, 0.0  ;;  %v1078_v13 = vmul.f32 %v12421_v48, %v956_v9 }
  0xfe   : > { %1350 = vst.msk [vmem:[#allocation2 + $0x18] sm:$0xff] %vm1345_vm2, %v1312_v10  ;;  %v1119_v14 = vadd.f32 %v12426_v49, %v1080_v8  ;;  %v9736_v15 = vpop.f32.mrf.mxu0 }
  0xff   : > { %v1218_v20 = vsel %vm1210_vm1, %v1216_v63, %v1217_v11  ;;  %v1330_v21 = vsel %vm1210_vm1, %v1217_v11, 0.0  ;;  %v1214_v22 = vrot.slane %v1146_v12, 7  ;;  %v1117_v23 = vadd.f32 %v12426_v49, %v1078_v13 }
 0x100   : > { %1354 = vst.msk [vmem:[#allocation2 + $0x38] sm:$0xff] %vm1345_vm2, %v1218_v20  ;;  %v1151_v24 = vmax.f32 %v1119_v14, 0.0  ;;  %v1081_v25 = vmul.f32 %v9736_v15, %v12421_v48  ;;  %v959_v26 = vpop.f32.mrf.mxu0 }
 0x101   : > { %1355 = vst.msk [vmem:[#allocation2 + $0x40] sm:$0x3] %vm1348_vm3, %v1330_v21  ;;  %v1215_v27 = vsel %vm1210_vm1, %v1213_v5, %v1214_v22  ;;  %v1329_v28 = vsel %vm1210_vm1, %v1214_v22, 0.0  ;;  %v1149_v29 = vmax.f32 %v1117_v23, 0.0  ;;  %v1079_v30 = vmul.f32 %v12421_v48, %v959_v26 }
 0x102   : > { %1351 = vst.msk [vmem:[#allocation2 + $0x20] sm:$0xff] %vm1345_vm2, %v1215_v27  ;;  %v1222_v31 = vrot.slane %v1151_v24, 7  ;;  %v1120_v32 = vadd.f32 %v12426_v49, %v1081_v25  ;;  %v9739_v33 = vpop.f32.mrf.mxu0 }
 0x103   : > { %1352 = vst.msk [vmem:[#allocation2 + $0x28] sm:$0x3] %vm1348_vm3, %v1329_v28  ;;  %v1219_v35 = vrot.slane %v1149_v29, 7  ;;  %v1118_v36 = vadd.f32 %v12426_v49, %v1079_v30  ;;  %v1084_v37 = vmul.f32 %v9739_v33, %v12421_v48  ;;  %v1595_v50 = vld [vmem:[#allocation2 + $0x30] sm:$0xff]  ;;  %v11998_v28 = vld [vmem:[%s16308_s27 + $0x8] sm:$0xff]  }
 0x104   : > { %v1315_v38 = vsel %vm1210_vm1, 0.0, %v1222_v31  ;;  %v1152_v39 = vmax.f32 %v1120_v32, 0.0  ;;  %v972_v40 = vpop.f32.mrf.mxu0  ;;  %9767 = vmatprep.subr.bf16.mxu0 %v11998_v28  ;;  %9975 = vmatprep.subr.bf16.mxu1 %v11998_v28 }
 0x105   : > { %1359 = vst.msk [vmem:[#allocation2 + $0x60] sm:$0xff] %vm1345_vm2, %v1315_v38  ;;  %v1314_v41 = vsel %vm1210_vm1, 0.0, %v1219_v35  ;;  %v1150_v42 = vmax.f32 %v1118_v36, 0.0  ;;  %v1123_v43 = vadd.f32 %v12426_v49, %v1084_v37  ;;  %v1082_v44 = vmul.f32 %v12421_v48, %v972_v40  ;;  %9768 = vmatpush3.bf16.msra.mxu0 %v11998_v28  ;;  %9980 = vmatpush3.bf16.msra.mxu1 %v11998_v28 }
 0x106   : > { %1356 = vst.msk [vmem:[#allocation2 + $0x48] sm:$0xff] %vm1345_vm2, %v1314_v41  ;;  %v1223_v45 = vrot.slane %v1152_v39, 7  ;;  %v9740_v46 = vpop.f32.mrf.mxu0 }
 0x107   : > { %v1220_v47 = vrot.slane %v1150_v42, 7  ;;  %v1596_v53 = vld [vmem:[#allocation2 + $0x38] sm:$0xff]  ;;  %v1155_v54 = vmax.f32 %v1123_v43, 0.0  ;;  %v1121_v55 = vadd.f32 %v12426_v49, %v1082_v44  ;;  %v1085_v56 = vmul.f32 %v9740_v46, %v12421_v48 }
 0x108   : > { %v1224_v57 = vsel %vm1210_vm1, %v1222_v31, %v1223_v45  ;;  %v1332_v58 = vsel %vm1210_vm1, %v1223_v45, 0.0  ;;  %v10112_v59 = vpack.i.bf16 %v1596_v53, %v1595_v50  ;;  %v975_v60 = vpop.f32.mrf.mxu0  ;;  %v1627_v63 = vld [vmem:[#allocation2 + $0x31] sm:$0xff]  ;;  %v1628_v0 = vld [vmem:[#allocation2 + $0x39] sm:$0xff] }
 0x109   : > { %1360 = vst.msk [vmem:[#allocation2 + $0x68] sm:$0xff] %vm1345_vm2, %v1224_v57  ;;  %v1221_v61 = vsel %vm1210_vm1, %v1219_v35, %v1220_v47  ;;  %v1331_v62 = vsel %vm1210_vm1, %v1220_v47, 0.0  ;;  %v1228_v1 = vrot.slane %v1155_v54, 7  ;;  %v1153_v2 = vmax.f32 %v1121_v55, 0.0  ;;  %v1659_v13 = vld [vmem:[#allocation2 + $0x32] sm:$0xff]  ;;  %v1660_v14 = vld [vmem:[#allocation2 + $0x3a] sm:$0xff] }
 0x10a   : > { %1361 = vst.msk [vmem:[#allocation2 + $0x70] sm:$0x3] %vm1348_vm3, %v1332_v58  ;;  %1358 = vst.msk [vmem:[#allocation2 + $0x58] sm:$0x3] %vm1348_vm3, %v1331_v62  ;;  %10113 = vrot.lane.b32.xlu0 %v10112_v59, %s16270_s5  ;;  %10098 = vrot.lane.b32.xlu1 %v10112_v59, %s16311_s6  ;;  %v1124_v3 = vadd.f32 %v12426_v49, %v1085_v56  ;;  %v1083_v4 = vmul.f32 %v12421_v48, %v975_v60  ;;  %v9743_v5 = vpop.f32.mrf.mxu0  ;;  %v1467_v34 = vld [vmem:[#allocation2 + $0x1a] sm:$0xff]  ;;  %v1468_v35 = vld [vmem:[#allocation2 + $0x22] sm:$0xff] }
 0x10b   : > { %1357 = vst.msk [vmem:[#allocation2 + $0x50] sm:$0xff] %vm1345_vm2, %v1221_v61  ;;  %v1317_v6 = vsel %vm1210_vm1, 0.0, %v1228_v1  ;;  %v1088_v7 = vmul.f32 %v9743_v5, %v12421_v48  ;;  %v10117_v8 = vpack.i.bf16 %v1628_v0, %v1627_v63  ;;  %v1225_v9 = vrot.slane %v1153_v2, 7 }
 0x10c   : > { %1365 = vst.msk [vmem:[#allocation2 + $0x90] sm:$0xff] %vm1345_vm2, %v1317_v6  ;;  %v1156_v10 = vmax.f32 %v1124_v3, 0.0  ;;  %v1122_v11 = vadd.f32 %v12426_v49, %v1083_v4  ;;  %v988_v12 = vpop.f32.mrf.mxu0  ;;  %v10122_v29 = vpack.i.bf16 %v1660_v14, %v1659_v13  ;;  %v12518_v44 = vpack.i.bf16 %v1468_v35, %v1467_v34  ;;  %v1504_v50 = vld [vmem:[#allocation2 + $0x60] sm:$0xff] }
 0x10d   : > { %v1127_v15 = vadd.f32 %v12426_v49, %v1088_v7  ;;  %v1086_v20 = vmul.f32 %v12421_v48, %v988_v12  ;;  %v1316_v21 = vsel %vm1210_vm1, 0.0, %v1225_v9  ;;  %v1435_v3 = vld [vmem:[#allocation2 + $0x19] sm:$0xff]  ;;  %v1436_v4 = vld [vmem:[#allocation2 + $0x21] sm:$0xff] }
 0x10e   : > { %10118 = vrot.lane.b32.xlu0 %v10117_v8, %s16312_s3  ;;  %10103 = vrot.lane.b32.xlu1 %v10117_v8, %s16272_s0  ;;  %v1229_v22 = vrot.slane %v1156_v10, 7  ;;  %v1154_v23 = vmax.f32 %v1122_v11, 0.0  ;;  %v9744_v24 = vpop.f32.mrf.mxu0  ;;  %1362 = vst.msk [vmem:[#allocation2 + $0x78] sm:$0xff] %vm1345_vm2, %v1316_v21  ;;  %v10137_v13 = vpack.i.bf16 %v1436_v4, %v1435_v3 }
 0x10f   : > { %v1159_v25 = vmax.f32 %v1127_v15, 0.0  ;;  %v1125_v26 = vadd.f32 %v12426_v49, %v1086_v20  ;;  %v1089_v27 = vmul.f32 %v9744_v24, %v12421_v48 }
 0x110   : > { %v1230_v30 = vsel %vm1210_vm1, %v1228_v1, %v1229_v22  ;;  %v1334_v31 = vsel %vm1210_vm1, %v1229_v22, 0.0  ;;  %v1226_v32 = vrot.slane %v1154_v23, 7  ;;  %v991_v33 = vpop.f32.mrf.mxu0  ;;  %v1505_v53 = vld [vmem:[#allocation2 + $0x68] sm:$0xff]  ;;  %v12544_v22 = vld [vmem:[#allocation2 + $0x20] sm:$0xff] }
 0x111   : > { %1366 = vst.msk [vmem:[#allocation2 + $0x98] sm:$0xff] %vm1345_vm2, %v1230_v30  ;;  %v1234_v36 = vrot.slane %v1159_v25, 7  ;;  %v1157_v37 = vmax.f32 %v1125_v26, 0.0  ;;  %v1128_v43 = vadd.f32 %v12426_v49, %v1089_v27  ;;  %v1087_v45 = vmul.f32 %v12421_v48, %v991_v33  ;;  %v1631_v23 = vld [vmem:[#allocation2 + $0x61] sm:$0xff]  ;;  %v1632_v24 = vld [vmem:[#allocation2 + $0x69] sm:$0xff] }
 0x112   : > { %1367 = vst.msk [vmem:[#allocation2 + $0xa0] sm:$0x3] %vm1348_vm3, %v1334_v31  ;;  %10123 = vrot.lane.b32.xlu0 %v10122_v29, %s16313_s28  ;;  %10108 = vrot.lane.b32.xlu1 %v10122_v29, %s16275_s4  ;;  %v1227_v38 = vsel %vm1210_vm1, %v1225_v9, %v1226_v32  ;;  %v1333_v39 = vsel %vm1210_vm1, %v1226_v32, 0.0  ;;  %v9747_v40 = vpop.f32.mrf.mxu0  ;;  %v10172_v63 = vpack.i.bf16 %v1505_v53, %v1504_v50  ;;  %v12554_v31 = vld [vmem:[#allocation2 + $0x18] sm:$0xff] }
 0x113   : > { %1363 = vst.msk [vmem:[#allocation2 + $0x80] sm:$0xff] %vm1345_vm2, %v1227_v38  ;;  %v1319_v41 = vsel %vm1210_vm1, 0.0, %v1234_v36  ;;  %v1231_v42 = vrot.slane %v1157_v37, 7  ;;  %v1092_v46 = vmul.f32 %v9747_v40, %v12421_v48  ;;  %v1160_v55 = vmax.f32 %v1128_v43, 0.0  ;;  %v11999_v40 = vld [vmem:[%s16308_s27] sm:$0xff]   ;;  %s16319_s27 = smov 40  }
 0x114   : > { %1364 = vst.msk [vmem:[#allocation2 + $0x88] sm:$0x3] %vm1348_vm3, %v1333_v39  ;;  %v1004_v47 = vpop.f32.mrf.mxu0  ;;  %v1126_v57 = vadd.f32 %v12426_v49, %v1087_v45  ;;  %v12560_v37 = vpack.i.bf16 %v1632_v24, %v1631_v23  ;;  %9769 = vmatprep.subr.bf16.mxu0 %v11999_v40  ;;  %9976 = vmatprep.subr.bf16.mxu1 %v11999_v40 }
 0x115   : > { %1371 = vst.msk [vmem:[#allocation2 + $0xc0] sm:$0xff] %vm1345_vm2, %v1319_v41  ;;  %v1318_v54 = vsel %vm1210_vm1, 0.0, %v1231_v42  ;;  %v1090_v56 = vmul.f32 %v12421_v48, %v1004_v47  ;;  %v1131_v58 = vadd.f32 %v12426_v49, %v1092_v46  ;;  %v1235_v60 = vrot.slane %v1160_v55, 7  ;;  %v1663_v41 = vld [vmem:[#allocation2 + $0x62] sm:$0xff]  ;;  %9770 = vmatpush3.bf16.msra.mxu0 %v11999_v40  ;;  %9981 = vmatpush3.bf16.msra.mxu1 %v11999_v40 }
 0x116   : > { %10128 = vrot.lane.b32.xlu0 %v10117_v8, %s16314_s24  ;;  %10143 = vrot.lane.b32.xlu1 %v12518_v44, %s16315_s26  ;;  %1368 = vst.msk [vmem:[#allocation2 + $0xa8] sm:$0xff] %vm1345_vm2, %v1318_v54  ;;  %v9748_v59 = vpop.f32.mrf.mxu0  ;;  %v1158_v0 = vmax.f32 %v1126_v57, 0.0 }
 0x117   : > { %v1129_v61 = vadd.f32 %v12426_v49, %v1090_v56  ;;  %v1093_v62 = vmul.f32 %v9748_v59, %v12421_v48  ;;  %v1163_v1 = vmax.f32 %v1131_v58, 0.0  ;;  %v1236_v5 = vsel %vm1210_vm1, %v1234_v36, %v1235_v60 }
 0x118   : > { %v1007_v2 = vpop.f32.mrf.mxu0  ;;  %v1336_v6 = vsel %vm1210_vm1, %v1235_v60, 0.0  ;;  %1372 = vst.msk [vmem:[#allocation2 + $0xc8] sm:$0xff] %vm1345_vm2, %v1236_v5  ;;  %v1232_v7 = vrot.slane %v1158_v0, 7  ;;  %v10147_v36 = vpack.i.bf16 %v12544_v22, %v12554_v31  ;;  %v1598_v0 = vld [vmem:[#allocation2 + $0x50] sm:$0xff] }
 0x119   : > { %1373 = vst.msk [vmem:[#allocation2 + $0xd0] sm:$0x3] %vm1348_vm3, %v1336_v6  ;;  %v1240_v8 = vrot.slane %v1163_v1, 7  ;;  %v1161_v9 = vmax.f32 %v1129_v61, 0.0  ;;  %v1132_v11 = vadd.f32 %v12426_v49, %v1093_v62  ;;  %v1091_v12 = vmul.f32 %v12421_v48, %v1007_v2 }
 0x11a   : > { %10133 = vrot.lane.b32.xlu0 %v10122_v29, %s16315_s26  ;;  %10173 = vrot.lane.b32.xlu1 %v10172_v63, %s16311_s6  ;;  %v9751_v10 = vpop.f32.mrf.mxu0  ;;  %v1233_v14 = vsel %vm1210_vm1, %v1231_v42, %v1232_v7  ;;  %v1335_v15 = vsel %vm1210_vm1, %v1232_v7, 0.0  ;;  %v1664_v42 = vld [vmem:[#allocation2 + $0x6a] sm:$0xff] }
 0x11b   : > { %v1321_v20 = vsel %vm1210_vm1, 0.0, %v1240_v8  ;;  %1369 = vst.msk [vmem:[#allocation2 + $0xb0] sm:$0xff] %vm1345_vm2, %v1233_v14  ;;  %v1237_v25 = vrot.slane %v1161_v9, 7  ;;  %v1164_v26 = vmax.f32 %v1132_v11, 0.0  ;;  %v1130_v27 = vadd.f32 %v12426_v49, %v1091_v12  ;;  %v1630_v14 = vld [vmem:[#allocation2 + $0x51] sm:$0xff] }
 0x11c   : > { %v1020_v21 = vpop.f32.mrf.mxu0  ;;  %1370 = vst.msk [vmem:[#allocation2 + $0xb8] sm:$0x3] %vm1348_vm3, %v1335_v15  ;;  %v1096_v28 = vmul.f32 %v9751_v10, %v12421_v48  ;;  %v12578_v59 = vpack.i.bf16 %v1664_v42, %v1663_v41 }
 0x11d   : > { %1377 = vst.msk [vmem:[#allocation2 + $0xf0] sm:$0xff] %vm1345_vm2, %v1321_v20  ;;  %v1094_v29 = vmul.f32 %v12421_v48, %v1020_v21  ;;  %v1320_v32 = vsel %vm1210_vm1, 0.0, %v1237_v25  ;;  %v1241_v33 = vrot.slane %v1164_v26, 7  ;;  %v1162_v34 = vmax.f32 %v1130_v27, 0.0 }
 0x11e   : > { %10138 = vrot.lane.b32.xlu0 %v10137_v13, %s16314_s24  ;;  %10188 = vrot.lane.b32.xlu1 %v10172_v63, %s16270_s5  ;;  %v9752_v30 = vpop.f32.mrf.mxu0  ;;  %v1135_v35 = vadd.f32 %v12426_v49, %v1096_v28  ;;  %1374 = vst.msk [vmem:[#allocation2 + $0xd8] sm:$0xff] %vm1345_vm2, %v1320_v32  ;;  %v1597_v63 = vld [vmem:[#allocation2 + $0x48] sm:$0xff]  ;;  %s16316_s5 = smov 48   ;;  %v1662_v32 = vld [vmem:[#allocation2 + $0x52] sm:$0xff] }
 0x11f   : > { %v1133_v38 = vadd.f32 %v12426_v49, %v1094_v29  ;;  %v1097_v39 = vmul.f32 %v9752_v30, %v12421_v48  ;;  %v1242_v43 = vsel %vm1210_vm1, %v1240_v8, %v1241_v33  ;;  %v1338_v45 = vsel %vm1210_vm1, %v1241_v33, 0.0  ;;  %v12607_v29 = vld [vmem:[%s16317_s23 + $0x8] sm:$0xff]  }
 0x120   : > { %v1238_v46 = vrot.slane %v1162_v34, 7  ;;  %v1167_v47 = vmax.f32 %v1135_v35, 0.0  ;;  %v1023_v50 = vpop.f32.mrf.mxu0  ;;  %1378 = vst.msk [vmem:[#allocation2 + $0xf8] sm:$0xff] %vm1345_vm2, %v1242_v43  ;;  %v10202_v8 = vpack.i.bf16 %v1598_v0, %v1597_v63  ;;  %v1661_v30 = vld [vmem:[#allocation2 + $0x4a] sm:$0xff]  ;;  %9803 = vmatprep.subr.bf16.mxu0 %v12607_v29 }
 0x121   : > { %1379 = vst.msk [vmem:[#allocation2 + $0x100] sm:$0x3] %vm1348_vm3, %v1338_v45  ;;  %v1165_v53 = vmax.f32 %v1133_v38, 0.0  ;;  %v1136_v54 = vadd.f32 %v12426_v49, %v1097_v39  ;;  %v1095_v62 = vmul.f32 %v12421_v48, %v1023_v50  ;;  %v10212_v38 = vpack.i.bf16 %v1662_v32, %v1661_v30  ;;  %v1445_v50 = vld [vmem:[#allocation2 + $0x91] sm:$0xff] }
 0x122   : > { %10148 = vrot.lane.b32.xlu0 %v10147_v36, %s16311_s6  ;;  %10193 = vrot.lane.b32.xlu1 %v12560_v37, %s16312_s3  ;;  %v1239_v55 = vsel %vm1210_vm1, %v1237_v25, %v1238_v46  ;;  %v1337_v56 = vsel %vm1210_vm1, %v1238_v46, 0.0  ;;  %v1246_v57 = vrot.slane %v1167_v47, 7  ;;  %v9755_v58 = vpop.f32.mrf.mxu0 }
 0x123   : > { %1375 = vst.msk [vmem:[#allocation2 + $0xe0] sm:$0xff] %vm1345_vm2, %v1239_v55  ;;  %v1243_v60 = vrot.slane %v1165_v53, 7  ;;  %v1168_v61 = vmax.f32 %v1136_v54, 0.0  ;;  %v1100_v2 = vmul.f32 %v9755_v58, %v12421_v48  ;;  %v1134_v6 = vadd.f32 %v12426_v49, %v1095_v62  ;;  %v1446_v53 = vld [vmem:[#allocation2 + $0x99] sm:$0xff] }
 0x124   : > { %1376 = vst.msk [vmem:[#allocation2 + $0xe8] sm:$0x3] %vm1348_vm3, %v1337_v56  ;;  %v1323_v1 = vsel %vm1210_vm1, 0.0, %v1246_v57  ;;  %v1036_v3 = vpop.f32.mrf.mxu0  ;;  %v1509_v58 = vld [vmem:[#allocation2 + $0x98] sm:$0xff] }
 0x125   : > { %1383 = vst.msk [vmem:[#allocation2 + $0x120] sm:$0xff] %vm1345_vm2, %v1323_v1  ;;  %v1322_v4 = vsel %vm1210_vm1, 0.0, %v1243_v60  ;;  %v1247_v5 = vrot.slane %v1168_v61, 7  ;;  %v1139_v7 = vadd.f32 %v12426_v49, %v1100_v2  ;;  %v1098_v11 = vmul.f32 %v12421_v48, %v1036_v3 }
 0x126   : > { %10153 = vrot.lane.b32.xlu0 %v10137_v13, %s16272_s0  ;;  %10198 = vrot.lane.b32.xlu1 %v12578_v59, %s16313_s28  ;;  %1380 = vst.msk [vmem:[#allocation2 + $0x108] sm:$0xff] %vm1345_vm2, %v1322_v4  ;;  %v9756_v12 = vpop.f32.mrf.mxu0  ;;  %v1629_v13 = vld [vmem:[#allocation2 + $0x49] sm:$0xff]  ;;  %v1166_v15 = vmax.f32 %v1134_v6, 0.0  ;;  %s16318_s0 = smov 32  }
 0x127   : > { %v1248_v9 = vsel %vm1210_vm1, %v1246_v57, %v1247_v5  ;;  %v1340_v10 = vsel %vm1210_vm1, %v1247_v5, 0.0  ;;  %v1171_v20 = vmax.f32 %v1139_v7, 0.0  ;;  %v1101_v21 = vmul.f32 %v9756_v12, %v12421_v48  ;;  %v1508_v57 = vld [vmem:[#allocation2 + $0x90] sm:$0xff] }
 0x128   : > { %1384 = vst.msk [vmem:[#allocation2 + $0x128] sm:$0xff] %vm1345_vm2, %v1248_v9  ;;  %v1137_v23 = vadd.f32 %v12426_v49, %v1098_v11  ;;  %v1244_v24 = vrot.slane %v1166_v15, 7  ;;  %v10207_v27 = vpack.i.bf16 %v1630_v14, %v1629_v13  ;;  %v1039_v43 = vpop.f32.mrf.mxu0  ;;  %v10252_v61 = vpack.i.bf16 %v1509_v58, %v1508_v57  ;;  %v1443_v9 = vld [vmem:[#allocation2 + $0x79] sm:$0xff] }
 0x129   : > { %1385 = vst.msk [vmem:[#allocation2 + $0x130] sm:$0x3] %vm1348_vm3, %v1340_v10  ;;  %v1252_v25 = vrot.slane %v1171_v20, 7  ;;  %v1140_v26 = vadd.f32 %v12426_v49, %v1101_v21  ;;  %v1099_v45 = vmul.f32 %v12421_v48, %v1039_v43  ;;  %v1444_v10 = vld [vmem:[#allocation2 + $0x81] sm:$0xff]  ;;  %v1506_v15 = vld [vmem:[#allocation2 + $0x78] sm:$0xff] }
 0x12a   : > { %10158 = vrot.lane.b32.xlu0 %v12518_v44, %s16275_s4  ;;  %10203 = vrot.lane.b32.xlu1 %v10202_v8, %s16316_s5  ;;  %v1169_v28 = vmax.f32 %v1137_v23, 0.0  ;;  %v1245_v33 = vsel %vm1210_vm1, %v1243_v60, %v1244_v24  ;;  %v1339_v44 = vsel %vm1210_vm1, %v1244_v24, 0.0  ;;  %v1478_v60 = vld [vmem:[#allocation2 + $0x9a] sm:$0xff]  ;;  %v9759_v63 = vpop.f32.mrf.mxu0  ;;  %v10282_v14 = vpack.i.bf16 %v1444_v10, %v1443_v9  ;;  %v1480_v57 = vld [vmem:[#allocation2 + $0xb2] sm:$0xff] }
 0x12b   : > { %1381 = vst.msk [vmem:[#allocation2 + $0x110] sm:$0xff] %vm1345_vm2, %v1245_v33  ;;  %v1325_v34 = vsel %vm1210_vm1, 0.0, %v1252_v25  ;;  %v1172_v36 = vmax.f32 %v1140_v26, 0.0  ;;  %v1138_v46 = vadd.f32 %v12426_v49, %v1099_v45  ;;  %v1104_v0 = vmul.f32 %v9759_v63, %v12421_v48  ;;  %v1507_v23 = vld [vmem:[#allocation2 + $0x80] sm:$0xff] }
 0x12c   : > { %1382 = vst.msk [vmem:[#allocation2 + $0x118] sm:$0x3] %vm1348_vm3, %v1339_v44  ;;  %v1249_v35 = vrot.slane %v1169_v28, 7  ;;  %v1052_v2 = vpop.f32.mrf.mxu0  ;;  %v1475_v24 = vld [vmem:[#allocation2 + $0x7a] sm:$0xff]  ;;  %v10292_v28 = vpack.i.bf16 %v1507_v23, %v1506_v15 }
 0x12d   : > { %1389 = vst.msk [vmem:[#allocation2 + $0x150] sm:$0xff] %vm1345_vm2, %v1325_v34  ;;  %v1253_v40 = vrot.slane %v1172_v36, 7  ;;  %v1170_v47 = vmax.f32 %v1138_v46, 0.0  ;;  %v1143_v1 = vadd.f32 %v12426_v49, %v1104_v0  ;;  %v1102_v4 = vmul.f32 %v12421_v48, %v1052_v2  ;;  %v1512_v44 = vld [vmem:[#allocation2 + $0xc0] sm:$0xff]  ;;  %v1513_v34 = vld [vmem:[#allocation2 + $0xc8] sm:$0xff]  ;;  %v12690_v0 = vpop.permute.xlu0 %10058 }
 0x12e   : > { %10163 = vrot.lane.b32.xlu0 %v12560_v37, %s16314_s24  ;;  %10208 = vrot.lane.b32.xlu1 %v10207_v27, %s16312_s3  ;;  %v1324_v39 = vsel %vm1210_vm1, 0.0, %v1249_v35  ;;  %v9760_v5 = vpop.f32.mrf.mxu0  ;;  %v1576_v46 = vld [vmem:[#allocation2 + $0xc2] sm:$0xff]  ;;  %v1549_v9 = vld [vmem:[#allocation2 + $0xf9] sm:$0xff] }
 0x12f   : > { %1386 = vst.msk [vmem:[#allocation2 + $0x138] sm:$0xff] %vm1345_vm2, %v1324_v39  ;;  %v1254_v41 = vsel %vm1210_vm1, %v1252_v25, %v1253_v40  ;;  %v1342_v42 = vsel %vm1210_vm1, %v1253_v40, 0.0  ;;  %v1250_v54 = vrot.slane %v1170_v47, 7  ;;  %v1175_v3 = vmax.f32 %v1143_v1, 0.0  ;;  %v1476_v25 = vld [vmem:[#allocation2 + $0x82] sm:$0xff]  ;;  %v1577_v47 = vld [vmem:[#allocation2 + $0xca] sm:$0xff] }
 0x130   : > { %1390 = vst.msk [vmem:[#allocation2 + $0x158] sm:$0xff] %vm1345_vm2, %v1254_v41  ;;  %v1141_v7 = vadd.f32 %v12426_v49, %v1102_v4  ;;  %v10287_v30 = vpack.i.bf16 %v1476_v25, %v1475_v24  ;;  %v1544_v40 = vld [vmem:[#allocation2 + $0xc1] sm:$0xff]  ;;  %v1545_v41 = vld [vmem:[#allocation2 + $0xc9] sm:$0xff]  ;;  %v1517_v4 = vld [vmem:[#allocation2 + $0xf8] sm:$0xff] }
 0x131   : > { %1391 = vst.msk [vmem:[#allocation2 + $0x160] sm:$0x3] %vm1348_vm3, %v1342_v42  ;;  %v1251_v55 = vsel %vm1210_vm1, %v1249_v35, %v1250_v54  ;;  %v1341_v56 = vsel %vm1210_vm1, %v1250_v54, 0.0  ;;  %v1258_v6 = vrot.slane %v1175_v3, 7  ;;  %v1055_v35 = vpop.f32.mrf.mxu0  ;;  %v10337_v43 = vpack.i.bf16 %v1545_v41, %v1544_v40  ;;  %v1447_v54 = vld [vmem:[#allocation2 + $0xa9] sm:$0xff]  ;;  %v12696_v2 = vpop.permute.xlu0 %10083 }
 0x132   : > { %10168 = vrot.lane.b32.xlu0 %v12578_v59, %s16315_s26  ;;  %10213 = vrot.lane.b32.xlu1 %v10212_v38, %s16313_s28  ;;  %1387 = vst.msk [vmem:[#allocation2 + $0x140] sm:$0xff] %vm1345_vm2, %v1251_v55  ;;  %v1173_v12 = vmax.f32 %v1141_v7, 0.0  ;;  %v1103_v36 = vmul.f32 %v12421_v48, %v1055_v35  ;;  %v1448_v55 = vld [vmem:[#allocation2 + $0xb1] sm:$0xff]  ;;  %v10060_v40 = vunpack.i.l.bf16 %v12690_v0  ;;  %v10061_v41 = vunpack.i.h.bf16 %v12690_v0 }
 0x133   : > { %1388 = vst.msk [vmem:[#allocation2 + $0x148] sm:$0x3] %vm1348_vm3, %v1341_v56  ;;  %v1327_v11 = vsel %vm1210_vm1, 0.0, %v1258_v6  ;;  %v10362_v56 = vpack.i.bf16 %v1448_v55, %v1447_v54  ;;  %v1516_v3 = vld [vmem:[#allocation2 + $0xf0] sm:$0xff]  ;;  %v1520_v55 = vld [vmem:[#allocation2 + $0x120] sm:$0xff] }
 0x134   : > { %1395 = vst.msk [vmem:[#allocation2 + $0x180] sm:$0xff] %vm1345_vm2, %v1327_v11  ;;  %v1255_v20 = vrot.slane %v1173_v12, 7  ;;  %v1142_v39 = vadd.f32 %v12426_v49, %v1103_v36  ;;  %v12706_v7 = vpack.i.bf16 %v1517_v4, %v1516_v3  ;;  %v1580_v11 = vld [vmem:[#allocation2 + $0xf2] sm:$0xff]  ;;  %v1581_v12 = vld [vmem:[#allocation2 + $0xfa] sm:$0xff]  ;;  %v1585_v0 = vld [vmem:[#allocation2 + $0x12a] sm:$0xff] }
 0x135   : > { %v12720_v15 = vpack.i.bf16 %v1581_v12, %v1580_v11  ;;  %v1455_v11 = vld [vmem:[#allocation2 + $0x109] sm:$0xff]  ;;  %v1456_v12 = vld [vmem:[#allocation2 + $0x111] sm:$0xff] }
 0x136   : > { %10178 = vrot.lane.b32.xlu0 %v12560_v37, %s16318_s0  ;;  %10218 = vrot.lane.b32.xlu1 %v10207_v27, %s16314_s24  ;;  %v10242_v37 = vpack.i.bf16 %v1446_v53, %v1445_v50  ;;  %v1326_v26 = vsel %vm1210_vm1, 0.0, %v1255_v20  ;;  %v1174_v42 = vmax.f32 %v1142_v39, 0.0  ;;  %v12678_v53 = vpop.permute.xlu1 %10063 }
 0x137   : > { %1392 = vst.msk [vmem:[#allocation2 + $0x168] sm:$0xff] %vm1345_vm2, %v1326_v26  ;;  %v1483_v26 = vld [vmem:[#allocation2 + $0xda] sm:$0xff] }
 0x138   : > { %v1256_v45 = vrot.slane %v1174_v42, 7  ;;  %v1401_v42 = vld [vmem:[#allocation2] sm:$0xff] }
 0x13a   : > { %10183 = vrot.lane.b32.xlu0 %v12578_v59, %s16275_s4  ;;  %10223 = vrot.lane.b32.xlu1 %v10212_v38, %s16315_s26  ;;  %v1477_v59 = vld [vmem:[#allocation2 + $0x92] sm:$0xff]  ;;  %v1343_v50 = vsel %vm1210_vm1, %v1256_v45, 0.0  ;;  %v12682_v58 = vpop.permute.xlu1 %10068 }
 0x13b   : > { %v10247_v62 = vpack.i.bf16 %v1478_v60, %v1477_v59  ;;  %1394 = vst.msk [vmem:[#allocation2 + $0x178] sm:$0x3] %vm1348_vm3, %v1343_v50  ;;  %v1605_v60 = vld [vmem:[#allocation2 + $0xa8] sm:$0xff]  ;;  %v10066_v50 = vunpack.i.h.bf16 %v12678_v53 }
 0x13e   : > { %10228 = vrot.lane.b32.xlu0 %v10202_v8, %s16311_s6  ;;  %10233 = vrot.lane.b32.xlu1 %v10207_v27, %s16318_s0  ;;  %v1105_v8 = vmul.f32 %v9760_v5, %v12421_v48  ;;  %v1257_v48 = vsel %vm1210_vm1, %v1255_v20, %v1256_v45  ;;  %v12688_v63 = vpop.permute.xlu1 %10073  ;;  %v1451_v20 = vld [vmem:[#allocation2 + $0xd9] sm:$0xff] }
 0x13f   : > { %1393 = vst.msk [vmem:[#allocation2 + $0x170] sm:$0xff] %vm1345_vm2, %v1257_v48  ;;  %v2715_v48 = vsel %vm1345_vm2, %v1401_v42, %v10060_v40 }
 0x140   : > { %v1144_v13 = vadd.f32 %v12426_v49, %v1105_v8  ;;  %v10342_v49 = vpack.i.bf16 %v1577_v47, %v1576_v46  ;;  %v1548_v8 = vld [vmem:[#allocation2 + $0xf1] sm:$0xff]  ;;  %v10065_v47 = vunpack.i.l.bf16 %v12678_v53  ;;  %v1584_v53 = vld [vmem:[#allocation2 + $0x122] sm:$0xff] }
 0x141   : > { %v12711_v10 = vpack.i.bf16 %v1549_v9, %v1548_v8 }
 0x142   : > { %10238 = vrot.lane.b32.xlu1 %v10212_v38, %s16275_s4  ;;  %10243 = vrot.lane.b32.xlu0 %v10242_v37, %s16314_s24  ;;  %v1176_v21 = vmax.f32 %v1144_v13, 0.0  ;;  %v10332_v38 = vpack.i.bf16 %v1513_v34, %v1512_v44  ;;  %v12694_v1 = vpop.permute.xlu1 %10078  ;;  %v1610_v44 = vld [vmem:[#allocation2 + $0xe0] sm:$0xff] }
 0x144   : > { %v1259_v27 = vrot.slane %v1176_v21, 7  ;;  %v1452_v21 = vld [vmem:[#allocation2 + $0xe1] sm:$0xff] }
 0x145   : > { %v12729_v25 = vpack.i.bf16 %v1452_v21, %v1451_v20 }
 0x146   : > { %10253 = vrot.lane.b32.xlu1 %v10252_v61, %s16311_s6  ;;  %10248 = vrot.lane.b32.xlu0 %v10247_v62, %s16315_s26  ;;  %v1260_v32 = vsel %vm1210_vm1, %v1258_v6, %v1259_v27  ;;  %v1344_v33 = vsel %vm1210_vm1, %v1259_v27, 0.0  ;;  %v12702_v5 = vpop.permute.xlu1 %10093  ;;  %v12704_v6 = vpop.permute.xlu0 %10088  ;;  %v1484_v27 = vld [vmem:[#allocation2 + $0xe2] sm:$0xff] }
 0x147   : > { %1396 = vst.msk [vmem:[#allocation2 + $0x188] sm:$0xff] %vm1345_vm2, %v1260_v32  ;;  %v12738_v32 = vpack.i.bf16 %v1484_v27, %v1483_v26 }
 0x148   : > { %1397 = vst.msk [vmem:[#allocation2 + $0x190] sm:$0x3] %vm1348_vm3, %v1344_v33  ;;  %v1609_v33 = vld [vmem:[#allocation2 + $0xd8] sm:$0xff]  ;;  %vm5299_vm3 = vcmask 162816  }
 0x149   : > { %v12747_v36 = vpack.i.bf16 %v1610_v44, %v1609_v33 }
 0x14a   : > { %10258 = vrot.lane.b32.xlu1 %v10242_v37, %s16318_s0  ;;  %10268 = vrot.lane.b32.xlu0 %v10252_v61, %s16316_s5  ;;  %v1606_v61 = vld [vmem:[#allocation2 + $0xb0] sm:$0xff] }
 0x14e   : > { %10263 = vrot.lane.b32.xlu1 %v10247_v62, %s16275_s4  ;;  %10273 = vrot.lane.b32.xlu0 %v10242_v37, %s16312_s3  ;;  %v1479_v37 = vld [vmem:[#allocation2 + $0xaa] sm:$0xff] }
 0x14f   : > { %v10367_v59 = vpack.i.bf16 %v1480_v57, %v1479_v37 }
 0x152   : > { %10278 = vrot.lane.b32.xlu0 %v10247_v62, %s16313_s28  ;;  %10283 = vrot.lane.b32.xlu1 %v10282_v14, %s16314_s24  ;;  %v10372_v62 = vpack.i.bf16 %v1606_v61, %v1605_v60  ;;  %v1552_v60 = vld [vmem:[#allocation2 + $0x121] sm:$0xff]  ;;  %v2748_v61 = vsel %vm2747_vm7, %v2715_v48, %v10065_v47 }
 0x156   : > { %10293 = vrot.lane.b32.xlu0 %v10292_v28, %s16311_s6  ;;  %10288 = vrot.lane.b32.xlu1 %v10287_v30, %s16315_s26 }
 0x15a   : > { %10298 = vrot.lane.b32.xlu0 %v10292_v28, %s16316_s5  ;;  %10333 = vrot.lane.b32.xlu1 %v10332_v38, %s16311_s6 }
 0x15e   : > { %10303 = vrot.lane.b32.xlu0 %v10282_v14, %s16312_s3  ;;  %10338 = vrot.lane.b32.xlu1 %v10337_v43, %s16318_s0 }
 0x162   : > { %10308 = vrot.lane.b32.xlu0 %v10287_v30, %s16313_s28  ;;  %10343 = vrot.lane.b32.xlu1 %v10342_v49, %s16275_s4 }
 0x166   : > { %10313 = vrot.lane.b32.xlu0 %v10282_v14, %s16318_s0  ;;  %10363 = vrot.lane.b32.xlu1 %v10362_v56, %s16314_s24 }
 0x16a   : > { %10318 = vrot.lane.b32.xlu0 %v10287_v30, %s16275_s4  ;;  %10368 = vrot.lane.b32.xlu1 %v10367_v59, %s16315_s26 }
 0x16e   : > { %10323 = vrot.lane.b32.xlu0 %v10337_v43, %s16314_s24  ;;  %10373 = vrot.lane.b32.xlu1 %v10372_v62, %s16316_s5 }
 0x172   : > { %10328 = vrot.lane.b32.xlu0 %v10342_v49, %s16315_s26  ;;  %10378 = vrot.lane.b32.xlu1 %v10362_v56, %s16312_s3 }
 0x176   : > { %10348 = vrot.lane.b32.xlu0 %v10332_v38, %s16316_s5  ;;  %10383 = vrot.lane.b32.xlu1 %v10367_v59, %s16313_s28 }
 0x17a   : > { %10353 = vrot.lane.b32.xlu0 %v10337_v43, %s16312_s3  ;;  %10413 = vrot.lane.b32.xlu1 %v12706_v7, %s16311_s6  ;;  %v1402_v43 = vld [vmem:[#allocation2 + $0x8] sm:$0xff] }
 0x17b   : > { %v2716_v54 = vsel %vm1345_vm2, %v1402_v43, %v10061_v41 }
 0x17c   : > { %v12713_v13 = vpop.permute.xlu0 %10113  ;;  %v12715_v14 = vpop.permute.xlu1 %10098  ;;  %v2749_v3 = vsel %vm2747_vm7, %v2716_v54, %v10066_v50 }
 0x17d   : > { %v10100_v41 = vunpack.i.l.bf16 %v12715_v14  ;;  %v10101_v47 = vunpack.i.h.bf16 %v12715_v14 }
 0x17e   : > { %10358 = vrot.lane.b32.xlu0 %v10342_v49, %s16313_s28  ;;  %10418 = vrot.lane.b32.xlu1 %v12711_v10, %s16318_s0 }
 0x180   : > { %v12722_v23 = vpop.permute.xlu0 %10118  ;;  %v12724_v24 = vpop.permute.xlu1 %10103 }
 0x181   : > { %v10121_v50 = vunpack.i.h.bf16 %v12722_v23  ;;  %v10106_v54 = vunpack.i.h.bf16 %v12724_v24  ;;  %v10105_v14 = vunpack.i.l.bf16 %v12724_v24 }
 0x182   : > { %10388 = vrot.lane.b32.xlu0 %v10372_v62, %s16311_s6  ;;  %10423 = vrot.lane.b32.xlu1 %v12720_v15, %s16275_s4  ;;  %v1553_v62 = vld [vmem:[#allocation2 + $0x129] sm:$0xff] }
 0x183   : > { %v12786_v26 = vpack.i.bf16 %v1553_v62, %v1552_v60 }
 0x184   : > { %v12731_v28 = vpop.permute.xlu0 %10123  ;;  %v12733_v30 = vpop.permute.xlu1 %10108 }
 0x186   : > { %10393 = vrot.lane.b32.xlu0 %v10362_v56, %s16318_s0  ;;  %10443 = vrot.lane.b32.xlu1 %v12729_v25, %s16314_s24  ;;  %v1521_v56 = vld [vmem:[#allocation2 + $0x128] sm:$0xff] }
 0x187   : > { %v12779_v8 = vpack.i.bf16 %v1521_v56, %v1520_v55 }
 0x188   : > { %v12740_v34 = vpop.permute.xlu0 %10128  ;;  %v12742_v35 = vpop.permute.xlu1 %10143 }
 0x189   : > { %v10145_v9 = vunpack.i.l.bf16 %v12742_v35  ;;  %v10146_v27 = vunpack.i.h.bf16 %v12742_v35  ;;  %v10115_v35 = vunpack.i.l.bf16 %v12713_v13 }
 0x18a   : > { %10398 = vrot.lane.b32.xlu0 %v10367_v59, %s16275_s4  ;;  %10448 = vrot.lane.b32.xlu1 %v12738_v32, %s16315_s26 }
 0x18c   : > { %v12749_v38 = vpop.permute.xlu0 %10133  ;;  %v12751_v39 = vpop.permute.xlu1 %10173 }
 0x18e   : > { %10403 = vrot.lane.b32.xlu0 %v12711_v10, %s16314_s24  ;;  %10453 = vrot.lane.b32.xlu1 %v12747_v36, %s16316_s5 }
 0x190   : > { %v10139_v45 = vpop.permute.xlu0 %10138  ;;  %v12759_v46 = vpop.permute.xlu1 %10188 }
 0x191   : > { %v10140_v49 = vunpack.i.l.bf16 %v10139_v45  ;;  %v10141_v37 = vunpack.i.h.bf16 %v10139_v45  ;;  %v10116_v45 = vunpack.i.h.bf16 %v12713_v13 }
 0x192   : > { %10408 = vrot.lane.b32.xlu0 %v12720_v15, %s16315_s26  ;;  %10458 = vrot.lane.b32.xlu1 %v12729_v25, %s16312_s3 }
 0x193   : > { %v2717_v4 = vsel %vm1345_vm2, %v12554_v31, %v10140_v49  ;;  %v2718_v20 = vsel %vm1345_vm2, %v12544_v22, %v10141_v37  ;;  %v12797_v22 = vpack.i.bf16 %v1456_v12, %v1455_v11  ;;  %v10120_v49 = vunpack.i.l.bf16 %v12722_v23 }
 0x194   : > { %v10149_v57 = vpop.permute.xlu0 %10148  ;;  %v12769_v59 = vpop.permute.xlu1 %10193  ;;  %v2750_v33 = vsel %vm2747_vm7, %v2717_v4, %v10145_v9  ;;  %v2751_v48 = vsel %vm2747_vm7, %v2718_v20, %v10146_v27  ;;  %v10111_v4 = vunpack.i.h.bf16 %v12733_v30  ;;  %v10110_v9 = vunpack.i.l.bf16 %v12733_v30 }
 0x195   : > { %v10151_v44 = vunpack.i.h.bf16 %v10149_v57  ;;  %v10150_v40 = vunpack.i.l.bf16 %v10149_v57  ;;  %v2784_v62 = vsel %vm2780_vm8, %v2751_v48, %v10101_v47 }
 0x196   : > { %10428 = vrot.lane.b32.xlu0 %v12706_v7, %s16316_s5  ;;  %10463 = vrot.lane.b32.xlu1 %v12738_v32, %s16313_s28  ;;  %v12788_v7 = vpack.i.bf16 %v1585_v0, %v1584_v53  ;;  %v10126_v0 = vunpack.i.h.bf16 %v12731_v28  ;;  %v2816_v27 = vsel %vm857_vm0, %v2784_v62, %v10106_v54  ;;  %v1488_v54 = vld [vmem:[#allocation2 + $0x112] sm:$0xff] }
 0x197   : > { %v2782_v37 = vsel %vm2780_vm8, %v2749_v3, %v10151_v44  ;;  %v2781_v57 = vsel %vm2780_vm8, %v2748_v61, %v10150_v40  ;;  %v10125_v61 = vunpack.i.l.bf16 %v12731_v28 }
 0x198   : > { %v10154_v21 = vpop.permute.xlu0 %10153  ;;  %v12784_v31 = vpop.permute.xlu1 %10198 }
 0x199   : > { %v10156_v42 = vunpack.i.h.bf16 %v10154_v21  ;;  %v10155_v43 = vunpack.i.l.bf16 %v10154_v21 }
 0x19a   : > { %10433 = vrot.lane.b32.xlu0 %v12711_v10, %s16312_s3  ;;  %10493 = vrot.lane.b32.xlu1 %v12779_v8, %s16311_s6  ;;  %v2783_v10 = vsel %vm2780_vm8, %v2750_v33, %v10100_v41 }
 0x19b   : > { %v2813_v53 = vsel %vm857_vm0, %v2781_v57, %v10155_v43  ;;  %v2814_v23 = vsel %vm857_vm0, %v2782_v37, %v10156_v42  ;;  %v2815_v21 = vsel %vm857_vm0, %v2783_v10, %v10105_v14  ;;  %v2849_v43 = vsel %vm2845_vm9, %v2816_v27, %v10111_v4  ;;  %v12030_v27 = vld [vmem:[#allocation2 + $0x30] sm:$0xff] }
 0x19c   : > { %v10159_v55 = vpop.permute.xlu0 %10158  ;;  %v10204_v56 = vpop.permute.xlu1 %10203  ;;  %v2848_v42 = vsel %vm2845_vm9, %v2815_v21, %v10110_v9  ;;  %v12029_v9 = vld [vmem:[%s12333_s29] sm:$0xff]  }
 0x19d   : > { %v10161_v60 = vunpack.i.h.bf16 %v10159_v55  ;;  %v10160_v13 = vunpack.i.l.bf16 %v10159_v55  ;;  %v10206_v28 = vunpack.i.h.bf16 %v10204_v56  ;;  %v10205_v33 = vunpack.i.l.bf16 %v10204_v56 }
 0x19e   : > { %10438 = vrot.lane.b32.xlu0 %v12720_v15, %s16313_s28  ;;  %10498 = vrot.lane.b32.xlu1 %v12786_v26, %s16318_s0 }
 0x19f   : > { %v2846_v3 = vsel %vm2845_vm9, %v2813_v53, %v10160_v13  ;;  %v2847_v24 = vsel %vm2845_vm9, %v2814_v23, %v10161_v60  ;;  %v2882_v10 = vsel %vm2878_vm10, %v2849_v43, %v10206_v28  ;;  %v12032_v43 = vld [vmem:[%s12333_s29 + $0x8] sm:$0xff]  }
 0x1a0   : > { %v2879_v11 = vsel %vm2878_vm10, %v2846_v3, %v10115_v35  ;;  %v2880_v12 = vsel %vm2878_vm10, %v2847_v24, %v10116_v45  ;;  %v12825_v15 = vpop.permute.xlu0 %10163  ;;  %v10209_v20 = vpop.permute.xlu1 %10208 }
 0x1a1   : > { %v10211_v44 = vunpack.i.h.bf16 %v10209_v20  ;;  %v10210_v40 = vunpack.i.l.bf16 %v10209_v20  ;;  %v2912_v30 = vsel %vm2911_vm11, %v2879_v11, %v10120_v49  ;;  %v2913_v41 = vsel %vm2911_vm11, %v2880_v12, %v10121_v50 }
 0x1a2   : > { %10468 = vrot.lane.b32.xlu0 %v12747_v36, %s16311_s6  ;;  %10503 = vrot.lane.b32.xlu1 %v12788_v7, %s16275_s4  ;;  %v2945_v47 = vsel %vm2944_vm12, %v2912_v30, %v10125_v61  ;;  %v2946_v48 = vsel %vm2944_vm12, %v2913_v41, %v10126_v0  ;;  %v1487_v36 = vld [vmem:[#allocation2 + $0x10a] sm:$0xff]  ;;  %v2881_v49 = vsel %vm2878_vm10, %v2848_v42, %v10205_v33  ;;  %v10131_v11 = vunpack.i.h.bf16 %v12740_v34  ;;  %v12031_v33 = vld [vmem:[#allocation2 + $0x38] sm:$0xff]  ;;  %s16282_s4 = smov 28  }
 0x1a3   : > { %v2914_v56 = vsel %vm2911_vm11, %v2881_v49, %v10210_v40  ;;  %v2915_v37 = vsel %vm2911_vm11, %v2882_v10, %v10211_v44  ;;  %v2977_v57 = vpack.c.bf16 %v2946_v48, %v2945_v47  ;;  %v12851_v14 = vpack.i.bf16 %v1488_v54, %v1487_v36  ;;  %v12861_v0 = vld [vmem:[#allocation2 + $0x108] sm:$0xff]  ;;  %v12863_v61 = vld [vmem:[#allocation2 + $0x110] sm:$0xff]  ;;  %v1525_v49 = vld [vmem:[#allocation2 + $0x158] sm:$0xff] }
 0x1a4   : > { %v12837_v45 = vpop.permute.xlu0 %10168  ;;  %v10214_v35 = vpop.permute.xlu1 %10213  ;;  %v12873_v3 = vpack.i.bf16 %v12863_v61, %v12861_v0  ;;  %v10135_v12 = vunpack.i.l.bf16 %v12749_v38  ;;  %v12033_v48 = vld [vmem:[%s12333_s29 + $0x10] sm:$0xff]  }
 0x1a5   : > { %v10216_v55 = vunpack.i.h.bf16 %v10214_v35  ;;  %v10215_v50 = vunpack.i.l.bf16 %v10214_v35  ;;  %9771 = vmatprep.mubr.msk.bf16.mxu0 %vm3029_vm13, %v2977_v57  ;;  %v1524_v10 = vld [vmem:[#allocation2 + $0x150] sm:$0xff] }
 0x1a6   : > { %10473 = vrot.lane.b32.xlu0 %v12729_v25, %s16318_s0  ;;  %10523 = vrot.lane.b32.xlu1 %v12797_v22, %s16314_s24  ;;  %v12001_v25 = vld [vmem:[%s16317_s23] sm:$0xff]  }
 0x1a7   : > { %v2947_v60 = vsel %vm2944_vm12, %v2914_v56, %v10215_v50  ;;  %v2948_v13 = vsel %vm2944_vm12, %v2915_v37, %v10216_v55  ;;  %v10191_v56 = vunpack.i.h.bf16 %v12759_v46  ;;  %v10190_v37 = vunpack.i.l.bf16 %v12759_v46 }
 0x1a8   : > { %v2978_v62 = vpack.c.bf16 %v2948_v13, %v2947_v60  ;;  %v12854_v53 = vpop.permute.xlu0 %10178  ;;  %v12856_v23 = vpop.permute.xlu1 %10218  ;;  %v10195_v46 = vunpack.i.l.bf16 %v12769_v59 }
 0x1aa   : > { %9772 = vmatmul.mubr.msk.bf16.vlgmr.msra.gmra.mxu0 %vm3029_vm13, %v2978_v62  ;;  %10478 = vrot.lane.b32.xlu0 %v12738_v32, %s16319_s27  ;;  %v10130_v32 = vunpack.i.l.bf16 %v12740_v34  ;;  %v2720_v34 = vsel %vm1345_vm2, %v12031_v33, %v10131_v11  ;;  %v12034_v33 = vld [vmem:[%s12333_s29 + $0x18] sm:$0xff]  }
 0x1ab   : > { %9804 = vmatpush3.bf16.msra.mxu0 %v12607_v29  ;;  %10528 = vrot.lane.b32.xlu1 %v12851_v14, %s16315_s26  ;;  %v10136_v29 = vunpack.i.h.bf16 %v12749_v38 }
 0x1ac   : > { %v12875_v24 = vpop.permute.xlu0 %10183  ;;  %v12877_v4 = vpop.permute.xlu1 %10223  ;;  %9805 = vmatprep.subr.bf16.mxu0 %v12001_v25  ;;  %9807 = vmatprep.mubr.msk.bf16.mxu0 %vm857_vm0, %v12029_v9  ;;  %v2719_v28 = vsel %vm1345_vm2, %v12030_v27, %v10130_v32  ;;  %v10196_v9 = vunpack.i.h.bf16 %v12769_v59  ;;  %v10200_v27 = vunpack.i.l.bf16 %v12784_v31 }
 0x1ad   : > { %v2752_v38 = vsel %vm2747_vm7, %v2719_v28, %v10135_v12  ;;  %v2753_v30 = vsel %vm2747_vm7, %v2720_v34, %v10136_v29  ;;  %v1556_v12 = vld [vmem:[#allocation2 + $0x151] sm:$0xff] }
 0x1ae   : > { %10483 = vrot.lane.b32.xlu0 %v12786_v26, %s16314_s24 }
 0x1af   : > { %9806 = vmatpush3.bf16.msra.mxu0 %v12001_v25  ;;  %10533 = vrot.lane.b32.xlu1 %v12873_v3, %s16316_s5  ;;  %v12915_v25 = vpack.i.bf16 %v1525_v49, %v1524_v10  ;;  %v12036_v10 = vld [vmem:[%s12333_s29 + $0x28] sm:$0xff]   ;;  %v12037_v49 = vld [vmem:[%s12333_s29 + $0x30] sm:$0xff]  }
 0x1b0   : > { %v10229_v20 = vpop.permute.xlu0 %10228  ;;  %v10234_v21 = vpop.permute.xlu1 %10233 }
 0x1b1   : > { %v10231_v44 = vunpack.i.h.bf16 %v10229_v20  ;;  %v10230_v40 = vunpack.i.l.bf16 %v10229_v20  ;;  %v10236_v41 = vunpack.i.h.bf16 %v10234_v21  ;;  %v10235_v42 = vunpack.i.l.bf16 %v10234_v21  ;;  %v1557_v20 = vld [vmem:[#allocation2 + $0x159] sm:$0xff] }
 0x1b2   : > { %9808 = vmatmul.mubr.msk.bf16.vlgmr.msra.gmra.mxu0 %vm857_vm0, %v12032_v43  ;;  %10488 = vrot.lane.b32.xlu0 %v12788_v7, %s16315_s26  ;;  %v10201_v21 = vunpack.i.h.bf16 %v12784_v31 }
 0x1b3   : > { %v2786_v35 = vsel %vm2780_vm8, %v2753_v30, %v10231_v44  ;;  %v2785_v47 = vsel %vm2780_vm8, %v2752_v38, %v10230_v40  ;;  %10538 = vrot.lane.b32.xlu1 %v12797_v22, %s16312_s3  ;;  %9811 = vmatprep.mubr.msk.bf16.mxu0 %vm857_vm0, %v12033_v48  ;;  %v12937_v40 = vpack.i.bf16 %v1557_v20, %v1556_v12  ;;  %v1588_v30 = vld [vmem:[#allocation2 + $0x152] sm:$0xff] }
 0x1b4   : > { %v10239_v36 = vpop.permute.xlu1 %10238  ;;  %v12903_v54 = vpop.permute.xlu0 %10243  ;;  %v2818_v57 = vsel %vm857_vm0, %v2786_v35, %v10236_v41  ;;  %v2817_v60 = vsel %vm857_vm0, %v2785_v47, %v10235_v42  ;;  %v1589_v41 = vld [vmem:[#allocation2 + $0x15a] sm:$0xff] }
 0x1b5   : > { %v10241_v55 = vunpack.i.h.bf16 %v10239_v36  ;;  %v10240_v50 = vunpack.i.l.bf16 %v10239_v36  ;;  %v12035_v42 = vld [vmem:[%s12333_s29 + $0x20] sm:$0xff]   ;;  %v12950_v43 = vpack.i.bf16 %v1589_v41, %v1588_v30  ;;  %v12038_v20 = vld [vmem:[%s12333_s29 + $0x38] sm:$0xff]   ;;  %v10181_v41 = vunpack.i.h.bf16 %v12854_v53 }
 0x1b6   : > { %10508 = vrot.lane.b32.xlu0 %v12779_v8, %s16316_s5  ;;  %v1459_v48 = vld [vmem:[#allocation2 + $0x139] sm:$0xff]  ;;  %v1460_v36 = vld [vmem:[#allocation2 + $0x141] sm:$0xff] }
 0x1b7   : > { %v2850_v13 = vsel %vm2845_vm9, %v2817_v60, %v10240_v50  ;;  %v2851_v62 = vsel %vm2845_vm9, %v2818_v57, %v10241_v55  ;;  %10543 = vrot.lane.b32.xlu1 %v12851_v14, %s16313_s28  ;;  %v10221_v57 = vunpack.i.h.bf16 %v12856_v23  ;;  %v10226_v60 = vunpack.i.h.bf16 %v12877_v4 }
 0x1b8   : > { %v12919_v11 = vpop.permute.xlu1 %10253  ;;  %v12921_v32 = vpop.permute.xlu0 %10248  ;;  %v2883_v8 = vsel %vm2878_vm10, %v2850_v13, %v10190_v37  ;;  %v2884_v29 = vsel %vm2878_vm10, %v2851_v62, %v10191_v56  ;;  %v1491_v56 = vld [vmem:[#allocation2 + $0x13a] sm:$0xff]  ;;  %v1492_v37 = vld [vmem:[#allocation2 + $0x142] sm:$0xff]  ;;  %v10225_v13 = vunpack.i.l.bf16 %v12877_v4 }
 0x1b9   : > { %v2916_v59 = vsel %vm2911_vm11, %v2883_v8, %v10195_v46  ;;  %v2917_v28 = vsel %vm2911_vm11, %v2884_v29, %v10196_v9  ;;  %v12978_v62 = vpack.i.bf16 %v1492_v37, %v1491_v56  ;;  %v12984_v8 = vld [vmem:[#allocation2 + $0x138] sm:$0xff]  ;;  %v12986_v29 = vld [vmem:[#allocation2 + $0x140] sm:$0xff]  ;;  %v10186_v37 = vunpack.i.h.bf16 %v12875_v24 }
 0x1ba   : > { %10513 = vrot.lane.b32.xlu0 %v12786_v26, %s16312_s3  ;;  %9812 = vmatmul.mubr.msk.bf16.gmra.mxu0 %vm857_vm0, %v12034_v33  ;;  %v2949_v34 = vsel %vm2944_vm12, %v2916_v59, %v10200_v27  ;;  %v2950_v44 = vsel %vm2944_vm12, %v2917_v28, %v10201_v21  ;;  %v13000_v59 = vpack.i.bf16 %v12986_v29, %v12984_v8  ;;  %v10176_v28 = vunpack.i.h.bf16 %v12751_v39 }
 0x1bb   : > { %10573 = vrot.lane.b32.xlu1 %v12915_v25, %s16311_s6  ;;  %v2979_v38 = vpack.c.bf16 %v2950_v44, %v2949_v34  ;;  %9815 = vmatprep.mubr.msk.bf16.mxu0 %vm857_vm0, %v12035_v42  ;;  %v10175_v33 = vunpack.i.l.bf16 %v12751_v39  ;;  %v12039_v44 = vld [vmem:[%s12333_s29 + $0x40] sm:$0xff]   ;;  %v10180_v42 = vunpack.i.l.bf16 %v12854_v53  ;;  %v12040_v53 = vld [vmem:[%s12333_s29 + $0x48] sm:$0xff]  }
 0x1bc   : > { %v12939_v31 = vpop.permute.xlu1 %10258  ;;  %v12941_v26 = vpop.permute.xlu0 %10268 }
 0x1bd   : > { %9775 = vmatprep.mubr.msk.bf16.mxu1 %vm3029_vm13, %v2979_v38 }
 0x1be   : > { %10518 = vrot.lane.b32.xlu0 %v12788_v7, %s16313_s28  ;;  %v12962_v7 = vpack.i.bf16 %v1460_v36, %v1459_v48 }
 0x1bf   : > { %10578 = vrot.lane.b32.xlu1 %v12937_v40, %s16318_s0 }
 0x1c0   : > { %v12952_v35 = vpop.permute.xlu1 %10263  ;;  %v12954_v47 = vpop.permute.xlu0 %10273 }
 0x1c2   : > { %10548 = vrot.lane.b32.xlu0 %v12873_v3, %s16311_s6  ;;  %9816 = vmatmul.mubr.msk.bf16.gmra.mxu0 %vm857_vm0, %v12036_v10  ;;  %v10220_v3 = vunpack.i.l.bf16 %v12856_v23  ;;  %v1407_v23 = vld [vmem:[#allocation2 + $0x48] sm:$0xff] }
 0x1c3   : > { %10583 = vrot.lane.b32.xlu1 %v12950_v43, %s16319_s27  ;;  %9819 = vmatprep.mubr.msk.bf16.mxu0 %vm857_vm0, %v12037_v49 }
 0x1c4   : > { %v12966_v55 = vpop.permute.xlu0 %10278  ;;  %v12968_v50 = vpop.permute.xlu1 %10283  ;;  %v2721_v12 = vsel %vm1345_vm2, %v1407_v23, %v10220_v3  ;;  %v10165_v23 = vunpack.i.l.bf16 %v12825_v15 }
 0x1c5   : > { %v2754_v21 = vsel %vm2747_vm7, %v2721_v12, %v10225_v13  ;;  %v10166_v13 = vunpack.i.h.bf16 %v12825_v15  ;;  %v12041_v12 = vld [vmem:[%s12333_s29 + $0x50] sm:$0xff]   ;;  %v1560_v15 = vld [vmem:[#allocation2 + $0x181] sm:$0xff] }
 0x1c6   : > { %10553 = vrot.lane.b32.xlu0 %v12797_v22, %s16318_s0  ;;  %v1408_v22 = vld [vmem:[#allocation2 + $0x50] sm:$0xff]  ;;  %v2787_v38 = vsel %vm2780_vm8, %v2754_v21, %v10175_v33  ;;  %v1529_v33 = vld [vmem:[#allocation2 + $0x188] sm:$0xff] }
 0x1c7   : > { %10603 = vrot.lane.b32.xlu1 %v12962_v7, %s16314_s24  ;;  %v2722_v4 = vsel %vm1345_vm2, %v1408_v22, %v10221_v57  ;;  %v2819_v36 = vsel %vm857_vm0, %v2787_v38, %v10180_v42  ;;  %v10185_v57 = vunpack.i.l.bf16 %v12875_v24  ;;  %v1528_v22 = vld [vmem:[#allocation2 + $0x180] sm:$0xff]  ;;  %v10171_v24 = vunpack.i.h.bf16 %v12837_v45 }
 0x1c8   : > { %v12980_v9 = vpop.permute.xlu0 %10293  ;;  %v12982_v46 = vpop.permute.xlu1 %10288  ;;  %v2755_v27 = vsel %vm2747_vm7, %v2722_v4, %v10226_v60  ;;  %v10170_v4 = vunpack.i.l.bf16 %v12837_v45  ;;  %v1592_v42 = vld [vmem:[#allocation2 + $0x182] sm:$0xff] }
 0x1c9   : > { %v2788_v30 = vsel %vm2780_vm8, %v2755_v27, %v10176_v28 }
 0x1ca   : > { %10558 = vrot.lane.b32.xlu0 %v12851_v14, %s16319_s27  ;;  %9820 = vmatmul.mubr.msk.bf16.gmra.mxu0 %vm857_vm0, %v12038_v20  ;;  %v2820_v10 = vsel %vm857_vm0, %v2788_v30, %v10181_v41  ;;  %v2852_v20 = vsel %vm2845_vm9, %v2819_v36, %v10185_v57 }
 0x1cb   : > { %10608 = vrot.lane.b32.xlu1 %v12978_v62, %s16315_s26  ;;  %9823 = vmatprep.mubr.msk.bf16.mxu0 %vm857_vm0, %v12039_v44  ;;  %v2853_v21 = vsel %vm2845_vm9, %v2820_v10, %v10186_v37  ;;  %v1409_v10 = vld [vmem:[#allocation2 + $0x60] sm:$0xff]  ;;  %v1410_v37 = vld [vmem:[#allocation2 + $0x68] sm:$0xff] }
 0x1cc   : > { %v10299_v34 = vpop.permute.xlu0 %10298  ;;  %v13004_v14 = vpop.permute.xlu1 %10333 }
 0x1cd   : > { %v10301_v49 = vunpack.i.h.bf16 %v10299_v34  ;;  %v10300_v56 = vunpack.i.l.bf16 %v10299_v34  ;;  %v1561_v34 = vld [vmem:[#allocation2 + $0x189] sm:$0xff] }
 0x1ce   : > { %10563 = vrot.lane.b32.xlu0 %v12937_v40, %s16314_s24 }
 0x1cf   : > { %10613 = vrot.lane.b32.xlu1 %v13000_v59, %s16316_s5  ;;  %v2886_v44 = vsel %vm2878_vm10, %v2853_v21, %v10301_v49  ;;  %v2885_v38 = vsel %vm2878_vm10, %v2852_v20, %v10300_v56  ;;  %v13048_v49 = vpack.i.bf16 %v1529_v33, %v1528_v22  ;;  %v13050_v56 = vpack.i.bf16 %v1561_v34, %v1560_v15 }
 0x1d0   : > { %v10304_v39 = vpop.permute.xlu0 %10303  ;;  %v13016_v48 = vpop.permute.xlu1 %10338  ;;  %v10295_v22 = vunpack.i.l.bf16 %v12980_v9  ;;  %v10286_v33 = vunpack.i.h.bf16 %v12968_v50  ;;  %v10291_v34 = vunpack.i.h.bf16 %v12982_v46 }
 0x1d1   : > { %v10306_v3 = vunpack.i.h.bf16 %v10304_v39  ;;  %v10305_v60 = vunpack.i.l.bf16 %v10304_v39  ;;  %v1593_v39 = vld [vmem:[#allocation2 + $0x18a] sm:$0xff] }
 0x1d2   : > { %10568 = vrot.lane.b32.xlu0 %v12950_v43, %s16315_s26  ;;  %9824 = vmatmul.mubr.msk.bf16.gmra.mxu0 %vm857_vm0, %v12040_v53  ;;  %v13056_v21 = vpack.i.bf16 %v1593_v39, %v1592_v42 }
 0x1d3   : > { %10618 = vrot.lane.b32.xlu1 %v12962_v7, %s16312_s3  ;;  %9827 = vmatprep.mubr.msk.bf16.mxu0 %vm857_vm0, %v12041_v12  ;;  %v2918_v45 = vsel %vm2911_vm11, %v2885_v38, %v10305_v60  ;;  %v2919_v36 = vsel %vm2911_vm11, %v2886_v44, %v10306_v3  ;;  %v2723_v60 = vsel %vm1345_vm2, %v1409_v10, %v10165_v23  ;;  %v10296_v38 = vunpack.i.h.bf16 %v12980_v9 }
 0x1d4   : > { %v10309_v27 = vpop.permute.xlu0 %10308  ;;  %v13036_v28 = vpop.permute.xlu1 %10343  ;;  %v2724_v3 = vsel %vm1345_vm2, %v1410_v37, %v10166_v13  ;;  %v10285_v23 = vunpack.i.l.bf16 %v12968_v50  ;;  %v10290_v9 = vunpack.i.l.bf16 %v12982_v46  ;;  %v10271_v50 = vunpack.i.h.bf16 %v12941_v26  ;;  %v1412_v46 = vld [vmem:[#allocation2 + $0x80] sm:$0xff] }
 0x1d5   : > { %v10311_v30 = vunpack.i.h.bf16 %v10309_v27  ;;  %v10310_v41 = vunpack.i.l.bf16 %v10309_v27  ;;  %v2756_v27 = vsel %vm2747_vm7, %v2723_v60, %v10170_v4  ;;  %v2757_v44 = vsel %vm2747_vm7, %v2724_v3, %v10171_v24 }
 0x1d6   : > { %10588 = vrot.lane.b32.xlu0 %v12915_v25, %s16316_s5  ;;  %v10256_v4 = vunpack.i.h.bf16 %v12919_v11  ;;  %v10255_v24 = vunpack.i.l.bf16 %v12919_v11  ;;  %v12042_v11 = vld [vmem:[%s12333_s29 + $0x58] sm:$0xff]   ;;  %v2789_v10 = vsel %vm2780_vm8, %v2756_v27, %v10295_v22  ;;  %v10280_v22 = vunpack.i.l.bf16 %v12966_v55 }
 0x1d7   : > { %v2951_v57 = vsel %vm2944_vm12, %v2918_v45, %v10310_v41  ;;  %v2952_v53 = vsel %vm2944_vm12, %v2919_v36, %v10311_v30  ;;  %10623 = vrot.lane.b32.xlu1 %v12978_v62, %s16313_s28  ;;  %v10270_v30 = vunpack.i.l.bf16 %v12941_v26  ;;  %v10276_v41 = vunpack.i.h.bf16 %v12954_v47  ;;  %v1411_v45 = vld [vmem:[#allocation2 + $0x78] sm:$0xff] }
 0x1d8   : > { %v10314_v12 = vpop.permute.xlu0 %10313  ;;  %v13054_v20 = vpop.permute.xlu1 %10363  ;;  %v2980_v25 = vpack.c.bf16 %v2952_v53, %v2951_v57  ;;  %v2790_v36 = vsel %vm2780_vm8, %v2757_v44, %v10296_v38  ;;  %v12043_v53 = vld [vmem:[%s12333_s29 + $0x60] sm:$0xff]   ;;  %v2725_v26 = vsel %vm1345_vm2, %v1411_v45, %v10285_v23  ;;  %v10281_v38 = vunpack.i.h.bf16 %v12966_v55 }
 0x1d9   : > { %v10316_v13 = vunpack.i.h.bf16 %v10314_v12  ;;  %v10315_v15 = vunpack.i.l.bf16 %v10314_v12  ;;  %v2758_v12 = vsel %vm2747_vm7, %v2725_v26, %v10290_v9  ;;  %v10261_v9 = vunpack.i.h.bf16 %v12939_v31 }
 0x1da   : > { %9776 = vmatmul.mubr.msk.bf16.vlgmr.msra.gmra.mxu1 %vm3029_vm13, %v2980_v25  ;;  %10593 = vrot.lane.b32.xlu0 %v12937_v40, %s16312_s3  ;;  %v10275_v40 = vunpack.i.l.bf16 %v12954_v47  ;;  %v2726_v47 = vsel %vm1345_vm2, %v1412_v46, %v10286_v33  ;;  %v10265_v46 = vunpack.i.l.bf16 %v12952_v35 }
 0x1db   : > { %10643 = vrot.lane.b32.xlu1 %v13048_v49, %s16311_s6  ;;  %9828 = vmatmul.mubr.msk.bf16.gmra.mxu0 %vm857_vm0, %v12042_v11  ;;  %v2821_v60 = vsel %vm857_vm0, %v2789_v10, %v10315_v15  ;;  %v2822_v3 = vsel %vm857_vm0, %v2790_v36, %v10316_v13  ;;  %v2759_v25 = vsel %vm2747_vm7, %v2726_v47, %v10291_v34  ;;  %v1463_v15 = vld [vmem:[#allocation2 + $0x169] sm:$0xff]  ;;  %v1464_v34 = vld [vmem:[#allocation2 + $0x171] sm:$0xff] }
 0x1dc   : > { %v10319_v42 = vpop.permute.xlu0 %10318  ;;  %v13077_v39 = vpop.permute.xlu1 %10368  ;;  %9831 = vmatprep.mubr.msk.bf16.mxu0 %vm857_vm0, %v12043_v53  ;;  %v2791_v11 = vsel %vm2780_vm8, %v2758_v12, %v10255_v24  ;;  %v2792_v45 = vsel %vm2780_vm8, %v2759_v25, %v10256_v4  ;;  %v1496_v10 = vld [vmem:[#allocation2 + $0x172] sm:$0xff] }
 0x1dd   : > { %v10321_v37 = vunpack.i.h.bf16 %v10319_v42  ;;  %v10320_v57 = vunpack.i.l.bf16 %v10319_v42  ;;  %v10260_v42 = vunpack.i.l.bf16 %v12939_v31  ;;  %v10266_v31 = vunpack.i.h.bf16 %v12952_v35  ;;  %v12045_v47 = vld [vmem:[%s12333_s29 + $0x70] sm:$0xff]  }
 0x1de   : > { %10598 = vrot.lane.b32.xlu0 %v12950_v43, %s16313_s28 }
 0x1df   : > { %v2854_v27 = vsel %vm2845_vm9, %v2821_v60, %v10320_v57  ;;  %v2855_v44 = vsel %vm2845_vm9, %v2822_v3, %v10321_v37  ;;  %10648 = vrot.lane.b32.xlu1 %v13050_v56, %s16318_s0  ;;  %v2823_v37 = vsel %vm857_vm0, %v2791_v11, %v10260_v42  ;;  %v2824_v57 = vsel %vm857_vm0, %v2792_v45, %v10261_v9 }
 0x1e0   : > { %v2887_v33 = vsel %vm2878_vm10, %v2854_v27, %v10270_v30  ;;  %v2888_v23 = vsel %vm2878_vm10, %v2855_v44, %v10271_v50  ;;  %v13101_v43 = vpop.permute.xlu0 %10323  ;;  %v10374_v13 = vpop.permute.xlu1 %10373  ;;  %v13113_v30 = vpack.i.bf16 %v1464_v34, %v1463_v15  ;;  %v2856_v25 = vsel %vm2845_vm9, %v2823_v37, %v10265_v46  ;;  %v12046_v46 = vld [vmem:[%s12333_s29 + $0x78] sm:$0xff]  }
 0x1e1   : > { %v2920_v55 = vsel %vm2911_vm11, %v2887_v33, %v10275_v40  ;;  %v2921_v50 = vsel %vm2911_vm11, %v2888_v23, %v10276_v41  ;;  %v1495_v40 = vld [vmem:[#allocation2 + $0x16a] sm:$0xff]  ;;  %v10376_v53 = vunpack.i.h.bf16 %v10374_v13  ;;  %v10375_v26 = vunpack.i.l.bf16 %v10374_v13 }
 0x1e2   : > { %10628 = vrot.lane.b32.xlu0 %v13000_v59, %s16311_s6  ;;  %v2953_v36 = vsel %vm2944_vm12, %v2920_v55, %v10280_v22  ;;  %v2954_v59 = vsel %vm2944_vm12, %v2921_v50, %v10281_v38  ;;  %v12044_v41 = vld [vmem:[%s12333_s29 + $0x68] sm:$0xff]   ;;  %v13131_v12 = vpack.i.bf16 %v1496_v10, %v1495_v40  ;;  %v2857_v27 = vsel %vm2845_vm9, %v2824_v57, %v10266_v31  ;;  %v13140_v33 = vld [vmem:[#allocation2 + $0x170] sm:$0xff]  ;;  %v1414_v10 = vld [vmem:[#allocation2 + $0x98] sm:$0xff] }
 0x1e3   : > { %10653 = vrot.lane.b32.xlu1 %v13056_v21, %s16319_s27  ;;  %9832 = vmatmul.mubr.msk.bf16.gmra.mxu0 %vm857_vm0, %v12044_v41  ;;  %v2981_v3 = vpack.c.bf16 %v2954_v59, %v2953_v36  ;;  %v13138_v22 = vld [vmem:[#allocation2 + $0x168] sm:$0xff]  ;;  %v2889_v23 = vsel %vm2878_vm10, %v2856_v25, %v10375_v26  ;;  %v10246_v36 = vunpack.i.h.bf16 %v12903_v54  ;;  %v10245_v59 = vunpack.i.l.bf16 %v12903_v54  ;;  %v1413_v40 = vld [vmem:[#allocation2 + $0x90] sm:$0xff] }
 0x1e4   : > { %v13117_v24 = vpop.permute.xlu0 %10328  ;;  %v10379_v4 = vpop.permute.xlu1 %10378  ;;  %9835 = vmatprep.mubr.msk.bf16.mxu0 %vm857_vm0, %v12045_v47  ;;  %v10682_v45 = vpack.i.bf16 %v13140_v33, %v13138_v22  ;;  %v10251_v37 = vunpack.i.h.bf16 %v12921_v32  ;;  %v10250_v57 = vunpack.i.l.bf16 %v12921_v32  ;;  %v10366_v54 = vunpack.i.h.bf16 %v13054_v20 }
 0x1e5   : > { %v10381_v35 = vunpack.i.h.bf16 %v10379_v4  ;;  %v10380_v60 = vunpack.i.l.bf16 %v10379_v4  ;;  %9779 = vmatprep.mubr.msk.bf16.mxu1 %vm3029_vm13, %v2981_v3  ;;  %v10365_v26 = vunpack.i.l.bf16 %v13054_v20  ;;  %v1416_v3 = vld [vmem:[#allocation2 + $0xb0] sm:$0xff]  ;;  %v10371_v20 = vunpack.i.h.bf16 %v13077_v39 }
 0x1e6   : > { %10633 = vrot.lane.b32.xlu0 %v12962_v7, %s16318_s0  ;;  %v2890_v7 = vsel %vm2878_vm10, %v2857_v27, %v10376_v53  ;;  %v2728_v53 = vsel %vm1345_vm2, %v1414_v10, %v10246_v36 }
 0x1e7   : > { %10673 = vrot.lane.b32.xlu1 %v13113_v30, %s16314_s24  ;;  %v2922_v34 = vsel %vm2911_vm11, %v2889_v23, %v10380_v60  ;;  %v2923_v9 = vsel %vm2911_vm11, %v2890_v7, %v10381_v35  ;;  %v1415_v60 = vld [vmem:[#allocation2 + $0xa8] sm:$0xff]  ;;  %v2761_v27 = vsel %vm2747_vm7, %v2728_v53, %v10251_v37  ;;  %v10336_v23 = vunpack.i.h.bf16 %v13004_v14 }
 0x1e8   : > { %v13136_v44 = vpop.permute.xlu0 %10348  ;;  %v10384_v38 = vpop.permute.xlu1 %10383 }
 0x1e9   : > { %v10386_v13 = vunpack.i.h.bf16 %v10384_v38  ;;  %v10385_v15 = vunpack.i.l.bf16 %v10384_v38 }
 0x1ea   : > { %10638 = vrot.lane.b32.xlu0 %v12978_v62, %s16319_s27 }
 0x1eb   : > { %v2955_v42 = vsel %vm2944_vm12, %v2922_v34, %v10385_v15  ;;  %v2956_v11 = vsel %vm2944_vm12, %v2923_v9, %v10386_v13  ;;  %10678 = vrot.lane.b32.xlu1 %v13131_v12, %s16315_s26  ;;  %9836 = vmatmul.mubr.msk.bf16.gmra.mxu0 %vm857_vm0, %v12046_v46  ;;  %v10335_v13 = vunpack.i.l.bf16 %v13004_v14  ;;  %v10370_v15 = vunpack.i.l.bf16 %v13077_v39 }
 0x1ec   : > { %v13154_v55 = vpop.permute.xlu0 %10353  ;;  %v13156_v50 = vpop.permute.xlu1 %10413  ;;  %v2982_v31 = vpack.c.bf16 %v2956_v11, %v2955_v42  ;;  %v2729_v34 = vsel %vm1345_vm2, %v1415_v60, %v10365_v26  ;;  %v2730_v9 = vsel %vm1345_vm2, %v1416_v3, %v10366_v54  ;;  %v10351_v42 = vunpack.i.h.bf16 %v13136_v44 }
 0x1ed   : > { %v10350_v11 = vunpack.i.l.bf16 %v13136_v44  ;;  %v10355_v39 = vunpack.i.l.bf16 %v13154_v55  ;;  %v2762_v44 = vsel %vm2747_vm7, %v2729_v34, %v10370_v15  ;;  %v2763_v37 = vsel %vm2747_vm7, %v2730_v9, %v10371_v20 }
 0x1ee   : > { %9780 = vmatmul.mubr.msk.bf16.gmra.mxu1 %vm3029_vm13, %v2982_v31  ;;  %10658 = vrot.lane.b32.xlu0 %v13048_v49, %s16316_s5  ;;  %v10340_v3 = vunpack.i.l.bf16 %v13016_v48 }
 0x1ef   : > { %10683 = vrot.lane.b32.xlu1 %v10682_v45, %s16316_s5  ;;  %s16284_s5 = smov 20  }
 0x1f0   : > { %v13164_v62 = vpop.permute.xlu0 %10358  ;;  %v13166_v4 = vpop.permute.xlu1 %10418 }
 0x1f1   : > { %v10361_v53 = vunpack.i.h.bf16 %v13164_v62  ;;  %v10360_v54 = vunpack.i.l.bf16 %v13164_v62 }
 0x1f2   : > { %10663 = vrot.lane.b32.xlu0 %v13050_v56, %s16312_s3  ;;  %v2727_v56 = vsel %vm1345_vm2, %v1413_v40, %v10245_v59  ;;  %v10356_v40 = vunpack.i.h.bf16 %v13154_v55 }
 0x1f3   : > { %10688 = vrot.lane.b32.xlu1 %v13113_v30, %s16312_s3  ;;  %s16343_s3 = smov 20  }
 0x1f4   : > { %v10389_v41 = vpop.permute.xlu0 %10388  ;;  %v13174_v49 = vpop.permute.xlu1 %10423 }
 0x1f5   : > { %v10391_v32 = vunpack.i.h.bf16 %v10389_v41  ;;  %v10390_v25 = vunpack.i.l.bf16 %v10389_v41 }
 0x1f6   : > { %10668 = vrot.lane.b32.xlu0 %v13056_v21, %s16313_s28  ;;  %v2760_v21 = vsel %vm2747_vm7, %v2727_v56, %v10250_v57 }
 0x1f7   : > { %10693 = vrot.lane.b32.xlu1 %v13131_v12, %s16313_s28  ;;  %v2793_v36 = vsel %vm2780_vm8, %v2760_v21, %v10390_v25  ;;  %v2796_v25 = vsel %vm2780_vm8, %v2763_v37, %v10336_v23  ;;  %s16320_s28 = sld [smem:[#allocation35_spill]] }
 0x1f8   : > { %v10394_v47 = vpop.permute.xlu0 %10393  ;;  %v13186_v35 = vpop.permute.xlu1 %10443 }
 0x1f9   : > { %v10396_v38 = vunpack.i.h.bf16 %v10394_v47  ;;  %v10395_v7 = vunpack.i.l.bf16 %v10394_v47 }
 0x1fa   : > { %10698 = vrot.lane.b32.xlu0 %v10682_v45, %s16311_s6  ;;  %v2794_v45 = vsel %vm2780_vm8, %v2761_v27, %v10391_v32  ;;  %v2795_v32 = vsel %vm2780_vm8, %v2762_v44, %v10335_v13  ;;  %v10346_v27 = vunpack.i.h.bf16 %v13036_v28 }
 0x1fb   : > { %v2825_v10 = vsel %vm857_vm0, %v2793_v36, %v10395_v7  ;;  %v2826_v41 = vsel %vm857_vm0, %v2794_v45, %v10396_v38  ;;  %v10345_v38 = vunpack.i.l.bf16 %v13036_v28  ;;  %v2827_v23 = vsel %vm857_vm0, %v2795_v32, %v10340_v3  ;;  %v1417_v32 = vld [vmem:[#allocation2 + $0xc0] sm:$0xff] }
 0x1fc   : > { %v10399_v31 = vpop.permute.xlu0 %10398  ;;  %v13199_v46 = vpop.permute.xlu1 %10448  ;;  %v10325_v3 = vunpack.i.l.bf16 %v13101_v43 }
 0x1fd   : > { %v10401_v14 = vunpack.i.h.bf16 %v10399_v31  ;;  %v10400_v59 = vunpack.i.l.bf16 %v10399_v31  ;;  %v2860_v31 = vsel %vm2845_vm9, %v2827_v23, %v10345_v38  ;;  %v10445_v38 = vunpack.i.l.bf16 %v13186_v35 }
 0x1fe   : > { %10703 = vrot.lane.b32.xlu0 %v13113_v30, %s16318_s0  ;;  %v10341_v30 = vunpack.i.h.bf16 %v13016_v48 }
 0x1ff   : > { %v2858_v57 = vsel %vm2845_vm9, %v2825_v10, %v10400_v59  ;;  %v2859_v56 = vsel %vm2845_vm9, %v2826_v41, %v10401_v14 }
 0x200   : > { %v2891_v55 = vsel %vm2878_vm10, %v2858_v57, %v10350_v11  ;;  %v2892_v26 = vsel %vm2878_vm10, %v2859_v56, %v10351_v42  ;;  %v13217_v47 = vpop.permute.xlu0 %10403  ;;  %v10454_v60 = vpop.permute.xlu1 %10453  ;;  %v2828_v15 = vsel %vm857_vm0, %v2796_v25, %v10341_v30  ;;  %v10326_v30 = vunpack.i.h.bf16 %v13101_v43  ;;  %v1418_v25 = vld [vmem:[#allocation2 + $0xc8] sm:$0xff] }
 0x201   : > { %v2924_v62 = vsel %vm2911_vm11, %v2891_v55, %v10355_v39  ;;  %v2925_v21 = vsel %vm2911_vm11, %v2892_v26, %v10356_v40  ;;  %v10455_v34 = vunpack.i.l.bf16 %v10454_v60  ;;  %v2861_v28 = vsel %vm2845_vm9, %v2828_v15, %v10346_v27 }
 0x202   : > { %10708 = vrot.lane.b32.xlu0 %v13131_v12, %s16319_s27  ;;  %v2957_v48 = vsel %vm2944_vm12, %v2924_v62, %v10360_v54  ;;  %v2958_v13 = vsel %vm2944_vm12, %v2925_v21, %v10361_v53  ;;  %v10456_v12 = vunpack.i.h.bf16 %v10454_v60  ;;  %v10331_v62 = vunpack.i.h.bf16 %v13117_v24  ;;  %s16342_s27 = smov 12  }
 0x203   : > { %v2983_v11 = vpack.c.bf16 %v2958_v13, %v2957_v48  ;;  %v2893_v59 = vsel %vm2878_vm10, %v2860_v31, %v10455_v34  ;;  %v10330_v21 = vunpack.i.l.bf16 %v13117_v24  ;;  %v10446_v27 = vunpack.i.h.bf16 %v13186_v35  ;;  %v1420_v48 = vld [vmem:[#allocation2 + $0xe0] sm:$0xff] }
 0x204   : > { %v13229_v7 = vpop.permute.xlu0 %10408  ;;  %v10459_v20 = vpop.permute.xlu1 %10458  ;;  %v2894_v14 = vsel %vm2878_vm10, %v2861_v28, %v10456_v12  ;;  %v2731_v15 = vsel %vm1345_vm2, %v1417_v32, %v10325_v3  ;;  %v2732_v12 = vsel %vm1345_vm2, %v1418_v25, %v10326_v30  ;;  %v10416_v31 = vunpack.i.h.bf16 %v13156_v50 }
 0x205   : > { %v10461_v9 = vunpack.i.h.bf16 %v10459_v20  ;;  %v10460_v42 = vunpack.i.l.bf16 %v10459_v20  ;;  %9783 = vmatprep.mubr.msk.bf16.mxu1 %vm3029_vm13, %v2983_v11  ;;  %v1419_v20 = vld [vmem:[#allocation2 + $0xd8] sm:$0xff]  ;;  %v10415_v35 = vunpack.i.l.bf16 %v13156_v50 }
 0x206   : > { %v2733_v28 = vsel %vm1345_vm2, %v1419_v20, %v10445_v38 }
 0x207   : > { %v2926_v10 = vsel %vm2911_vm11, %v2893_v59, %v10460_v42  ;;  %v2927_v41 = vsel %vm2911_vm11, %v2894_v14, %v10461_v9  ;;  %v2764_v9 = vsel %vm2747_vm7, %v2731_v15, %v10330_v21  ;;  %v2765_v42 = vsel %vm2747_vm7, %v2732_v12, %v10331_v62 }
 0x208   : > { %v13238_v45 = vpop.permute.xlu0 %10428  ;;  %v10464_v36 = vpop.permute.xlu1 %10463  ;;  %v10451_v14 = vunpack.i.h.bf16 %v13199_v46  ;;  %v10450_v59 = vunpack.i.l.bf16 %v13199_v46  ;;  %v10420_v15 = vunpack.i.l.bf16 %v13166_v4 }
 0x209   : > { %v10466_v40 = vunpack.i.h.bf16 %v10464_v36  ;;  %v10465_v39 = vunpack.i.l.bf16 %v10464_v36  ;;  %v2734_v36 = vsel %vm1345_vm2, %v1420_v48, %v10446_v27 }
 0x20a   : > { %v2766_v21 = vsel %vm2747_vm7, %v2733_v28, %v10450_v59  ;;  %v2767_v27 = vsel %vm2747_vm7, %v2734_v36, %v10451_v14  ;;  %v10426_v28 = vunpack.i.h.bf16 %v13174_v49  ;;  %v10425_v36 = vunpack.i.l.bf16 %v13174_v49 }
 0x20b   : > { %v2959_v44 = vsel %vm2944_vm12, %v2926_v10, %v10465_v39  ;;  %v2960_v37 = vsel %vm2944_vm12, %v2927_v41, %v10466_v40  ;;  %v10431_v40 = vunpack.i.h.bf16 %v13238_v45  ;;  %v10430_v39 = vunpack.i.l.bf16 %v13238_v45 }
 0x20c   : > { %v10434_v57 = vpop.permute.xlu0 %10433  ;;  %v13246_v56 = vpop.permute.xlu1 %10493  ;;  %v2984_v53 = vpack.c.bf16 %v2960_v37, %v2959_v44 }
 0x20d   : > { %v10435_v30 = vunpack.i.l.bf16 %v10434_v57 }
 0x20e   : > { %9784 = vmatmul.mubr.msk.bf16.gmra.mxu1 %vm3029_vm13, %v2984_v53 }
 0x210   : > { %v10439_v54 = vpop.permute.xlu0 %10438  ;;  %v13249_v55 = vpop.permute.xlu1 %10498 }
 0x211   : > { %v10441_v46 = vunpack.i.h.bf16 %v10439_v54  ;;  %v10440_v25 = vunpack.i.l.bf16 %v10439_v54 }
 0x214   : > { %v10469_v26 = vpop.permute.xlu0 %10468  ;;  %v13251_v60 = vpop.permute.xlu1 %10503 }
 0x215   : > { %v10471_v43 = vunpack.i.h.bf16 %v10469_v26  ;;  %v10470_v34 = vunpack.i.l.bf16 %v10469_v26  ;;  %v10436_v26 = vunpack.i.h.bf16 %v10434_v57 }
 0x217   : > { %v2798_v41 = vsel %vm2780_vm8, %v2765_v42, %v10471_v43  ;;  %v2797_v44 = vsel %vm2780_vm8, %v2764_v9, %v10470_v34  ;;  %v2799_v43 = vsel %vm2780_vm8, %v2766_v21, %v10415_v35  ;;  %v2800_v34 = vsel %vm2780_vm8, %v2767_v27, %v10416_v31 }
 0x218   : > { %v10474_v13 = vpop.permute.xlu0 %10473  ;;  %v13259_v23 = vpop.permute.xlu1 %10523  ;;  %v2831_v14 = vsel %vm857_vm0, %v2799_v43, %v10420_v15  ;;  %v10411_v43 = vunpack.i.h.bf16 %v13229_v7 }
 0x219   : > { %v10476_v24 = vunpack.i.h.bf16 %v10474_v13  ;;  %v10475_v11 = vunpack.i.l.bf16 %v10474_v13  ;;  %v10421_v13 = vunpack.i.h.bf16 %v13166_v4 }
 0x21b   : > { %v2829_v3 = vsel %vm857_vm0, %v2797_v44, %v10475_v11  ;;  %v2830_v32 = vsel %vm857_vm0, %v2798_v41, %v10476_v24  ;;  %v2832_v59 = vsel %vm857_vm0, %v2800_v34, %v10421_v13  ;;  %v2864_v41 = vsel %vm2845_vm9, %v2831_v14, %v10425_v36 }
 0x21c   : > { %v10479_v10 = vpop.permute.xlu0 %10478  ;;  %v2865_v44 = vsel %vm2845_vm9, %v2832_v59, %v10426_v28  ;;  %v10405_v13 = vunpack.i.l.bf16 %v13217_v47  ;;  %v10410_v34 = vunpack.i.l.bf16 %v13229_v7  ;;  %v10496_v7 = vunpack.i.h.bf16 %v13246_v56 }
 0x21d   : > { %v10481_v37 = vunpack.i.h.bf16 %v10479_v10  ;;  %v10480_v53 = vunpack.i.l.bf16 %v10479_v10  ;;  %v13275_v50 = vpop.permute.xlu1 %10528 }
 0x21f   : > { %v2862_v62 = vsel %vm2845_vm9, %v2829_v3, %v10480_v53  ;;  %v2863_v45 = vsel %vm2845_vm9, %v2830_v32, %v10481_v37 }
 0x220   : > { %v2895_v38 = vsel %vm2878_vm10, %v2862_v62, %v10430_v39  ;;  %v2896_v20 = vsel %vm2878_vm10, %v2863_v45, %v10431_v40  ;;  %v13285_v48 = vpop.permute.xlu0 %10483 }
 0x221   : > { %v10534_v57 = vpop.permute.xlu1 %10533  ;;  %v2928_v54 = vsel %vm2911_vm11, %v2895_v38, %v10435_v30  ;;  %v2929_v12 = vsel %vm2911_vm11, %v2896_v20, %v10436_v26 }
 0x222   : > { %v2961_v9 = vsel %vm2944_vm12, %v2928_v54, %v10440_v25  ;;  %v2962_v42 = vsel %vm2944_vm12, %v2929_v12, %v10441_v46  ;;  %v10536_v40 = vunpack.i.h.bf16 %v10534_v57  ;;  %v10535_v35 = vunpack.i.l.bf16 %v10534_v57  ;;  %v1421_v54 = vld [vmem:[#allocation2 + $0xf0] sm:$0xff]  ;;  %v1422_v12 = vld [vmem:[#allocation2 + $0xf8] sm:$0xff] }
 0x223   : > { %v2985_v11 = vpack.c.bf16 %v2962_v42, %v2961_v9  ;;  %v10406_v57 = vunpack.i.h.bf16 %v13217_v47  ;;  %v10526_v9 = vunpack.i.h.bf16 %v13259_v23  ;;  %v10525_v42 = vunpack.i.l.bf16 %v13259_v23 }
 0x224   : > { %v13295_v24 = vpop.permute.xlu0 %10488  ;;  %v2898_v49 = vsel %vm2878_vm10, %v2865_v44, %v10536_v40  ;;  %v2897_v53 = vsel %vm2878_vm10, %v2864_v41, %v10535_v35  ;;  %v2735_v28 = vsel %vm1345_vm2, %v1421_v54, %v10405_v13  ;;  %v10531_v44 = vunpack.i.h.bf16 %v13275_v50 }
 0x225   : > { %v10539_v4 = vpop.permute.xlu1 %10538  ;;  %9787 = vmatprep.mubr.msk.bf16.mxu1 %vm3029_vm13, %v2985_v11  ;;  %v2736_v36 = vsel %vm1345_vm2, %v1422_v12, %v10406_v57  ;;  %v2768_v59 = vsel %vm2747_vm7, %v2735_v28, %v10410_v34  ;;  %v2737_v23 = vsel %vm1345_vm2, %v12861_v0, %v10525_v42  ;;  %v2738_v41 = vsel %vm1345_vm2, %v12863_v61, %v10526_v9 }
 0x226   : > { %v10541_v31 = vunpack.i.h.bf16 %v10539_v4  ;;  %v10540_v39 = vunpack.i.l.bf16 %v10539_v4  ;;  %v2769_v40 = vsel %vm2747_vm7, %v2736_v36, %v10411_v43  ;;  %v2771_v54 = vsel %vm2747_vm7, %v2738_v41, %v10531_v44 }
 0x227   : > { %v10501_v9 = vunpack.i.h.bf16 %v13249_v55  ;;  %v10500_v42 = vunpack.i.l.bf16 %v13249_v55  ;;  %v2804_v36 = vsel %vm2780_vm8, %v2771_v54, %v10496_v7 }
 0x228   : > { %v13302_v10 = vpop.permute.xlu0 %10508  ;;  %v2930_v3 = vsel %vm2911_vm11, %v2897_v53, %v10540_v39  ;;  %v2931_v32 = vsel %vm2911_vm11, %v2898_v49, %v10541_v31  ;;  %v10495_v39 = vunpack.i.l.bf16 %v13246_v56 }
 0x229   : > { %v10544_v37 = vpop.permute.xlu1 %10543  ;;  %v10511_v49 = vunpack.i.h.bf16 %v13302_v10  ;;  %v10510_v53 = vunpack.i.l.bf16 %v13302_v10  ;;  %v2836_v41 = vsel %vm857_vm0, %v2804_v36, %v10501_v9  ;;  %v10486_v9 = vunpack.i.h.bf16 %v13285_v48 }
 0x22a   : > { %v10546_v26 = vunpack.i.h.bf16 %v10544_v37  ;;  %v10545_v30 = vunpack.i.l.bf16 %v10544_v37  ;;  %v10530_v37 = vunpack.i.l.bf16 %v13275_v50  ;;  %v10490_v36 = vunpack.i.l.bf16 %v13295_v24 }
 0x22c   : > { %v2963_v46 = vsel %vm2944_vm12, %v2930_v3, %v10545_v30  ;;  %v2964_v25 = vsel %vm2944_vm12, %v2931_v32, %v10546_v26  ;;  %v10514_v62 = vpop.permute.xlu0 %10513  ;;  %v2770_v13 = vsel %vm2747_vm7, %v2737_v23, %v10530_v37 }
 0x22d   : > { %v13312_v45 = vpop.permute.xlu1 %10573  ;;  %v2986_v21 = vpack.c.bf16 %v2964_v25, %v2963_v46  ;;  %v10516_v0 = vunpack.i.h.bf16 %v10514_v62  ;;  %v10515_v25 = vunpack.i.l.bf16 %v10514_v62  ;;  %v2803_v28 = vsel %vm2780_vm8, %v2770_v13, %v10495_v39 }
 0x22e   : > { %v2835_v23 = vsel %vm857_vm0, %v2803_v28, %v10500_v42  ;;  %v10485_v42 = vunpack.i.l.bf16 %v13285_v48  ;;  %v10491_v28 = vunpack.i.h.bf16 %v13295_v24 }
 0x22f   : > { %9788 = vmatmul.mubr.msk.bf16.gmra.mxu1 %vm3029_vm13, %v2986_v21 }
 0x230   : > { %v10519_v27 = vpop.permute.xlu0 %10518 }
 0x231   : > { %v13315_v38 = vpop.permute.xlu1 %10578  ;;  %v10521_v50 = vunpack.i.h.bf16 %v10519_v27 }
 0x234   : > { %v10549_v20 = vpop.permute.xlu0 %10548 }
 0x235   : > { %v13319_v15 = vpop.permute.xlu1 %10583  ;;  %v10551_v4 = vunpack.i.h.bf16 %v10549_v20  ;;  %v10550_v14 = vunpack.i.l.bf16 %v10549_v20  ;;  %v10520_v20 = vunpack.i.l.bf16 %v10519_v27 }
 0x237   : > { %v2802_v30 = vsel %vm2780_vm8, %v2769_v40, %v10551_v4  ;;  %v2801_v3 = vsel %vm2780_vm8, %v2768_v59, %v10550_v14 }
 0x238   : > { %v10554_v11 = vpop.permute.xlu0 %10553 }
 0x239   : > { %v13327_v47 = vpop.permute.xlu1 %10603  ;;  %v10556_v35 = vunpack.i.h.bf16 %v10554_v11  ;;  %v10555_v31 = vunpack.i.l.bf16 %v10554_v11 }
 0x23b   : > { %v2833_v61 = vsel %vm857_vm0, %v2801_v3, %v10555_v31  ;;  %v2834_v21 = vsel %vm857_vm0, %v2802_v30, %v10556_v35  ;;  %v10506_v35 = vunpack.i.h.bf16 %v13251_v60  ;;  %v10505_v31 = vunpack.i.l.bf16 %v13251_v60 }
 0x23c   : > { %v10559_v26 = vpop.permute.xlu0 %10558 }
 0x23d   : > { %v10561_v56 = vunpack.i.h.bf16 %v10559_v26  ;;  %v10560_v32 = vunpack.i.l.bf16 %v10559_v26  ;;  %v13343_v46 = vpop.permute.xlu1 %10608  ;;  %v2869_v26 = vsel %vm2845_vm9, %v2836_v41, %v10506_v35 }
 0x23f   : > { %v2866_v57 = vsel %vm2845_vm9, %v2833_v61, %v10560_v32  ;;  %v2867_v10 = vsel %vm2845_vm9, %v2834_v21, %v10561_v56 }
 0x240   : > { %v2899_v12 = vsel %vm2878_vm10, %v2866_v57, %v10510_v53  ;;  %v2900_v43 = vsel %vm2878_vm10, %v2867_v10, %v10511_v49  ;;  %v13353_v34 = vpop.permute.xlu0 %10563  ;;  %v2868_v53 = vsel %vm2845_vm9, %v2835_v23, %v10505_v31 }
 0x241   : > { %v10614_v62 = vpop.permute.xlu1 %10613  ;;  %v2932_v27 = vsel %vm2911_vm11, %v2899_v12, %v10515_v25  ;;  %v2933_v11 = vsel %vm2911_vm11, %v2900_v43, %v10516_v0  ;;  %v10606_v12 = vunpack.i.h.bf16 %v13327_v47  ;;  %v10605_v43 = vunpack.i.l.bf16 %v13327_v47 }
 0x242   : > { %v2965_v4 = vsel %vm2944_vm12, %v2932_v27, %v10520_v20  ;;  %v2966_v14 = vsel %vm2944_vm12, %v2933_v11, %v10521_v50  ;;  %v10616_v44 = vunpack.i.h.bf16 %v10614_v62  ;;  %v10615_v39 = vunpack.i.l.bf16 %v10614_v62  ;;  %v1425_v27 = vld [vmem:[#allocation2 + $0x120] sm:$0xff]  ;;  %v1426_v11 = vld [vmem:[#allocation2 + $0x128] sm:$0xff] }
 0x243   : > { %v2987_v40 = vpack.c.bf16 %v2966_v14, %v2965_v4  ;;  %v10611_v4 = vunpack.i.h.bf16 %v13343_v46  ;;  %v10610_v14 = vunpack.i.l.bf16 %v13343_v46  ;;  %v2741_v47 = vsel %vm1345_vm2, %v12984_v8, %v10605_v43 }
 0x244   : > { %v13363_v59 = vpop.permute.xlu0 %10568  ;;  %v2902_v60 = vsel %vm2878_vm10, %v2869_v26, %v10616_v44  ;;  %v2901_v3 = vsel %vm2878_vm10, %v2868_v53, %v10615_v39  ;;  %v2742_v35 = vsel %vm1345_vm2, %v12986_v29, %v10606_v12  ;;  %v2739_v23 = vsel %vm1345_vm2, %v1425_v27, %v10485_v42 }
 0x245   : > { %v10619_v55 = vpop.permute.xlu1 %10618  ;;  %9791 = vmatprep.mubr.msk.bf16.mxu1 %vm3029_vm13, %v2987_v40  ;;  %v2740_v41 = vsel %vm1345_vm2, %v1426_v11, %v10486_v9  ;;  %v2772_v39 = vsel %vm2747_vm7, %v2739_v23, %v10490_v36  ;;  %v10575_v8 = vunpack.i.l.bf16 %v13312_v45  ;;  %v2775_v29 = vsel %vm2747_vm7, %v2742_v35, %v10611_v4 }
 0x246   : > { %v10621_v7 = vunpack.i.h.bf16 %v10619_v55  ;;  %v10620_v37 = vunpack.i.l.bf16 %v10619_v55  ;;  %v2773_v46 = vsel %vm2747_vm7, %v2740_v41, %v10491_v28  ;;  %v10581_v28 = vunpack.i.h.bf16 %v13315_v38 }
 0x248   : > { %v13370_v49 = vpop.permute.xlu0 %10588  ;;  %v2934_v0 = vsel %vm2911_vm11, %v2901_v3, %v10620_v37  ;;  %v2935_v25 = vsel %vm2911_vm11, %v2902_v60, %v10621_v7  ;;  %v10576_v7 = vunpack.i.h.bf16 %v13312_v45  ;;  %v2774_v37 = vsel %vm2747_vm7, %v2741_v47, %v10610_v14 }
 0x249   : > { %v10624_v30 = vpop.permute.xlu1 %10623  ;;  %v10591_v53 = vunpack.i.h.bf16 %v13370_v49  ;;  %v10590_v26 = vunpack.i.l.bf16 %v13370_v49  ;;  %v2807_v35 = vsel %vm2780_vm8, %v2774_v37, %v10575_v8 }
 0x24a   : > { %v10626_v56 = vunpack.i.h.bf16 %v10624_v30  ;;  %v10625_v32 = vunpack.i.l.bf16 %v10624_v30 }
 0x24c   : > { %v2967_v61 = vsel %vm2944_vm12, %v2934_v0, %v10625_v32  ;;  %v2968_v21 = vsel %vm2944_vm12, %v2935_v25, %v10626_v56  ;;  %v13380_v50 = vpop.permute.xlu0 %10593 }
 0x24d   : > { %v13382_v20 = vpop.permute.xlu1 %10643  ;;  %v2988_v57 = vpack.c.bf16 %v2968_v21, %v2967_v61 }
 0x24e   : > { %v10646_v23 = vunpack.i.h.bf16 %v13382_v20 }
 0x24f   : > { %9792 = vmatmul.mubr.msk.bf16.gmra.mxu1 %vm3029_vm13, %v2988_v57  ;;  %v10596_v57 = vunpack.i.h.bf16 %v13380_v50 }
 0x250   : > { %v13385_v10 = vpop.permute.xlu0 %10598 }
 0x251   : > { %v13387_v13 = vpop.permute.xlu1 %10648  ;;  %v10601_v43 = vunpack.i.h.bf16 %v13385_v10  ;;  %v10600_v9 = vunpack.i.l.bf16 %v13385_v10 }
 0x254   : > { %v10629_v54 = vpop.permute.xlu0 %10628 }
 0x255   : > { %v13391_v62 = vpop.permute.xlu1 %10653  ;;  %v10631_v31 = vunpack.i.h.bf16 %v10629_v54  ;;  %v10630_v55 = vunpack.i.l.bf16 %v10629_v54  ;;  %v10595_v54 = vunpack.i.l.bf16 %v13380_v50  ;;  %v10580_v50 = vunpack.i.l.bf16 %v13315_v38 }
 0x256   : > { %v10645_v38 = vunpack.i.l.bf16 %v13382_v20 }
 0x257   : > { %v2806_v60 = vsel %vm2780_vm8, %v2773_v46, %v10631_v31  ;;  %v2805_v3 = vsel %vm2780_vm8, %v2772_v39, %v10630_v55  ;;  %v2808_v31 = vsel %vm2780_vm8, %v2775_v29, %v10576_v7  ;;  %v2839_v8 = vsel %vm857_vm0, %v2807_v35, %v10580_v50 }
 0x258   : > { %v10634_v40 = vpop.permute.xlu0 %10633  ;;  %v2840_v37 = vsel %vm857_vm0, %v2808_v31, %v10581_v28  ;;  %v10566_v50 = vunpack.i.h.bf16 %v13353_v34 }
 0x259   : > { %v10674_v48 = vpop.permute.xlu1 %10673  ;;  %v10636_v44 = vunpack.i.h.bf16 %v10634_v40  ;;  %v10635_v24 = vunpack.i.l.bf16 %v10634_v40  ;;  %v10586_v40 = vunpack.i.h.bf16 %v13319_v15 }
 0x25a   : > { %v10676_v61 = vunpack.i.h.bf16 %v10674_v48  ;;  %v10675_v21 = vunpack.i.l.bf16 %v10674_v48 }
 0x25b   : > { %v2837_v25 = vsel %vm857_vm0, %v2805_v3, %v10635_v24  ;;  %v2838_v45 = vsel %vm857_vm0, %v2806_v60, %v10636_v44 }
 0x25c   : > { %v10639_v30 = vpop.permute.xlu0 %10638  ;;  %v2745_v47 = vsel %vm1345_vm2, %v13138_v22, %v10675_v21  ;;  %v2746_v10 = vsel %vm1345_vm2, %v13140_v33, %v10676_v61  ;;  %v10585_v33 = vunpack.i.l.bf16 %v13319_v15 }
 0x25d   : > { %v10641_v56 = vunpack.i.h.bf16 %v10639_v30  ;;  %v10640_v32 = vunpack.i.l.bf16 %v10639_v30  ;;  %v10679_v0 = vpop.permute.xlu1 %10678 }
 0x25e   : > { %v10681_v36 = vunpack.i.h.bf16 %v10679_v0  ;;  %v10680_v4 = vunpack.i.l.bf16 %v10679_v0  ;;  %v10655_v0 = vunpack.i.l.bf16 %v13391_v62 }
 0x25f   : > { %v2870_v49 = vsel %vm2845_vm9, %v2837_v25, %v10640_v32  ;;  %v2871_v12 = vsel %vm2845_vm9, %v2838_v45, %v10641_v56  ;;  %v10656_v32 = vunpack.i.h.bf16 %v13391_v62  ;;  %v2872_v25 = vsel %vm2845_vm9, %v2839_v8, %v10585_v33 }
 0x260   : > { %v2903_v42 = vsel %vm2878_vm10, %v2870_v49, %v10590_v26  ;;  %v2904_v27 = vsel %vm2878_vm10, %v2871_v12, %v10591_v53  ;;  %v13425_v11 = vpop.permute.xlu0 %10658  ;;  %v2778_v24 = vsel %vm2747_vm7, %v2745_v47, %v10680_v4  ;;  %v2779_v39 = vsel %vm2747_vm7, %v2746_v10, %v10681_v36  ;;  %v1430_v47 = vld [vmem:[#allocation2 + $0x158] sm:$0xff] }
 0x261   : > { %v10684_v14 = vpop.permute.xlu1 %10683  ;;  %v2936_v55 = vsel %vm2911_vm11, %v2903_v42, %v10595_v54  ;;  %v2937_v48 = vsel %vm2911_vm11, %v2904_v27, %v10596_v57  ;;  %v10651_v53 = vunpack.i.h.bf16 %v13387_v13  ;;  %v10650_v26 = vunpack.i.l.bf16 %v13387_v13 }
 0x262   : > { %v2969_v44 = vsel %vm2944_vm12, %v2936_v55, %v10600_v9  ;;  %v2970_v22 = vsel %vm2944_vm12, %v2937_v48, %v10601_v43  ;;  %v10686_v29 = vunpack.i.h.bf16 %v10684_v14  ;;  %v10685_v20 = vunpack.i.l.bf16 %v10684_v14  ;;  %v1429_v14 = vld [vmem:[#allocation2 + $0x150] sm:$0xff] }
 0x263   : > { %v2989_v7 = vpack.c.bf16 %v2970_v22, %v2969_v44  ;;  %v2811_v15 = vsel %vm2780_vm8, %v2778_v24, %v10645_v38  ;;  %v2812_v3 = vsel %vm2780_vm8, %v2779_v39, %v10646_v23  ;;  %v2873_v45 = vsel %vm2845_vm9, %v2840_v37, %v10586_v40 }
 0x264   : > { %v13440_v41 = vpop.permute.xlu0 %10663  ;;  %v2906_v13 = vsel %vm2878_vm10, %v2873_v45, %v10686_v29  ;;  %v2905_v21 = vsel %vm2878_vm10, %v2872_v25, %v10685_v20  ;;  %v2843_v12 = vsel %vm857_vm0, %v2811_v15, %v10650_v26  ;;  %v2844_v43 = vsel %vm857_vm0, %v2812_v3, %v10651_v53 }
 0x265   : > { %v10689_v46 = vpop.permute.xlu1 %10688  ;;  %9795 = vmatprep.mubr.msk.bf16.mxu1 %vm3029_vm13, %v2989_v7  ;;  %v10565_v42 = vunpack.i.l.bf16 %v13353_v34  ;;  %v10571_v40 = vunpack.i.h.bf16 %v13363_v59  ;;  %v10570_v10 = vunpack.i.l.bf16 %v13363_v59  ;;  %v2876_v35 = vsel %vm2845_vm9, %v2843_v12, %v10655_v0 }
 0x266   : > { %v10691_v30 = vunpack.i.h.bf16 %v10689_v46  ;;  %v10690_v60 = vunpack.i.l.bf16 %v10689_v46  ;;  %v2877_v31 = vsel %vm2845_vm9, %v2844_v43, %v10656_v32  ;;  %v10071_v23 = vunpack.i.h.bf16 %v12682_v58 }
 0x267   : > { %v10070_v38 = vunpack.i.l.bf16 %v12682_v58  ;;  %v10076_v44 = vunpack.i.h.bf16 %v12688_v63  ;;  %v10075_v34 = vunpack.i.l.bf16 %v12688_v63  ;;  %v10081_v22 = vunpack.i.h.bf16 %v12694_v1  ;;  %v13493_v58 = vld [vmem:[%s16320_s28] ss:$0 sm:$0xff]  ;;  %s16280_s28 = smov 12  }
 0x268   : > { %v13454_v56 = vpop.permute.xlu0 %10668  ;;  %v2938_v9 = vsel %vm2911_vm11, %v2905_v21, %v10690_v60  ;;  %v2939_v62 = vsel %vm2911_vm11, %v2906_v13, %v10691_v30  ;;  %v10080_v33 = vunpack.i.l.bf16 %v12694_v1  ;;  %v2743_v59 = vsel %vm1345_vm2, %v1429_v14, %v10565_v42  ;;  %v13503_v30 = vld [vmem:[%s16321_s2] ss:$0 sm:$0xff]  ;;  %s16323_s2 = smov 4  }
 0x269   : > { %v10694_v61 = vpop.permute.xlu1 %10693  ;;  %v2744_v7 = vsel %vm1345_vm2, %v1430_v47, %v10566_v50  ;;  %v2909_v8 = vsel %vm2878_vm10, %v2876_v35, %v10070_v38  ;;  %v2910_v1 = vsel %vm2878_vm10, %v2877_v31, %v10071_v23  ;;  %v2776_v37 = vsel %vm2747_vm7, %v2743_v59, %v10570_v10 }
 0x26a   : > { %v10696_v57 = vunpack.i.h.bf16 %v10694_v61  ;;  %v10695_v54 = vunpack.i.l.bf16 %v10694_v61  ;;  %v13462_v49 = vpop.f32.mrf.mxu0  ;;  %v2777_v29 = vsel %vm2747_vm7, %v2744_v7, %v10571_v40  ;;  %v10661_v60 = vunpack.i.h.bf16 %v13425_v11 }
 0x26b   : > { %v10660_v15 = vunpack.i.l.bf16 %v13425_v11  ;;  %v10666_v3 = vunpack.i.h.bf16 %v13440_v41  ;;  %v10665_v0 = vunpack.i.l.bf16 %v13440_v41  ;;  %v2942_v13 = vsel %vm2911_vm11, %v2909_v8, %v10075_v34 }
 0x26c   : > { %v2971_v27 = vsel %vm2944_vm12, %v2938_v9, %v10695_v54  ;;  %v2972_v28 = vsel %vm2944_vm12, %v2939_v62, %v10696_v57  ;;  %v13471_v36 = vpop.f32.mrf.mxu0  ;;  %v10699_v4 = vpop.permute.xlu0 %10698  ;;  %v2943_v21 = vsel %vm2911_vm11, %v2910_v1, %v10076_v44  ;;  %v10670_v43 = vunpack.i.l.bf16 %v13454_v56 }
 0x26d   : > { %v2990_v48 = vpack.c.bf16 %v2972_v28, %v2971_v27  ;;  %v10701_v24 = vunpack.i.h.bf16 %v10699_v4  ;;  %v10700_v63 = vunpack.i.l.bf16 %v10699_v4  ;;  %v10671_v50 = vunpack.i.h.bf16 %v13454_v56 }
 0x26e   : > { %v13478_v55 = vpop.f32.mrf.mxu0  ;;  %v2975_v35 = vsel %vm2944_vm12, %v2942_v13, %v10080_v33  ;;  %v2976_v56 = vsel %vm2944_vm12, %v2943_v21, %v10081_v22 }
 0x26f   : > { %9796 = vmatmul.mubr.msk.bf16.gmra.mxu1 %vm3029_vm13, %v2990_v48  ;;  %v2810_v25 = vsel %vm2780_vm8, %v2777_v29, %v10701_v24  ;;  %v2809_v57 = vsel %vm2780_vm8, %v2776_v37, %v10700_v63 }
 0x270   : > { %v13488_v39 = vpop.f32.mrf.mxu0  ;;  %v10704_v46 = vpop.permute.xlu0 %10703 }
 0x271   : > { %v10706_v20 = vunpack.i.h.bf16 %v10704_v46  ;;  %v10705_v53 = vunpack.i.l.bf16 %v10704_v46 }
 0x272   : > { %v9809_v26 = vpop.f32.mrf.mxu0 }
 0x273   : > { %v3539_v32 = vmul.f32 %v9809_v26, %v13493_v58  ;;  %v2841_v9 = vsel %vm857_vm0, %v2809_v57, %v10705_v53  ;;  %v2842_v41 = vsel %vm857_vm0, %v2810_v25, %v10706_v20 }
 0x274   : > { %v3403_v45 = vpop.f32.mrf.mxu0  ;;  %v10709_v61 = vpop.permute.xlu0 %10708 }
 0x275   : > { %v3578_v54 = vadd.f32 %v13503_v30, %v3539_v32  ;;  %v3537_v11 = vmul.f32 %v13493_v58, %v3403_v45  ;;  %v10711_v12 = vunpack.i.h.bf16 %v10709_v61  ;;  %v10710_v62 = vunpack.i.l.bf16 %v10709_v61 }
 0x276   : > { %v9810_v42 = vpop.f32.mrf.mxu0 }
 0x277   : > { %v3610_v27 = vmax.f32 %v3578_v54, 0.0  ;;  %v3576_v28 = vadd.f32 %v13503_v30, %v3537_v11  ;;  %v2875_v4 = vsel %vm2845_vm9, %v2842_v41, %v10711_v12  ;;  %v3540_v14 = vmul.f32 %v9810_v42, %v13493_v58 }
 0x278   : > { %v2874_v40 = vsel %vm2845_vm9, %v2841_v9, %v10710_v62  ;;  %v2908_v47 = vsel %vm2878_vm10, %v2875_v4, %v10661_v60  ;;  %v3406_v10 = vpop.f32.mrf.mxu0  ;;  %v12002_v60 = vld [vmem:[%s16322_s8 + $0x10] ss:$0 sps:$4 sm:$0x33]   ;;  %vm5364_vm9 = vcmask 228352  }
 0x279   : > { %v3675_v31 = vrot.slane %v3610_v27, 7  ;;  %v3608_v48 = vmax.f32 %v3576_v28, 0.0  ;;  %v2907_v23 = vsel %vm2878_vm10, %v2874_v40, %v10660_v15  ;;  %v3579_v38 = vadd.f32 %v13503_v30, %v3540_v14  ;;  %9984 = vmatprep.subr.msk.bf16.mxu1 %vm5514_vm14, %v12002_v60 }
 0x27a   : > { %v3538_v44 = vmul.f32 %v13493_v58, %v3406_v10  ;;  %v2940_v34 = vsel %vm2911_vm11, %v2907_v23, %v10665_v0  ;;  %v2941_v59 = vsel %vm2911_vm11, %v2908_v47, %v10666_v3  ;;  %v9813_v24 = vpop.f32.mrf.mxu0  ;;  %v2992_v3 = vpack.c.bf16 %v2976_v56, %v2975_v35 }
 0x27b   : > { %v3769_v46 = vsel %vm1210_vm1, 0.0, %v3675_v31  ;;  %v3672_v7 = vrot.slane %v3608_v48, 7  ;;  %v3611_v63 = vmax.f32 %v3579_v38, 0.0  ;;  %v2973_v33 = vsel %vm2944_vm12, %v2940_v34, %v10670_v43 }
 0x27c   : > { %3808 = vst.msk [vmem:[#allocation3 + $0x30] sm:$0xff] %vm3800_vm4, %v3769_v46  ;;  %v3577_v8 = vadd.f32 %v13503_v30, %v3538_v44  ;;  %v2974_v1 = vsel %vm2944_vm12, %v2941_v59, %v10671_v50  ;;  %v3543_v37 = vmul.f32 %v9813_v24, %v13493_v58  ;;  %v3419_v29 = vpop.f32.mrf.mxu0  ;;  %v5516_v11 = vsel %vm5514_vm14, %v12002_v60, 0 }
 0x27d   : > { %v3768_v20 = vsel %vm1210_vm1, 0.0, %v3672_v7  ;;  %v3676_v53 = vrot.slane %v3611_v63, 7  ;;  %v2991_v22 = vpack.c.bf16 %v2974_v1, %v2973_v33  ;;  %v3541_v26 = vmul.f32 %v13493_v58, %v3419_v29  ;;  %9840 = vmatpush3.bf16.msra.mxu1 %v5516_v11 }
 0x27e   : > { %3805 = vst.msk [vmem:[#allocation3 + $0x18] sm:$0xff] %vm3800_vm4, %v3768_v20  ;;  %v3609_v15 = vmax.f32 %v3577_v8, 0.0  ;;  %v3582_v32 = vadd.f32 %v13503_v30, %v3543_v37  ;;  %v9814_v0 = vpop.f32.mrf.mxu0  ;;  %vm5465_vm10 = vcmask 293888  }
 0x27f   : > { %v3677_v25 = vsel %vm1210_vm1, %v3675_v31, %v3676_v53  ;;  %v3785_v45 = vsel %vm1210_vm1, %v3676_v53, 0.0  ;;  %9799 = vmatprep.mubr.msk.bf16.mxu1 %vm3029_vm13, %v2991_v22  ;;  %v3580_v61 = vadd.f32 %v13503_v30, %v3541_v26  ;;  %v3544_v13 = vmul.f32 %v9814_v0, %v13493_v58 }
 0x280   : > { %3809 = vst.msk [vmem:[#allocation3 + $0x38] sm:$0xff] %vm3800_vm4, %v3677_v25  ;;  %v3673_v21 = vrot.slane %v3609_v15, 7  ;;  %9800 = vmatmul.mubr.msk.bf16.gmra.mxu1 %vm3029_vm13, %v2992_v3  ;;  %v3614_v57 = vmax.f32 %v3582_v32, 0.0  ;;  %v3422_v54 = vpop.f32.mrf.mxu0 }
 0x281   : > { %3810 = vst.msk [vmem:[#allocation3 + $0x40] sm:$0x3] %vm3803_vm5, %v3785_v45  ;;  %v3612_v12 = vmax.f32 %v3580_v61, 0.0  ;;  %v3583_v43 = vadd.f32 %v13503_v30, %v3544_v13  ;;  %v3542_v9 = vmul.f32 %v13493_v58, %v3422_v54 }
 0x282   : > { %v3674_v41 = vsel %vm1210_vm1, %v3672_v7, %v3673_v21  ;;  %v3784_v62 = vsel %vm1210_vm1, %v3673_v21, 0.0  ;;  %v3681_v42 = vrot.slane %v3614_v57, 7  ;;  %v9817_v27 = vpop.f32.mrf.mxu0 }
 0x283   : > { %3806 = vst.msk [vmem:[#allocation3 + $0x20] sm:$0xff] %vm3800_vm4, %v3674_v41  ;;  %v3678_v28 = vrot.slane %v3612_v12, 7  ;;  %v3615_v4 = vmax.f32 %v3583_v43, 0.0  ;;  %v3581_v14 = vadd.f32 %v13503_v30, %v3542_v9  ;;  %v3547_v50 = vmul.f32 %v9817_v27, %v13493_v58  ;;  %v13571_v56 = vld [vmem:[#allocation3 + $0x30] sm:$0xff] }
 0x284   : > { %3807 = vst.msk [vmem:[#allocation3 + $0x28] sm:$0x3] %vm3803_vm5, %v3784_v62  ;;  %v3771_v40 = vsel %vm1210_vm1, 0.0, %v3681_v42  ;;  %v3435_v47 = vpop.f32.mrf.mxu0 }
 0x285   : > { %3814 = vst.msk [vmem:[#allocation3 + $0x60] sm:$0xff] %vm3800_vm4, %v3771_v40  ;;  %v3770_v10 = vsel %vm1210_vm1, 0.0, %v3678_v28  ;;  %v3682_v35 = vrot.slane %v3615_v4, 7  ;;  %v3613_v31 = vmax.f32 %v3581_v14, 0.0  ;;  %v3586_v48 = vadd.f32 %v13503_v30, %v3547_v50 }
 0x286   : > { %3811 = vst.msk [vmem:[#allocation3 + $0x48] sm:$0xff] %vm3800_vm4, %v3770_v10  ;;  %v3545_v23 = vmul.f32 %v13493_v58, %v3435_v47  ;;  %v9818_v38 = vpop.f32.mrf.mxu0 }
 0x287   : > { %v3683_v44 = vsel %vm1210_vm1, %v3681_v42, %v3682_v35  ;;  %v3787_v34 = vsel %vm1210_vm1, %v3682_v35, 0.0  ;;  %v3679_v59 = vrot.slane %v3613_v31, 7  ;;  %v13573_v24 = vld [vmem:[#allocation3 + $0x38] sm:$0xff]  ;;  %v3618_v46 = vmax.f32 %v3586_v48, 0.0 }
 0x288   : > { %3815 = vst.msk [vmem:[#allocation3 + $0x68] sm:$0xff] %vm3800_vm4, %v3683_v44  ;;  %v10727_v7 = vpack.i.bf16 %v13573_v24, %v13571_v56  ;;  %v3584_v63 = vadd.f32 %v13503_v30, %v3545_v23  ;;  %v3548_v33 = vmul.f32 %v9818_v38, %v13493_v58  ;;  %v3438_v8 = vpop.f32.mrf.mxu0  ;;  %v4082_v29 = vld [vmem:[#allocation3 + $0x31] sm:$0xff]  ;;  %v4083_v20 = vld [vmem:[#allocation3 + $0x39] sm:$0xff] }
 0x289   : > { %3816 = vst.msk [vmem:[#allocation3 + $0x70] sm:$0x3] %vm3803_vm5, %v3787_v34  ;;  %v3680_v1 = vsel %vm1210_vm1, %v3678_v28, %v3679_v59  ;;  %v3786_v37 = vsel %vm1210_vm1, %v3679_v59, 0.0  ;;  %v3687_v53 = vrot.slane %v3618_v46, 7  ;;  %v3546_v60 = vmul.f32 %v13493_v58, %v3438_v8  ;;  %v4114_v21 = vld [vmem:[#allocation3 + $0x32] sm:$0xff]  ;;  %v4115_v57 = vld [vmem:[#allocation3 + $0x3a] sm:$0xff] }
 0x28a   : > { %3812 = vst.msk [vmem:[#allocation3 + $0x50] sm:$0xff] %vm3800_vm4, %v3680_v1  ;;  %10728 = vrot.lane.b32.xlu0 %v10727_v7, %s16311_s6  ;;  %10713 = vrot.lane.b32.xlu1 %v10727_v7, %s16280_s28  ;;  %v3616_v22 = vmax.f32 %v3584_v63, 0.0  ;;  %v3587_v26 = vadd.f32 %v13503_v30, %v3548_v33  ;;  %v9821_v15 = vpop.f32.mrf.mxu0  ;;  %v10732_v0 = vpack.i.bf16 %v4083_v20, %v4082_v29  ;;  %v13611_v44 = vld [vmem:[#allocation3 + $0x20] sm:$0xff] }
 0x28b   : > { %3813 = vst.msk [vmem:[#allocation3 + $0x58] sm:$0x3] %vm3803_vm5, %v3786_v37  ;;  %v3773_v3 = vsel %vm1210_vm1, 0.0, %v3687_v53  ;;  %v3551_v32 = vmul.f32 %v9821_v15, %v13493_v58  ;;  %v3585_v61 = vadd.f32 %v13503_v30, %v3546_v60  ;;  %v10737_v28 = vpack.i.bf16 %v4115_v57, %v4114_v21  ;;  %v3890_v34 = vld [vmem:[#allocation3 + $0x19] sm:$0xff]  ;;  %v3891_v59 = vld [vmem:[#allocation3 + $0x21] sm:$0xff] }
 0x28c   : > { %3820 = vst.msk [vmem:[#allocation3 + $0x90] sm:$0xff] %vm3800_vm4, %v3773_v3  ;;  %v3684_v25 = vrot.slane %v3616_v22, 7  ;;  %v3619_v45 = vmax.f32 %v3587_v26, 0.0  ;;  %v3451_v13 = vpop.f32.mrf.mxu0  ;;  %v13621_v37 = vld [vmem:[#allocation3 + $0x18] sm:$0xff]  ;;  %v10752_v3 = vpack.i.bf16 %v3891_v59, %v3890_v34 }
 0x28d   : > { %v3590_v54 = vadd.f32 %v13503_v30, %v3551_v32  ;;  %v3549_v11 = vmul.f32 %v13493_v58, %v3451_v13  ;;  %v3617_v9 = vmax.f32 %v3585_v61, 0.0  ;;  %v12003_v60 = vld [vmem:[%s16322_s8 + $0x8] sm:$0xff]   ;;  %v10762_v15 = vpack.i.bf16 %v13611_v44, %v13621_v37 }
 0x28e   : > { %10733 = vrot.lane.b32.xlu0 %v10732_v0, %s16282_s4  ;;  %10718 = vrot.lane.b32.xlu1 %v10732_v0, %s16315_s26  ;;  %v3772_v12 = vsel %vm1210_vm1, 0.0, %v3684_v25  ;;  %v3688_v43 = vrot.slane %v3619_v45, 7  ;;  %v9822_v41 = vpop.f32.mrf.mxu0  ;;  %v3922_v57 = vld [vmem:[#allocation3 + $0x1a] sm:$0xff] }
 0x28f   : > { %3817 = vst.msk [vmem:[#allocation3 + $0x78] sm:$0xff] %vm3800_vm4, %v3772_v12  ;;  %v3622_v62 = vmax.f32 %v3590_v54, 0.0  ;;  %v3588_v42 = vadd.f32 %v13503_v30, %v3549_v11  ;;  %v3552_v27 = vmul.f32 %v9822_v41, %v13493_v58  ;;  %v3685_v40 = vrot.slane %v3617_v9, 7  ;;  %9841 = vmatprep.subr.bf16.mxu1 %v12003_v60  ;;  %v3923_v54 = vld [vmem:[#allocation3 + $0x22] sm:$0xff] }
 0x290   : > { %v3689_v4 = vsel %vm1210_vm1, %v3687_v53, %v3688_v43  ;;  %v3789_v14 = vsel %vm1210_vm1, %v3688_v43, 0.0  ;;  %v3454_v50 = vpop.f32.mrf.mxu0  ;;  %9842 = vmatpush3.bf16.msra.mxu1 %v12003_v60  ;;  %v3991_v59 = vld [vmem:[#allocation3 + $0x61] sm:$0xff] }
 0x291   : > { %3821 = vst.msk [vmem:[#allocation3 + $0x98] sm:$0xff] %vm3800_vm4, %v3689_v4  ;;  %v3693_v47 = vrot.slane %v3622_v62, 7  ;;  %v3620_v10 = vmax.f32 %v3588_v42, 0.0  ;;  %v3591_v35 = vadd.f32 %v13503_v30, %v3552_v27  ;;  %v3686_v48 = vsel %vm1210_vm1, %v3684_v25, %v3685_v40  ;;  %v3960_v4 = vld [vmem:[#allocation3 + $0x68] sm:$0xff] }
 0x292   : > { %3822 = vst.msk [vmem:[#allocation3 + $0xa0] sm:$0x3] %vm3803_vm5, %v3789_v14  ;;  %10738 = vrot.lane.b32.xlu0 %v10737_v28, %s16318_s0  ;;  %10723 = vrot.lane.b32.xlu1 %v10737_v28, %s16284_s5  ;;  %v9825_v31 = vpop.f32.mrf.mxu0  ;;  %v3788_v23 = vsel %vm1210_vm1, %v3685_v40, 0.0  ;;  %v3550_v63 = vmul.f32 %v13493_v58, %v3454_v50  ;;  %v10757_v27 = vpack.i.bf16 %v3923_v54, %v3922_v57 }
 0x293   : > { %v3775_v38 = vsel %vm1210_vm1, 0.0, %v3693_v47  ;;  %3818 = vst.msk [vmem:[#allocation3 + $0x80] sm:$0xff] %vm3800_vm4, %v3686_v48  ;;  %v3690_v46 = vrot.slane %v3620_v10, 7  ;;  %v3623_v7 = vmax.f32 %v3591_v35, 0.0  ;;  %v3555_v33 = vmul.f32 %v9825_v31, %v13493_v58 }
 0x294   : > { %3819 = vst.msk [vmem:[#allocation3 + $0x88] sm:$0x3] %vm3803_vm5, %v3788_v23  ;;  %v3467_v8 = vpop.f32.mrf.mxu0  ;;  %v3589_v53 = vadd.f32 %v13503_v30, %v3550_v63 }
 0x295   : > { %3826 = vst.msk [vmem:[#allocation3 + $0xc0] sm:$0xff] %vm3800_vm4, %v3775_v38  ;;  %v3553_v1 = vmul.f32 %v13493_v58, %v3467_v8  ;;  %v3774_v29 = vsel %vm1210_vm1, 0.0, %v3690_v46  ;;  %v3694_v20 = vrot.slane %v3623_v7, 7  ;;  %v3594_v22 = vadd.f32 %v13503_v30, %v3555_v33 }
 0x296   : > { %10748 = vrot.lane.b32.xlu0 %v10737_v28, %s16314_s24  ;;  %10743 = vrot.lane.b32.xlu1 %v10732_v0, %s16323_s2  ;;  %v9826_v26 = vpop.f32.mrf.mxu0  ;;  %3823 = vst.msk [vmem:[#allocation3 + $0xa8] sm:$0xff] %vm3800_vm4, %v3774_v29  ;;  %v3621_v61 = vmax.f32 %v3589_v53, 0.0  ;;  %v3959_v28 = vld [vmem:[#allocation3 + $0x60] sm:$0xff] }
 0x297   : > { %v3592_v32 = vadd.f32 %v13503_v30, %v3553_v1  ;;  %v3556_v0 = vmul.f32 %v9826_v26, %v13493_v58  ;;  %v3695_v25 = vsel %vm1210_vm1, %v3693_v47, %v3694_v20  ;;  %v3791_v45 = vsel %vm1210_vm1, %v3694_v20, 0.0 }
 0x298   : > { %v3626_v13 = vmax.f32 %v3594_v22, 0.0  ;;  %v3470_v21 = vpop.f32.mrf.mxu0  ;;  %3827 = vst.msk [vmem:[#allocation3 + $0xc8] sm:$0xff] %vm3800_vm4, %v3695_v25  ;;  %v3691_v43 = vrot.slane %v3621_v61, 7  ;;  %v10777_v38 = vpack.i.bf16 %v3960_v4, %v3959_v28  ;;  %v4023_v61 = vld [vmem:[#allocation3 + $0x62] sm:$0xff] }
 0x299   : > { %3828 = vst.msk [vmem:[#allocation3 + $0xd0] sm:$0x3] %vm3803_vm5, %v3791_v45  ;;  %v3624_v11 = vmax.f32 %v3592_v32, 0.0  ;;  %v3595_v12 = vadd.f32 %v13503_v30, %v3556_v0  ;;  %v3554_v41 = vmul.f32 %v13493_v58, %v3470_v21 }
 0x29a   : > { %10763 = vrot.lane.b32.xlu0 %v10762_v15, %s16280_s28  ;;  %10753 = vrot.lane.b32.xlu1 %v10752_v3, %s16323_s2  ;;  %v3699_v9 = vrot.slane %v3626_v13, 7  ;;  %v3692_v14 = vsel %vm1210_vm1, %v3690_v46, %v3691_v43  ;;  %v3790_v50 = vsel %vm1210_vm1, %v3691_v43, 0.0  ;;  %v3992_v46 = vld [vmem:[#allocation3 + $0x69] sm:$0xff] }
 0x29b   : > { %v3696_v62 = vrot.slane %v3624_v11, 7  ;;  %v3627_v42 = vmax.f32 %v3595_v12, 0.0  ;;  %v9829_v40 = vpop.f32.mrf.mxu0  ;;  %3824 = vst.msk [vmem:[#allocation3 + $0xb0] sm:$0xff] %vm3800_vm4, %v3692_v14  ;;  %v3593_v31 = vadd.f32 %v13503_v30, %v3554_v41  ;;  %v10782_v22 = vpack.i.bf16 %v3992_v46, %v3991_v59  ;;  %v12004_v15 = vld [vmem:[%s16322_s8] sm:$0xff]  }
 0x29c   : > { %3825 = vst.msk [vmem:[#allocation3 + $0xb8] sm:$0x3] %vm3803_vm5, %v3790_v50  ;;  %v3777_v47 = vsel %vm1210_vm1, 0.0, %v3699_v9  ;;  %v3559_v48 = vmul.f32 %v9829_v40, %v13493_v58  ;;  %v4024_v13 = vld [vmem:[#allocation3 + $0x6a] sm:$0xff]  ;;  %9843 = vmatprep.subr.bf16.mxu1 %v12004_v15 }
 0x29d   : > { %3832 = vst.msk [vmem:[#allocation3 + $0xf0] sm:$0xff] %vm3800_vm4, %v3777_v47  ;;  %v3776_v10 = vsel %vm1210_vm1, 0.0, %v3696_v62  ;;  %v3700_v35 = vrot.slane %v3627_v42, 7  ;;  %v3483_v23 = vpop.f32.mrf.mxu0  ;;  %v3625_v33 = vmax.f32 %v3593_v31, 0.0  ;;  %9844 = vmatpush3.bf16.msra.mxu1 %v12004_v15  ;;  %v10787_v41 = vpack.i.bf16 %v4024_v13, %v4023_v61  ;;  %v4053_v59 = vld [vmem:[#allocation3 + $0x50] sm:$0xff] }
 0x29e   : > { %10768 = vrot.lane.b32.xlu0 %v10752_v3, %s16315_s26  ;;  %10758 = vrot.lane.b32.xlu1 %v10757_v27, %s16314_s24  ;;  %3829 = vst.msk [vmem:[#allocation3 + $0xd8] sm:$0xff] %vm3800_vm4, %v3776_v10  ;;  %v3557_v34 = vmul.f32 %v13493_v58, %v3483_v23  ;;  %v3598_v8 = vadd.f32 %v13503_v30, %v3559_v48 }
 0x29f   : > { %v3701_v7 = vsel %vm1210_vm1, %v3699_v9, %v3700_v35  ;;  %v3793_v63 = vsel %vm1210_vm1, %v3700_v35, 0.0  ;;  %v9830_v1 = vpop.f32.mrf.mxu0  ;;  %v3697_v29 = vrot.slane %v3625_v33, 7  ;;  %9922 = vmatprep.subr.mxu1 %v16278_v16 }
 0x2a0   : > { %3833 = vst.msk [vmem:[#allocation3 + $0xf8] sm:$0xff] %vm3800_vm4, %v3701_v7  ;;  %v3630_v20 = vmax.f32 %v3598_v8, 0.0  ;;  %v3596_v26 = vadd.f32 %v13503_v30, %v3557_v34  ;;  %v3560_v60 = vmul.f32 %v9830_v1, %v13493_v58  ;;  %v4052_v34 = vld [vmem:[#allocation3 + $0x48] sm:$0xff] }
 0x2a1   : > { %3834 = vst.msk [vmem:[#allocation3 + $0x100] sm:$0x3] %vm3803_vm5, %v3793_v63  ;;  %v3486_v53 = vpop.f32.mrf.mxu0  ;;  %v3698_v3 = vsel %vm1210_vm1, %v3696_v62, %v3697_v29  ;;  %v3792_v32 = vsel %vm1210_vm1, %v3697_v29, 0.0 }
 0x2a2   : > { %10773 = vrot.lane.b32.xlu0 %v10757_v27, %s16284_s5  ;;  %10778 = vrot.lane.b32.xlu1 %v10777_v38, %s16280_s28  ;;  %v3705_v0 = vrot.slane %v3630_v20, 7  ;;  %v3558_v25 = vmul.f32 %v13493_v58, %v3486_v53  ;;  %3830 = vst.msk [vmem:[#allocation3 + $0xe0] sm:$0xff] %vm3800_vm4, %v3698_v3  ;;  %v3628_v21 = vmax.f32 %v3596_v26, 0.0  ;;  %v3599_v54 = vadd.f32 %v13503_v30, %v3560_v60  ;;  %v4116_v53 = vld [vmem:[#allocation3 + $0x4a] sm:$0xff]  ;;  %v4117_v26 = vld [vmem:[#allocation3 + $0x52] sm:$0xff] }
 0x2a3   : > { %v9833_v45 = vpop.f32.mrf.mxu0  ;;  %3831 = vst.msk [vmem:[#allocation3 + $0xe8] sm:$0x3] %vm3803_vm5, %v3792_v32  ;;  %v10817_v20 = vpack.i.bf16 %v4053_v59, %v4052_v34  ;;  %v4084_v3 = vld [vmem:[#allocation3 + $0x49] sm:$0xff]  ;;  %v4085_v32 = vld [vmem:[#allocation3 + $0x51] sm:$0xff]  ;;  %v4088_v59 = vld [vmem:[#allocation3 + $0x79] sm:$0xff] }
 0x2a4   : > { %v3779_v57 = vsel %vm1210_vm1, 0.0, %v3705_v0  ;;  %v3597_v11 = vadd.f32 %v13503_v30, %v3558_v25  ;;  %v3702_v12 = vrot.slane %v3628_v21, 7  ;;  %v3563_v43 = vmul.f32 %v9833_v45, %v13493_v58  ;;  %v4121_v34 = vld [vmem:[#allocation3 + $0x82] sm:$0xff] }
 0x2a5   : > { %3838 = vst.msk [vmem:[#allocation3 + $0x120] sm:$0xff] %vm3800_vm4, %v3779_v57  ;;  %v3499_v9 = vpop.f32.mrf.mxu0  ;;  %v3631_v62 = vmax.f32 %v3599_v54, 0.0  ;;  %v10827_v45 = vpack.i.bf16 %v4117_v26, %v4116_v53  ;;  %v10822_v61 = vpack.i.bf16 %v4085_v32, %v4084_v3 }
 0x2a6   : > { %10793 = vrot.lane.b32.xlu0 %v10777_v38, %s16311_s6  ;;  %10783 = vrot.lane.b32.xlu1 %v10782_v22, %s16315_s26  ;;  %v3629_v42 = vmax.f32 %v3597_v11, 0.0  ;;  %v3561_v27 = vmul.f32 %v13493_v58, %v3499_v9  ;;  %v3778_v28 = vsel %vm1210_vm1, 0.0, %v3702_v12  ;;  %v3602_v4 = vadd.f32 %v13503_v30, %v3563_v43  ;;  %v3964_v43 = vld [vmem:[#allocation3 + $0x98] sm:$0xff] }
 0x2a7   : > { %v9834_v14 = vpop.f32.mrf.mxu0  ;;  %3835 = vst.msk [vmem:[#allocation3 + $0x108] sm:$0xff] %vm3800_vm4, %v3778_v28  ;;  %v3706_v50 = vrot.slane %v3631_v62, 7  ;;  %v3996_v62 = vld [vmem:[#allocation3 + $0x99] sm:$0xff] }
 0x2a8   : > { %v3703_v40 = vrot.slane %v3629_v42, 7  ;;  %v3600_v47 = vadd.f32 %v13503_v30, %v3561_v27  ;;  %v3634_v10 = vmax.f32 %v3602_v4, 0.0  ;;  %v3564_v35 = vmul.f32 %v9834_v14, %v13493_v58  ;;  %v4027_v27 = vld [vmem:[#allocation3 + $0x92] sm:$0xff]  ;;  %v4028_v28 = vld [vmem:[#allocation3 + $0x9a] sm:$0xff] }
 0x2a9   : > { %v3707_v31 = vsel %vm1210_vm1, %v3705_v0, %v3706_v50  ;;  %v3795_v48 = vsel %vm1210_vm1, %v3706_v50, 0.0  ;;  %v3502_v63 = vpop.f32.mrf.mxu0  ;;  %v10867_v4 = vpack.i.bf16 %v4028_v28, %v4027_v27  ;;  %v4060_v27 = vld [vmem:[#allocation3 + $0xa8] sm:$0xff]  ;;  %v4061_v28 = vld [vmem:[#allocation3 + $0xb0] sm:$0xff] }
 0x2aa   : > { %10798 = vrot.lane.b32.xlu0 %v10782_v22, %s16282_s4  ;;  %10788 = vrot.lane.b32.xlu1 %v10787_v41, %s16284_s5  ;;  %v3704_v23 = vsel %vm1210_vm1, %v3702_v12, %v3703_v40  ;;  %v3794_v38 = vsel %vm1210_vm1, %v3703_v40, 0.0  ;;  %3839 = vst.msk [vmem:[#allocation3 + $0x128] sm:$0xff] %vm3800_vm4, %v3707_v31  ;;  %v3711_v46 = vrot.slane %v3634_v10, 7  ;;  %v3632_v7 = vmax.f32 %v3600_v47, 0.0  ;;  %v3963_v12 = vld [vmem:[#allocation3 + $0x90] sm:$0xff]  ;;  %v4056_v40 = vld [vmem:[#allocation3 + $0x78] sm:$0xff] }
 0x2ab   : > { %3840 = vst.msk [vmem:[#allocation3 + $0x130] sm:$0x3] %vm3803_vm5, %v3795_v48  ;;  %3837 = vst.msk [vmem:[#allocation3 + $0x118] sm:$0x3] %vm3803_vm5, %v3794_v38  ;;  %v3603_v33 = vadd.f32 %v13503_v30, %v3564_v35  ;;  %v3562_v8 = vmul.f32 %v13493_v58, %v3502_v63  ;;  %v10857_v9 = vpack.i.bf16 %v3964_v43, %v3963_v12  ;;  %v9837_v14 = vpop.f32.mrf.mxu0  ;;  %v4057_v47 = vld [vmem:[#allocation3 + $0x80] sm:$0xff]  ;;  %v4000_v43 = vld [vmem:[#allocation3 + $0xc9] sm:$0xff] }
 0x2ac   : > { %3836 = vst.msk [vmem:[#allocation3 + $0x110] sm:$0xff] %vm3800_vm4, %v3704_v23  ;;  %v3781_v1 = vsel %vm1210_vm1, 0.0, %v3711_v46  ;;  %v3708_v29 = vrot.slane %v3632_v7, 7  ;;  %v3567_v50 = vmul.f32 %v9837_v14, %v13493_v58  ;;  %v4120_v48 = vld [vmem:[#allocation3 + $0x7a] sm:$0xff]  ;;  %v10897_v38 = vpack.i.bf16 %v4057_v47, %v4056_v40  ;;  %v4124_v14 = vld [vmem:[#allocation3 + $0xaa] sm:$0xff] }
 0x2ad   : > { %3844 = vst.msk [vmem:[#allocation3 + $0x150] sm:$0xff] %vm3800_vm4, %v3781_v1  ;;  %v3635_v60 = vmax.f32 %v3603_v33, 0.0  ;;  %v3601_v15 = vadd.f32 %v13503_v30, %v3562_v8  ;;  %v3515_v10 = vpop.f32.mrf.mxu0  ;;  %v10907_v26 = vpack.i.bf16 %v4121_v34, %v4120_v48  ;;  %v3999_v12 = vld [vmem:[#allocation3 + $0xc1] sm:$0xff]  ;;  %v4092_v40 = vld [vmem:[#allocation3 + $0xa9] sm:$0xff]  ;;  %v4093_v47 = vld [vmem:[#allocation3 + $0xb1] sm:$0xff] }
 0x2ae   : > { %10803 = vrot.lane.b32.xlu0 %v10787_v41, %s16318_s0  ;;  %10808 = vrot.lane.b32.xlu1 %v10782_v22, %s16323_s2  ;;  %v3780_v0 = vsel %vm1210_vm1, 0.0, %v3708_v29  ;;  %v3606_v35 = vadd.f32 %v13503_v30, %v3567_v50  ;;  %v3565_v31 = vmul.f32 %v13493_v58, %v3515_v10  ;;  %v4125_v50 = vld [vmem:[#allocation3 + $0xb2] sm:$0xff] }
 0x2af   : > { %3841 = vst.msk [vmem:[#allocation3 + $0x138] sm:$0xff] %vm3800_vm4, %v3780_v0  ;;  %v3712_v22 = vrot.slane %v3635_v60, 7  ;;  %v3633_v25 = vmax.f32 %v3601_v15, 0.0  ;;  %v9838_v23 = vpop.f32.mrf.mxu0  ;;  %v10987_v10 = vpack.i.bf16 %v4125_v50, %v4124_v14  ;;  %v13777_v34 = vld [vmem:[#allocation3 + $0x199] sm:$0xff] }
 0x2b0   : > { %v3638_v7 = vmax.f32 %v3606_v35, 0.0  ;;  %v3604_v63 = vadd.f32 %v13503_v30, %v3565_v31  ;;  %v3568_v33 = vmul.f32 %v9838_v23, %v13493_v58  ;;  %v10982_v35 = vpack.i.bf16 %v4093_v47, %v4092_v40  ;;  %v3971_v23 = vld [vmem:[#allocation3 + $0xf0] sm:$0xff] }
 0x2b1   : > { %v3713_v13 = vsel %vm1210_vm1, %v3711_v46, %v3712_v22  ;;  %v3797_v21 = vsel %vm1210_vm1, %v3712_v22, 0.0  ;;  %v3709_v57 = vrot.slane %v3633_v25, 7  ;;  %v4089_v46 = vld [vmem:[#allocation3 + $0x81] sm:$0xff]  ;;  %v3518_v8 = vpop.f32.mrf.mxu0 }
 0x2b2   : > { %10813 = vrot.lane.b32.xlu0 %v10787_v41, %s16314_s24  ;;  %10818 = vrot.lane.b32.xlu1 %v10817_v20, %s16311_s6  ;;  %3845 = vst.msk [vmem:[#allocation3 + $0x158] sm:$0xff] %vm3800_vm4, %v3713_v13  ;;  %v3995_v41 = vld [vmem:[#allocation3 + $0x91] sm:$0xff]  ;;  %v3717_v1 = vrot.slane %v3638_v7, 7  ;;  %v3566_v53 = vmul.f32 %v13493_v58, %v3518_v8  ;;  %v10902_v60 = vpack.i.bf16 %v4089_v46, %v4088_v59  ;;  %v13779_v59 = vld [vmem:[#allocation3 + $0x1a1] sm:$0xff] }
 0x2b3   : > { %3846 = vst.msk [vmem:[#allocation3 + $0x160] sm:$0x3] %vm3803_vm5, %v3797_v21  ;;  %v3710_v54 = vsel %vm1210_vm1, %v3708_v29, %v3709_v57  ;;  %v3796_v11 = vsel %vm1210_vm1, %v3709_v57, 0.0  ;;  %v10862_v42 = vpack.i.bf16 %v3996_v62, %v3995_v41  ;;  %v3636_v29 = vmax.f32 %v3604_v63, 0.0  ;;  %v3967_v57 = vld [vmem:[#allocation3 + $0xc0] sm:$0xff]  ;;  %v4032_v62 = vld [vmem:[#allocation3 + $0xca] sm:$0xff] }
 0x2b4   : > { %3842 = vst.msk [vmem:[#allocation3 + $0x140] sm:$0xff] %vm3800_vm4, %v3710_v54  ;;  %v3783_v15 = vsel %vm1210_vm1, 0.0, %v3717_v1  ;;  %v3605_v0 = vadd.f32 %v13503_v30, %v3566_v53  ;;  %v3968_v54 = vld [vmem:[#allocation3 + $0xc8] sm:$0xff]  ;;  %v11307_v46 = vpack.i.bf16 %v13779_v59, %v13777_v34  ;;  %v4003_v8 = vld [vmem:[#allocation3 + $0xf1] sm:$0xff] }
 0x2b5   : > { %3843 = vst.msk [vmem:[#allocation3 + $0x148] sm:$0x3] %vm3803_vm5, %v3796_v11  ;;  %v3714_v3 = vrot.slane %v3636_v29, 7  ;;  %v10937_v11 = vpack.i.bf16 %v3968_v54, %v3967_v57  ;;  %v4031_v41 = vld [vmem:[#allocation3 + $0xc2] sm:$0xff] }
 0x2b6   : > { %10828 = vrot.lane.b32.xlu0 %v10827_v45, %s16318_s0  ;;  %10823 = vrot.lane.b32.xlu1 %v10822_v61, %s16282_s4  ;;  %3850 = vst.msk [vmem:[#allocation3 + $0x180] sm:$0xff] %vm3800_vm4, %v3783_v15  ;;  %v4035_v15 = vld [vmem:[#allocation3 + $0xf2] sm:$0xff] }
 0x2b7   : > { %v3782_v22 = vsel %vm1210_vm1, 0.0, %v3714_v3 }
 0x2b8   : > { %3847 = vst.msk [vmem:[#allocation3 + $0x168] sm:$0xff] %vm3800_vm4, %v3782_v22 }
 0x2ba   : > { %10843 = vrot.lane.b32.xlu0 %v10817_v20, %s16280_s28  ;;  %10833 = vrot.lane.b32.xlu1 %v10822_v61, %s16323_s2  ;;  %v3607_v20 = vadd.f32 %v13503_v30, %v3568_v33 }
 0x2bc   : > { %v3639_v32 = vmax.f32 %v3607_v20, 0.0 }
 0x2be   : > { %10848 = vrot.lane.b32.xlu0 %v10822_v61, %s16315_s26  ;;  %10838 = vrot.lane.b32.xlu1 %v10827_v45, %s16314_s24  ;;  %v3718_v25 = vrot.slane %v3639_v32, 7 }
 0x2c0   : > { %v3719_v58 = vsel %vm1210_vm1, %v3717_v1, %v3718_v25  ;;  %v3799_v61 = vsel %vm1210_vm1, %v3718_v25, 0.0  ;;  %v4004_v1 = vld [vmem:[#allocation3 + $0xf9] sm:$0xff] }
 0x2c1   : > { %3851 = vst.msk [vmem:[#allocation3 + $0x188] sm:$0xff] %vm3800_vm4, %v3719_v58  ;;  %v11022_v53 = vpack.i.bf16 %v4004_v1, %v4003_v8  ;;  %v4064_v58 = vld [vmem:[#allocation3 + $0xd8] sm:$0xff] }
 0x2c2   : > { %10853 = vrot.lane.b32.xlu0 %v10827_v45, %s16284_s5  ;;  %10858 = vrot.lane.b32.xlu1 %v10857_v9, %s16280_s28  ;;  %v3637_v45 = vmax.f32 %v3605_v0, 0.0  ;;  %3852 = vst.msk [vmem:[#allocation3 + $0x190] sm:$0x3] %vm3803_vm5, %v3799_v61  ;;  %v4065_v61 = vld [vmem:[#allocation3 + $0xe0] sm:$0xff] }
 0x2c4   : > { %v3715_v13 = vrot.slane %v3637_v45, 7  ;;  %v10086_v45 = vunpack.i.h.bf16 %v12696_v2 }
 0x2c6   : > { %10873 = vrot.lane.b32.xlu0 %v10857_v9, %s16311_s6  ;;  %10863 = vrot.lane.b32.xlu1 %v10862_v42, %s16315_s26  ;;  %v3716_v30 = vsel %vm1210_vm1, %v3714_v3, %v3715_v13  ;;  %v3798_v21 = vsel %vm1210_vm1, %v3715_v13, 0.0  ;;  %v10942_v9 = vpack.i.bf16 %v4000_v43, %v3999_v12  ;;  %v4036_v3 = vld [vmem:[#allocation3 + $0xfa] sm:$0xff]  ;;  %v10090_v13 = vunpack.i.l.bf16 %v12704_v6 }
 0x2c7   : > { %3848 = vst.msk [vmem:[#allocation3 + $0x170] sm:$0xff] %vm3800_vm4, %v3716_v30  ;;  %v11027_v25 = vpack.i.bf16 %v4036_v3, %v4035_v15  ;;  %v4128_v12 = vld [vmem:[#allocation3 + $0xda] sm:$0xff] }
 0x2c8   : > { %3849 = vst.msk [vmem:[#allocation3 + $0x178] sm:$0x3] %vm3803_vm5, %v3798_v21  ;;  %v10091_v21 = vunpack.i.h.bf16 %v12704_v6 }
 0x2ca   : > { %10878 = vrot.lane.b32.xlu0 %v10862_v42, %s16282_s4  ;;  %10868 = vrot.lane.b32.xlu1 %v10867_v4, %s16284_s5 }
 0x2ce   : > { %10883 = vrot.lane.b32.xlu0 %v10867_v4, %s16318_s0  ;;  %10888 = vrot.lane.b32.xlu1 %v10862_v42, %s16323_s2  ;;  %v10947_v42 = vpack.i.bf16 %v4032_v62, %v4031_v41  ;;  %v4129_v41 = vld [vmem:[#allocation3 + $0xe2] sm:$0xff]  ;;  %v4096_v62 = vld [vmem:[#allocation3 + $0xd9] sm:$0xff] }
 0x2d2   : > { %10893 = vrot.lane.b32.xlu0 %v10867_v4, %s16314_s24  ;;  %10898 = vrot.lane.b32.xlu1 %v10897_v38, %s16311_s6  ;;  %v10977_v4 = vpack.i.bf16 %v4061_v28, %v4060_v27 }
 0x2d6   : > { %10908 = vrot.lane.b32.xlu0 %v10907_v26, %s16318_s0  ;;  %10903 = vrot.lane.b32.xlu1 %v10902_v60, %s16282_s4 }
 0x2da   : > { %10923 = vrot.lane.b32.xlu0 %v10897_v38, %s16280_s28  ;;  %10913 = vrot.lane.b32.xlu1 %v10902_v60, %s16323_s2  ;;  %v3972_v38 = vld [vmem:[#allocation3 + $0xf8] sm:$0xff] }
 0x2db   : > { %v11017_v33 = vpack.i.bf16 %v3972_v38, %v3971_v23 }
 0x2de   : > { %10928 = vrot.lane.b32.xlu0 %v10902_v60, %s16315_s26  ;;  %10918 = vrot.lane.b32.xlu1 %v10907_v26, %s16314_s24  ;;  %v13795_v60 = vld [vmem:[#allocation3 + $0x1a2] sm:$0xff] }
 0x2df   : > { %6002 = vst.msk [vmem:[#allocation3 + $0x1a8] sm:$0x3] %vm3803_vm5, %v12372_v19 }
 0x2e2   : > { %10933 = vrot.lane.b32.xlu0 %v10907_v26, %s16284_s5  ;;  %10938 = vrot.lane.b32.xlu1 %v10937_v11, %s16280_s28  ;;  %v13793_v26 = vld [vmem:[#allocation3 + $0x19a] sm:$0xff] }
 0x2e3   : > { %6000 = vst.msk [vmem:[#allocation3 + $0x198] sm:$0xff] %vm3800_vm4, %v12368_v18  ;;  %6001 = vst.msk [vmem:[#allocation3 + $0x1a0] sm:$0xff] %vm3800_vm4, %v12364_v17  ;;  %v11332_v32 = vpack.i.bf16 %v13795_v60, %v13793_v26  ;;  %v10085_v18 = vunpack.i.l.bf16 %v12696_v2  ;;  %v5171_v2 = vsel %vm3800_vm4, %v12430_v52, %v10086_v45  ;;  %v11067_v52 = vpack.i.bf16 %v4129_v41, %v4128_v12  ;;  %v3976_v41 = vld [vmem:[#allocation3 + $0x128] sm:$0xff] }
 0x2e4   : > { %v5203_v6 = vsel %vm1345_vm2, %v5171_v2, %v10091_v21 }
 0x2e5   : > { %v5170_v30 = vsel %vm3800_vm4, %v12428_v51, %v10085_v18 }
 0x2e6   : > { %10953 = vrot.lane.b32.xlu0 %v10937_v11, %s16311_s6  ;;  %10943 = vrot.lane.b32.xlu1 %v10942_v9, %s16315_s26  ;;  %v11057_v11 = vpack.i.bf16 %v4065_v61, %v4064_v58  ;;  %v5202_v51 = vsel %vm1345_vm2, %v5170_v30, %v10090_v13 }
 0x2ea   : > { %10958 = vrot.lane.b32.xlu0 %v10942_v9, %s16282_s4  ;;  %10948 = vrot.lane.b32.xlu1 %v10947_v42, %s16284_s5  ;;  %v6226_v34 = vld [vmem:[#allocation3 + $0x1a0] sm:$0xff] }
 0x2ee   : > { %10963 = vrot.lane.b32.xlu0 %v10947_v42, %s16318_s0  ;;  %10968 = vrot.lane.b32.xlu1 %v10942_v9, %s16323_s2 }
 0x2f2   : > { %10973 = vrot.lane.b32.xlu0 %v10947_v42, %s16314_s24  ;;  %10978 = vrot.lane.b32.xlu1 %v10977_v4, %s16311_s6  ;;  %v4097_v42 = vld [vmem:[#allocation3 + $0xe1] sm:$0xff] }
 0x2f3   : > { %v11062_v50 = vpack.i.bf16 %v4097_v42, %v4096_v62 }
 0x2f6   : > { %10988 = vrot.lane.b32.xlu0 %v10987_v10, %s16318_s0  ;;  %10983 = vrot.lane.b32.xlu1 %v10982_v35, %s16282_s4 }
 0x2fa   : > { %11003 = vrot.lane.b32.xlu0 %v10977_v4, %s16280_s28  ;;  %10993 = vrot.lane.b32.xlu1 %v10982_v35, %s16323_s2 }
 0x2fc   : > { %v13771_v31 = vpop.permute.xlu0 %10728  ;;  %v13773_v48 = vpop.permute.xlu1 %10713 }
 0x2fd   : > { %v10731_v23 = vunpack.i.h.bf16 %v13771_v31  ;;  %v10730_v38 = vunpack.i.l.bf16 %v13771_v31 }
 0x2fe   : > { %11008 = vrot.lane.b32.xlu0 %v10982_v35, %s16315_s26  ;;  %10998 = vrot.lane.b32.xlu1 %v10987_v10, %s16314_s24 }
 0x300   : > { %v13783_v7 = vpop.permute.xlu0 %10733  ;;  %v13785_v63 = vpop.permute.xlu1 %10718 }
 0x301   : > { %v10736_v15 = vunpack.i.h.bf16 %v13783_v7  ;;  %v10735_v3 = vunpack.i.l.bf16 %v13783_v7 }
 0x302   : > { %11013 = vrot.lane.b32.xlu0 %v10987_v10, %s16284_s5  ;;  %11018 = vrot.lane.b32.xlu1 %v11017_v33, %s16280_s28 }
 0x304   : > { %v13789_v29 = vpop.permute.xlu0 %10738  ;;  %v13791_v20 = vpop.permute.xlu1 %10723 }
 0x305   : > { %v10741_v45 = vunpack.i.h.bf16 %v13789_v29  ;;  %v10740_v58 = vunpack.i.l.bf16 %v13789_v29 }
 0x306   : > { %11033 = vrot.lane.b32.xlu0 %v11017_v33, %s16311_s6  ;;  %11023 = vrot.lane.b32.xlu1 %v11022_v53, %s16315_s26 }
 0x308   : > { %v13807_v0 = vpop.permute.xlu0 %10748  ;;  %v13809_v22 = vpop.permute.xlu1 %10743 }
 0x30a   : > { %11038 = vrot.lane.b32.xlu0 %v11022_v53, %s16282_s4  ;;  %11028 = vrot.lane.b32.xlu1 %v11027_v25, %s16284_s5 }
 0x30c   : > { %v10764_v19 = vpop.permute.xlu0 %10763  ;;  %v13814_v17 = vpop.permute.xlu1 %10753 }
 0x30d   : > { %v10766_v43 = vunpack.i.h.bf16 %v10764_v19  ;;  %v10765_v9 = vunpack.i.l.bf16 %v10764_v19  ;;  %v10756_v61 = vunpack.i.h.bf16 %v13814_v17  ;;  %v10755_v13 = vunpack.i.l.bf16 %v13814_v17 }
 0x30e   : > { %11043 = vrot.lane.b32.xlu0 %v11027_v25, %s16318_s0  ;;  %11048 = vrot.lane.b32.xlu1 %v11022_v53, %s16323_s2 }
 0x30f   : > { %v5236_v40 = vsel %vm5234_vm15, %v5203_v6, %v10766_v43  ;;  %v5235_v47 = vsel %vm5234_vm15, %v5202_v51, %v10765_v9  ;;  %v5172_v9 = vsel %vm3800_vm4, %v13621_v37, %v10755_v13 }
 0x310   : > { %v10769_v57 = vpop.permute.xlu0 %10768  ;;  %v13823_v54 = vpop.permute.xlu1 %10758 }
 0x311   : > { %v10771_v27 = vunpack.i.h.bf16 %v10769_v57  ;;  %v10770_v28 = vunpack.i.l.bf16 %v10769_v57  ;;  %v10761_v21 = vunpack.i.h.bf16 %v13823_v54  ;;  %v10760_v57 = vunpack.i.l.bf16 %v13823_v54  ;;  %v3975_v54 = vld [vmem:[#allocation3 + $0x120] sm:$0xff] }
 0x312   : > { %11053 = vrot.lane.b32.xlu0 %v11027_v25, %s16314_s24  ;;  %11058 = vrot.lane.b32.xlu1 %v11057_v11, %s16311_s6  ;;  %v11097_v37 = vpack.i.bf16 %v3976_v41, %v3975_v54  ;;  %v10746_v41 = vunpack.i.h.bf16 %v13809_v22 }
 0x313   : > { %v5267_v33 = vsel %vm2747_vm7, %v5235_v47, %v10770_v28  ;;  %v5268_v8 = vsel %vm2747_vm7, %v5236_v40, %v10771_v27  ;;  %v5204_v62 = vsel %vm1345_vm2, %v5172_v9, %v10760_v57  ;;  %v10716_v27 = vunpack.i.h.bf16 %v13773_v48  ;;  %v4008_v40 = vld [vmem:[#allocation3 + $0x129] sm:$0xff] }
 0x314   : > { %v10774_v4 = vpop.permute.xlu0 %10773  ;;  %v13831_v14 = vpop.permute.xlu1 %10778  ;;  %v10715_v28 = vunpack.i.l.bf16 %v13773_v48  ;;  %v10721_v47 = vunpack.i.h.bf16 %v13785_v63 }
 0x315   : > { %v10776_v10 = vunpack.i.h.bf16 %v10774_v4  ;;  %v10775_v35 = vunpack.i.l.bf16 %v10774_v4 }
 0x316   : > { %11068 = vrot.lane.b32.xlu0 %v11067_v52, %s16318_s0  ;;  %11063 = vrot.lane.b32.xlu1 %v11062_v50, %s16282_s4  ;;  %v5237_v6 = vsel %vm5234_vm15, %v5204_v62, %v10715_v28  ;;  %v10745_v62 = vunpack.i.l.bf16 %v13809_v22  ;;  %v5175_v22 = vsel %vm3800_vm4, %v13573_v24, %v10746_v41 }
 0x317   : > { %v5300_v1 = vsel %vm5299_vm3, %v5267_v33, %v10775_v35  ;;  %v5301_v53 = vsel %vm5299_vm3, %v5268_v8, %v10776_v10  ;;  %v10720_v10 = vunpack.i.l.bf16 %v13785_v63  ;;  %v4039_v8 = vld [vmem:[#allocation3 + $0x122] sm:$0xff] }
 0x318   : > { %v5332_v25 = vsel %vm2780_vm8, %v5300_v1, %v10730_v38  ;;  %v5333_v31 = vsel %vm2780_vm8, %v5301_v53, %v10731_v23  ;;  %v13847_v18 = vpop.permute.xlu0 %10793  ;;  %v13849_v19 = vpop.permute.xlu1 %10783  ;;  %v4040_v1 = vld [vmem:[#allocation3 + $0x12a] sm:$0xff]  ;;  %v10725_v53 = vunpack.i.l.bf16 %v13791_v20 }
 0x319   : > { %v5365_v7 = vsel %vm5364_vm9, %v5332_v25, %v10735_v3  ;;  %v5366_v30 = vsel %vm5364_vm9, %v5333_v31, %v10736_v15  ;;  %v5269_v23 = vsel %vm2747_vm7, %v5237_v6, %v10720_v10  ;;  %v10750_v6 = vunpack.i.l.bf16 %v13807_v0 }
 0x31a   : > { %11083 = vrot.lane.b32.xlu0 %v11057_v11, %s16280_s28  ;;  %11073 = vrot.lane.b32.xlu1 %v11062_v50, %s16323_s2  ;;  %v5397_v12 = vsel %vm857_vm0, %v5365_v7, %v10740_v58  ;;  %v5398_v29 = vsel %vm857_vm0, %v5366_v30, %v10741_v45  ;;  %v5173_v11 = vsel %vm3800_vm4, %v13611_v44, %v10756_v61 }
 0x31b   : > { %v5429_v17 = vpack.c.bf16 %v5398_v29, %v5397_v12  ;;  %v5205_v42 = vsel %vm1345_vm2, %v5173_v11, %v10761_v21  ;;  %v5302_v63 = vsel %vm5299_vm3, %v5269_v23, %v10725_v53  ;;  %v11107_v58 = vpack.i.bf16 %v4040_v1, %v4039_v8 }
 0x31c   : > { %v13863_v2 = vpop.permute.xlu0 %10798  ;;  %v13865_v43 = vpop.permute.xlu1 %10788  ;;  %v5238_v4 = vsel %vm5234_vm15, %v5205_v42, %v10716_v27  ;;  %v4068_v42 = vld [vmem:[#allocation3 + $0x108] sm:$0xff]  ;;  %v4069_v27 = vld [vmem:[#allocation3 + $0x110] sm:$0xff]  ;;  %v5174_v10 = vsel %vm3800_vm4, %v13571_v56, %v10745_v62 }
 0x31d   : > { %9845 = vmatprep.mubr.msk.bf16.mxu1 %vm5465_vm10, %v5429_v17  ;;  %v5270_v38 = vsel %vm2747_vm7, %v5238_v4, %v10721_v47  ;;  %v4133_v47 = vld [vmem:[#allocation3 + $0x112] sm:$0xff]  ;;  %v5206_v53 = vsel %vm1345_vm2, %v5174_v10, %v10750_v6 }
 0x31e   : > { %11088 = vrot.lane.b32.xlu0 %v11062_v50, %s16315_s26  ;;  %11078 = vrot.lane.b32.xlu1 %v11067_v52, %s16314_s24  ;;  %v4007_v50 = vld [vmem:[#allocation3 + $0x121] sm:$0xff]  ;;  %v3863_v10 = vld [vmem:[#allocation3 + $0x50] sm:$0xff] }
 0x31f   : > { %v11102_v33 = vpack.i.bf16 %v4008_v40, %v4007_v50  ;;  %v11137_v50 = vpack.i.bf16 %v4069_v27, %v4068_v42  ;;  %v4132_v40 = vld [vmem:[#allocation3 + $0x10a] sm:$0xff] }
 0x320   : > { %v13878_v44 = vpop.permute.xlu0 %10803  ;;  %v13880_v51 = vpop.permute.xlu1 %10808 }
 0x322   : > { %11093 = vrot.lane.b32.xlu0 %v11067_v52, %s16284_s5  ;;  %11098 = vrot.lane.b32.xlu1 %v11097_v37, %s16280_s28  ;;  %v10726_v52 = vunpack.i.h.bf16 %v13791_v20 }
 0x324   : > { %v13888_v48 = vpop.permute.xlu0 %10813  ;;  %v10819_v35 = vpop.permute.xlu1 %10818  ;;  %v5303_v25 = vsel %vm5299_vm3, %v5270_v38, %v10726_v52  ;;  %v4100_v38 = vld [vmem:[#allocation3 + $0x109] sm:$0xff]  ;;  %v11147_v52 = vpack.i.bf16 %v4133_v47, %v4132_v40  ;;  %v3980_v47 = vld [vmem:[#allocation3 + $0x158] sm:$0xff] }
 0x325   : > { %v10821_v15 = vunpack.i.h.bf16 %v10819_v35  ;;  %v10820_v3 = vunpack.i.l.bf16 %v10819_v35  ;;  %v3979_v40 = vld [vmem:[#allocation3 + $0x150] sm:$0xff] }
 0x326   : > { %11113 = vrot.lane.b32.xlu0 %v11097_v37, %s16311_s6  ;;  %11103 = vrot.lane.b32.xlu1 %v11102_v33, %s16315_s26  ;;  %v10751_v37 = vunpack.i.h.bf16 %v13807_v0 }
 0x327   : > { %v5334_v21 = vsel %vm2780_vm8, %v5302_v63, %v10820_v3  ;;  %v5335_v20 = vsel %vm2780_vm8, %v5303_v25, %v10821_v15 }
 0x328   : > { %v10829_v31 = vpop.permute.xlu0 %10828  ;;  %v10824_v45 = vpop.permute.xlu1 %10823  ;;  %v5207_v15 = vsel %vm1345_vm2, %v5175_v22, %v10751_v37  ;;  %v3862_v22 = vld [vmem:[#allocation3 + $0x48] sm:$0xff] }
 0x329   : > { %v10831_v61 = vunpack.i.h.bf16 %v10829_v31  ;;  %v10830_v13 = vunpack.i.l.bf16 %v10829_v31  ;;  %v10826_v7 = vunpack.i.h.bf16 %v10824_v45  ;;  %v10825_v30 = vunpack.i.l.bf16 %v10824_v45 }
 0x32a   : > { %11118 = vrot.lane.b32.xlu0 %v11102_v33, %s16282_s4  ;;  %11108 = vrot.lane.b32.xlu1 %v11107_v58, %s16284_s5  ;;  %v10796_v45 = vunpack.i.h.bf16 %v13847_v18 }
 0x32b   : > { %v5367_v57 = vsel %vm5364_vm9, %v5334_v21, %v10825_v30  ;;  %v5368_v12 = vsel %vm5364_vm9, %v5335_v20, %v10826_v7  ;;  %v10801_v20 = vunpack.i.h.bf16 %v13863_v2 }
 0x32c   : > { %v5399_v29 = vsel %vm857_vm0, %v5367_v57, %v10830_v13  ;;  %v5400_v17 = vsel %vm857_vm0, %v5368_v12, %v10831_v61  ;;  %v10844_v11 = vpop.permute.xlu0 %10843  ;;  %v13906_v9 = vpop.permute.xlu1 %10833  ;;  %v10800_v57 = vunpack.i.l.bf16 %v13863_v2 }
 0x32d   : > { %v5430_v54 = vpack.c.bf16 %v5400_v17, %v5399_v29  ;;  %v10846_v35 = vunpack.i.h.bf16 %v10844_v11  ;;  %v10845_v23 = vunpack.i.l.bf16 %v10844_v11  ;;  %v10806_v17 = vunpack.i.h.bf16 %v13878_v44 }
 0x32e   : > { %11123 = vrot.lane.b32.xlu0 %v11107_v58, %s16318_s0  ;;  %11128 = vrot.lane.b32.xlu1 %v11102_v33, %s16323_s2  ;;  %v4101_v33 = vld [vmem:[#allocation3 + $0x111] sm:$0xff]  ;;  %v10805_v11 = vunpack.i.l.bf16 %v13878_v44  ;;  %v10836_v2 = vunpack.i.h.bf16 %v13906_v9  ;;  %v10835_v62 = vunpack.i.l.bf16 %v13906_v9 }
 0x32f   : > { %9846 = vmatmul.mubr.msk.bf16.vlgmr.msra.gmra.mxu1 %vm5465_vm10, %v5430_v54  ;;  %v11142_v3 = vpack.i.bf16 %v4101_v33, %v4100_v38  ;;  %v5239_v56 = vsel %vm5234_vm15, %v5206_v53, %v10845_v23  ;;  %v5240_v63 = vsel %vm5234_vm15, %v5207_v15, %v10846_v35  ;;  %v4011_v53 = vld [vmem:[#allocation3 + $0x151] sm:$0xff]  ;;  %v4012_v15 = vld [vmem:[#allocation3 + $0x159] sm:$0xff] }
 0x330   : > { %v10849_v28 = vpop.permute.xlu0 %10848  ;;  %v13915_v4 = vpop.permute.xlu1 %10838  ;;  %v5177_v9 = vsel %vm3800_vm4, %v3863_v10, %v10836_v2  ;;  %v5176_v35 = vsel %vm3800_vm4, %v3862_v22, %v10835_v62  ;;  %v14001_v10 = vld [vmem:[#allocation3 + $0x138] sm:$0xff] }
 0x331   : > { %v10851_v8 = vunpack.i.h.bf16 %v10849_v28  ;;  %v10850_v1 = vunpack.i.l.bf16 %v10849_v28  ;;  %v10841_v44 = vunpack.i.h.bf16 %v13915_v4  ;;  %v10840_v37 = vunpack.i.l.bf16 %v13915_v4 }
 0x332   : > { %11133 = vrot.lane.b32.xlu0 %v11107_v58, %s16314_s24  ;;  %11138 = vrot.lane.b32.xlu1 %v11137_v50, %s16311_s6  ;;  %v10795_v58 = vunpack.i.l.bf16 %v13847_v18 }
 0x333   : > { %v5271_v61 = vsel %vm2747_vm7, %v5239_v56, %v10850_v1  ;;  %v5272_v13 = vsel %vm2747_vm7, %v5240_v63, %v10851_v8  ;;  %v5208_v4 = vsel %vm1345_vm2, %v5176_v35, %v10840_v37  ;;  %v5209_v38 = vsel %vm1345_vm2, %v5177_v9, %v10841_v44  ;;  %v14003_v9 = vld [vmem:[#allocation3 + $0x140] sm:$0xff] }
 0x334   : > { %v10854_v0 = vpop.permute.xlu0 %10853  ;;  %v13925_v24 = vpop.permute.xlu1 %10858  ;;  %v11177_v8 = vpack.i.bf16 %v3980_v47, %v3979_v40  ;;  %v10781_v1 = vunpack.i.h.bf16 %v13831_v14  ;;  %v10811_v35 = vunpack.i.h.bf16 %v13880_v51 }
 0x335   : > { %v10856_v25 = vunpack.i.h.bf16 %v10854_v0  ;;  %v10855_v31 = vunpack.i.l.bf16 %v10854_v0  ;;  %v10780_v0 = vunpack.i.l.bf16 %v13831_v14  ;;  %v4043_v14 = vld [vmem:[#allocation3 + $0x152] sm:$0xff] }
 0x336   : > { %11148 = vrot.lane.b32.xlu0 %v11147_v52, %s16318_s0  ;;  %11143 = vrot.lane.b32.xlu1 %v11142_v3, %s16282_s4  ;;  %v5242_v56 = vsel %vm5234_vm15, %v5209_v38, %v10781_v1  ;;  %v10816_v38 = vunpack.i.h.bf16 %v13888_v48 }
 0x337   : > { %v5304_v7 = vsel %vm5299_vm3, %v5271_v61, %v10855_v31  ;;  %v5305_v30 = vsel %vm5299_vm3, %v5272_v13, %v10856_v25  ;;  %v10786_v25 = vunpack.i.h.bf16 %v13849_v19  ;;  %v10785_v31 = vunpack.i.l.bf16 %v13849_v19 }
 0x338   : > { %v13937_v21 = vpop.permute.xlu0 %10873  ;;  %v5336_v12 = vsel %vm2780_vm8, %v5304_v7, %v10795_v58  ;;  %v5337_v18 = vsel %vm2780_vm8, %v5305_v30, %v10796_v45  ;;  %v13943_v29 = vpop.permute.xlu1 %10863  ;;  %v11182_v58 = vpack.i.bf16 %v4012_v15, %v4011_v53 }
 0x339   : > { %v5369_v54 = vsel %vm5364_vm9, %v5336_v12, %v10800_v57  ;;  %v5370_v41 = vsel %vm5364_vm9, %v5337_v18, %v10801_v20  ;;  %v5274_v30 = vsel %vm2747_vm7, %v5242_v56, %v10786_v25  ;;  %v10791_v20 = vunpack.i.h.bf16 %v13865_v43  ;;  %v4137_v25 = vld [vmem:[#allocation3 + $0x142] sm:$0xff] }
 0x33a   : > { %11163 = vrot.lane.b32.xlu0 %v11137_v50, %s16280_s28  ;;  %11153 = vrot.lane.b32.xlu1 %v11142_v3, %s16323_s2  ;;  %v5401_v27 = vsel %vm857_vm0, %v5369_v54, %v10805_v11  ;;  %v5402_v28 = vsel %vm857_vm0, %v5370_v41, %v10806_v17  ;;  %v10790_v57 = vunpack.i.l.bf16 %v13865_v43  ;;  %v11217_v56 = vpack.i.bf16 %v14003_v9, %v14001_v10 }
 0x33b   : > { %v5431_v50 = vpack.c.bf16 %v5402_v28, %v5401_v27  ;;  %v5307_v41 = vsel %vm5299_vm3, %v5274_v30, %v10791_v20 }
 0x33c   : > { %v13953_v42 = vpop.permute.xlu0 %10878  ;;  %v13959_v6 = vpop.permute.xlu1 %10868 }
 0x33d   : > { %9849 = vmatprep.mubr.msk.bf16.mxu1 %vm5465_vm10, %v5431_v50 }
 0x33e   : > { %11168 = vrot.lane.b32.xlu0 %v11142_v3, %s16315_s26  ;;  %11158 = vrot.lane.b32.xlu1 %v11147_v52, %s16314_s24  ;;  %v5241_v3 = vsel %vm5234_vm15, %v5208_v4, %v10780_v0  ;;  %v10810_v4 = vunpack.i.l.bf16 %v13880_v51  ;;  %v4136_v0 = vld [vmem:[#allocation3 + $0x13a] sm:$0xff] }
 0x33f   : > { %v5273_v7 = vsel %vm2747_vm7, %v5241_v3, %v10785_v31  ;;  %v4104_v31 = vld [vmem:[#allocation3 + $0x139] sm:$0xff]  ;;  %v4105_v51 = vld [vmem:[#allocation3 + $0x141] sm:$0xff]  ;;  %v11227_v20 = vpack.i.bf16 %v4137_v25, %v4136_v0 }
 0x340   : > { %v13966_v23 = vpop.permute.xlu0 %10883  ;;  %v13970_v33 = vpop.permute.xlu1 %10888  ;;  %v5306_v54 = vsel %vm5299_vm3, %v5273_v7, %v10790_v57  ;;  %v11222_v57 = vpack.i.bf16 %v4105_v51, %v4104_v31  ;;  %v3984_v25 = vld [vmem:[#allocation3 + $0x188] sm:$0xff] }
 0x342   : > { %11173 = vrot.lane.b32.xlu0 %v11147_v52, %s16284_s5  ;;  %11178 = vrot.lane.b32.xlu1 %v11177_v8, %s16280_s28  ;;  %v4044_v52 = vld [vmem:[#allocation3 + $0x15a] sm:$0xff] }
 0x343   : > { %v11187_v11 = vpack.i.bf16 %v4044_v52, %v4043_v14 }
 0x344   : > { %v13978_v63 = vpop.permute.xlu0 %10893  ;;  %v10899_v45 = vpop.permute.xlu1 %10898 }
 0x345   : > { %v10901_v61 = vunpack.i.h.bf16 %v10899_v45  ;;  %v10900_v13 = vunpack.i.l.bf16 %v10899_v45  ;;  %v3864_v45 = vld [vmem:[#allocation3 + $0x60] sm:$0xff] }
 0x346   : > { %11193 = vrot.lane.b32.xlu0 %v11177_v8, %s16311_s6  ;;  %11183 = vrot.lane.b32.xlu1 %v11182_v58, %s16315_s26  ;;  %v10815_v8 = vunpack.i.l.bf16 %v13888_v48 }
 0x347   : > { %v5338_v27 = vsel %vm2780_vm8, %v5306_v54, %v10900_v13  ;;  %v5339_v28 = vsel %vm2780_vm8, %v5307_v41, %v10901_v61  ;;  %v5178_v61 = vsel %vm3800_vm4, %v3864_v45, %v10810_v4  ;;  %v10876_v54 = vunpack.i.h.bf16 %v13937_v21  ;;  %v3866_v45 = vld [vmem:[#allocation3 + $0x78] sm:$0xff] }
 0x348   : > { %v10909_v12 = vpop.permute.xlu0 %10908  ;;  %v10904_v17 = vpop.permute.xlu1 %10903  ;;  %v5210_v13 = vsel %vm1345_vm2, %v5178_v61, %v10815_v8  ;;  %v10875_v41 = vunpack.i.l.bf16 %v13937_v21  ;;  %v10885_v21 = vunpack.i.l.bf16 %v13966_v23 }
 0x349   : > { %v10911_v19 = vunpack.i.h.bf16 %v10909_v12  ;;  %v10910_v18 = vunpack.i.l.bf16 %v10909_v12  ;;  %v10906_v2 = vunpack.i.h.bf16 %v10904_v17  ;;  %v10905_v62 = vunpack.i.l.bf16 %v10904_v17 }
 0x34a   : > { %11198 = vrot.lane.b32.xlu0 %v11182_v58, %s16282_s4  ;;  %11188 = vrot.lane.b32.xlu1 %v11187_v11, %s16284_s5 }
 0x34b   : > { %v5371_v43 = vsel %vm5364_vm9, %v5338_v27, %v10905_v62  ;;  %v5372_v44 = vsel %vm5364_vm9, %v5339_v28, %v10906_v2  ;;  %v10881_v27 = vunpack.i.h.bf16 %v13953_v42  ;;  %v10880_v28 = vunpack.i.l.bf16 %v13953_v42 }
 0x34c   : > { %v10924_v37 = vpop.permute.xlu0 %10923  ;;  %v13996_v50 = vpop.permute.xlu1 %10913  ;;  %v5403_v40 = vsel %vm857_vm0, %v5371_v43, %v10910_v18  ;;  %v5404_v47 = vsel %vm857_vm0, %v5372_v44, %v10911_v19 }
 0x34d   : > { %v5432_v22 = vpack.c.bf16 %v5404_v47, %v5403_v40  ;;  %v10926_v53 = vunpack.i.h.bf16 %v10924_v37  ;;  %v10925_v15 = vunpack.i.l.bf16 %v10924_v37  ;;  %v10886_v37 = vunpack.i.h.bf16 %v13966_v23 }
 0x34e   : > { %11203 = vrot.lane.b32.xlu0 %v11187_v11, %s16318_s0  ;;  %11208 = vrot.lane.b32.xlu1 %v11182_v58, %s16323_s2  ;;  %v3865_v58 = vld [vmem:[#allocation3 + $0x68] sm:$0xff]  ;;  %v10915_v0 = vunpack.i.l.bf16 %v13996_v50 }
 0x34f   : > { %9850 = vmatmul.mubr.msk.bf16.gmra.mxu1 %vm5465_vm10, %v5432_v22  ;;  %v5179_v48 = vsel %vm3800_vm4, %v3865_v58, %v10811_v35  ;;  %v5243_v12 = vsel %vm5234_vm15, %v5210_v13, %v10925_v15  ;;  %v3983_v15 = vld [vmem:[#allocation3 + $0x180] sm:$0xff] }
 0x350   : > { %v10929_v1 = vpop.permute.xlu0 %10928  ;;  %v14011_v3 = vpop.permute.xlu1 %10918  ;;  %v5211_v7 = vsel %vm1345_vm2, %v5179_v48, %v10816_v38  ;;  %v3867_v58 = vld [vmem:[#allocation3 + $0x80] sm:$0xff] }
 0x351   : > { %v10931_v14 = vunpack.i.h.bf16 %v10929_v1  ;;  %v10930_v52 = vunpack.i.l.bf16 %v10929_v1  ;;  %v5244_v19 = vsel %vm5234_vm15, %v5211_v7, %v10926_v53  ;;  %v10916_v1 = vunpack.i.h.bf16 %v13996_v50 }
 0x352   : > { %11213 = vrot.lane.b32.xlu0 %v11187_v11, %s16314_s24  ;;  %11218 = vrot.lane.b32.xlu1 %v11217_v56, %s16311_s6  ;;  %v10921_v31 = vunpack.i.h.bf16 %v14011_v3  ;;  %v10920_v51 = vunpack.i.l.bf16 %v14011_v3  ;;  %v10861_v7 = vunpack.i.h.bf16 %v13925_v24 }
 0x353   : > { %v5275_v2 = vsel %vm2747_vm7, %v5243_v12, %v10930_v52  ;;  %v5276_v62 = vsel %vm2747_vm7, %v5244_v19, %v10931_v14  ;;  %v11257_v14 = vpack.i.bf16 %v3984_v25, %v3983_v15  ;;  %v5181_v50 = vsel %vm3800_vm4, %v3867_v58, %v10916_v1  ;;  %v4016_v12 = vld [vmem:[#allocation3 + $0x189] sm:$0xff] }
 0x354   : > { %v10934_v30 = vpop.permute.xlu0 %10933  ;;  %v14023_v11 = vpop.permute.xlu1 %10938  ;;  %v5180_v52 = vsel %vm3800_vm4, %v3866_v45, %v10915_v0  ;;  %v5213_v3 = vsel %vm1345_vm2, %v5181_v50, %v10921_v31  ;;  %v14089_v25 = vld [vmem:[#allocation3 + $0x168] sm:$0xff]  ;;  %v14091_v31 = vld [vmem:[#allocation3 + $0x170] sm:$0xff] }
 0x355   : > { %v10936_v18 = vunpack.i.h.bf16 %v10934_v30  ;;  %v10935_v17 = vunpack.i.l.bf16 %v10934_v30  ;;  %v5212_v61 = vsel %vm1345_vm2, %v5180_v52, %v10920_v51  ;;  %v10860_v30 = vunpack.i.l.bf16 %v13925_v24  ;;  %v4047_v24 = vld [vmem:[#allocation3 + $0x182] sm:$0xff] }
 0x356   : > { %11228 = vrot.lane.b32.xlu0 %v11227_v20, %s16318_s0  ;;  %11223 = vrot.lane.b32.xlu1 %v11222_v57, %s16282_s4  ;;  %v10941_v59 = vunpack.i.h.bf16 %v14023_v11 }
 0x357   : > { %v5308_v43 = vsel %vm5299_vm3, %v5275_v2, %v10935_v17  ;;  %v5309_v44 = vsel %vm5299_vm3, %v5276_v62, %v10936_v18  ;;  %v5245_v19 = vsel %vm5234_vm15, %v5212_v61, %v10860_v30  ;;  %v5246_v18 = vsel %vm5234_vm15, %v5213_v3, %v10861_v7 }
 0x358   : > { %v5340_v40 = vsel %vm2780_vm8, %v5308_v43, %v10875_v41  ;;  %v5341_v47 = vsel %vm2780_vm8, %v5309_v44, %v10876_v54  ;;  %v14039_v22 = vpop.permute.xlu0 %10953  ;;  %v14041_v35 = vpop.permute.xlu1 %10943  ;;  %v10866_v54 = vunpack.i.h.bf16 %v13943_v29  ;;  %v10865_v41 = vunpack.i.l.bf16 %v13943_v29 }
 0x359   : > { %v5373_v42 = vsel %vm5364_vm9, %v5340_v40, %v10880_v28  ;;  %v5374_v4 = vsel %vm5364_vm9, %v5341_v47, %v10881_v27  ;;  %v11282_v61 = vpack.i.bf16 %v14091_v31, %v14089_v25 }
 0x35a   : > { %11243 = vrot.lane.b32.xlu0 %v11217_v56, %s16280_s28  ;;  %v5405_v38 = vsel %vm857_vm0, %v5373_v42, %v10885_v21  ;;  %v5406_v8 = vsel %vm857_vm0, %v5374_v4, %v10886_v37  ;;  %11233 = vrot.lane.b32.xlu1 %v11222_v57, %s16323_s2  ;;  %v5277_v43 = vsel %vm2747_vm7, %v5245_v19, %v10865_v41  ;;  %v10871_v37 = vunpack.i.h.bf16 %v13959_v6 }
 0x35b   : > { %v5433_v23 = vpack.c.bf16 %v5406_v8, %v5405_v38  ;;  %v5278_v44 = vsel %vm2747_vm7, %v5246_v18, %v10866_v54  ;;  %v10870_v21 = vunpack.i.l.bf16 %v13959_v6  ;;  %v4140_v38 = vld [vmem:[#allocation3 + $0x16a] sm:$0xff]  ;;  %v4141_v8 = vld [vmem:[#allocation3 + $0x172] sm:$0xff]  ;;  %v10891_v19 = vunpack.i.h.bf16 %v13970_v33 }
 0x35c   : > { %v14051_v53 = vpop.permute.xlu0 %10958  ;;  %v14055_v56 = vpop.permute.xlu1 %10948  ;;  %v5311_v1 = vsel %vm5299_vm3, %v5278_v44, %v10871_v37  ;;  %v11292_v50 = vpack.i.bf16 %v4141_v8, %v4140_v38  ;;  %v10890_v18 = vunpack.i.l.bf16 %v13970_v33  ;;  %v10896_v54 = vunpack.i.h.bf16 %v13978_v63 }
 0x35d   : > { %9853 = vmatprep.mubr.msk.bf16.mxu1 %vm5465_vm10, %v5433_v23  ;;  %v5310_v23 = vsel %vm5299_vm3, %v5277_v43, %v10870_v21  ;;  %v10895_v41 = vunpack.i.l.bf16 %v13978_v63  ;;  %v3869_v43 = vld [vmem:[#allocation3 + $0x98] sm:$0xff] }
 0x35e   : > { %11248 = vrot.lane.b32.xlu0 %v11222_v57, %s16315_s26  ;;  %11238 = vrot.lane.b32.xlu1 %v11227_v20, %s16314_s24  ;;  %v4015_v57 = vld [vmem:[#allocation3 + $0x181] sm:$0xff]  ;;  %v5183_v33 = vsel %vm3800_vm4, %v3869_v43, %v10891_v19  ;;  %v3871_v43 = vld [vmem:[#allocation3 + $0xb0] sm:$0xff] }
 0x35f   : > { %v11262_v62 = vpack.i.bf16 %v4016_v12, %v4015_v57  ;;  %v4108_v57 = vld [vmem:[#allocation3 + $0x169] sm:$0xff]  ;;  %v4109_v12 = vld [vmem:[#allocation3 + $0x171] sm:$0xff] }
 0x360   : > { %v14062_v48 = vpop.permute.xlu0 %10963  ;;  %v14066_v13 = vpop.permute.xlu1 %10968 }
 0x362   : > { %11253 = vrot.lane.b32.xlu0 %v11227_v20, %s16284_s5  ;;  %11258 = vrot.lane.b32.xlu1 %v11257_v14, %s16280_s28  ;;  %v4048_v20 = vld [vmem:[#allocation3 + $0x18a] sm:$0xff] }
 0x363   : > { %v14084_v4 = vpack.i.bf16 %v4048_v20, %v4047_v24 }
 0x364   : > { %v14074_v17 = vpop.permute.xlu0 %10973  ;;  %v10979_v2 = vpop.permute.xlu1 %10978 }
 0x365   : > { %v10981_v27 = vunpack.i.h.bf16 %v10979_v2  ;;  %v10980_v28 = vunpack.i.l.bf16 %v10979_v2 }
 0x366   : > { %11273 = vrot.lane.b32.xlu0 %v11257_v14, %s16311_s6  ;;  %11263 = vrot.lane.b32.xlu1 %v11262_v62, %s16315_s26 }
 0x367   : > { %v5342_v6 = vsel %vm2780_vm8, %v5310_v23, %v10980_v28  ;;  %v5343_v51 = vsel %vm2780_vm8, %v5311_v1, %v10981_v27  ;;  %v11287_v27 = vpack.i.bf16 %v4109_v12, %v4108_v57  ;;  %v3868_v28 = vld [vmem:[#allocation3 + $0x90] sm:$0xff]  ;;  %v10956_v1 = vunpack.i.h.bf16 %v14039_v22 }
 0x368   : > { %v10989_v40 = vpop.permute.xlu0 %10988  ;;  %v10984_v42 = vpop.permute.xlu1 %10983  ;;  %v5182_v21 = vsel %vm3800_vm4, %v3868_v28, %v10890_v18  ;;  %v3870_v28 = vld [vmem:[#allocation3 + $0xa8] sm:$0xff] }
 0x369   : > { %v10991_v29 = vunpack.i.h.bf16 %v10989_v40  ;;  %v10990_v47 = vunpack.i.l.bf16 %v10989_v40  ;;  %v10986_v0 = vunpack.i.h.bf16 %v10984_v42  ;;  %v10985_v15 = vunpack.i.l.bf16 %v10984_v42 }
 0x36a   : > { %11278 = vrot.lane.b32.xlu0 %v11262_v62, %s16282_s4  ;;  %11268 = vrot.lane.b32.xlu1 %v14084_v4, %s16284_s5  ;;  %v5214_v63 = vsel %vm1345_vm2, %v5182_v21, %v10895_v41  ;;  %v5215_v40 = vsel %vm1345_vm2, %v5183_v33, %v10896_v54  ;;  %v6067_v33 = vld [vmem:[#allocation3 + $0x2] sm:$0xff] }
 0x36b   : > { %v5375_v45 = vsel %vm5364_vm9, %v5342_v6, %v10985_v15  ;;  %v5376_v58 = vsel %vm5364_vm9, %v5343_v51, %v10986_v0  ;;  %v10955_v0 = vunpack.i.l.bf16 %v14039_v22  ;;  %v10961_v51 = vunpack.i.h.bf16 %v14051_v53 }
 0x36c   : > { %v11004_v14 = vpop.permute.xlu0 %11003  ;;  %v14099_v52 = vpop.permute.xlu1 %10993  ;;  %v5407_v3 = vsel %vm857_vm0, %v5375_v45, %v10990_v47  ;;  %v5408_v7 = vsel %vm857_vm0, %v5376_v58, %v10991_v29  ;;  %v10960_v45 = vunpack.i.l.bf16 %v14051_v53  ;;  %v10965_v22 = vunpack.i.l.bf16 %v14062_v48 }
 0x36d   : > { %v5434_v30 = vpack.c.bf16 %v5408_v7, %v5407_v3  ;;  %v11006_v62 = vunpack.i.h.bf16 %v11004_v14  ;;  %v11005_v24 = vunpack.i.l.bf16 %v11004_v14  ;;  %v10996_v54 = vunpack.i.h.bf16 %v14099_v52 }
 0x36e   : > { %11293 = vrot.lane.b32.xlu0 %v11292_v50, %s16318_s0  ;;  %11283 = vrot.lane.b32.xlu1 %v11282_v61, %s16311_s6  ;;  %v10995_v41 = vunpack.i.l.bf16 %v14099_v52 }
 0x36f   : > { %9854 = vmatmul.mubr.msk.bf16.gmra.mxu1 %vm5465_vm10, %v5434_v30  ;;  %v5247_v47 = vsel %vm5234_vm15, %v5214_v63, %v11005_v24  ;;  %v5248_v42 = vsel %vm5234_vm15, %v5215_v40, %v11006_v62 }
 0x370   : > { %v11009_v2 = vpop.permute.xlu0 %11008  ;;  %v10999_v20 = vpop.permute.xlu1 %10998  ;;  %v5184_v52 = vsel %vm3800_vm4, %v3870_v28, %v10995_v41 }
 0x371   : > { %v11011_v44 = vunpack.i.h.bf16 %v11009_v2  ;;  %v11010_v37 = vunpack.i.l.bf16 %v11009_v2  ;;  %v11001_v62 = vunpack.i.h.bf16 %v10999_v20  ;;  %v11000_v24 = vunpack.i.l.bf16 %v10999_v20  ;;  %v6035_v20 = vld [vmem:[#allocation3 + $0x1] sm:$0xff] }
 0x372   : > { %11313 = vrot.lane.b32.xlu0 %v11282_v61, %s16280_s28  ;;  %11288 = vrot.lane.b32.xlu1 %v11287_v27, %s16282_s4  ;;  %v10966_v61 = vunpack.i.h.bf16 %v14062_v48 }
 0x373   : > { %v5279_v15 = vsel %vm2747_vm7, %v5247_v47, %v11010_v37  ;;  %v5280_v6 = vsel %vm2747_vm7, %v5248_v42, %v11011_v44  ;;  %v6036_v37 = vld [vmem:[#allocation3 + $0x9] sm:$0xff]  ;;  %v5216_v21 = vsel %vm1345_vm2, %v5184_v52, %v11000_v24  ;;  %v6225_v47 = vld [vmem:[#allocation3 + $0x198] sm:$0xff]  ;;  %v10970_v52 = vunpack.i.l.bf16 %v14066_v13 }
 0x374   : > { %v11014_v29 = vpop.permute.xlu0 %11013  ;;  %v14120_v23 = vpop.permute.xlu1 %11018  ;;  %v11337_v40 = vpack.i.bf16 %v6036_v37, %v6035_v20  ;;  %v10976_v20 = vunpack.i.h.bf16 %v14074_v17  ;;  %v10975_v37 = vunpack.i.l.bf16 %v14074_v17 }
 0x375   : > { %v11016_v38 = vunpack.i.h.bf16 %v11014_v29  ;;  %v11015_v8 = vunpack.i.l.bf16 %v11014_v29  ;;  %v6068_v29 = vld [vmem:[#allocation3 + $0xa] sm:$0xff] }
 0x376   : > { %11318 = vrot.lane.b32.xlu0 %v11287_v27, %s16315_s26  ;;  %11298 = vrot.lane.b32.xlu1 %v11287_v27, %s16323_s2  ;;  %v11342_v42 = vpack.i.bf16 %v6068_v29, %v6067_v33 }
 0x377   : > { %v5312_v58 = vsel %vm5299_vm3, %v5279_v15, %v11015_v8  ;;  %v5313_v14 = vsel %vm5299_vm3, %v5280_v6, %v11016_v38  ;;  %v11347_v38 = vpack.i.bf16 %v6226_v34, %v6225_v47  ;;  %v10946_v15 = vunpack.i.h.bf16 %v14041_v35  ;;  %v3872_v47 = vld [vmem:[#allocation3 + $0xc0] sm:$0xff]  ;;  %v3873_v34 = vld [vmem:[#allocation3 + $0xc8] sm:$0xff] }
 0x378   : > { %v5344_v3 = vsel %vm2780_vm8, %v5312_v58, %v10955_v0  ;;  %v5345_v7 = vsel %vm2780_vm8, %v5313_v14, %v10956_v1  ;;  %v14136_v30 = vpop.permute.xlu0 %11033  ;;  %v14138_v57 = vpop.permute.xlu1 %11023  ;;  %v10945_v6 = vunpack.i.l.bf16 %v14041_v35  ;;  %v10950_v58 = vunpack.i.l.bf16 %v14055_v56 }
 0x379   : > { %v5377_v53 = vsel %vm5364_vm9, %v5344_v3, %v10960_v45  ;;  %v5378_v12 = vsel %vm5364_vm9, %v5345_v7, %v10961_v51 }
 0x37a   : > { %11323 = vrot.lane.b32.xlu0 %v11292_v50, %s16284_s5  ;;  %v5409_v19 = vsel %vm857_vm0, %v5377_v53, %v10965_v22  ;;  %v5410_v18 = vsel %vm857_vm0, %v5378_v12, %v10966_v61  ;;  %11303 = vrot.lane.b32.xlu1 %v11292_v50, %s16314_s24  ;;  %v5185_v50 = vsel %vm3800_vm4, %v3871_v43, %v10996_v54 }
 0x37b   : > { %v5435_v48 = vpack.c.bf16 %v5410_v18, %v5409_v19 }
 0x37c   : > { %v14148_v2 = vpop.permute.xlu0 %11038  ;;  %v14150_v27 = vpop.permute.xlu1 %11028 }
 0x37d   : > { %9857 = vmatprep.mubr.msk.bf16.mxu1 %vm5465_vm10, %v5435_v48 }
 0x37e   : > { %11328 = vrot.lane.b32.xlu0 %v14084_v4, %s16318_s0  ;;  %11308 = vrot.lane.b32.xlu1 %v11307_v46, %s16282_s4  ;;  %v5217_v4 = vsel %vm1345_vm2, %v5185_v50, %v11001_v62  ;;  %v10940_v46 = vunpack.i.l.bf16 %v14023_v11  ;;  %v10971_v50 = vunpack.i.h.bf16 %v14066_v13  ;;  %v5186_v13 = vsel %vm3800_vm4, %v3872_v47, %v10970_v52 }
 0x37f   : > { %v5250_v1 = vsel %vm5234_vm15, %v5217_v4, %v10941_v59 }
 0x380   : > { %v14161_v44 = vpop.permute.xlu0 %11043  ;;  %v14165_v63 = vpop.permute.xlu1 %11048  ;;  %v5249_v8 = vsel %vm5234_vm15, %v5216_v21, %v10940_v46  ;;  %v5282_v60 = vsel %vm2747_vm7, %v5250_v1, %v10946_v15 }
 0x381   : > { %v5281_v26 = vsel %vm2747_vm7, %v5249_v8, %v10945_v6 }
 0x382   : > { %11333 = vrot.lane.b32.xlu1 %v11332_v32, %s16318_s0  ;;  %11338 = vrot.lane.b32.xlu0 %v11337_v40, %s16323_s2  ;;  %v10951_v32 = vunpack.i.h.bf16 %v14055_v56  ;;  %v5314_v35 = vsel %vm5299_vm3, %v5281_v26, %v10950_v58  ;;  %v14192_v56 = vpop.f32.mrf.mxu1  ;;  %v11036_v26 = vunpack.i.h.bf16 %v14136_v30 }
 0x384   : > { %v14176_v0 = vpop.permute.xlu0 %11053  ;;  %v11059_v11 = vpop.permute.xlu1 %11058  ;;  %v5315_v7 = vsel %vm5299_vm3, %v5282_v60, %v10951_v32  ;;  %v11035_v60 = vunpack.i.l.bf16 %v14136_v30 }
 0x385   : > { %v11061_v51 = vunpack.i.h.bf16 %v11059_v11  ;;  %v11060_v45 = vunpack.i.l.bf16 %v11059_v11  ;;  %v14203_v21 = vpop.f32.mrf.mxu1 }
 0x386   : > { %11343 = vrot.lane.b32.xlu0 %v11342_v42, %s16314_s24  ;;  %11348 = vrot.lane.b32.xlu1 %v11347_v38, %s16311_s6  ;;  %v5187_v42 = vsel %vm3800_vm4, %v3873_v34, %v10971_v50  ;;  %v5218_v38 = vsel %vm1345_vm2, %v5186_v13, %v10975_v37  ;;  %v11020_v13 = vunpack.i.l.bf16 %v14120_v23 }
 0x387   : > { %v5346_v19 = vsel %vm2780_vm8, %v5314_v35, %v11060_v45  ;;  %v5347_v18 = vsel %vm2780_vm8, %v5315_v7, %v11061_v51  ;;  %v5219_v17 = vsel %vm1345_vm2, %v5187_v42, %v10976_v20  ;;  %v14209_v1 = vpop.f32.mrf.mxu1  ;;  %v11046_v35 = vunpack.i.h.bf16 %v14161_v44 }
 0x388   : > { %v11069_v14 = vpop.permute.xlu0 %11068  ;;  %v11064_v3 = vpop.permute.xlu1 %11063  ;;  %v11045_v7 = vunpack.i.l.bf16 %v14161_v44 }
 0x389   : > { %v11071_v61 = vunpack.i.h.bf16 %v11069_v14  ;;  %v11070_v22 = vunpack.i.l.bf16 %v11069_v14  ;;  %v11066_v53 = vunpack.i.h.bf16 %v11064_v3  ;;  %v11065_v12 = vunpack.i.l.bf16 %v11064_v3 }
 0x38a   : > { %v11041_v14 = vunpack.i.h.bf16 %v14148_v2 }
 0x38b   : > { %v5379_v48 = vsel %vm5364_vm9, %v5346_v19, %v11065_v12  ;;  %v5380_v54 = vsel %vm5364_vm9, %v5347_v18, %v11066_v53  ;;  %v14229_v19 = vpop.f32.mrf.mxu1 }
 0x38c   : > { %v11084_v41 = vpop.permute.xlu0 %11083  ;;  %v14194_v62 = vpop.permute.xlu1 %11073  ;;  %v5411_v24 = vsel %vm857_vm0, %v5379_v48, %v11070_v22  ;;  %v5412_v28 = vsel %vm857_vm0, %v5380_v54, %v11071_v61  ;;  %v11040_v61 = vunpack.i.l.bf16 %v14148_v2 }
 0x38d   : > { %v5436_v43 = vpack.c.bf16 %v5412_v28, %v5411_v24  ;;  %v11086_v4 = vunpack.i.h.bf16 %v11084_v41  ;;  %v11085_v40 = vunpack.i.l.bf16 %v11084_v41  ;;  %v14237_v24 = vpop.f32.mrf.mxu1  ;;  %v11076_v28 = vunpack.i.h.bf16 %v14194_v62 }
 0x38f   : > { %9858 = vmatmul.mubr.msk.bf16.gmra.mxu1 %vm5465_vm10, %v5436_v43  ;;  %v5251_v15 = vsel %vm5234_vm15, %v5218_v38, %v11085_v40  ;;  %v5252_v6 = vsel %vm5234_vm15, %v5219_v17, %v11086_v4  ;;  %v11075_v43 = vunpack.i.l.bf16 %v14194_v62  ;;  %v3874_v4 = vld [vmem:[#allocation3 + $0xd8] sm:$0xff]  ;;  %v3875_v40 = vld [vmem:[#allocation3 + $0xe0] sm:$0xff] }
 0x390   : > { %v11089_v33 = vpop.permute.xlu0 %11088  ;;  %v11079_v29 = vpop.permute.xlu1 %11078  ;;  %v5189_v47 = vsel %vm3800_vm4, %v3875_v40, %v11076_v28 }
 0x391   : > { %v11091_v59 = vunpack.i.h.bf16 %v11089_v33  ;;  %v11090_v46 = vunpack.i.l.bf16 %v11089_v33  ;;  %v11081_v52 = vunpack.i.h.bf16 %v11079_v29  ;;  %v11080_v20 = vunpack.i.l.bf16 %v11079_v29  ;;  %v14246_v33 = vpop.f32.mrf.mxu1 }
 0x392   : > { %v5188_v34 = vsel %vm3800_vm4, %v3874_v4, %v11075_v43  ;;  %v11021_v29 = vunpack.i.h.bf16 %v14120_v23 }
 0x393   : > { %v5283_v32 = vsel %vm2747_vm7, %v5251_v15, %v11090_v46  ;;  %v5284_v58 = vsel %vm2747_vm7, %v5252_v6, %v11091_v59  ;;  %v5220_v62 = vsel %vm1345_vm2, %v5188_v34, %v11080_v20  ;;  %v5221_v46 = vsel %vm1345_vm2, %v5189_v47, %v11081_v52  ;;  %v14258_v38 = vpop.f32.mrf.mxu1 }
 0x394   : > { %v11094_v8 = vpop.permute.xlu0 %11093  ;;  %v14213_v45 = vpop.permute.xlu1 %11098  ;;  %v5253_v17 = vsel %vm5234_vm15, %v5220_v62, %v11020_v13  ;;  %v11026_v6 = vunpack.i.h.bf16 %v14138_v57  ;;  %v11051_v47 = vunpack.i.h.bf16 %v14165_v63  ;;  %v11050_v34 = vunpack.i.l.bf16 %v14165_v63 }
 0x395   : > { %v11096_v11 = vunpack.i.h.bf16 %v11094_v8  ;;  %v11095_v51 = vunpack.i.l.bf16 %v11094_v8  ;;  %v5254_v8 = vsel %vm5234_vm15, %v5221_v46, %v11021_v29  ;;  %v11056_v62 = vunpack.i.h.bf16 %v14176_v0 }
 0x396   : > { %v5286_v23 = vsel %vm2747_vm7, %v5254_v8, %v11026_v6  ;;  %v11055_v46 = vunpack.i.l.bf16 %v14176_v0 }
 0x397   : > { %v5316_v22 = vsel %vm5299_vm3, %v5283_v32, %v11095_v51  ;;  %v5317_v3 = vsel %vm5299_vm3, %v5284_v58, %v11096_v11  ;;  %v11025_v11 = vunpack.i.l.bf16 %v14138_v57 }
 0x398   : > { %v5348_v53 = vsel %vm2780_vm8, %v5316_v22, %v11035_v60  ;;  %v5349_v30 = vsel %vm2780_vm8, %v5317_v3, %v11036_v26  ;;  %v14227_v12 = vpop.permute.xlu0 %11113  ;;  %v14231_v18 = vpop.permute.xlu1 %11103 }
 0x399   : > { %v5381_v2 = vsel %vm5364_vm9, %v5348_v53, %v11040_v61  ;;  %v5382_v48 = vsel %vm5364_vm9, %v5349_v30, %v11041_v14  ;;  %v14266_v26 = vpop.f32.mrf.mxu1  ;;  %v5285_v58 = vsel %vm2747_vm7, %v5253_v17, %v11025_v11  ;;  %v11031_v14 = vunpack.i.h.bf16 %v14150_v27  ;;  %v3876_v11 = vld [vmem:[#allocation3 + $0xf0] sm:$0xff] }
 0x39a   : > { %v5413_v54 = vsel %vm857_vm0, %v5381_v2, %v11045_v7  ;;  %v5414_v41 = vsel %vm857_vm0, %v5382_v48, %v11046_v35  ;;  %v11030_v61 = vunpack.i.l.bf16 %v14150_v27  ;;  %v5190_v63 = vsel %vm3800_vm4, %v3876_v11, %v11050_v34 }
 0x39b   : > { %v5437_v44 = vpack.c.bf16 %v5414_v41, %v5413_v54  ;;  %v14272_v3 = vpop.f32.mrf.mxu1  ;;  %v5319_v30 = vsel %vm5299_vm3, %v5286_v23, %v11031_v14  ;;  %v5222_v23 = vsel %vm1345_vm2, %v5190_v63, %v11055_v46 }
 0x39c   : > { %v14241_v50 = vpop.permute.xlu0 %11118  ;;  %v14243_v37 = vpop.permute.xlu1 %11108  ;;  %v5318_v57 = vsel %vm5299_vm3, %v5285_v58, %v11030_v61 }
 0x39d   : > { %9861 = vmatprep.mubr.msk.bf16.mxu1 %vm5465_vm10, %v5437_v44  ;;  %v14280_v43 = vpop.f32.mrf.mxu1 }
 0x39f   : > { %v14291_v13 = vpop.f32.mrf.mxu1 }
 0x3a0   : > { %v14250_v59 = vpop.permute.xlu0 %11123  ;;  %v14254_v42 = vpop.permute.xlu1 %11128 }
 0x3a1   : > { %v14297_v61 = vpop.f32.mrf.mxu1 }
 0x3a4   : > { %v14262_v15 = vpop.permute.xlu0 %11133  ;;  %v11139_v51 = vpop.permute.xlu1 %11138 }
 0x3a5   : > { %v11141_v60 = vunpack.i.h.bf16 %v11139_v51  ;;  %v11140_v32 = vunpack.i.l.bf16 %v11139_v51  ;;  %v3877_v51 = vld [vmem:[#allocation3 + $0xf8] sm:$0xff] }
 0x3a6   : > { %v5191_v58 = vsel %vm3800_vm4, %v3877_v51, %v11051_v47 }
 0x3a7   : > { %v5350_v54 = vsel %vm2780_vm8, %v5318_v57, %v11140_v32  ;;  %v5351_v41 = vsel %vm2780_vm8, %v5319_v30, %v11141_v60  ;;  %v5223_v0 = vsel %vm1345_vm2, %v5191_v58, %v11056_v62  ;;  %v11116_v30 = vunpack.i.h.bf16 %v14227_v12 }
 0x3a8   : > { %v11149_v22 = vpop.permute.xlu0 %11148  ;;  %v11144_v53 = vpop.permute.xlu1 %11143 }
 0x3a9   : > { %v11151_v35 = vunpack.i.h.bf16 %v11149_v22  ;;  %v11150_v7 = vunpack.i.l.bf16 %v11149_v22  ;;  %v11146_v2 = vunpack.i.h.bf16 %v11144_v53  ;;  %v11145_v48 = vunpack.i.l.bf16 %v11144_v53 }
 0x3ab   : > { %v5383_v44 = vsel %vm5364_vm9, %v5350_v54, %v11145_v48  ;;  %v5384_v27 = vsel %vm5364_vm9, %v5351_v41, %v11146_v2  ;;  %v11115_v2 = vunpack.i.l.bf16 %v14227_v12  ;;  %v14307_v41 = vpop.f32.mrf.mxu1 }
 0x3ac   : > { %v11164_v28 = vpop.permute.xlu0 %11163  ;;  %v14282_v52 = vpop.permute.xlu1 %11153  ;;  %v5415_v20 = vsel %vm857_vm0, %v5383_v44, %v11150_v7  ;;  %v5416_v4 = vsel %vm857_vm0, %v5384_v27, %v11151_v35  ;;  %v11121_v44 = vunpack.i.h.bf16 %v14241_v50  ;;  %v11120_v27 = vunpack.i.l.bf16 %v14241_v50 }
 0x3ad   : > { %v5438_v40 = vpack.c.bf16 %v5416_v4, %v5415_v20  ;;  %v11166_v17 = vunpack.i.h.bf16 %v11164_v28  ;;  %v11165_v8 = vunpack.i.l.bf16 %v11164_v28  ;;  %v11126_v4 = vunpack.i.h.bf16 %v14250_v59 }
 0x3ae   : > { %v11155_v51 = vunpack.i.l.bf16 %v14282_v52 }
 0x3af   : > { %9862 = vmatmul.mubr.msk.bf16.gmra.mxu1 %vm5465_vm10, %v5438_v40  ;;  %v5255_v22 = vsel %vm5234_vm15, %v5222_v23, %v11165_v8  ;;  %v5256_v35 = vsel %vm5234_vm15, %v5223_v0, %v11166_v17  ;;  %v11125_v40 = vunpack.i.l.bf16 %v14250_v59  ;;  %v14325_v8 = vpop.f32.mrf.mxu1  ;;  %v11156_v59 = vunpack.i.h.bf16 %v14282_v52  ;;  %v3878_v0 = vld [vmem:[#allocation3 + $0x108] sm:$0xff] }
 0x3b0   : > { %v11169_v29 = vpop.permute.xlu0 %11168  ;;  %v11159_v6 = vpop.permute.xlu1 %11158 }
 0x3b1   : > { %v11171_v60 = vunpack.i.h.bf16 %v11169_v29  ;;  %v11170_v32 = vunpack.i.l.bf16 %v11169_v29  ;;  %v11160_v58 = vunpack.i.l.bf16 %v11159_v6  ;;  %v14334_v23 = vpop.f32.mrf.mxu1 }
 0x3b2   : > { %16324 = vst [vmem:[#allocation15_spill] sm:$0xff] %v14334_v23 }
 0x3b3   : > { %v5287_v48 = vsel %vm2747_vm7, %v5255_v22, %v11170_v32  ;;  %v5288_v54 = vsel %vm2747_vm7, %v5256_v35, %v11171_v60  ;;  %v11161_v32 = vunpack.i.h.bf16 %v11159_v6  ;;  %v5192_v35 = vsel %vm3800_vm4, %v3878_v0, %v11155_v51 }
 0x3b4   : > { %v11174_v14 = vpop.permute.xlu0 %11173  ;;  %v14301_v57 = vpop.permute.xlu1 %11178  ;;  %v5224_v52 = vsel %vm1345_vm2, %v5192_v35, %v11160_v58  ;;  %v11101_v6 = vunpack.i.h.bf16 %v14213_v45 }
 0x3b5   : > { %v11176_v7 = vunpack.i.h.bf16 %v11174_v14  ;;  %v11175_v53 = vunpack.i.l.bf16 %v11174_v14  ;;  %v3879_v14 = vld [vmem:[#allocation3 + $0x110] sm:$0xff] }
 0x3b6   : > { %v5193_v22 = vsel %vm3800_vm4, %v3879_v14, %v11156_v59 }
 0x3b7   : > { %v5320_v28 = vsel %vm5299_vm3, %v5287_v48, %v11175_v53  ;;  %v5321_v20 = vsel %vm5299_vm3, %v5288_v54, %v11176_v7  ;;  %v5225_v53 = vsel %vm1345_vm2, %v5193_v22, %v11161_v32  ;;  %v14346_v48 = vpop.f32.mrf.mxu1 }
 0x3b8   : > { %v5352_v12 = vsel %vm2780_vm8, %v5320_v28, %v11115_v2  ;;  %v5353_v47 = vsel %vm2780_vm8, %v5321_v20, %v11116_v30  ;;  %v14317_v34 = vpop.permute.xlu0 %11193  ;;  %v14319_v62 = vpop.permute.xlu1 %11183  ;;  %v11100_v2 = vunpack.i.l.bf16 %v14213_v45  ;;  %16325 = vst [vmem:[#allocation16_spill] sm:$0xff] %v14346_v48  ;;  %v11106_v20 = vunpack.i.h.bf16 %v14231_v18 }
 0x3b9   : > { %v5385_v46 = vsel %vm5364_vm9, %v5352_v12, %v11120_v27  ;;  %v5386_v50 = vsel %vm5364_vm9, %v5353_v47, %v11121_v44  ;;  %v5258_v44 = vsel %vm5234_vm15, %v5225_v53, %v11101_v6  ;;  %v14352_v28 = vpop.f32.mrf.mxu1 }
 0x3ba   : > { %v5417_v29 = vsel %vm857_vm0, %v5385_v46, %v11125_v40  ;;  %v5418_v17 = vsel %vm857_vm0, %v5386_v50, %v11126_v4  ;;  %v5257_v54 = vsel %vm5234_vm15, %v5224_v52, %v11100_v2  ;;  %16326 = vst [vmem:[#allocation17_spill] sm:$0xff] %v14352_v28  ;;  %v11105_v4 = vunpack.i.l.bf16 %v14231_v18 }
 0x3bb   : > { %v5439_v11 = vpack.c.bf16 %v5418_v17, %v5417_v29  ;;  %v5290_v45 = vsel %vm2747_vm7, %v5258_v44, %v11106_v20  ;;  %v11111_v50 = vunpack.i.h.bf16 %v14243_v37  ;;  %v11110_v29 = vunpack.i.l.bf16 %v14243_v37 }
 0x3bc   : > { %v14329_v60 = vpop.permute.xlu0 %11198  ;;  %v14331_v63 = vpop.permute.xlu1 %11188  ;;  %v5289_v46 = vsel %vm2747_vm7, %v5257_v54, %v11105_v4  ;;  %v11131_v4 = vunpack.i.h.bf16 %v14254_v42 }
 0x3bd   : > { %9865 = vmatprep.mubr.msk.bf16.mxu1 %vm5465_vm10, %v5439_v11  ;;  %v14360_v11 = vpop.f32.mrf.mxu1  ;;  %v5322_v58 = vsel %vm5299_vm3, %v5289_v46, %v11110_v29  ;;  %v5323_v18 = vsel %vm5299_vm3, %v5290_v45, %v11111_v50 }
 0x3be   : > { %16327 = vst [vmem:[#allocation18_spill] sm:$0xff] %v14360_v11 }
 0x3bf   : > { %v14368_v6 = vpop.f32.mrf.mxu1 }
 0x3c0   : > { %v14338_v7 = vpop.permute.xlu0 %11203  ;;  %v14342_v30 = vpop.permute.xlu1 %11208  ;;  %16328 = vst [vmem:[#allocation19_spill] sm:$0xff] %v14368_v6 }
 0x3c1   : > { %v14377_v45 = vpop.f32.mrf.mxu1 }
 0x3c2   : > { %16329 = vst [vmem:[#allocation20_spill] sm:$0xff] %v14377_v45 }
 0x3c4   : > { %v14350_v27 = vpop.permute.xlu0 %11213  ;;  %v11219_v40 = vpop.permute.xlu1 %11218 }
 0x3c5   : > { %v11221_v12 = vunpack.i.h.bf16 %v11219_v40  ;;  %v11220_v47 = vunpack.i.l.bf16 %v11219_v40  ;;  %v11130_v40 = vunpack.i.l.bf16 %v14254_v42 }
 0x3c7   : > { %v5354_v22 = vsel %vm2780_vm8, %v5322_v58, %v11220_v47  ;;  %v5355_v35 = vsel %vm2780_vm8, %v5323_v18, %v11221_v12  ;;  %v11136_v47 = vunpack.i.h.bf16 %v14262_v15  ;;  %v11135_v12 = vunpack.i.l.bf16 %v14262_v15  ;;  %v14379_v18 = vpop.f32.mrf.mxu1 }
 0x3c8   : > { %v11229_v17 = vpop.permute.xlu0 %11228  ;;  %v11224_v32 = vpop.permute.xlu1 %11223  ;;  %16330 = vst [vmem:[#allocation21_spill] sm:$0xff] %v14379_v18 }
 0x3c9   : > { %v11231_v59 = vunpack.i.h.bf16 %v11229_v17  ;;  %v11230_v51 = vunpack.i.l.bf16 %v11229_v17  ;;  %v11226_v0 = vunpack.i.h.bf16 %v11224_v32  ;;  %v11225_v14 = vunpack.i.l.bf16 %v11224_v32  ;;  %v3881_v32 = vld [vmem:[#allocation3 + $0x128] sm:$0xff] }
 0x3ca   : > { %v5195_v42 = vsel %vm3800_vm4, %v3881_v32, %v11131_v4  ;;  %v11201_v4 = vunpack.i.h.bf16 %v14329_v60 }
 0x3cb   : > { %v5387_v52 = vsel %vm5364_vm9, %v5354_v22, %v11225_v14  ;;  %v5388_v37 = vsel %vm5364_vm9, %v5355_v35, %v11226_v0  ;;  %v5227_v14 = vsel %vm1345_vm2, %v5195_v42, %v11136_v47  ;;  %v11196_v22 = vunpack.i.h.bf16 %v14317_v34 }
 0x3cc   : > { %v11244_v53 = vpop.permute.xlu0 %11243  ;;  %v11234_v2 = vpop.permute.xlu1 %11233  ;;  %v5419_v54 = vsel %vm857_vm0, %v5387_v52, %v11230_v51  ;;  %v5420_v44 = vsel %vm857_vm0, %v5388_v37, %v11231_v59  ;;  %v3880_v51 = vld [vmem:[#allocation3 + $0x120] sm:$0xff]  ;;  %v11195_v35 = vunpack.i.l.bf16 %v14317_v34  ;;  %v11206_v34 = vunpack.i.h.bf16 %v14338_v7 }
 0x3cd   : > { %v5440_v20 = vpack.c.bf16 %v5420_v44, %v5419_v54  ;;  %v11246_v50 = vunpack.i.h.bf16 %v11244_v53  ;;  %v11245_v29 = vunpack.i.l.bf16 %v11244_v53  ;;  %v5194_v0 = vsel %vm3800_vm4, %v3880_v51, %v11130_v40 }
 0x3ce   : > { %v5226_v15 = vsel %vm1345_vm2, %v5194_v0, %v11135_v12  ;;  %v11200_v40 = vunpack.i.l.bf16 %v14329_v60  ;;  %v11236_v32 = vunpack.i.h.bf16 %v11234_v2  ;;  %v11235_v42 = vunpack.i.l.bf16 %v11234_v2 }
 0x3cf   : > { %9866 = vmatmul.mubr.msk.bf16.gmra.mxu1 %vm5465_vm10, %v5440_v20  ;;  %v5259_v37 = vsel %vm5234_vm15, %v5226_v15, %v11245_v29  ;;  %v5260_v53 = vsel %vm5234_vm15, %v5227_v14, %v11246_v50  ;;  %v11205_v29 = vunpack.i.l.bf16 %v14338_v7 }
 0x3d0   : > { %v11249_v46 = vpop.permute.xlu0 %11248  ;;  %v11239_v17 = vpop.permute.xlu1 %11238 }
 0x3d1   : > { %v11251_v59 = vunpack.i.h.bf16 %v11249_v46  ;;  %v11250_v58 = vunpack.i.l.bf16 %v11249_v46  ;;  %v14395_v46 = vpop.f32.mrf.mxu1 }
 0x3d2   : > { %16331 = vst [vmem:[#allocation22_spill] sm:$0xff] %v14395_v46 }
 0x3d3   : > { %v5291_v12 = vsel %vm2747_vm7, %v5259_v37, %v11250_v58  ;;  %v5292_v47 = vsel %vm2747_vm7, %v5260_v53, %v11251_v59  ;;  %v11241_v58 = vunpack.i.h.bf16 %v11239_v17  ;;  %v11240_v59 = vunpack.i.l.bf16 %v11239_v17 }
 0x3d4   : > { %v11254_v52 = vpop.permute.xlu0 %11253  ;;  %v14389_v20 = vpop.permute.xlu1 %11258 }
 0x3d5   : > { %v11256_v54 = vunpack.i.h.bf16 %v11254_v52  ;;  %v11255_v44 = vunpack.i.l.bf16 %v11254_v52 }
 0x3d7   : > { %v5324_v50 = vsel %vm5299_vm3, %v5291_v12, %v11255_v44  ;;  %v5325_v51 = vsel %vm5299_vm3, %v5292_v47, %v11256_v54  ;;  %v14411_v54 = vpop.f32.mrf.mxu1  ;;  %v11181_v12 = vunpack.i.h.bf16 %v14301_v57  ;;  %v11180_v47 = vunpack.i.l.bf16 %v14301_v57 }
 0x3d8   : > { %v5356_v0 = vsel %vm2780_vm8, %v5324_v50, %v11195_v35  ;;  %v5357_v60 = vsel %vm2780_vm8, %v5325_v51, %v11196_v22  ;;  %v14403_v15 = vpop.permute.xlu0 %11273  ;;  %v14405_v14 = vpop.permute.xlu1 %11263  ;;  %16332 = vst [vmem:[#allocation23_spill] sm:$0xff] %v14411_v54  ;;  %v5197_v22 = vsel %vm3800_vm4, %v14003_v9, %v11236_v32  ;;  %v5196_v35 = vsel %vm3800_vm4, %v14001_v10, %v11235_v42 }
 0x3d9   : > { %v5389_v52 = vsel %vm5364_vm9, %v5356_v0, %v11200_v40  ;;  %v5390_v7 = vsel %vm5364_vm9, %v5357_v60, %v11201_v4  ;;  %v5228_v44 = vsel %vm1345_vm2, %v5196_v35, %v11240_v59  ;;  %v5229_v40 = vsel %vm1345_vm2, %v5197_v22, %v11241_v58 }
 0x3da   : > { %v5421_v37 = vsel %vm857_vm0, %v5389_v52, %v11205_v29  ;;  %v5422_v53 = vsel %vm857_vm0, %v5390_v7, %v11206_v34  ;;  %v14426_v34 = vpop.f32.mrf.mxu1  ;;  %v11211_v9 = vunpack.i.h.bf16 %v14342_v30  ;;  %v11210_v10 = vunpack.i.l.bf16 %v14342_v30  ;;  %v3884_v52 = vld [vmem:[#allocation3 + $0x150] sm:$0xff]  ;;  %v3885_v30 = vld [vmem:[#allocation3 + $0x158] sm:$0xff] }
 0x3db   : > { %v5441_v2 = vpack.c.bf16 %v5422_v53, %v5421_v37  ;;  %16333 = vst [vmem:[#allocation24_spill] sm:$0xff] %v14426_v34  ;;  %v5261_v29 = vsel %vm5234_vm15, %v5228_v44, %v11180_v47  ;;  %v5262_v50 = vsel %vm5234_vm15, %v5229_v40, %v11181_v12  ;;  %v11186_v42 = vunpack.i.h.bf16 %v14319_v62 }
 0x3dc   : > { %v14417_v17 = vpop.permute.xlu0 %11278  ;;  %v14421_v4 = vpop.permute.xlu1 %11268  ;;  %v11185_v0 = vunpack.i.l.bf16 %v14319_v62  ;;  %v11216_v60 = vunpack.i.h.bf16 %v14350_v27  ;;  %v11215_v57 = vunpack.i.l.bf16 %v14350_v27  ;;  %v11191_v22 = vunpack.i.h.bf16 %v14331_v63 }
 0x3dd   : > { %9869 = vmatprep.mubr.msk.bf16.mxu1 %vm5465_vm10, %v5441_v2  ;;  %v14432_v32 = vpop.f32.mrf.mxu1  ;;  %v5294_v2 = vsel %vm2747_vm7, %v5262_v50, %v11186_v42  ;;  %v11190_v35 = vunpack.i.l.bf16 %v14331_v63  ;;  %v5199_v62 = vsel %vm3800_vm4, %v3885_v30, %v11211_v9  ;;  %v5198_v44 = vsel %vm3800_vm4, %v3884_v52, %v11210_v10 }
 0x3de   : > { %16334 = vst [vmem:[#allocation25_spill] sm:$0xff] %v14432_v32  ;;  %v5293_v53 = vsel %vm2747_vm7, %v5261_v29, %v11185_v0  ;;  %v5230_v47 = vsel %vm1345_vm2, %v5198_v44, %v11215_v57  ;;  %v11261_v29 = vunpack.i.h.bf16 %v14389_v20  ;;  %v5327_v63 = vsel %vm5299_vm3, %v5294_v2, %v11191_v22 }
 0x3df   : > { %v14446_v12 = vpop.f32.mrf.mxu1  ;;  %v5326_v42 = vsel %vm5299_vm3, %v5293_v53, %v11190_v35  ;;  %v11260_v59 = vunpack.i.l.bf16 %v14389_v20  ;;  %v11276_v57 = vunpack.i.h.bf16 %v14403_v15  ;;  %v11271_v40 = vunpack.i.h.bf16 %v14421_v4 }
 0x3e0   : > { %v11294_v51 = vpop.permute.xlu0 %11293  ;;  %v11284_v58 = vpop.permute.xlu1 %11283  ;;  %16335 = vst [vmem:[#allocation26_spill] sm:$0xff] %v14446_v12 }
 0x3e1   : > { %v11286_v7 = vunpack.i.h.bf16 %v11284_v58  ;;  %v11285_v37 = vunpack.i.l.bf16 %v11284_v58  ;;  %v5231_v58 = vsel %vm1345_vm2, %v5199_v62, %v11216_v60  ;;  %v11296_v30 = vunpack.i.h.bf16 %v11294_v51  ;;  %v14459_v53 = vpop.f32.mrf.mxu1 }
 0x3e2   : > { %v11295_v10 = vunpack.i.l.bf16 %v11294_v51  ;;  %16336 = vst [vmem:[#allocation27_spill] sm:$0xff] %v14459_v53 }
 0x3e3   : > { %v5358_v52 = vsel %vm2780_vm8, %v5326_v42, %v11285_v37  ;;  %v5359_v16 = vsel %vm2780_vm8, %v5327_v63, %v11286_v7  ;;  %v11275_v7 = vunpack.i.l.bf16 %v14403_v15  ;;  %v11266_v63 = vunpack.i.h.bf16 %v14405_v14 }
 0x3e4   : > { %v11314_v27 = vpop.permute.xlu0 %11313  ;;  %v11289_v50 = vpop.permute.xlu1 %11288 }
 0x3e5   : > { %v11291_v0 = vunpack.i.h.bf16 %v11289_v50  ;;  %v11290_v9 = vunpack.i.l.bf16 %v11289_v50  ;;  %v11316_v2 = vunpack.i.h.bf16 %v11314_v27  ;;  %v11315_v22 = vunpack.i.l.bf16 %v11314_v27 }
 0x3e6   : > { %v11280_v27 = vunpack.i.l.bf16 %v14417_v17 }
 0x3e7   : > { %v5391_v60 = vsel %vm5364_vm9, %v5358_v52, %v11290_v9  ;;  %v5392_v62 = vsel %vm5364_vm9, %v5359_v16, %v11291_v0  ;;  %v11265_v9 = vunpack.i.l.bf16 %v14405_v14  ;;  %v11281_v52 = vunpack.i.h.bf16 %v14417_v17 }
 0x3e8   : > { %v11319_v44 = vpop.permute.xlu0 %11318  ;;  %v11299_v35 = vpop.permute.xlu1 %11298  ;;  %v5423_v51 = vsel %vm857_vm0, %v5391_v60, %v11295_v10  ;;  %v5424_v37 = vsel %vm857_vm0, %v5392_v62, %v11296_v30  ;;  %v11270_v10 = vunpack.i.l.bf16 %v14421_v4  ;;  %v5263_v60 = vsel %vm5234_vm15, %v5230_v47, %v11315_v22  ;;  %v14480_v4 = vld [vmem:[%s16338_s9] ss:$0 sm:$0xff] }
 0x3e9   : > { %v11321_v50 = vunpack.i.h.bf16 %v11319_v44  ;;  %v11320_v20 = vunpack.i.l.bf16 %v11319_v44  ;;  %v5442_v42 = vpack.c.bf16 %v5424_v37, %v5423_v51  ;;  %v11301_v16 = vunpack.i.h.bf16 %v11299_v35  ;;  %v14471_v30 = vpop.f32.mrf.mxu1 }
 0x3ea   : > { %v11300_v0 = vunpack.i.l.bf16 %v11299_v35  ;;  %16337 = vst [vmem:[#allocation28_spill] sm:$0xff] %v14471_v30  ;;  %v5264_v62 = vsel %vm5234_vm15, %v5231_v58, %v11316_v2 }
 0x3eb   : > { %9870 = vmatmul.mubr.msk.bf16.gmra.mxu1 %vm5465_vm10, %v5442_v42  ;;  %v5295_v51 = vsel %vm2747_vm7, %v5263_v60, %v11320_v20  ;;  %v5296_v17 = vsel %vm2747_vm7, %v5264_v62, %v11321_v50  ;;  %v5201_v42 = vsel %vm3800_vm4, %v14091_v31, %v11301_v16  ;;  %v14495_v31 = vld [vmem:[%s16235_s10] ss:$0 sm:$0xff] }
 0x3ec   : > { %v11324_v15 = vpop.permute.xlu0 %11323  ;;  %v11304_v35 = vpop.permute.xlu1 %11303  ;;  %v5200_v47 = vsel %vm3800_vm4, %v14089_v25, %v11300_v0 }
 0x3ed   : > { %v11326_v14 = vunpack.i.h.bf16 %v11324_v15  ;;  %v11325_v44 = vunpack.i.l.bf16 %v11324_v15  ;;  %v11306_v37 = vunpack.i.h.bf16 %v11304_v35  ;;  %v11305_v53 = vunpack.i.l.bf16 %v11304_v35 }
 0x3ef   : > { %v5328_v58 = vsel %vm5299_vm3, %v5295_v51, %v11325_v44  ;;  %v5329_v2 = vsel %vm5299_vm3, %v5296_v17, %v11326_v14  ;;  %v9847_v22 = vpop.f32.mrf.mxu1  ;;  %v5232_v15 = vsel %vm1345_vm2, %v5200_v47, %v11305_v53  ;;  %v5233_v60 = vsel %vm1345_vm2, %v5201_v42, %v11306_v37 }
 0x3f0   : > { %v5360_v50 = vsel %vm2780_vm8, %v5328_v58, %v11275_v7  ;;  %v5361_v20 = vsel %vm2780_vm8, %v5329_v2, %v11276_v57  ;;  %v11329_v16 = vpop.permute.xlu0 %11328  ;;  %v5265_v25 = vsel %vm5234_vm15, %v5232_v15, %v11260_v59  ;;  %v5266_v0 = vsel %vm5234_vm15, %v5233_v60, %v11261_v29  ;;  %v11309_v7 = vpop.permute.xlu1 %11308 }
 0x3f1   : > { %v5688_v62 = vmul.f32 %v9847_v22, %v14480_v4  ;;  %v11331_v14 = vunpack.i.h.bf16 %v11329_v16  ;;  %v5552_v44 = vpop.f32.mrf.mxu1  ;;  %v5297_v57 = vsel %vm2747_vm7, %v5265_v25, %v11265_v9  ;;  %v5298_v53 = vsel %vm2747_vm7, %v5266_v0, %v11266_v63 }
 0x3f2   : > { %v11330_v35 = vunpack.i.l.bf16 %v11329_v16  ;;  %v5393_v51 = vsel %vm5364_vm9, %v5360_v50, %v11280_v27  ;;  %v5394_v37 = vsel %vm5364_vm9, %v5361_v20, %v11281_v52  ;;  %v11311_v42 = vunpack.i.h.bf16 %v11309_v7 }
 0x3f3   : > { %v5727_v17 = vadd.f32 %v14495_v31, %v5688_v62  ;;  %v11310_v59 = vunpack.i.l.bf16 %v11309_v7  ;;  %v9848_v47 = vpop.f32.mrf.mxu1  ;;  %v5426_v58 = vsel %vm857_vm0, %v5394_v37, %v11331_v14  ;;  %v5330_v2 = vsel %vm5299_vm3, %v5297_v57, %v11270_v10 }
 0x3f4   : > { %v5425_v29 = vsel %vm857_vm0, %v5393_v51, %v11330_v35  ;;  %v5331_v9 = vsel %vm5299_vm3, %v5298_v53, %v11271_v40  ;;  %v16339_v63 = vunpack.i.l.bf16 %v12702_v5  ;;  %v16340_v50 = vunpack.i.h.bf16 %v12702_v5  ;;  %v11334_v15 = vpop.permute.xlu1 %11333 }
 0x3f5   : > { %v5759_v22 = vmax.f32 %v5727_v17, 0.0  ;;  %v5686_v20 = vmul.f32 %v14480_v4, %v5552_v44  ;;  %v5555_v60 = vpop.f32.mrf.mxu1  ;;  %v5689_v25 = vmul.f32 %v9848_v47, %v14480_v4  ;;  %v11336_v10 = vunpack.i.h.bf16 %v11334_v15 }
 0x3f6   : > { %v5362_v27 = vsel %vm2780_vm8, %v5330_v2, %v16339_v63  ;;  %v5363_v52 = vsel %vm2780_vm8, %v5331_v9, %v16340_v50  ;;  %v11335_v62 = vunpack.i.l.bf16 %v11334_v15  ;;  %v5687_v14 = vmul.f32 %v14480_v4, %v5555_v60 }
 0x3f7   : > { %v5396_v16 = vsel %vm5364_vm9, %v5363_v52, %v11311_v42  ;;  %v5824_v0 = vrot.slane %v5759_v22, 7  ;;  %v5725_v40 = vadd.f32 %v14495_v31, %v5686_v20  ;;  %v5395_v7 = vsel %vm5364_vm9, %v5362_v27, %v11310_v59 }
 0x3f8   : > { %v5728_v5 = vadd.f32 %v14495_v31, %v5689_v25  ;;  %v5428_v57 = vsel %vm857_vm0, %v5396_v16, %v11336_v10  ;;  %v5443_v44 = vpack.c.bf16 %v5426_v58, %v5425_v29  ;;  %v5427_v51 = vsel %vm857_vm0, %v5395_v7, %v11335_v62 }
 0x3f9   : > { %v5918_v53 = vsel %vm1210_vm1, 0.0, %v5824_v0  ;;  %v5757_v35 = vmax.f32 %v5725_v40, 0.0  ;;  %v5726_v17 = vadd.f32 %v14495_v31, %v5687_v14  ;;  %v5444_v42 = vpack.c.bf16 %v5428_v57, %v5427_v51 }
 0x3fa   : > { %5955 = vst.msk [vmem:[#allocation3 + $0x30] sm:$0xff] %vm3800_vm4, %v5918_v53  ;;  %v5760_v37 = vmax.f32 %v5728_v5, 0.0  ;;  %9873 = vmatprep.mubr.msk.bf16.mxu1 %vm5465_vm10, %v5443_v44 }
 0x3fb   : > { %v5821_v47 = vrot.slane %v5757_v35, 7  ;;  %v5758_v59 = vmax.f32 %v5726_v17, 0.0  ;;  %9874 = vmatmul.mubr.msk.bf16.gmra.mxu1 %vm5465_vm10, %v5444_v42 }
 0x3fc   : > { %v5825_v2 = vrot.slane %v5760_v37, 7 }
 0x3fd   : > { %v5917_v29 = vsel %vm1210_vm1, 0.0, %v5821_v47  ;;  %v5822_v58 = vrot.slane %v5758_v59, 7 }
 0x3fe   : > { %5952 = vst.msk [vmem:[#allocation3 + $0x18] sm:$0xff] %vm3800_vm4, %v5917_v29  ;;  %v5826_v9 = vsel %vm1210_vm1, %v5824_v0, %v5825_v2  ;;  %v5934_v22 = vsel %vm1210_vm1, %v5825_v2, 0.0 }
 0x3ff   : > { %5957 = vst.msk [vmem:[#allocation3 + $0x40] sm:$0x3] %vm3803_vm5, %v5934_v22  ;;  %v5823_v63 = vsel %vm1210_vm1, %v5821_v47, %v5822_v58  ;;  %v5933_v27 = vsel %vm1210_vm1, %v5822_v58, 0.0 }
 0x400   : > { %5956 = vst.msk [vmem:[#allocation3 + $0x38] sm:$0xff] %vm3800_vm4, %v5826_v9  ;;  %5953 = vst.msk [vmem:[#allocation3 + $0x20] sm:$0xff] %vm3800_vm4, %v5823_v63 }
 0x401   : > { %5954 = vst.msk [vmem:[#allocation3 + $0x28] sm:$0x3] %vm3803_vm5, %v5933_v27  ;;  %v14539_v50 = vld [vmem:[#allocation3 + $0x30] sm:$0xff] }
 0x405   : > { %v14560_v42 = vld [vmem:[#allocation3 + $0x18] sm:$0xff] }
 0x407   : > { %v14541_v52 = vld [vmem:[#allocation3 + $0x38] sm:$0xff]  ;;  %v14554_v57 = vld [vmem:[#allocation3 + $0x20] sm:$0xff] }
 0x408   : > { %v11367_v20 = vpack.i.bf16 %v14541_v52, %v14539_v50  ;;  %v6227_v15 = vld [vmem:[#allocation3 + $0x31] sm:$0xff]  ;;  %v6228_v60 = vld [vmem:[#allocation3 + $0x39] sm:$0xff]  ;;  %v6038_v53 = vld [vmem:[#allocation3 + $0x21] sm:$0xff]  ;;  %v11402_v59 = vpack.i.bf16 %v14554_v57, %v14560_v42 }
 0x409   : > { %v11372_v16 = vpack.i.bf16 %v6228_v60, %v6227_v15  ;;  %v6259_v25 = vld [vmem:[#allocation3 + $0x32] sm:$0xff]  ;;  %v6260_v10 = vld [vmem:[#allocation3 + $0x3a] sm:$0xff]  ;;  %v6070_v27 = vld [vmem:[#allocation3 + $0x22] sm:$0xff] }
 0x40a   : > { %11368 = vrot.lane.b32.xlu0 %v11367_v20, %s16311_s6  ;;  %11353 = vrot.lane.b32.xlu1 %v11367_v20, %s16280_s28  ;;  %v11377_v0 = vpack.i.bf16 %v6260_v10, %v6259_v25  ;;  %v6037_v44 = vld [vmem:[#allocation3 + $0x19] sm:$0xff] }
 0x40b   : > { %v11392_v2 = vpack.i.bf16 %v6038_v53, %v6037_v44  ;;  %v6069_v63 = vld [vmem:[#allocation3 + $0x1a] sm:$0xff] }
 0x40e   : > { %11373 = vrot.lane.b32.xlu0 %v11372_v16, %s16282_s4  ;;  %11358 = vrot.lane.b32.xlu1 %v11372_v16, %s16315_s26 }
 0x40f   : > { %v9851_v40 = vpop.f32.mrf.mxu1 }
 0x410   : > { %v5692_v62 = vmul.f32 %v9851_v40, %v14480_v4  ;;  %v11397_v40 = vpack.i.bf16 %v6070_v27, %v6069_v63  ;;  %v12006_v63 = vld [vmem:[%s16236_s11 + $0x8] sm:$0xff]  }
 0x411   : > { %v5568_v14 = vpop.f32.mrf.mxu1 }
 0x412   : > { %11378 = vrot.lane.b32.xlu0 %v11377_v0, %s16318_s0  ;;  %11363 = vrot.lane.b32.xlu1 %v11377_v0, %s16284_s5  ;;  %v5731_v7 = vadd.f32 %v14495_v31, %v5692_v62  ;;  %v5690_v5 = vmul.f32 %v14480_v4, %v5568_v14 }
 0x413   : > { %v9852_v35 = vpop.f32.mrf.mxu1 }
 0x414   : > { %v5763_v51 = vmax.f32 %v5731_v7, 0.0  ;;  %v5729_v17 = vadd.f32 %v14495_v31, %v5690_v5  ;;  %v5693_v37 = vmul.f32 %v9852_v35, %v14480_v4 }
 0x415   : > { %v5571_v47 = vpop.f32.mrf.mxu1 }
 0x416   : > { %11388 = vrot.lane.b32.xlu0 %v11377_v0, %s16314_s24  ;;  %11383 = vrot.lane.b32.xlu1 %v11372_v16, %s16323_s2  ;;  %v5830_v29 = vrot.slane %v5763_v51, 7  ;;  %v5761_v58 = vmax.f32 %v5729_v17, 0.0  ;;  %v5732_v9 = vadd.f32 %v14495_v31, %v5693_v37  ;;  %v5691_v22 = vmul.f32 %v14480_v4, %v5571_v47 }
 0x418   : > { %v5920_v20 = vsel %vm1210_vm1, 0.0, %v5830_v29  ;;  %v5827_v15 = vrot.slane %v5761_v58, 7  ;;  %v5764_v60 = vmax.f32 %v5732_v9, 0.0  ;;  %v5730_v16 = vadd.f32 %v14495_v31, %v5691_v22 }
 0x419   : > { %5961 = vst.msk [vmem:[#allocation3 + $0x60] sm:$0xff] %vm3800_vm4, %v5920_v20 }
 0x41a   : > { %11403 = vrot.lane.b32.xlu0 %v11402_v59, %s16280_s28  ;;  %11393 = vrot.lane.b32.xlu1 %v11392_v2, %s16323_s2  ;;  %v5919_v25 = vsel %vm1210_vm1, 0.0, %v5827_v15  ;;  %v5831_v10 = vrot.slane %v5764_v60, 7  ;;  %v5762_v0 = vmax.f32 %v5730_v16, 0.0  ;;  %v12005_v59 = vld [vmem:[%s16236_s11 + $0x10] ss:$0 sps:$4 sm:$0x33]  }
 0x41b   : > { %5958 = vst.msk [vmem:[#allocation3 + $0x48] sm:$0xff] %vm3800_vm4, %v5919_v25  ;;  %v7656_v58 = vsel %vm5514_vm14, %v12005_v59, 0  ;;  %9985 = vmatprep.subr.msk.bf16.mxu0 %vm5514_vm14, %v12005_v59 }
 0x41c   : > { %v5832_v62 = vsel %vm1210_vm1, %v5830_v29, %v5831_v10  ;;  %v5936_v14 = vsel %vm1210_vm1, %v5831_v10, 0.0  ;;  %v5828_v7 = vrot.slane %v5762_v0, 7  ;;  %9878 = vmatpush3.bf16.msra.mxu0 %v7656_v58 }
 0x41d   : > { %5963 = vst.msk [vmem:[#allocation3 + $0x70] sm:$0x3] %vm3803_vm5, %v5936_v14  ;;  %9879 = vmatprep.subr.bf16.mxu0 %v12006_v63 }
 0x41e   : > { %11408 = vrot.lane.b32.xlu0 %v11392_v2, %s16315_s26  ;;  %11398 = vrot.lane.b32.xlu1 %v11397_v40, %s16314_s24  ;;  %5962 = vst.msk [vmem:[#allocation3 + $0x68] sm:$0xff] %vm3800_vm4, %v5832_v62  ;;  %v5829_v5 = vsel %vm1210_vm1, %v5827_v15, %v5828_v7  ;;  %v5935_v44 = vsel %vm1210_vm1, %v5828_v7, 0.0 }
 0x41f   : > { %5960 = vst.msk [vmem:[#allocation3 + $0x58] sm:$0x3] %vm3803_vm5, %v5935_v44 }
 0x420   : > { %5959 = vst.msk [vmem:[#allocation3 + $0x50] sm:$0xff] %vm3800_vm4, %v5829_v5  ;;  %v6199_v53 = vld [vmem:[#allocation3 + $0x60] sm:$0xff]  ;;  %9880 = vmatpush3.bf16.msra.mxu0 %v12006_v63  ;;  %v16341_v63 = vmov 0.0  }
 0x422   : > { %11413 = vrot.lane.b32.xlu0 %v11397_v40, %s16284_s5  ;;  %v12007_v40 = vld [vmem:[%s16236_s11] sm:$0xff]   ;;  %v6197_v5 = vld [vmem:[#allocation3 + $0x48] sm:$0xff] }
 0x423   : > { %9881 = vmatprep.subr.bf16.mxu0 %v12007_v40 }
 0x424   : > { %9882 = vmatpush3.bf16.msra.mxu0 %v12007_v40 }
 0x425   : > { %v6200_v35 = vld [vmem:[#allocation3 + $0x68] sm:$0xff]  ;;  %9915 = vmatprep.subr.mxu0 %v16341_v63 }
 0x426   : > { %v11432_v51 = vpack.i.bf16 %v6200_v35, %v6199_v53  ;;  %v6231_v17 = vld [vmem:[#allocation3 + $0x61] sm:$0xff]  ;;  %v6232_v37 = vld [vmem:[#allocation3 + $0x69] sm:$0xff] }
 0x427   : > { %v11437_v47 = vpack.i.bf16 %v6232_v37, %v6231_v17  ;;  %v6263_v2 = vld [vmem:[#allocation3 + $0x62] sm:$0xff]  ;;  %v6264_v29 = vld [vmem:[#allocation3 + $0x6a] sm:$0xff]  ;;  %v6262_v25 = vld [vmem:[#allocation3 + $0x52] sm:$0xff] }
 0x428   : > { %11433 = vrot.lane.b32.xlu0 %v11432_v51, %s16311_s6  ;;  %11418 = vrot.lane.b32.xlu1 %v11432_v51, %s16280_s28  ;;  %v11442_v9 = vpack.i.bf16 %v6264_v29, %v6263_v2  ;;  %v6261_v16 = vld [vmem:[#allocation3 + $0x4a] sm:$0xff]  ;;  %s16375_s28 = sld [smem:[#allocation39_spill]] }
 0x429   : > { %v6198_v10 = vld [vmem:[#allocation3 + $0x50] sm:$0xff]  ;;  %v11467_v53 = vpack.i.bf16 %v6262_v25, %v6261_v16 }
 0x42a   : > { %v11457_v35 = vpack.i.bf16 %v6198_v10, %v6197_v5  ;;  %v6229_v59 = vld [vmem:[#allocation3 + $0x49] sm:$0xff]  ;;  %v6230_v2 = vld [vmem:[#allocation3 + $0x51] sm:$0xff] }
 0x42c   : > { %11438 = vrot.lane.b32.xlu0 %v11437_v47, %s16282_s4  ;;  %11423 = vrot.lane.b32.xlu1 %v11437_v47, %s16315_s26 }
 0x42f   : > { %v9855_v22 = vpop.f32.mrf.mxu1 }
 0x430   : > { %11443 = vrot.lane.b32.xlu0 %v11442_v9, %s16318_s0  ;;  %11428 = vrot.lane.b32.xlu1 %v11442_v9, %s16284_s5  ;;  %v5696_v27 = vmul.f32 %v9855_v22, %v14480_v4 }
 0x431   : > { %v5584_v20 = vpop.f32.mrf.mxu1 }
 0x432   : > { %v5735_v15 = vadd.f32 %v14495_v31, %v5696_v27  ;;  %v5694_v60 = vmul.f32 %v14480_v4, %v5584_v20  ;;  %v11462_v27 = vpack.i.bf16 %v6230_v2, %v6229_v59 }
 0x433   : > { %v9856_v0 = vpop.f32.mrf.mxu1 }
 0x434   : > { %11453 = vrot.lane.b32.xlu0 %v11442_v9, %s16314_s24  ;;  %11448 = vrot.lane.b32.xlu1 %v11437_v47, %s16323_s2  ;;  %v5767_v62 = vmax.f32 %v5735_v15, 0.0  ;;  %v5733_v14 = vadd.f32 %v14495_v31, %v5694_v60  ;;  %v5697_v7 = vmul.f32 %v9856_v0, %v14480_v4 }
 0x435   : > { %v5587_v44 = vpop.f32.mrf.mxu1 }
 0x436   : > { %v5836_v51 = vrot.slane %v5767_v62, 7  ;;  %v5765_v17 = vmax.f32 %v5733_v14, 0.0  ;;  %v5736_v37 = vadd.f32 %v14495_v31, %v5697_v7  ;;  %v5695_v47 = vmul.f32 %v14480_v4, %v5587_v44 }
 0x438   : > { %11468 = vrot.lane.b32.xlu0 %v11467_v53, %s16318_s0  ;;  %11458 = vrot.lane.b32.xlu1 %v11457_v35, %s16311_s6  ;;  %v5922_v29 = vsel %vm1210_vm1, 0.0, %v5836_v51  ;;  %v5833_v58 = vrot.slane %v5765_v17, 7  ;;  %v5768_v9 = vmax.f32 %v5736_v37, 0.0  ;;  %v5734_v22 = vadd.f32 %v14495_v31, %v5695_v47 }
 0x439   : > { %5967 = vst.msk [vmem:[#allocation3 + $0x90] sm:$0xff] %vm3800_vm4, %v5922_v29 }
 0x43a   : > { %v5921_v20 = vsel %vm1210_vm1, 0.0, %v5833_v58  ;;  %v5837_v15 = vrot.slane %v5768_v9, 7  ;;  %v5766_v60 = vmax.f32 %v5734_v22, 0.0 }
 0x43b   : > { %5964 = vst.msk [vmem:[#allocation3 + $0x78] sm:$0xff] %vm3800_vm4, %v5921_v20 }
 0x43c   : > { %11463 = vrot.lane.b32.xlu1 %v11462_v27, %s16282_s4  ;;  %11483 = vrot.lane.b32.xlu0 %v11457_v35, %s16342_s27  ;;  %v5838_v16 = vsel %vm1210_vm1, %v5836_v51, %v5837_v15  ;;  %v5938_v25 = vsel %vm1210_vm1, %v5837_v15, 0.0  ;;  %v5834_v10 = vrot.slane %v5766_v60, 7 }
 0x43d   : > { %5969 = vst.msk [vmem:[#allocation3 + $0xa0] sm:$0x3] %vm3803_vm5, %v5938_v25 }
 0x43e   : > { %5968 = vst.msk [vmem:[#allocation3 + $0x98] sm:$0xff] %vm3800_vm4, %v5838_v16  ;;  %v5835_v0 = vsel %vm1210_vm1, %v5833_v58, %v5834_v10  ;;  %v5937_v40 = vsel %vm1210_vm1, %v5834_v10, 0.0 }
 0x43f   : > { %5966 = vst.msk [vmem:[#allocation3 + $0x88] sm:$0x3] %vm3803_vm5, %v5937_v40 }
 0x440   : > { %5965 = vst.msk [vmem:[#allocation3 + $0x80] sm:$0xff] %vm3800_vm4, %v5835_v0  ;;  %11488 = vrot.lane.b32.xlu0 %v11462_v27, %s16315_s26  ;;  %11473 = vrot.lane.b32.xlu1 %v11462_v27, %s16323_s2  ;;  %v6203_v62 = vld [vmem:[#allocation3 + $0x90] sm:$0xff] }
 0x442   : > { %v6201_v16 = vld [vmem:[#allocation3 + $0x78] sm:$0xff] }
 0x444   : > { %11493 = vrot.lane.b32.xlu0 %v11467_v53, %s16284_s5  ;;  %11478 = vrot.lane.b32.xlu1 %v11467_v53, %s16314_s24 }
 0x445   : > { %v6204_v14 = vld [vmem:[#allocation3 + $0x98] sm:$0xff] }
 0x446   : > { %v11512_v7 = vpack.i.bf16 %v6204_v14, %v6203_v62  ;;  %v6235_v5 = vld [vmem:[#allocation3 + $0x91] sm:$0xff]  ;;  %v6236_v44 = vld [vmem:[#allocation3 + $0x99] sm:$0xff] }
 0x447   : > { %v11517_v35 = vpack.i.bf16 %v6236_v44, %v6235_v5  ;;  %v6267_v51 = vld [vmem:[#allocation3 + $0x92] sm:$0xff]  ;;  %v6268_v17 = vld [vmem:[#allocation3 + $0x9a] sm:$0xff]  ;;  %v6266_v9 = vld [vmem:[#allocation3 + $0x82] sm:$0xff] }
 0x448   : > { %11513 = vrot.lane.b32.xlu0 %v11512_v7, %s16311_s6  ;;  %11498 = vrot.lane.b32.xlu1 %v11512_v7, %s16342_s27  ;;  %v11522_v37 = vpack.i.bf16 %v6268_v17, %v6267_v51  ;;  %v6265_v58 = vld [vmem:[#allocation3 + $0x7a] sm:$0xff] }
 0x449   : > { %v6202_v22 = vld [vmem:[#allocation3 + $0x80] sm:$0xff]  ;;  %v11547_v10 = vpack.i.bf16 %v6266_v9, %v6265_v58 }
 0x44a   : > { %v11537_v0 = vpack.i.bf16 %v6202_v22, %v6201_v16  ;;  %v6233_v5 = vld [vmem:[#allocation3 + $0x79] sm:$0xff]  ;;  %v6234_v44 = vld [vmem:[#allocation3 + $0x81] sm:$0xff] }
 0x44c   : > { %11518 = vrot.lane.b32.xlu0 %v11517_v35, %s16282_s4  ;;  %11503 = vrot.lane.b32.xlu1 %v11517_v35, %s16315_s26 }
 0x44f   : > { %v9859_v53 = vpop.f32.mrf.mxu1 }
 0x450   : > { %11523 = vrot.lane.b32.xlu0 %v11522_v37, %s16318_s0  ;;  %11508 = vrot.lane.b32.xlu1 %v11522_v37, %s16284_s5  ;;  %v5700_v47 = vmul.f32 %v9859_v53, %v14480_v4  ;;  %v11542_v53 = vpack.i.bf16 %v6234_v44, %v6233_v5 }
 0x451   : > { %v5600_v59 = vpop.f32.mrf.mxu1 }
 0x452   : > { %v5739_v2 = vadd.f32 %v14495_v31, %v5700_v47  ;;  %v5698_v29 = vmul.f32 %v14480_v4, %v5600_v59 }
 0x453   : > { %v9860_v27 = vpop.f32.mrf.mxu1 }
 0x454   : > { %11533 = vrot.lane.b32.xlu0 %v11522_v37, %s16314_s24  ;;  %11528 = vrot.lane.b32.xlu1 %v11517_v35, %s16323_s2  ;;  %v5771_v20 = vmax.f32 %v5739_v2, 0.0  ;;  %v5737_v15 = vadd.f32 %v14495_v31, %v5698_v29  ;;  %v5701_v60 = vmul.f32 %v9860_v27, %v14480_v4 }
 0x455   : > { %v5603_v25 = vpop.f32.mrf.mxu1 }
 0x456   : > { %v5842_v40 = vrot.slane %v5771_v20, 7  ;;  %v5769_v62 = vmax.f32 %v5737_v15, 0.0  ;;  %v5740_v14 = vadd.f32 %v14495_v31, %v5701_v60  ;;  %v5699_v7 = vmul.f32 %v14480_v4, %v5603_v25 }
 0x458   : > { %11548 = vrot.lane.b32.xlu0 %v11547_v10, %s16318_s0  ;;  %11538 = vrot.lane.b32.xlu1 %v11537_v0, %s16311_s6  ;;  %v5924_v35 = vsel %vm1210_vm1, 0.0, %v5842_v40  ;;  %v5839_v51 = vrot.slane %v5769_v62, 7  ;;  %v5772_v17 = vmax.f32 %v5740_v14, 0.0  ;;  %v5738_v37 = vadd.f32 %v14495_v31, %v5699_v7  ;;  %v14672_v7 = vpop.permute.xlu0 %11338 }
 0x459   : > { %5973 = vst.msk [vmem:[#allocation3 + $0xc0] sm:$0xff] %vm3800_vm4, %v5924_v35 }
 0x45a   : > { %v5923_v47 = vsel %vm1210_vm1, 0.0, %v5839_v51  ;;  %v5843_v59 = vrot.slane %v5772_v17, 7  ;;  %v5770_v2 = vmax.f32 %v5738_v37, 0.0 }
 0x45b   : > { %5970 = vst.msk [vmem:[#allocation3 + $0xa8] sm:$0xff] %vm3800_vm4, %v5923_v47 }
 0x45c   : > { %11543 = vrot.lane.b32.xlu1 %v11542_v53, %s16282_s4  ;;  %11563 = vrot.lane.b32.xlu0 %v11537_v0, %s16342_s27  ;;  %v5844_v29 = vsel %vm1210_vm1, %v5842_v40, %v5843_v59  ;;  %v5940_v58 = vsel %vm1210_vm1, %v5843_v59, 0.0  ;;  %v5840_v9 = vrot.slane %v5770_v2, 7 }
 0x45d   : > { %5975 = vst.msk [vmem:[#allocation3 + $0xd0] sm:$0x3] %vm3803_vm5, %v5940_v58  ;;  %v14683_v58 = vpop.permute.xlu0 %11343 }
 0x45e   : > { %5974 = vst.msk [vmem:[#allocation3 + $0xc8] sm:$0xff] %vm3800_vm4, %v5844_v29  ;;  %v5841_v22 = vsel %vm1210_vm1, %v5839_v51, %v5840_v9  ;;  %v5939_v27 = vsel %vm1210_vm1, %v5840_v9, 0.0  ;;  %v14685_v9 = vpop.permute.xlu1 %11348 }
 0x45f   : > { %5972 = vst.msk [vmem:[#allocation3 + $0xb8] sm:$0x3] %vm3803_vm5, %v5939_v27 }
 0x460   : > { %5971 = vst.msk [vmem:[#allocation3 + $0xb0] sm:$0xff] %vm3800_vm4, %v5841_v22  ;;  %11568 = vrot.lane.b32.xlu0 %v11542_v53, %s16315_s26  ;;  %11553 = vrot.lane.b32.xlu1 %v11542_v53, %s16323_s2  ;;  %v6207_v20 = vld [vmem:[#allocation3 + $0xc0] sm:$0xff] }
 0x462   : > { %v6205_v22 = vld [vmem:[#allocation3 + $0xa8] sm:$0xff] }
 0x464   : > { %11573 = vrot.lane.b32.xlu0 %v11547_v10, %s16284_s5  ;;  %11558 = vrot.lane.b32.xlu1 %v11547_v10, %s16314_s24 }
 0x465   : > { %v6208_v15 = vld [vmem:[#allocation3 + $0xc8] sm:$0xff] }
 0x466   : > { %v11592_v60 = vpack.i.bf16 %v6208_v15, %v6207_v20  ;;  %v6239_v16 = vld [vmem:[#allocation3 + $0xc1] sm:$0xff]  ;;  %v6240_v25 = vld [vmem:[#allocation3 + $0xc9] sm:$0xff] }
 0x467   : > { %v11597_v0 = vpack.i.bf16 %v6240_v25, %v6239_v16  ;;  %v6271_v40 = vld [vmem:[#allocation3 + $0xc2] sm:$0xff]  ;;  %v6272_v62 = vld [vmem:[#allocation3 + $0xca] sm:$0xff]  ;;  %v6270_v37 = vld [vmem:[#allocation3 + $0xb2] sm:$0xff] }
 0x468   : > { %11593 = vrot.lane.b32.xlu0 %v11592_v60, %s16311_s6  ;;  %11578 = vrot.lane.b32.xlu1 %v11592_v60, %s16342_s27  ;;  %v11602_v14 = vpack.i.bf16 %v6272_v62, %v6271_v40  ;;  %v6269_v17 = vld [vmem:[#allocation3 + $0xaa] sm:$0xff] }
 0x469   : > { %v6206_v53 = vld [vmem:[#allocation3 + $0xb0] sm:$0xff]  ;;  %v11627_v20 = vpack.i.bf16 %v6270_v37, %v6269_v17 }
 0x46a   : > { %v11617_v15 = vpack.i.bf16 %v6206_v53, %v6205_v22  ;;  %v6237_v40 = vld [vmem:[#allocation3 + $0xa9] sm:$0xff]  ;;  %v6238_v62 = vld [vmem:[#allocation3 + $0xb1] sm:$0xff] }
 0x46c   : > { %11598 = vrot.lane.b32.xlu0 %v11597_v0, %s16282_s4  ;;  %11583 = vrot.lane.b32.xlu1 %v11597_v0, %s16315_s26 }
 0x46f   : > { %v9863_v10 = vpop.f32.mrf.mxu1 }
 0x470   : > { %11603 = vrot.lane.b32.xlu0 %v11602_v14, %s16318_s0  ;;  %11588 = vrot.lane.b32.xlu1 %v11602_v14, %s16284_s5  ;;  %v5704_v5 = vmul.f32 %v9863_v10, %v14480_v4 }
 0x471   : > { %v5616_v44 = vpop.f32.mrf.mxu1 }
 0x472   : > { %v5743_v35 = vadd.f32 %v14495_v31, %v5704_v5  ;;  %v5702_v51 = vmul.f32 %v14480_v4, %v5616_v44 }
 0x473   : > { %v9864_v47 = vpop.f32.mrf.mxu1 }
 0x474   : > { %11613 = vrot.lane.b32.xlu0 %v11602_v14, %s16314_s24  ;;  %11608 = vrot.lane.b32.xlu1 %v11597_v0, %s16323_s2  ;;  %v5775_v59 = vmax.f32 %v5743_v35, 0.0  ;;  %v5741_v2 = vadd.f32 %v14495_v31, %v5702_v51  ;;  %v5705_v29 = vmul.f32 %v9864_v47, %v14480_v4  ;;  %v11622_v35 = vpack.i.bf16 %v6238_v62, %v6237_v40 }
 0x475   : > { %v5619_v27 = vpop.f32.mrf.mxu1 }
 0x476   : > { %v5848_v60 = vrot.slane %v5775_v59, 7  ;;  %v5773_v16 = vmax.f32 %v5741_v2, 0.0  ;;  %v5744_v25 = vadd.f32 %v14495_v31, %v5705_v29  ;;  %v5703_v0 = vmul.f32 %v14480_v4, %v5619_v27 }
 0x478   : > { %11628 = vrot.lane.b32.xlu0 %v11627_v20, %s16318_s0  ;;  %11618 = vrot.lane.b32.xlu1 %v11617_v15, %s16311_s6  ;;  %v5926_v14 = vsel %vm1210_vm1, 0.0, %v5848_v60  ;;  %v5845_v10 = vrot.slane %v5773_v16, 7  ;;  %v5776_v5 = vmax.f32 %v5744_v25, 0.0  ;;  %v5742_v44 = vadd.f32 %v14495_v31, %v5703_v0 }
 0x479   : > { %5979 = vst.msk [vmem:[#allocation3 + $0xf0] sm:$0xff] %vm3800_vm4, %v5926_v14 }
 0x47a   : > { %v5925_v51 = vsel %vm1210_vm1, 0.0, %v5845_v10  ;;  %v5849_v17 = vrot.slane %v5776_v5, 7  ;;  %v5774_v37 = vmax.f32 %v5742_v44, 0.0  ;;  %v6003_v44 = vld [vmem:[#allocation3] sm:$0xff] }
 0x47b   : > { %5976 = vst.msk [vmem:[#allocation3 + $0xd8] sm:$0xff] %vm3800_vm4, %v5925_v51  ;;  %v11340_v51 = vunpack.i.l.bf16 %v14672_v7 }
 0x47c   : > { %v14695_v53 = vpop.permute.xlu0 %11368  ;;  %v14697_v47 = vpop.permute.xlu1 %11353  ;;  %11623 = vrot.lane.b32.xlu1 %v11622_v35, %s16282_s4  ;;  %11643 = vrot.lane.b32.xlu0 %v11617_v15, %s16342_s27  ;;  %v5850_v59 = vsel %vm1210_vm1, %v5848_v60, %v5849_v17  ;;  %v5942_v2 = vsel %vm1210_vm1, %v5849_v17, 0.0  ;;  %v5846_v29 = vrot.slane %v5774_v37, 7 }
 0x47d   : > { %5981 = vst.msk [vmem:[#allocation3 + $0x100] sm:$0x3] %vm3803_vm5, %v5942_v2 }
 0x47e   : > { %5980 = vst.msk [vmem:[#allocation3 + $0xf8] sm:$0xff] %vm3800_vm4, %v5850_v59  ;;  %v5847_v22 = vsel %vm1210_vm1, %v5845_v10, %v5846_v29  ;;  %v5941_v27 = vsel %vm1210_vm1, %v5846_v29, 0.0 }
 0x47f   : > { %5978 = vst.msk [vmem:[#allocation3 + $0xe8] sm:$0x3] %vm3803_vm5, %v5941_v27  ;;  %v11345_v27 = vunpack.i.l.bf16 %v14683_v58 }
 0x480   : > { %v14708_v16 = vpop.permute.xlu0 %11373  ;;  %v14710_v25 = vpop.permute.xlu1 %11358  ;;  %5977 = vst.msk [vmem:[#allocation3 + $0xe0] sm:$0xff] %vm3800_vm4, %v5847_v22  ;;  %11648 = vrot.lane.b32.xlu0 %v11622_v35, %s16315_s26  ;;  %11633 = vrot.lane.b32.xlu1 %v11622_v35, %s16323_s2  ;;  %v6211_v0 = vld [vmem:[#allocation3 + $0xf0] sm:$0xff]  ;;  %v11341_v35 = vunpack.i.h.bf16 %v14672_v7  ;;  %v11346_v22 = vunpack.i.h.bf16 %v14683_v58 }
 0x482   : > { %v6209_v28 = vld [vmem:[#allocation3 + $0xd8] sm:$0xff] }
 0x484   : > { %v14716_v15 = vpop.permute.xlu0 %11378  ;;  %v14718_v60 = vpop.permute.xlu1 %11363  ;;  %11653 = vrot.lane.b32.xlu0 %v11627_v20, %s16284_s5  ;;  %11638 = vrot.lane.b32.xlu1 %v11627_v20, %s16314_s24  ;;  %v6004_v20 = vld [vmem:[#allocation3 + $0x8] sm:$0xff] }
 0x485   : > { %v6212_v40 = vld [vmem:[#allocation3 + $0xf8] sm:$0xff] }
 0x486   : > { %v11672_v62 = vpack.i.bf16 %v6212_v40, %v6211_v0  ;;  %v6243_v10 = vld [vmem:[#allocation3 + $0xf1] sm:$0xff]  ;;  %v6244_v5 = vld [vmem:[#allocation3 + $0xf9] sm:$0xff]  ;;  %v7316_v0 = vsel %vm3800_vm4, %v6004_v20, %v11341_v35  ;;  %v7315_v40 = vsel %vm3800_vm4, %v6003_v44, %v11340_v51  ;;  %v11371_v44 = vunpack.i.h.bf16 %v14695_v53 }
 0x487   : > { %v11677_v37 = vpack.i.bf16 %v6244_v5, %v6243_v10  ;;  %v6275_v2 = vld [vmem:[#allocation3 + $0xf2] sm:$0xff]  ;;  %v6276_v29 = vld [vmem:[#allocation3 + $0xfa] sm:$0xff]  ;;  %v7347_v54 = vsel %vm1345_vm2, %v7315_v40, %v11345_v27  ;;  %v7348_v58 = vsel %vm1345_vm2, %v7316_v0, %v11346_v22  ;;  %v11370_v51 = vunpack.i.l.bf16 %v14695_v53 }
 0x488   : > { %v14722_v14 = vpop.permute.xlu0 %11388  ;;  %11673 = vrot.lane.b32.xlu0 %v11672_v62, %s16311_s6  ;;  %11658 = vrot.lane.b32.xlu1 %v11672_v62, %s16342_s27  ;;  %v14728_v17 = vpop.permute.xlu1 %11383  ;;  %v11682_v7 = vpack.i.bf16 %v6276_v29, %v6275_v2  ;;  %v11376_v20 = vunpack.i.h.bf16 %v14708_v16  ;;  %v11380_v29 = vunpack.i.l.bf16 %v14716_v15  ;;  %v6273_v22 = vld [vmem:[#allocation3 + $0xda] sm:$0xff] }
 0x489   : > { %v6210_v0 = vld [vmem:[#allocation3 + $0xe0] sm:$0xff] }
 0x48c   : > { %v11404_v59 = vpop.permute.xlu0 %11403  ;;  %11678 = vrot.lane.b32.xlu0 %v11677_v37, %s16282_s4  ;;  %11663 = vrot.lane.b32.xlu1 %v11677_v37, %s16315_s26  ;;  %v14736_v5 = vpop.permute.xlu1 %11393 }
 0x48d   : > { %v11405_v62 = vunpack.i.l.bf16 %v11404_v59  ;;  %v11406_v10 = vunpack.i.h.bf16 %v11404_v59  ;;  %v11375_v59 = vunpack.i.l.bf16 %v14708_v16 }
 0x48f   : > { %v9867_v12 = vpop.f32.mrf.mxu1  ;;  %v7379_v18 = vsel %vm5234_vm15, %v7347_v54, %v11405_v62  ;;  %v7380_v46 = vsel %vm5234_vm15, %v7348_v58, %v11406_v10 }
 0x490   : > { %v11409_v30 = vpop.permute.xlu0 %11408  ;;  %11683 = vrot.lane.b32.xlu0 %v11682_v7, %s16318_s0  ;;  %11668 = vrot.lane.b32.xlu1 %v11682_v7, %s16284_s5  ;;  %v5708_v35 = vmul.f32 %v9867_v12, %v14480_v4  ;;  %v6274_v12 = vld [vmem:[#allocation3 + $0xe2] sm:$0xff]  ;;  %v14758_v11 = vpop.permute.xlu1 %11398 }
 0x491   : > { %v11410_v32 = vunpack.i.l.bf16 %v11409_v30  ;;  %v11411_v34 = vunpack.i.h.bf16 %v11409_v30  ;;  %v5632_v2 = vpop.f32.mrf.mxu1  ;;  %v11707_v58 = vpack.i.bf16 %v6274_v12, %v6273_v22 }
 0x492   : > { %v5747_v27 = vadd.f32 %v14495_v31, %v5708_v35  ;;  %v5706_v30 = vmul.f32 %v14480_v4, %v5632_v2 }
 0x493   : > { %v7411_v53 = vsel %vm2747_vm7, %v7379_v18, %v11410_v32  ;;  %v9868_v16 = vpop.f32.mrf.mxu1  ;;  %v7412_v54 = vsel %vm2747_vm7, %v7380_v46, %v11411_v34 }
 0x494   : > { %v11414_v40 = vpop.permute.xlu0 %11413  ;;  %11693 = vrot.lane.b32.xlu0 %v11682_v7, %s16314_s24  ;;  %11688 = vrot.lane.b32.xlu1 %v11677_v37, %s16323_s2  ;;  %v5779_v62 = vmax.f32 %v5747_v27, 0.0  ;;  %v5745_v35 = vadd.f32 %v14495_v31, %v5706_v30  ;;  %v5709_v2 = vmul.f32 %v9868_v16, %v14480_v4  ;;  %v11697_v7 = vpack.i.bf16 %v6210_v0, %v6209_v28  ;;  %v6241_v27 = vld [vmem:[#allocation3 + $0xd9] sm:$0xff]  ;;  %v6242_v30 = vld [vmem:[#allocation3 + $0xe1] sm:$0xff] }
 0x495   : > { %v11416_v6 = vunpack.i.h.bf16 %v11414_v40  ;;  %v11415_v45 = vunpack.i.l.bf16 %v11414_v40  ;;  %v5635_v32 = vpop.f32.mrf.mxu1  ;;  %v11381_v16 = vunpack.i.h.bf16 %v14716_v15 }
 0x496   : > { %v5854_v40 = vrot.slane %v5779_v62, 7  ;;  %v5777_v34 = vmax.f32 %v5745_v35, 0.0  ;;  %v5748_v23 = vadd.f32 %v14495_v31, %v5709_v2  ;;  %v5707_v48 = vmul.f32 %v14480_v4, %v5635_v32 }
 0x497   : > { %v7443_v10 = vsel %vm5299_vm3, %v7411_v53, %v11415_v45  ;;  %v7444_v18 = vsel %vm5299_vm3, %v7412_v54, %v11416_v6  ;;  %v11702_v54 = vpack.i.bf16 %v6242_v30, %v6241_v27  ;;  %v11395_v32 = vunpack.i.l.bf16 %v14736_v5 }
 0x498   : > { %v7475_v37 = vsel %vm2780_vm8, %v7443_v10, %v11370_v51  ;;  %v7476_v46 = vsel %vm2780_vm8, %v7444_v18, %v11371_v44  ;;  %11708 = vrot.lane.b32.xlu0 %v11707_v58, %s16318_s0  ;;  %11698 = vrot.lane.b32.xlu1 %v11697_v7, %s16311_s6  ;;  %v5928_v6 = vsel %vm1210_vm1, 0.0, %v5854_v40  ;;  %v5851_v45 = vrot.slane %v5777_v34, 7 }
 0x499   : > { %v7507_v28 = vsel %vm5364_vm9, %v7475_v37, %v11375_v59  ;;  %v7508_v44 = vsel %vm5364_vm9, %v7476_v46, %v11376_v20  ;;  %5985 = vst.msk [vmem:[#allocation3 + $0x120] sm:$0xff] %vm3800_vm4, %v5928_v6  ;;  %v5780_v15 = vmax.f32 %v5748_v23, 0.0  ;;  %v5746_v22 = vadd.f32 %v14495_v31, %v5707_v48 }
 0x49a   : > { %v7539_v51 = vsel %vm857_vm0, %v7507_v28, %v11380_v29  ;;  %v14775_v12 = vpop.permute.xlu0 %11433  ;;  %v14777_v0 = vpop.permute.xlu1 %11418  ;;  %v7540_v53 = vsel %vm857_vm0, %v7508_v44, %v11381_v16  ;;  %v5927_v59 = vsel %vm1210_vm1, 0.0, %v5851_v45  ;;  %v11396_v18 = vunpack.i.h.bf16 %v14736_v5 }
 0x49b   : > { %5982 = vst.msk [vmem:[#allocation3 + $0x108] sm:$0xff] %vm3800_vm4, %v5927_v59  ;;  %v5855_v62 = vrot.slane %v5780_v15, 7  ;;  %v5778_v20 = vmax.f32 %v5746_v22, 0.0  ;;  %v7571_v35 = vpack.c.bf16 %v7540_v53, %v7539_v51  ;;  %v11401_v37 = vunpack.i.h.bf16 %v14758_v11 }
 0x49c   : > { %11703 = vrot.lane.b32.xlu1 %v11702_v54, %s16282_s4  ;;  %11723 = vrot.lane.b32.xlu0 %v11697_v7, %s16342_s27  ;;  %v11400_v46 = vunpack.i.l.bf16 %v14758_v11  ;;  %v7317_v5 = vsel %vm3800_vm4, %v14560_v42, %v11395_v32  ;;  %v7318_v30 = vsel %vm3800_vm4, %v14554_v57, %v11396_v18  ;;  %v11356_v28 = vunpack.i.h.bf16 %v14697_v47 }
 0x49d   : > { %v5856_v23 = vsel %vm1210_vm1, %v5854_v40, %v5855_v62  ;;  %v5944_v48 = vsel %vm1210_vm1, %v5855_v62, 0.0  ;;  %v5852_v29 = vrot.slane %v5778_v20, 7  ;;  %9883 = vmatprep.mubr.msk.bf16.mxu0 %vm5465_vm10, %v7571_v35  ;;  %v7350_v16 = vsel %vm1345_vm2, %v7318_v30, %v11401_v37 }
 0x49e   : > { %v14787_v2 = vpop.permute.xlu0 %11438  ;;  %v14789_v10 = vpop.permute.xlu1 %11423  ;;  %5987 = vst.msk [vmem:[#allocation3 + $0x130] sm:$0x3] %vm3803_vm5, %v5944_v48  ;;  %v7349_v11 = vsel %vm1345_vm2, %v7317_v5, %v11400_v46  ;;  %v11355_v6 = vunpack.i.l.bf16 %v14697_v47  ;;  %v11361_v53 = vunpack.i.h.bf16 %v14710_v25  ;;  %v11390_v59 = vunpack.i.l.bf16 %v14722_v14 }
 0x49f   : > { %5986 = vst.msk [vmem:[#allocation3 + $0x128] sm:$0xff] %vm3800_vm4, %v5856_v23  ;;  %v5853_v7 = vsel %vm1210_vm1, %v5851_v45, %v5852_v29  ;;  %v5943_v40 = vsel %vm1210_vm1, %v5852_v29, 0.0  ;;  %v11385_v45 = vunpack.i.l.bf16 %v14728_v17  ;;  %v11386_v47 = vunpack.i.h.bf16 %v14728_v17 }
 0x4a0   : > { %11728 = vrot.lane.b32.xlu0 %v11702_v54, %s16315_s26  ;;  %11713 = vrot.lane.b32.xlu1 %v11702_v54, %s16323_s2  ;;  %5984 = vst.msk [vmem:[#allocation3 + $0x118] sm:$0x3] %vm3803_vm5, %v5943_v40  ;;  %v6215_v57 = vld [vmem:[#allocation3 + $0x120] sm:$0xff]  ;;  %v7381_v15 = vsel %vm5234_vm15, %v7349_v11, %v11355_v6  ;;  %v11360_v54 = vunpack.i.l.bf16 %v14710_v25  ;;  %v11366_v29 = vunpack.i.h.bf16 %v14718_v60  ;;  %v11365_v17 = vunpack.i.l.bf16 %v14718_v60 }
 0x4a1   : > { %5983 = vst.msk [vmem:[#allocation3 + $0x110] sm:$0xff] %vm3800_vm4, %v5853_v7  ;;  %v7319_v35 = vsel %vm3800_vm4, %v14539_v50, %v11385_v45  ;;  %v7320_v5 = vsel %vm3800_vm4, %v14541_v52, %v11386_v47 }
 0x4a2   : > { %v14803_v34 = vpop.permute.xlu0 %11443  ;;  %v14805_v27 = vpop.permute.xlu1 %11428  ;;  %v7413_v18 = vsel %vm2747_vm7, %v7381_v15, %v11360_v54  ;;  %v7351_v11 = vsel %vm1345_vm2, %v7319_v35, %v11390_v59  ;;  %v14855_v54 = vld [vmem:[%s16338_s9] ss:$0 sm:$0xff] }
 0x4a4   : > { %11733 = vrot.lane.b32.xlu0 %v11707_v58, %s16284_s5  ;;  %11718 = vrot.lane.b32.xlu1 %v11707_v58, %s16314_s24  ;;  %v7382_v58 = vsel %vm5234_vm15, %v7350_v16, %v11356_v28  ;;  %v11391_v16 = vunpack.i.h.bf16 %v14722_v14  ;;  %v7445_v28 = vsel %vm5299_vm3, %v7413_v18, %v11365_v17  ;;  %v14865_v18 = vld [vmem:[%s16235_s10] ss:$0 sm:$0xff] }
 0x4a5   : > { %v7414_v25 = vsel %vm2747_vm7, %v7382_v58, %v11361_v53 }
 0x4a6   : > { %v14818_v44 = vpop.permute.xlu0 %11453  ;;  %v14820_v42 = vpop.permute.xlu1 %11448  ;;  %v6216_v51 = vld [vmem:[#allocation3 + $0x128] sm:$0xff]  ;;  %v7446_v6 = vsel %vm5299_vm3, %v7414_v25, %v11366_v29 }
 0x4a7   : > { %v11752_v22 = vpack.i.bf16 %v6216_v51, %v6215_v57  ;;  %v6247_v62 = vld [vmem:[#allocation3 + $0x121] sm:$0xff]  ;;  %v6248_v20 = vld [vmem:[#allocation3 + $0x129] sm:$0xff] }
 0x4a8   : > { %v6279_v32 = vld [vmem:[#allocation3 + $0x122] sm:$0xff]  ;;  %v6280_v7 = vld [vmem:[#allocation3 + $0x12a] sm:$0xff]  ;;  %v14836_v46 = vpack.i.bf16 %v6248_v20, %v6247_v62 }
 0x4a9   : > { %11753 = vrot.lane.b32.xlu0 %v11752_v22, %s16311_s6  ;;  %11738 = vrot.lane.b32.xlu1 %v11752_v22, %s16342_s27  ;;  %v11762_v51 = vpack.i.bf16 %v6280_v7, %v6279_v32 }
 0x4aa   : > { %v11469_v23 = vpop.permute.xlu0 %11468  ;;  %v11459_v48 = vpop.permute.xlu1 %11458 }
 0x4ab   : > { %v11461_v40 = vunpack.i.h.bf16 %v11459_v48  ;;  %v11460_v37 = vunpack.i.l.bf16 %v11459_v48  ;;  %v9871_v50 = vpop.f32.mrf.mxu1  ;;  %v11471_v52 = vunpack.i.h.bf16 %v11469_v23  ;;  %v11470_v14 = vunpack.i.l.bf16 %v11469_v23 }
 0x4ac   : > { %v5712_v30 = vmul.f32 %v9871_v50, %v14480_v4 }
 0x4ad   : > { %11758 = vrot.lane.b32.xlu0 %v14836_v46, %s16282_s4  ;;  %11743 = vrot.lane.b32.xlu1 %v14836_v46, %s16315_s26  ;;  %v5648_v58 = vpop.f32.mrf.mxu1  ;;  %v7478_v22 = vsel %vm2780_vm8, %v7446_v6, %v11461_v40  ;;  %v7477_v53 = vsel %vm2780_vm8, %v7445_v28, %v11460_v37  ;;  %v7352_v37 = vsel %vm1345_vm2, %v7320_v5, %v11391_v16  ;;  %v6277_v28 = vld [vmem:[#allocation3 + $0x10a] sm:$0xff]  ;;  %v6278_v6 = vld [vmem:[#allocation3 + $0x112] sm:$0xff]  ;;  %s16344_s4 = smov 28  }
 0x4ae   : > { %v11464_v60 = vpop.permute.xlu1 %11463  ;;  %v11484_v45 = vpop.permute.xlu0 %11483  ;;  %v5751_v4 = vadd.f32 %v14495_v31, %v5712_v30  ;;  %v5710_v59 = vmul.f32 %v14855_v54, %v5648_v58  ;;  %v6214_v16 = vld [vmem:[#allocation3 + $0x110] sm:$0xff] }
 0x4af   : > { %v11466_v57 = vunpack.i.h.bf16 %v11464_v60  ;;  %v11465_v15 = vunpack.i.l.bf16 %v11464_v60  ;;  %v11486_v20 = vunpack.i.h.bf16 %v11484_v45  ;;  %v9872_v35 = vpop.f32.mrf.mxu1  ;;  %v11485_v29 = vunpack.i.l.bf16 %v11484_v45 }
 0x4b0   : > { %v5783_v47 = vmax.f32 %v5751_v4, 0.0  ;;  %v5749_v25 = vadd.f32 %v14865_v18, %v5710_v59  ;;  %v5713_v50 = vmul.f32 %v14855_v54, %v9872_v35  ;;  %v11436_v60 = vunpack.i.h.bf16 %v14775_v12 }
 0x4b1   : > { %v7509_v62 = vsel %vm5364_vm9, %v7477_v53, %v11465_v15  ;;  %v7510_v31 = vsel %vm5364_vm9, %v7478_v22, %v11466_v57  ;;  %11763 = vrot.lane.b32.xlu0 %v11762_v51, %s16318_s0  ;;  %11748 = vrot.lane.b32.xlu1 %v11762_v51, %s16343_s3  ;;  %v5651_v30 = vpop.f32.mrf.mxu1  ;;  %v11435_v57 = vunpack.i.l.bf16 %v14775_v12  ;;  %v7383_v22 = vsel %vm5234_vm15, %v7351_v11, %v11485_v29 }
 0x4b2   : > { %v7541_v23 = vsel %vm857_vm0, %v7509_v62, %v11470_v14  ;;  %v7542_v48 = vsel %vm857_vm0, %v7510_v31, %v11471_v52  ;;  %v11489_v32 = vpop.permute.xlu0 %11488  ;;  %v14869_v7 = vpop.permute.xlu1 %11473  ;;  %v5860_v17 = vrot.slane %v5783_v47, 7  ;;  %v5781_v45 = vmax.f32 %v5749_v25, 0.0 }
 0x4b3   : > { %v7572_v40 = vpack.c.bf16 %v7542_v48, %v7541_v23  ;;  %v11491_v52 = vunpack.i.h.bf16 %v11489_v32  ;;  %v11490_v4 = vunpack.i.l.bf16 %v11489_v32  ;;  %v5752_v58 = vadd.f32 %v14865_v18, %v5713_v50  ;;  %v6213_v48 = vld [vmem:[#allocation3 + $0x108] sm:$0xff] }
 0x4b4   : > { %v5930_v15 = vsel %vm1210_vm1, 0.0, %v5860_v17  ;;  %v5711_v5 = vmul.f32 %v14855_v54, %v5651_v30  ;;  %v7384_v14 = vsel %vm5234_vm15, %v7352_v37, %v11486_v20  ;;  %v5857_v53 = vrot.slane %v5781_v45, 7 }
 0x4b5   : > { %9884 = vmatmul.mubr.msk.bf16.vlgmr.msra.gmra.mxu0 %vm5465_vm10, %v7572_v40  ;;  %5991 = vst.msk [vmem:[#allocation3 + $0x150] sm:$0xff] %vm3800_vm4, %v5930_v15  ;;  %11773 = vrot.lane.b32.xlu0 %v11762_v51, %s16314_s24  ;;  %v14886_v47 = vpack.i.bf16 %v6278_v6, %v6277_v28  ;;  %v5784_v62 = vmax.f32 %v5752_v58, 0.0  ;;  %v7415_v11 = vsel %vm2747_vm7, %v7383_v22, %v11490_v4  ;;  %v6245_v28 = vld [vmem:[#allocation3 + $0x109] sm:$0xff]  ;;  %v6246_v6 = vld [vmem:[#allocation3 + $0x111] sm:$0xff]  ;;  %v11440_v58 = vunpack.i.l.bf16 %v14787_v2 }
 0x4b6   : > { %v11494_v59 = vpop.permute.xlu0 %11493  ;;  %v14884_v12 = vpop.permute.xlu1 %11478  ;;  %v5750_v31 = vadd.f32 %v14865_v18, %v5711_v5  ;;  %11768 = vrot.lane.b32.xlu1 %v14836_v46, %s16323_s2  ;;  %v5929_v20 = vsel %vm1210_vm1, 0.0, %v5857_v53  ;;  %v7416_v51 = vsel %vm2747_vm7, %v7384_v14, %v11491_v52  ;;  %v11777_v29 = vpack.i.bf16 %v6214_v16, %v6213_v48 }
 0x4b7   : > { %v11496_v35 = vunpack.i.h.bf16 %v11494_v59  ;;  %v11495_v23 = vunpack.i.l.bf16 %v11494_v59  ;;  %5988 = vst.msk [vmem:[#allocation3 + $0x138] sm:$0xff] %vm3800_vm4, %v5929_v20  ;;  %v5861_v25 = vrot.slane %v5784_v62, 7  ;;  %v11782_v22 = vpack.i.bf16 %v6246_v6, %v6245_v28 }
 0x4b8   : > { %v5782_v32 = vmax.f32 %v5750_v31, 0.0  ;;  %v11445_v59 = vunpack.i.l.bf16 %v14803_v34  ;;  %v11475_v48 = vunpack.i.l.bf16 %v14869_v7  ;;  %v11480_v28 = vunpack.i.l.bf16 %v14884_v12 }
 0x4b9   : > { %v7447_v40 = vsel %vm5299_vm3, %v7415_v11, %v11495_v23  ;;  %v7448_v37 = vsel %vm5299_vm3, %v7416_v51, %v11496_v35  ;;  %11788 = vrot.lane.b32.xlu0 %v14886_v47, %s16318_s0  ;;  %v5862_v45 = vsel %vm1210_vm1, %v5860_v17, %v5861_v25  ;;  %v5946_v52 = vsel %vm1210_vm1, %v5861_v25, 0.0 }
 0x4ba   : > { %v7479_v46 = vsel %vm2780_vm8, %v7447_v40, %v11435_v57  ;;  %v14900_v50 = vpop.permute.xlu0 %11513  ;;  %v14902_v30 = vpop.permute.xlu1 %11498  ;;  %v5858_v4 = vrot.slane %v5782_v32, 7  ;;  %v7480_v15 = vsel %vm2780_vm8, %v7448_v37, %v11436_v60  ;;  %11778 = vrot.lane.b32.xlu1 %v11777_v29, %s16311_s6  ;;  %v11441_v57 = vunpack.i.h.bf16 %v14787_v2  ;;  %5993 = vst.msk [vmem:[#allocation3 + $0x160] sm:$0x3] %vm3803_vm5, %v5946_v52  ;;  %v6009_v52 = vld [vmem:[#allocation3 + $0x48] sm:$0xff] }
 0x4bb   : > { %5992 = vst.msk [vmem:[#allocation3 + $0x158] sm:$0xff] %vm3800_vm4, %v5862_v45  ;;  %v9875_v5 = vpop.f32.mrf.mxu1  ;;  %v11446_v60 = vunpack.i.h.bf16 %v14803_v34  ;;  %v11476_v37 = vunpack.i.h.bf16 %v14869_v7 }
 0x4bc   : > { %v5859_v16 = vsel %vm1210_vm1, %v5857_v53, %v5858_v4  ;;  %v5945_v17 = vsel %vm1210_vm1, %v5858_v4, 0.0  ;;  %v5716_v14 = vmul.f32 %v14855_v54, %v9875_v5  ;;  %v7511_v53 = vsel %vm5364_vm9, %v7479_v46, %v11440_v58  ;;  %v6010_v5 = vld [vmem:[#allocation3 + $0x50] sm:$0xff] }
 0x4bd   : > { %5990 = vst.msk [vmem:[#allocation3 + $0x148] sm:$0x3] %vm3803_vm5, %v5945_v17  ;;  %11803 = vrot.lane.b32.xlu0 %v11777_v29, %s16342_s27  ;;  %v5664_v2 = vpop.f32.mrf.mxu1  ;;  %v7512_v31 = vsel %vm5364_vm9, %v7480_v15, %v11441_v57  ;;  %v7543_v11 = vsel %vm857_vm0, %v7511_v53, %v11445_v59  ;;  %v11481_v46 = vunpack.i.h.bf16 %v14884_v12  ;;  %v7321_v12 = vsel %vm3800_vm4, %v6009_v52, %v11475_v48 }
 0x4be   : > { %5989 = vst.msk [vmem:[#allocation3 + $0x140] sm:$0xff] %vm3800_vm4, %v5859_v16  ;;  %v14920_v62 = vpop.permute.xlu0 %11518  ;;  %v5755_v35 = vadd.f32 %v14865_v18, %v5716_v14  ;;  %11783 = vrot.lane.b32.xlu1 %v11782_v22, %s16344_s4  ;;  %v5714_v23 = vmul.f32 %v14855_v54, %v5664_v2  ;;  %v14927_v34 = vpop.permute.xlu1 %11503  ;;  %v7544_v51 = vsel %vm857_vm0, %v7512_v31, %v11446_v60  ;;  %v11420_v2 = vunpack.i.l.bf16 %v14777_v0 }
 0x4bf   : > { %v9876_v20 = vpop.f32.mrf.mxu1  ;;  %v7573_v40 = vpack.c.bf16 %v7544_v51, %v7543_v11  ;;  %v7322_v53 = vsel %vm3800_vm4, %v6010_v5, %v11476_v37  ;;  %v11421_v11 = vunpack.i.h.bf16 %v14777_v0 }
 0x4c0   : > { %v5787_v29 = vmax.f32 %v5755_v35, 0.0  ;;  %v5753_v25 = vadd.f32 %v14865_v18, %v5714_v23  ;;  %v5717_v32 = vmul.f32 %v14855_v54, %v9876_v20  ;;  %v7354_v31 = vsel %vm1345_vm2, %v7322_v53, %v11481_v46  ;;  %v6219_v20 = vld [vmem:[#allocation3 + $0x150] sm:$0xff] }
 0x4c1   : > { %11808 = vrot.lane.b32.xlu0 %v11782_v22, %s16315_s26  ;;  %v5667_v6 = vpop.f32.mrf.mxu1  ;;  %9887 = vmatprep.mubr.msk.bf16.mxu0 %vm5465_vm10, %v7573_v40 }
 0x4c2   : > { %v14938_v45 = vpop.permute.xlu0 %11523  ;;  %v5866_v4 = vrot.slane %v5787_v29, 7  ;;  %v5785_v15 = vmax.f32 %v5753_v25, 0.0  ;;  %v5756_v57 = vadd.f32 %v14865_v18, %v5717_v32  ;;  %11793 = vrot.lane.b32.xlu1 %v11782_v22, %s16323_s2  ;;  %v5715_v7 = vmul.f32 %v14855_v54, %v5667_v6  ;;  %v14944_v58 = vpop.permute.xlu1 %11508  ;;  %v6220_v59 = vld [vmem:[#allocation3 + $0x158] sm:$0xff] }
 0x4c3   : > { %v7353_v22 = vsel %vm1345_vm2, %v7321_v12, %v11480_v28  ;;  %v11832_v51 = vpack.i.bf16 %v6220_v59, %v6219_v20  ;;  %v6251_v37 = vld [vmem:[#allocation3 + $0x151] sm:$0xff]  ;;  %v6252_v46 = vld [vmem:[#allocation3 + $0x159] sm:$0xff]  ;;  %v11425_v28 = vunpack.i.l.bf16 %v14789_v10  ;;  %v11426_v6 = vunpack.i.h.bf16 %v14789_v10 }
 0x4c4   : > { %v5932_v16 = vsel %vm1210_vm1, 0.0, %v5866_v4  ;;  %v5863_v17 = vrot.slane %v5785_v15, 7  ;;  %v5788_v14 = vmax.f32 %v5756_v57, 0.0  ;;  %v5754_v60 = vadd.f32 %v14865_v18, %v5715_v7 }
 0x4c5   : > { %5997 = vst.msk [vmem:[#allocation3 + $0x180] sm:$0xff] %vm3800_vm4, %v5932_v16  ;;  %11813 = vrot.lane.b32.xlu0 %v14886_v47, %s16343_s3  ;;  %v7385_v29 = vsel %vm5234_vm15, %v7353_v22, %v11420_v2  ;;  %v11837_v7 = vpack.i.bf16 %v6252_v46, %v6251_v37  ;;  %v11430_v12 = vunpack.i.l.bf16 %v14805_v27  ;;  %v11451_v59 = vunpack.i.h.bf16 %v14820_v42 }
 0x4c6   : > { %v14955_v54 = vpop.permute.xlu0 %11533  ;;  %v5931_v35 = vsel %vm1210_vm1, 0.0, %v5863_v17  ;;  %v5867_v23 = vrot.slane %v5788_v14, 7  ;;  %v5786_v18 = vmax.f32 %v5754_v60, 0.0  ;;  %11798 = vrot.lane.b32.xlu1 %v14886_v47, %s16314_s24  ;;  %v14961_v48 = vpop.permute.xlu1 %11528  ;;  %v7386_v47 = vsel %vm5234_vm15, %v7354_v31, %v11421_v11  ;;  %v6283_v14 = vld [vmem:[#allocation3 + $0x152] sm:$0xff] }
 0x4c7   : > { %5994 = vst.msk [vmem:[#allocation3 + $0x168] sm:$0xff] %vm3800_vm4, %v5931_v35  ;;  %v7417_v57 = vsel %vm2747_vm7, %v7385_v29, %v11425_v28  ;;  %v7418_v5 = vsel %vm2747_vm7, %v7386_v47, %v11426_v6  ;;  %v11431_v60 = vunpack.i.h.bf16 %v14805_v27  ;;  %v11450_v2 = vunpack.i.l.bf16 %v14820_v42 }
 0x4c8   : > { %v5868_v25 = vsel %vm1210_vm1, %v5866_v4, %v5867_v23  ;;  %v5948_v32 = vsel %vm1210_vm1, %v5867_v23, 0.0  ;;  %v5864_v40 = vrot.slane %v5786_v18, 7  ;;  %v11456_v22 = vunpack.i.h.bf16 %v14818_v44 }
 0x4c9   : > { %5999 = vst.msk [vmem:[#allocation3 + $0x190] sm:$0x3] %vm3803_vm5, %v5948_v32  ;;  %11833 = vrot.lane.b32.xlu0 %v11832_v51, %s16311_s6  ;;  %v11455_v31 = vunpack.i.l.bf16 %v14818_v44  ;;  %v7449_v35 = vsel %vm5299_vm3, %v7417_v57, %v11430_v12  ;;  %v7450_v18 = vsel %vm5299_vm3, %v7418_v5, %v11431_v60  ;;  %v12049_v32 = vld [vmem:[#allocation3 + $0x60] sm:$0xff]  ;;  %v12050_v44 = vld [vmem:[#allocation3 + $0x68] sm:$0xff] }
 0x4ca   : > { %5998 = vst.msk [vmem:[#allocation3 + $0x188] sm:$0xff] %vm3800_vm4, %v5868_v25  ;;  %v11549_v0 = vpop.permute.xlu0 %11548  ;;  %v5865_v52 = vsel %vm1210_vm1, %v5863_v17, %v5864_v40  ;;  %v5947_v4 = vsel %vm1210_vm1, %v5864_v40, 0.0  ;;  %11818 = vrot.lane.b32.xlu1 %v11832_v51, %s16342_s27  ;;  %v11539_v15 = vpop.permute.xlu1 %11538  ;;  %v6284_v17 = vld [vmem:[#allocation3 + $0x15a] sm:$0xff]  ;;  %v7323_v40 = vsel %vm3800_vm4, %v12049_v32, %v11450_v2  ;;  %v7324_v37 = vsel %vm3800_vm4, %v12050_v44, %v11451_v59 }
 0x4cb   : > { %5996 = vst.msk [vmem:[#allocation3 + $0x178] sm:$0x3] %vm3803_vm5, %v5947_v4  ;;  %v11541_v16 = vunpack.i.h.bf16 %v11539_v15  ;;  %v11540_v10 = vunpack.i.l.bf16 %v11539_v15  ;;  %v11842_v11 = vpack.i.bf16 %v6284_v17, %v6283_v14  ;;  %v11551_v51 = vunpack.i.h.bf16 %v11549_v0  ;;  %v15008_v2 = vld [vmem:[#allocation3 + $0x140] sm:$0xff] }
 0x4cc   : > { %5995 = vst.msk [vmem:[#allocation3 + $0x170] sm:$0xff] %vm3800_vm4, %v5865_v52  ;;  %v11550_v29 = vunpack.i.l.bf16 %v11549_v0  ;;  %v11516_v14 = vunpack.i.h.bf16 %v14900_v50  ;;  %v7355_v17 = vsel %vm1345_vm2, %v7323_v40, %v11455_v31  ;;  %v7356_v60 = vsel %vm1345_vm2, %v7324_v37, %v11456_v22  ;;  %v6249_v37 = vld [vmem:[#allocation3 + $0x139] sm:$0xff] }
 0x4cd   : > { %11838 = vrot.lane.b32.xlu0 %v11837_v7, %s16344_s4  ;;  %v7482_v42 = vsel %vm2780_vm8, %v7450_v18, %v11541_v16  ;;  %v7481_v25 = vsel %vm2780_vm8, %v7449_v35, %v11540_v10  ;;  %v6281_v16 = vld [vmem:[#allocation3 + $0x13a] sm:$0xff]  ;;  %v6282_v10 = vld [vmem:[#allocation3 + $0x142] sm:$0xff]  ;;  %v11515_v31 = vunpack.i.l.bf16 %v14900_v50  ;;  %v11520_v32 = vunpack.i.l.bf16 %v14920_v62 }
 0x4ce   : > { %v11564_v53 = vpop.permute.xlu0 %11563  ;;  %11823 = vrot.lane.b32.xlu1 %v11837_v7, %s16315_s26  ;;  %v11544_v23 = vpop.permute.xlu1 %11543  ;;  %vm8217_vm1 = vcmask 93184   ;;  %vm8486_vm5 = vcmask 15360  }
 0x4cf   : > { %v11546_v20 = vunpack.i.h.bf16 %v11544_v23  ;;  %v11545_v27 = vunpack.i.l.bf16 %v11544_v23  ;;  %v11566_v6 = vunpack.i.h.bf16 %v11564_v53  ;;  %v11565_v52 = vunpack.i.l.bf16 %v11564_v53 }
 0x4d1   : > { %v7513_v46 = vsel %vm5364_vm9, %v7481_v25, %v11545_v27  ;;  %v7514_v28 = vsel %vm5364_vm9, %v7482_v42, %v11546_v20  ;;  %11843 = vrot.lane.b32.xlu0 %v11842_v11, %s16318_s0  ;;  %v7388_v53 = vsel %vm5234_vm15, %v7356_v60, %v11566_v6  ;;  %v7387_v35 = vsel %vm5234_vm15, %v7355_v17, %v11565_v52 }
 0x4d2   : > { %v11569_v47 = vpop.permute.xlu0 %11568  ;;  %11828 = vrot.lane.b32.xlu1 %v11842_v11, %s16343_s3  ;;  %v14999_v0 = vpop.permute.xlu1 %11553  ;;  %v7545_v4 = vsel %vm857_vm0, %v7513_v46, %v11550_v29  ;;  %v7546_v15 = vsel %vm857_vm0, %v7514_v28, %v11551_v51  ;;  %v15016_v51 = vld [vmem:[#allocation3 + $0x138] sm:$0xff]  ;;  %v6250_v46 = vld [vmem:[#allocation3 + $0x141] sm:$0xff]  ;;  %v11526_v28 = vunpack.i.h.bf16 %v14938_v45 }
 0x4d3   : > { %v11571_v57 = vunpack.i.h.bf16 %v11569_v47  ;;  %v11570_v12 = vunpack.i.l.bf16 %v11569_v47  ;;  %v7574_v5 = vpack.c.bf16 %v7546_v15, %v7545_v4  ;;  %v11857_v25 = vpack.i.bf16 %v15008_v2, %v15016_v51 }
 0x4d4   : > { %v11525_v47 = vunpack.i.l.bf16 %v14938_v45  ;;  %v11862_v4 = vpack.i.bf16 %v6250_v46, %v6249_v37 }
 0x4d5   : > { %11853 = vrot.lane.b32.xlu0 %v11842_v11, %s16314_s24  ;;  %9888 = vmatmul.mubr.msk.bf16.gmra.mxu0 %vm5465_vm10, %v7574_v5  ;;  %v7419_v22 = vsel %vm2747_vm7, %v7387_v35, %v11570_v12  ;;  %v7420_v27 = vsel %vm2747_vm7, %v7388_v53, %v11571_v57  ;;  %v11867_v11 = vpack.i.bf16 %v6282_v10, %v6281_v16  ;;  %v11556_v16 = vunpack.i.h.bf16 %v14999_v0  ;;  %v6013_v53 = vld [vmem:[#allocation3 + $0x78] sm:$0xff]  ;;  %v6014_v35 = vld [vmem:[#allocation3 + $0x80] sm:$0xff] }
 0x4d6   : > { %v11574_v59 = vpop.permute.xlu0 %11573  ;;  %11848 = vrot.lane.b32.xlu1 %v11837_v7, %s16323_s2  ;;  %v11559_v20 = vpop.permute.xlu1 %11558  ;;  %v11521_v7 = vunpack.i.h.bf16 %v14920_v62  ;;  %v11555_v10 = vunpack.i.l.bf16 %v14999_v0 }
 0x4d7   : > { %v11576_v23 = vunpack.i.h.bf16 %v11574_v59  ;;  %v11575_v18 = vunpack.i.l.bf16 %v11574_v59  ;;  %v11561_v17 = vunpack.i.h.bf16 %v11559_v20  ;;  %v11560_v60 = vunpack.i.l.bf16 %v11559_v20 }
 0x4d9   : > { %v7451_v29 = vsel %vm5299_vm3, %v7419_v22, %v11575_v18  ;;  %v7452_v42 = vsel %vm5299_vm3, %v7420_v27, %v11576_v23  ;;  %11868 = vrot.lane.b32.xlu0 %v11867_v11, %s16318_s0  ;;  %v6224_v23 = vld [vmem:[#allocation3 + $0x188] sm:$0xff]  ;;  %v7325_v18 = vsel %vm3800_vm4, %v6013_v53, %v11555_v10  ;;  %v11530_v53 = vunpack.i.l.bf16 %v14961_v48 }
 0x4da   : > { %v7483_v50 = vsel %vm2780_vm8, %v7451_v29, %v11515_v31  ;;  %v7484_v40 = vsel %vm2780_vm8, %v7452_v42, %v11516_v14  ;;  %v15027_v44 = vpop.permute.xlu0 %11593  ;;  %11858 = vrot.lane.b32.xlu1 %v11857_v25, %s16311_s6  ;;  %v15032_v6 = vpop.permute.xlu1 %11578  ;;  %v7326_v31 = vsel %vm3800_vm4, %v6014_v35, %v11556_v16  ;;  %v7357_v22 = vsel %vm1345_vm2, %v7325_v18, %v11560_v60  ;;  %v6223_v29 = vld [vmem:[#allocation3 + $0x180] sm:$0xff] }
 0x4db   : > { %v7515_v62 = vsel %vm5364_vm9, %v7483_v50, %v11520_v32  ;;  %v7516_v52 = vsel %vm5364_vm9, %v7484_v40, %v11521_v7  ;;  %v7358_v27 = vsel %vm1345_vm2, %v7326_v31, %v11561_v17  ;;  %v11501_v42 = vunpack.i.h.bf16 %v14902_v30  ;;  %v6255_v32 = vld [vmem:[#allocation3 + $0x181] sm:$0xff]  ;;  %v6256_v50 = vld [vmem:[#allocation3 + $0x189] sm:$0xff] }
 0x4dc   : > { %v7547_v15 = vsel %vm857_vm0, %v7515_v62, %v11525_v47  ;;  %v7548_v57 = vsel %vm857_vm0, %v7516_v52, %v11526_v28  ;;  %v11912_v7 = vpack.i.bf16 %v6224_v23, %v6223_v29  ;;  %v11506_v28 = vunpack.i.h.bf16 %v14927_v34  ;;  %v6193_v62 = vld [vmem:[#allocation3 + $0x182] sm:$0xff] }
 0x4dd   : > { %11883 = vrot.lane.b32.xlu0 %v11857_v25, %s16342_s27  ;;  %v7575_v5 = vpack.c.bf16 %v7548_v57, %v7547_v15  ;;  %v11500_v25 = vunpack.i.l.bf16 %v14902_v30  ;;  %v7390_v37 = vsel %vm5234_vm15, %v7358_v27, %v11501_v42  ;;  %v11917_v52 = vpack.i.bf16 %v6256_v50, %v6255_v32  ;;  %v6194_v30 = vld [vmem:[#allocation3 + $0x18a] sm:$0xff]  ;;  %v6286_v15 = vld [vmem:[#allocation3 + $0x172] sm:$0xff] }
 0x4de   : > { %v15039_v12 = vpop.permute.xlu0 %11598  ;;  %11863 = vrot.lane.b32.xlu1 %v11862_v4, %s16344_s4  ;;  %v15042_v45 = vpop.permute.xlu1 %11583  ;;  %v11511_v17 = vunpack.i.h.bf16 %v14944_v58  ;;  %v11510_v60 = vunpack.i.l.bf16 %v14944_v58  ;;  %v11536_v23 = vunpack.i.h.bf16 %v14955_v54  ;;  %v11535_v18 = vunpack.i.l.bf16 %v14955_v54 }
 0x4df   : > { %9891 = vmatprep.mubr.msk.bf16.mxu0 %vm5465_vm10, %v7575_v5  ;;  %v7389_v40 = vsel %vm5234_vm15, %v7357_v22, %v11500_v25  ;;  %v7422_v5 = vsel %vm2747_vm7, %v7390_v37, %v11506_v28  ;;  %v15081_v22 = vpack.i.bf16 %v6194_v30, %v6193_v62  ;;  %v6015_v25 = vld [vmem:[#allocation3 + $0x90] sm:$0xff] }
 0x4e0   : > { %v7454_v29 = vsel %vm5299_vm3, %v7422_v5, %v11511_v17  ;;  %v15089_v37 = vld [vmem:[#allocation3 + $0x170] sm:$0xff]  ;;  %v7327_v28 = vsel %vm3800_vm4, %v6015_v25, %v11530_v53 }
 0x4e1   : > { %11888 = vrot.lane.b32.xlu0 %v11862_v4, %s16315_s26 }
 0x4e2   : > { %v15048_v14 = vpop.permute.xlu0 %11603  ;;  %11873 = vrot.lane.b32.xlu1 %v11862_v4, %s16323_s2  ;;  %v15051_v59 = vpop.permute.xlu1 %11588  ;;  %v6285_v4 = vld [vmem:[#allocation3 + $0x16a] sm:$0xff] }
 0x4e3   : > { %v15083_v27 = vpack.i.bf16 %v6286_v15, %v6285_v4  ;;  %v15101_v15 = vld [vmem:[#allocation3 + $0x168] sm:$0xff] }
 0x4e5   : > { %11893 = vrot.lane.b32.xlu0 %v11867_v11, %s16343_s3 }
 0x4e6   : > { %v15056_v0 = vpop.permute.xlu0 %11613  ;;  %11878 = vrot.lane.b32.xlu1 %v11867_v11, %s16314_s24  ;;  %v15061_v20 = vpop.permute.xlu1 %11608  ;;  %v11505_v11 = vunpack.i.l.bf16 %v14927_v34  ;;  %v11531_v34 = vunpack.i.h.bf16 %v14961_v48 }
 0x4e8   : > { %v7421_v57 = vsel %vm2747_vm7, %v7389_v40, %v11505_v11 }
 0x4e9   : > { %11913 = vrot.lane.b32.xlu0 %v11912_v7, %s16311_s6  ;;  %v7453_v58 = vsel %vm5299_vm3, %v7421_v57, %v11510_v60 }
 0x4ea   : > { %v11629_v46 = vpop.permute.xlu0 %11628  ;;  %11898 = vrot.lane.b32.xlu1 %v11912_v7, %s16342_s27  ;;  %v11619_v47 = vpop.permute.xlu1 %11618  ;;  %v6016_v7 = vld [vmem:[#allocation3 + $0x98] sm:$0xff] }
 0x4eb   : > { %v11621_v16 = vunpack.i.h.bf16 %v11619_v47  ;;  %v11620_v10 = vunpack.i.l.bf16 %v11619_v47  ;;  %v11631_v32 = vunpack.i.h.bf16 %v11629_v46  ;;  %v11630_v50 = vunpack.i.l.bf16 %v11629_v46 }
 0x4ec   : > { %v7328_v11 = vsel %vm3800_vm4, %v6016_v7, %v11531_v34  ;;  %v11922_v34 = vpack.i.bf16 %v15089_v37, %v15101_v15 }
 0x4ed   : > { %11918 = vrot.lane.b32.xlu0 %v11917_v52, %s16344_s4  ;;  %v7486_v40 = vsel %vm2780_vm8, %v7454_v29, %v11621_v16  ;;  %v7485_v54 = vsel %vm2780_vm8, %v7453_v58, %v11620_v10  ;;  %v6253_v16 = vld [vmem:[#allocation3 + $0x169] sm:$0xff]  ;;  %v6254_v10 = vld [vmem:[#allocation3 + $0x171] sm:$0xff] }
 0x4ee   : > { %v11644_v35 = vpop.permute.xlu0 %11643  ;;  %11903 = vrot.lane.b32.xlu1 %v11917_v52, %s16315_s26  ;;  %v11624_v31 = vpop.permute.xlu1 %11623  ;;  %v11927_v29 = vpack.i.bf16 %v6254_v10, %v6253_v16 }
 0x4ef   : > { %v11626_v42 = vunpack.i.h.bf16 %v11624_v31  ;;  %v11625_v48 = vunpack.i.l.bf16 %v11624_v31  ;;  %v11646_v30 = vunpack.i.h.bf16 %v11644_v35  ;;  %v11645_v46 = vunpack.i.l.bf16 %v11644_v35 }
 0x4f0   : > { %v7359_v35 = vsel %vm1345_vm2, %v7327_v28, %v11535_v18  ;;  %v7360_v31 = vsel %vm1345_vm2, %v7328_v11, %v11536_v23  ;;  %v11595_v18 = vunpack.i.l.bf16 %v15027_v44  ;;  %v11601_v11 = vunpack.i.h.bf16 %v15039_v12 }
 0x4f1   : > { %v7517_v47 = vsel %vm5364_vm9, %v7485_v54, %v11625_v48  ;;  %v7518_v62 = vsel %vm5364_vm9, %v7486_v40, %v11626_v42  ;;  %11933 = vrot.lane.b32.xlu0 %v15083_v27, %s16318_s0  ;;  %v7392_v42 = vsel %vm5234_vm15, %v7360_v31, %v11646_v30  ;;  %v7391_v48 = vsel %vm5234_vm15, %v7359_v35, %v11645_v46 }
 0x4f2   : > { %v11649_v52 = vpop.permute.xlu0 %11648  ;;  %11908 = vrot.lane.b32.xlu1 %v15081_v22, %s16343_s3  ;;  %v15099_v4 = vpop.permute.xlu1 %11633  ;;  %v7549_v57 = vsel %vm857_vm0, %v7517_v47, %v11630_v50  ;;  %v7550_v5 = vsel %vm857_vm0, %v7518_v62, %v11631_v32  ;;  %v11596_v50 = vunpack.i.h.bf16 %v15027_v44  ;;  %v11600_v47 = vunpack.i.l.bf16 %v15039_v12 }
 0x4f3   : > { %v11651_v17 = vunpack.i.h.bf16 %v11649_v52  ;;  %v11650_v60 = vunpack.i.l.bf16 %v11649_v52  ;;  %v7576_v53 = vpack.c.bf16 %v7550_v5, %v7549_v57  ;;  %v11606_v44 = vunpack.i.h.bf16 %v15048_v14 }
 0x4f4   : > { %v11605_v46 = vunpack.i.l.bf16 %v15048_v14  ;;  %v11636_v35 = vunpack.i.h.bf16 %v15099_v4  ;;  %v11635_v31 = vunpack.i.l.bf16 %v15099_v4 }
 0x4f5   : > { %11953 = vrot.lane.b32.xlu0 %v11922_v34, %s16342_s27  ;;  %9892 = vmatmul.mubr.msk.bf16.gmra.mxu0 %vm5465_vm10, %v7576_v53  ;;  %v7423_v23 = vsel %vm2747_vm7, %v7391_v48, %v11650_v60  ;;  %v7424_v40 = vsel %vm2747_vm7, %v7392_v42, %v11651_v17  ;;  %v6258_v53 = vld [vmem:[#allocation3 + $0x1a1] sm:$0xff] }
 0x4f6   : > { %v11654_v58 = vpop.permute.xlu0 %11653  ;;  %11923 = vrot.lane.b32.xlu1 %v11922_v34, %s16311_s6  ;;  %v11639_v32 = vpop.permute.xlu1 %11638  ;;  %v6257_v34 = vld [vmem:[#allocation3 + $0x199] sm:$0xff] }
 0x4f7   : > { %v11656_v25 = vunpack.i.h.bf16 %v11654_v58  ;;  %v11655_v7 = vunpack.i.l.bf16 %v11654_v58  ;;  %v11641_v42 = vunpack.i.h.bf16 %v11639_v32  ;;  %v11640_v48 = vunpack.i.l.bf16 %v11639_v32 }
 0x4f9   : > { %v7455_v54 = vsel %vm5299_vm3, %v7423_v23, %v11655_v7  ;;  %v7456_v28 = vsel %vm5299_vm3, %v7424_v40, %v11656_v25  ;;  %11958 = vrot.lane.b32.xlu0 %v11927_v29, %s16315_s26  ;;  %v11947_v25 = vpack.i.bf16 %v6258_v53, %v6257_v34  ;;  %v6289_v7 = vld [vmem:[#allocation3 + $0x19a] sm:$0xff]  ;;  %v6018_v23 = vld [vmem:[#allocation3 + $0xb0] sm:$0xff]  ;;  %v11590_v53 = vunpack.i.l.bf16 %v15051_v59 }
 0x4fa   : > { %v7487_v62 = vsel %vm2780_vm8, %v7455_v54, %v11595_v18  ;;  %v7488_v52 = vsel %vm2780_vm8, %v7456_v28, %v11596_v50  ;;  %v15125_v30 = vpop.permute.xlu0 %11673  ;;  %11928 = vrot.lane.b32.xlu1 %v11927_v29, %s16344_s4  ;;  %v15130_v57 = vpop.permute.xlu1 %11658  ;;  %v6290_v50 = vld [vmem:[#allocation3 + $0x1a2] sm:$0xff]  ;;  %v7330_v4 = vsel %vm3800_vm4, %v6018_v23, %v11636_v35  ;;  %v11611_v35 = vunpack.i.h.bf16 %v15061_v20 }
 0x4fb   : > { %v7519_v5 = vsel %vm5364_vm9, %v7487_v62, %v11600_v47  ;;  %v7520_v12 = vsel %vm5364_vm9, %v7488_v52, %v11601_v11  ;;  %v6017_v18 = vld [vmem:[#allocation3 + $0xa8] sm:$0xff]  ;;  %v7362_v32 = vsel %vm1345_vm2, %v7330_v4, %v11641_v42  ;;  %v11972_v28 = vpack.i.bf16 %v6290_v50, %v6289_v7 }
 0x4fc   : > { %v7551_v16 = vsel %vm857_vm0, %v7519_v5, %v11605_v46  ;;  %v7552_v10 = vsel %vm857_vm0, %v7520_v12, %v11606_v44  ;;  %v7329_v40 = vsel %vm3800_vm4, %v6017_v18, %v11635_v31  ;;  %v11581_v11 = vunpack.i.h.bf16 %v15032_v6  ;;  %v6020_v4 = vld [vmem:[#allocation3 + $0xc8] sm:$0xff] }
 0x4fd   : > { %11963 = vrot.lane.b32.xlu0 %v15083_v27, %s16343_s3  ;;  %v7577_v60 = vpack.c.bf16 %v7552_v10, %v7551_v16  ;;  %v11580_v47 = vunpack.i.l.bf16 %v15032_v6  ;;  %v11586_v46 = vunpack.i.h.bf16 %v15042_v45  ;;  %v11585_v5 = vunpack.i.l.bf16 %v15042_v45 }
 0x4fe   : > { %v15138_v17 = vpop.permute.xlu0 %11678  ;;  %11938 = vrot.lane.b32.xlu1 %v11927_v29, %s16323_s2  ;;  %v15141_v14 = vpop.permute.xlu1 %11663  ;;  %v7394_v52 = vsel %vm5234_vm15, %v7362_v32, %v11581_v11  ;;  %v11591_v6 = vunpack.i.h.bf16 %v15051_v59  ;;  %v11610_v31 = vunpack.i.l.bf16 %v15061_v20  ;;  %v11616_v45 = vunpack.i.h.bf16 %v15056_v0 }
 0x4ff   : > { %9895 = vmatprep.mubr.msk.bf16.mxu0 %vm5465_vm10, %v7577_v60  ;;  %v7426_v10 = vsel %vm2747_vm7, %v7394_v52, %v11586_v46  ;;  %v7332_v11 = vsel %vm3800_vm4, %v6020_v4, %v11611_v35 }
 0x500   : > { %v7458_v50 = vsel %vm5299_vm3, %v7426_v10, %v11591_v6  ;;  %v7364_v6 = vsel %vm1345_vm2, %v7332_v11, %v11616_v45  ;;  %v11681_v45 = vunpack.i.h.bf16 %v15138_v17 }
 0x501   : > { %11968 = vrot.lane.b32.xlu0 %v15081_v22, %s16318_s0  ;;  %v7361_v22 = vsel %vm1345_vm2, %v7329_v40, %v11640_v48  ;;  %v11615_v48 = vunpack.i.l.bf16 %v15056_v0  ;;  %v6019_v40 = vld [vmem:[#allocation3 + $0xc0] sm:$0xff] }
 0x502   : > { %v15148_v58 = vpop.permute.xlu0 %11683  ;;  %11943 = vrot.lane.b32.xlu1 %v15083_v27, %s16314_s24  ;;  %v15152_v29 = vpop.permute.xlu1 %11668  ;;  %v7393_v62 = vsel %vm5234_vm15, %v7361_v22, %v11580_v47 }
 0x503   : > { %v7425_v16 = vsel %vm2747_vm7, %v7393_v62, %v11585_v5 }
 0x504   : > { %v7457_v7 = vsel %vm5299_vm3, %v7425_v16, %v11590_v53 }
 0x506   : > { %v15156_v54 = vpop.permute.xlu0 %11693  ;;  %11948 = vrot.lane.b32.xlu1 %v11947_v25, %s16344_s4  ;;  %v15161_v27 = vpop.permute.xlu1 %11688 }
 0x50a   : > { %v11709_v44 = vpop.permute.xlu0 %11708  ;;  %11973 = vrot.lane.b32.xlu1 %v11972_v28, %s16318_s0  ;;  %v11699_v12 = vpop.permute.xlu1 %11698  ;;  %v7331_v28 = vsel %vm3800_vm4, %v6019_v40, %v11610_v31  ;;  %v11680_v40 = vunpack.i.l.bf16 %v15138_v17  ;;  %s9523_s0 = sshll.u32 %s12121_s25, 12 }
 0x50b   : > { %v11701_v60 = vunpack.i.h.bf16 %v11699_v12  ;;  %v11700_v34 = vunpack.i.l.bf16 %v11699_v12  ;;  %v11711_v22 = vunpack.i.h.bf16 %v11709_v44  ;;  %v11710_v59 = vunpack.i.l.bf16 %v11709_v44  ;;  %s16165_s3 = scalar_lea.hbm %s16375_s28, %s9523_s0 }
 0x50d   : > { %v7490_v32 = vsel %vm2780_vm8, %v7458_v50, %v11701_v60  ;;  %v7489_v20 = vsel %vm2780_vm8, %v7457_v7, %v11700_v34  ;;  %v7363_v34 = vsel %vm1345_vm2, %v7331_v28, %v11615_v48  ;;  %v11676_v50 = vunpack.i.h.bf16 %v15125_v30 }
 0x50e   : > { %v11724_v42 = vpop.permute.xlu0 %11723  ;;  %v11704_v25 = vpop.permute.xlu1 %11703 }
 0x50f   : > { %v11706_v18 = vunpack.i.h.bf16 %v11704_v25  ;;  %v11705_v23 = vunpack.i.l.bf16 %v11704_v25  ;;  %v11726_v52 = vunpack.i.h.bf16 %v11724_v42  ;;  %v11725_v46 = vunpack.i.l.bf16 %v11724_v42 }
 0x511   : > { %v7521_v0 = vsel %vm5364_vm9, %v7489_v20, %v11705_v23  ;;  %v7522_v47 = vsel %vm5364_vm9, %v7490_v32, %v11706_v18  ;;  %v7396_v35 = vsel %vm5234_vm15, %v7364_v6, %v11726_v52  ;;  %v7395_v31 = vsel %vm5234_vm15, %v7363_v34, %v11725_v46  ;;  %v6021_v6 = vld [vmem:[#allocation3 + $0xd8] sm:$0xff] }
 0x512   : > { %v11729_v62 = vpop.permute.xlu0 %11728  ;;  %v11714_v5 = vpop.permute.xlu1 %11713  ;;  %v7553_v12 = vsel %vm857_vm0, %v7521_v0, %v11710_v59  ;;  %v7554_v44 = vsel %vm857_vm0, %v7522_v47, %v11711_v22  ;;  %v11675_v18 = vunpack.i.l.bf16 %v15125_v30  ;;  %v11686_v59 = vunpack.i.h.bf16 %v15148_v58 }
 0x513   : > { %v11731_v16 = vunpack.i.h.bf16 %v11729_v62  ;;  %v11730_v10 = vunpack.i.l.bf16 %v11729_v62  ;;  %v7578_v60 = vpack.c.bf16 %v7554_v44, %v7553_v12  ;;  %v11685_v32 = vunpack.i.l.bf16 %v15148_v58 }
 0x514   : > { %v11716_v12 = vunpack.i.h.bf16 %v11714_v5  ;;  %v11715_v44 = vunpack.i.l.bf16 %v11714_v5  ;;  %v11661_v5 = vunpack.i.h.bf16 %v15130_v57 }
 0x515   : > { %9896 = vmatmul.mubr.msk.bf16.gmra.mxu0 %vm5465_vm10, %v7578_v60  ;;  %v7427_v23 = vsel %vm2747_vm7, %v7395_v31, %v11730_v10  ;;  %v7428_v48 = vsel %vm2747_vm7, %v7396_v35, %v11731_v16 }
 0x516   : > { %v11734_v53 = vpop.permute.xlu0 %11733  ;;  %v11719_v7 = vpop.permute.xlu1 %11718  ;;  %v7333_v35 = vsel %vm3800_vm4, %v6021_v6, %v11715_v44 }
 0x517   : > { %v11736_v42 = vunpack.i.h.bf16 %v11734_v53  ;;  %v11735_v25 = vunpack.i.l.bf16 %v11734_v53  ;;  %v11721_v10 = vunpack.i.h.bf16 %v11719_v7  ;;  %v11720_v60 = vunpack.i.l.bf16 %v11719_v7  ;;  %v6022_v53 = vld [vmem:[#allocation3 + $0xe0] sm:$0xff] }
 0x518   : > { %v7334_v31 = vsel %vm3800_vm4, %v6022_v53, %v11716_v12  ;;  %v11660_v7 = vunpack.i.l.bf16 %v15130_v57  ;;  %v11670_v57 = vunpack.i.l.bf16 %v15152_v29  ;;  %v6023_v53 = vld [vmem:[#allocation3 + $0xf0] sm:$0xff] }
 0x519   : > { %v7459_v4 = vsel %vm5299_vm3, %v7427_v23, %v11735_v25  ;;  %v7460_v22 = vsel %vm5299_vm3, %v7428_v48, %v11736_v42  ;;  %v7365_v25 = vsel %vm1345_vm2, %v7333_v35, %v11720_v60  ;;  %v6024_v35 = vld [vmem:[#allocation3 + $0xf8] sm:$0xff] }
 0x51a   : > { %v7491_v20 = vsel %vm2780_vm8, %v7459_v4, %v11675_v18  ;;  %v7492_v30 = vsel %vm2780_vm8, %v7460_v22, %v11676_v50  ;;  %v7366_v50 = vsel %vm1345_vm2, %v7334_v31, %v11721_v10  ;;  %v7397_v23 = vsel %vm5234_vm15, %v7365_v25, %v11660_v7 }
 0x51b   : > { %v7523_v28 = vsel %vm5364_vm9, %v7491_v20, %v11680_v40  ;;  %v7524_v11 = vsel %vm5364_vm9, %v7492_v30, %v11681_v45  ;;  %v15207_v0 = vpop.permute.xlu0 %11753  ;;  %v15209_v47 = vpop.permute.xlu1 %11738  ;;  %v7398_v48 = vsel %vm5234_vm15, %v7366_v50, %v11661_v5  ;;  %v11666_v40 = vunpack.i.h.bf16 %v15141_v14 }
 0x51c   : > { %v7555_v17 = vsel %vm857_vm0, %v7523_v28, %v11685_v32  ;;  %v7556_v62 = vsel %vm857_vm0, %v7524_v11, %v11686_v59  ;;  %v11665_v4 = vunpack.i.l.bf16 %v15141_v14  ;;  %v11671_v28 = vunpack.i.h.bf16 %v15152_v29 }
 0x51d   : > { %v7579_v52 = vpack.c.bf16 %v7556_v62, %v7555_v17  ;;  %v7430_v32 = vsel %vm2747_vm7, %v7398_v48, %v11666_v40  ;;  %v11691_v11 = vunpack.i.h.bf16 %v15161_v27  ;;  %v11690_v17 = vunpack.i.l.bf16 %v15161_v27 }
 0x51e   : > { %v7429_v59 = vsel %vm2747_vm7, %v7397_v23, %v11665_v4  ;;  %v11695_v14 = vunpack.i.l.bf16 %v15156_v54  ;;  %v7462_v10 = vsel %vm5299_vm3, %v7430_v32, %v11671_v28 }
 0x51f   : > { %v15213_v46 = vpop.permute.xlu0 %11758  ;;  %v15215_v58 = vpop.permute.xlu1 %11743  ;;  %9899 = vmatprep.mubr.msk.bf16.mxu0 %vm5465_vm10, %v7579_v52  ;;  %v11696_v52 = vunpack.i.h.bf16 %v15156_v54  ;;  %v7461_v44 = vsel %vm5299_vm3, %v7429_v59, %v11670_v57  ;;  %v7335_v50 = vsel %vm3800_vm4, %v6023_v53, %v11690_v17  ;;  %v7336_v5 = vsel %vm3800_vm4, %v6024_v35, %v11691_v11 }
 0x520   : > { %v11761_v35 = vunpack.i.h.bf16 %v15213_v46 }
 0x521   : > { %v7368_v28 = vsel %vm1345_vm2, %v7336_v5, %v11696_v52 }
 0x523   : > { %v15218_v16 = vpop.permute.xlu0 %11763  ;;  %v15220_v34 = vpop.permute.xlu1 %11748 }
 0x527   : > { %v15224_v42 = vpop.permute.xlu0 %11773 }
 0x528   : > { %v15228_v18 = vpop.permute.xlu1 %11768 }
 0x52b   : > { %v11789_v45 = vpop.permute.xlu0 %11788 }
 0x52c   : > { %v11779_v22 = vpop.permute.xlu1 %11778  ;;  %v11791_v31 = vunpack.i.h.bf16 %v11789_v45  ;;  %v11790_v29 = vunpack.i.l.bf16 %v11789_v45 }
 0x52d   : > { %v11781_v20 = vunpack.i.h.bf16 %v11779_v22  ;;  %v11780_v30 = vunpack.i.l.bf16 %v11779_v22 }
 0x52f   : > { %v11804_v62 = vpop.permute.xlu0 %11803  ;;  %v7494_v25 = vsel %vm2780_vm8, %v7462_v10, %v11781_v20  ;;  %v7493_v27 = vsel %vm2780_vm8, %v7461_v44, %v11780_v30  ;;  %v7367_v30 = vsel %vm1345_vm2, %v7335_v50, %v11695_v14  ;;  %v11756_v10 = vunpack.i.h.bf16 %v15207_v0 }
 0x530   : > { %v11784_v12 = vpop.permute.xlu1 %11783  ;;  %v11806_v48 = vunpack.i.h.bf16 %v11804_v62  ;;  %v11805_v40 = vunpack.i.l.bf16 %v11804_v62  ;;  %v11765_v50 = vunpack.i.l.bf16 %v15218_v16 }
 0x531   : > { %v11786_v60 = vunpack.i.h.bf16 %v11784_v12  ;;  %v11785_v6 = vunpack.i.l.bf16 %v11784_v12 }
 0x532   : > { %v7400_v11 = vsel %vm5234_vm15, %v7368_v28, %v11806_v48  ;;  %v7399_v17 = vsel %vm5234_vm15, %v7367_v30, %v11805_v40  ;;  %v6025_v28 = vld [vmem:[#allocation3 + $0x108] sm:$0xff] }
 0x533   : > { %v7525_v54 = vsel %vm5364_vm9, %v7493_v27, %v11785_v6  ;;  %v7526_v7 = vsel %vm5364_vm9, %v7494_v25, %v11786_v60  ;;  %v11809_v23 = vpop.permute.xlu0 %11808  ;;  %v11755_v60 = vunpack.i.l.bf16 %v15207_v0  ;;  %v11766_v0 = vunpack.i.h.bf16 %v15218_v16 }
 0x534   : > { %v11794_v4 = vpop.permute.xlu1 %11793  ;;  %v7557_v22 = vsel %vm857_vm0, %v7525_v54, %v11790_v29  ;;  %v7558_v45 = vsel %vm857_vm0, %v7526_v7, %v11791_v31  ;;  %v11811_v59 = vunpack.i.h.bf16 %v11809_v23  ;;  %v11810_v32 = vunpack.i.l.bf16 %v11809_v23 }
 0x535   : > { %v7580_v20 = vpack.c.bf16 %v7558_v45, %v7557_v22  ;;  %v11760_v31 = vunpack.i.l.bf16 %v15213_v46  ;;  %v11796_v45 = vunpack.i.h.bf16 %v11794_v4 }
 0x536   : > { %v7431_v6 = vsel %vm2747_vm7, %v7399_v17, %v11810_v32  ;;  %v7432_v14 = vsel %vm2747_vm7, %v7400_v11, %v11811_v59  ;;  %v11795_v59 = vunpack.i.l.bf16 %v11794_v4  ;;  %v11741_v4 = vunpack.i.h.bf16 %v15209_v47 }
 0x537   : > { %9900 = vmatmul.mubr.msk.bf16.gmra.mxu0 %vm5465_vm10, %v7580_v20  ;;  %v11814_v57 = vpop.permute.xlu0 %11813 }
 0x538   : > { %v11816_v62 = vunpack.i.h.bf16 %v11814_v57  ;;  %v11815_v12 = vunpack.i.l.bf16 %v11814_v57  ;;  %v11799_v44 = vpop.permute.xlu1 %11798  ;;  %v6026_v57 = vld [vmem:[#allocation3 + $0x110] sm:$0xff]  ;;  %v7337_v11 = vsel %vm3800_vm4, %v6025_v28, %v11795_v59 }
 0x539   : > { %v11801_v32 = vunpack.i.h.bf16 %v11799_v44  ;;  %v11800_v20 = vunpack.i.l.bf16 %v11799_v44  ;;  %v7338_v17 = vsel %vm3800_vm4, %v6026_v57, %v11796_v45  ;;  %v11740_v44 = vunpack.i.l.bf16 %v15209_v47  ;;  %v6027_v57 = vld [vmem:[#allocation3 + $0x120] sm:$0xff] }
 0x53a   : > { %v7463_v52 = vsel %vm5299_vm3, %v7431_v6, %v11815_v12  ;;  %v7464_v53 = vsel %vm5299_vm3, %v7432_v14, %v11816_v62  ;;  %v11750_v47 = vunpack.i.l.bf16 %v15220_v34 }
 0x53b   : > { %v7495_v29 = vsel %vm2780_vm8, %v7463_v52, %v11755_v60  ;;  %v7496_v25 = vsel %vm2780_vm8, %v7464_v53, %v11756_v10  ;;  %v15269_v27 = vpop.permute.xlu0 %11833  ;;  %v7369_v12 = vsel %vm1345_vm2, %v7337_v11, %v11800_v20  ;;  %v7370_v10 = vsel %vm1345_vm2, %v7338_v17, %v11801_v32  ;;  %v6028_v11 = vld [vmem:[#allocation3 + $0x128] sm:$0xff] }
 0x53c   : > { %v15273_v5 = vpop.permute.xlu1 %11818  ;;  %v7527_v54 = vsel %vm5364_vm9, %v7495_v29, %v11760_v31  ;;  %v7528_v7 = vsel %vm5364_vm9, %v7496_v25, %v11761_v35  ;;  %v7401_v6 = vsel %vm5234_vm15, %v7369_v12, %v11740_v44  ;;  %v7402_v14 = vsel %vm5234_vm15, %v7370_v10, %v11741_v4 }
 0x53d   : > { %v7559_v23 = vsel %vm857_vm0, %v7527_v54, %v11765_v50  ;;  %v7560_v46 = vsel %vm857_vm0, %v7528_v7, %v11766_v0  ;;  %v11746_v53 = vunpack.i.h.bf16 %v15215_v58  ;;  %v11745_v35 = vunpack.i.l.bf16 %v15215_v58 }
 0x53e   : > { %v7581_v40 = vpack.c.bf16 %v7560_v46, %v7559_v23  ;;  %v11751_v54 = vunpack.i.h.bf16 %v15220_v34  ;;  %v11771_v7 = vunpack.i.h.bf16 %v15228_v18  ;;  %v11770_v23 = vunpack.i.l.bf16 %v15228_v18 }
 0x53f   : > { %v15279_v48 = vpop.permute.xlu0 %11838  ;;  %v7433_v29 = vsel %vm2747_vm7, %v7401_v6, %v11745_v35  ;;  %v7434_v25 = vsel %vm2747_vm7, %v7402_v14, %v11746_v53  ;;  %v11775_v58 = vunpack.i.l.bf16 %v15224_v42 }
 0x540   : > { %v15281_v22 = vpop.permute.xlu1 %11823  ;;  %9903 = vmatprep.mubr.msk.bf16.mxu0 %vm5465_vm10, %v7581_v40  ;;  %v11776_v40 = vunpack.i.h.bf16 %v15224_v42  ;;  %v7465_v59 = vsel %vm5299_vm3, %v7433_v29, %v11750_v47  ;;  %v7466_v32 = vsel %vm5299_vm3, %v7434_v25, %v11751_v54  ;;  %v7339_v10 = vsel %vm3800_vm4, %v6027_v57, %v11770_v23 }
 0x541   : > { %v7340_v4 = vsel %vm3800_vm4, %v6028_v11, %v11771_v7  ;;  %v11841_v11 = vunpack.i.h.bf16 %v15279_v48 }
 0x542   : > { %v7372_v54 = vsel %vm1345_vm2, %v7340_v4, %v11776_v40 }
 0x543   : > { %v15284_v16 = vpop.permute.xlu0 %11843 }
 0x544   : > { %v15286_v30 = vpop.permute.xlu1 %11828 }
 0x547   : > { %v15290_v62 = vpop.permute.xlu0 %11853 }
 0x548   : > { %v15294_v60 = vpop.permute.xlu1 %11848 }
 0x54b   : > { %v11869_v52 = vpop.permute.xlu0 %11868 }
 0x54c   : > { %v11859_v31 = vpop.permute.xlu1 %11858  ;;  %v11871_v17 = vunpack.i.h.bf16 %v11869_v52  ;;  %v11870_v34 = vunpack.i.l.bf16 %v11869_v52 }
 0x54d   : > { %v11861_v0 = vunpack.i.h.bf16 %v11859_v31  ;;  %v11860_v50 = vunpack.i.l.bf16 %v11859_v31 }
 0x54f   : > { %v11884_v46 = vpop.permute.xlu0 %11883  ;;  %v7498_v12 = vsel %vm2780_vm8, %v7466_v32, %v11861_v0  ;;  %v7497_v18 = vsel %vm2780_vm8, %v7465_v59, %v11860_v50  ;;  %v7371_v50 = vsel %vm1345_vm2, %v7339_v10, %v11775_v58  ;;  %v11836_v32 = vunpack.i.h.bf16 %v15269_v27 }
 0x550   : > { %v11864_v45 = vpop.permute.xlu1 %11863  ;;  %v11886_v14 = vunpack.i.h.bf16 %v11884_v46  ;;  %v11885_v53 = vunpack.i.l.bf16 %v11884_v46  ;;  %v11845_v10 = vunpack.i.l.bf16 %v15284_v16 }
 0x551   : > { %v11866_v20 = vunpack.i.h.bf16 %v11864_v45  ;;  %v11865_v28 = vunpack.i.l.bf16 %v11864_v45 }
 0x552   : > { %v7404_v7 = vsel %vm5234_vm15, %v7372_v54, %v11886_v14  ;;  %v7403_v23 = vsel %vm5234_vm15, %v7371_v50, %v11885_v53  ;;  %v11850_v54 = vunpack.i.l.bf16 %v15294_v60 }
 0x553   : > { %v7529_v42 = vsel %vm5364_vm9, %v7497_v18, %v11865_v28  ;;  %v7530_v44 = vsel %vm5364_vm9, %v7498_v12, %v11866_v20  ;;  %v11889_v6 = vpop.permute.xlu0 %11888  ;;  %v11835_v20 = vunpack.i.l.bf16 %v15269_v27  ;;  %v11846_v27 = vunpack.i.h.bf16 %v15284_v16 }
 0x554   : > { %v11874_v35 = vpop.permute.xlu1 %11873  ;;  %v7561_v31 = vsel %vm857_vm0, %v7529_v42, %v11870_v34  ;;  %v7562_v52 = vsel %vm857_vm0, %v7530_v44, %v11871_v17  ;;  %v11891_v29 = vunpack.i.h.bf16 %v11889_v6  ;;  %v11890_v25 = vunpack.i.l.bf16 %v11889_v6 }
 0x555   : > { %v7582_v0 = vpack.c.bf16 %v7562_v52, %v7561_v31  ;;  %v11840_v17 = vunpack.i.l.bf16 %v15279_v48  ;;  %v11876_v6 = vunpack.i.h.bf16 %v11874_v35  ;;  %v11875_v14 = vunpack.i.l.bf16 %v11874_v35 }
 0x556   : > { %v7435_v28 = vsel %vm2747_vm7, %v7403_v23, %v11890_v25  ;;  %v7436_v58 = vsel %vm2747_vm7, %v7404_v7, %v11891_v29  ;;  %v11851_v35 = vunpack.i.h.bf16 %v15294_v60  ;;  %v11826_v60 = vunpack.i.h.bf16 %v15281_v22 }
 0x557   : > { %9904 = vmatmul.mubr.msk.bf16.gmra.mxu0 %vm5465_vm10, %v7582_v0  ;;  %v11894_v47 = vpop.permute.xlu0 %11893  ;;  %v7341_v16 = vsel %vm3800_vm4, %v15016_v51, %v11875_v14  ;;  %v7342_v50 = vsel %vm3800_vm4, %v15008_v2, %v11876_v6  ;;  %v11856_v51 = vunpack.i.h.bf16 %v15290_v62 }
 0x558   : > { %v11896_v46 = vunpack.i.h.bf16 %v11894_v47  ;;  %v11895_v45 = vunpack.i.l.bf16 %v11894_v47  ;;  %v11879_v59 = vpop.permute.xlu1 %11878 }
 0x559   : > { %v11881_v31 = vunpack.i.h.bf16 %v11879_v59  ;;  %v11880_v52 = vunpack.i.l.bf16 %v11879_v59 }
 0x55a   : > { %v7467_v40 = vsel %vm5299_vm3, %v7435_v28, %v11895_v45  ;;  %v7468_v57 = vsel %vm5299_vm3, %v7436_v58, %v11896_v46  ;;  %v11821_v46 = vunpack.i.h.bf16 %v15273_v5  ;;  %v11820_v45 = vunpack.i.l.bf16 %v15273_v5  ;;  %v12051_v58 = vld [vmem:[#allocation3 + $0x150] sm:$0xff] }
 0x55b   : > { %v7499_v34 = vsel %vm2780_vm8, %v7467_v40, %v11835_v20  ;;  %v7500_v12 = vsel %vm2780_vm8, %v7468_v57, %v11836_v32  ;;  %v15335_v18 = vpop.permute.xlu0 %11913  ;;  %v7373_v47 = vsel %vm1345_vm2, %v7341_v16, %v11880_v52  ;;  %v7374_v7 = vsel %vm1345_vm2, %v7342_v50, %v11881_v31  ;;  %v12052_v57 = vld [vmem:[#allocation3 + $0x158] sm:$0xff] }
 0x55c   : > { %v15339_v4 = vpop.permute.xlu1 %11898  ;;  %v7531_v42 = vsel %vm5364_vm9, %v7499_v34, %v11840_v17  ;;  %v7532_v44 = vsel %vm5364_vm9, %v7500_v12, %v11841_v11  ;;  %v11855_v32 = vunpack.i.l.bf16 %v15290_v62  ;;  %v7405_v2 = vsel %vm5234_vm15, %v7373_v47, %v11820_v45 }
 0x55d   : > { %v7563_v48 = vsel %vm857_vm0, %v7531_v42, %v11845_v10  ;;  %v7564_v53 = vsel %vm857_vm0, %v7532_v44, %v11846_v27  ;;  %v7406_v20 = vsel %vm5234_vm15, %v7374_v7, %v11821_v46  ;;  %v11825_v28 = vunpack.i.l.bf16 %v15281_v22 }
 0x55e   : > { %v7583_v25 = vpack.c.bf16 %v7564_v53, %v7563_v48  ;;  %v7343_v40 = vsel %vm3800_vm4, %v12051_v58, %v11850_v54  ;;  %v7344_v5 = vsel %vm3800_vm4, %v12052_v57, %v11851_v35  ;;  %v11351_v17 = vunpack.i.h.bf16 %v14685_v9 }
 0x55f   : > { %v15345_v29 = vpop.permute.xlu0 %11918  ;;  %v11831_v62 = vunpack.i.h.bf16 %v15286_v30  ;;  %v11830_v12 = vunpack.i.l.bf16 %v15286_v30  ;;  %v7437_v27 = vsel %vm2747_vm7, %v7405_v2, %v11825_v28  ;;  %v7438_v10 = vsel %vm2747_vm7, %v7406_v20, %v11826_v60 }
 0x560   : > { %v15347_v0 = vpop.permute.xlu1 %11903  ;;  %9907 = vmatprep.mubr.msk.bf16.mxu0 %vm5465_vm10, %v7583_v25  ;;  %v7375_v44 = vsel %vm1345_vm2, %v7343_v40, %v11855_v32  ;;  %v7376_v6 = vsel %vm1345_vm2, %v7344_v5, %v11856_v51  ;;  %v11916_v14 = vunpack.i.h.bf16 %v15335_v18  ;;  %v11915_v48 = vunpack.i.l.bf16 %v15335_v18 }
 0x561   : > { %v11901_v25 = vunpack.i.h.bf16 %v15339_v4  ;;  %v11921_v30 = vunpack.i.h.bf16 %v15345_v29  ;;  %v7469_v16 = vsel %vm5299_vm3, %v7437_v27, %v11830_v12  ;;  %v7470_v50 = vsel %vm5299_vm3, %v7438_v10, %v11831_v62 }
 0x563   : > { %v11934_v23 = vpop.permute.xlu0 %11933 }
 0x564   : > { %v15360_v59 = vpop.permute.xlu1 %11908  ;;  %v11936_v45 = vunpack.i.h.bf16 %v11934_v23  ;;  %v11935_v51 = vunpack.i.l.bf16 %v11934_v23 }
 0x567   : > { %v11954_v11 = vpop.permute.xlu0 %11953 }
 0x568   : > { %v11924_v34 = vpop.permute.xlu1 %11923  ;;  %v11956_v53 = vunpack.i.h.bf16 %v11954_v11  ;;  %v11955_v31 = vunpack.i.l.bf16 %v11954_v11 }
 0x569   : > { %v11926_v42 = vunpack.i.h.bf16 %v11924_v34  ;;  %v11925_v22 = vunpack.i.l.bf16 %v11924_v34  ;;  %v11920_v34 = vunpack.i.l.bf16 %v15345_v29 }
 0x56a   : > { %v7408_v2 = vsel %vm5234_vm15, %v7376_v6, %v11956_v53  ;;  %v7407_v20 = vsel %vm5234_vm15, %v7375_v44, %v11955_v31  ;;  %v11900_v6 = vunpack.i.l.bf16 %v15339_v4  ;;  %v11906_v53 = vunpack.i.h.bf16 %v15347_v0 }
 0x56b   : > { %v11959_v52 = vpop.permute.xlu0 %11958  ;;  %v7502_v18 = vsel %vm2780_vm8, %v7470_v50, %v11926_v42  ;;  %v7501_v32 = vsel %vm2780_vm8, %v7469_v16, %v11925_v22  ;;  %v11911_v4 = vunpack.i.h.bf16 %v15360_v59 }
 0x56c   : > { %v11929_v35 = vpop.permute.xlu1 %11928  ;;  %v11961_v7 = vunpack.i.h.bf16 %v11959_v52  ;;  %v11960_v46 = vunpack.i.l.bf16 %v11959_v52 }
 0x56d   : > { %v11931_v54 = vunpack.i.h.bf16 %v11929_v35  ;;  %v11930_v47 = vunpack.i.l.bf16 %v11929_v35 }
 0x56e   : > { %v7439_v62 = vsel %vm2747_vm7, %v7407_v20, %v11960_v46  ;;  %v7440_v12 = vsel %vm2747_vm7, %v7408_v2, %v11961_v7  ;;  %v11905_v46 = vunpack.i.l.bf16 %v15347_v0  ;;  %v11910_v2 = vunpack.i.l.bf16 %v15360_v59 }
 0x56f   : > { %v7533_v60 = vsel %vm5364_vm9, %v7501_v32, %v11930_v47  ;;  %v7534_v28 = vsel %vm5364_vm9, %v7502_v18, %v11931_v54  ;;  %v11964_v58 = vpop.permute.xlu0 %11963 }
 0x570   : > { %v11966_v40 = vunpack.i.h.bf16 %v11964_v58  ;;  %v11965_v57 = vunpack.i.l.bf16 %v11964_v58  ;;  %v11939_v5 = vpop.permute.xlu1 %11938  ;;  %v7565_v11 = vsel %vm857_vm0, %v7533_v60, %v11935_v51  ;;  %v7566_v23 = vsel %vm857_vm0, %v7534_v28, %v11936_v45 }
 0x571   : > { %v7584_v27 = vpack.c.bf16 %v7566_v23, %v7565_v11  ;;  %v11941_v22 = vunpack.i.h.bf16 %v11939_v5  ;;  %v11940_v44 = vunpack.i.l.bf16 %v11939_v5  ;;  %v11350_v11 = vunpack.i.l.bf16 %v14685_v9 }
 0x572   : > { %v7471_v10 = vsel %vm5299_vm3, %v7439_v62, %v11965_v57  ;;  %v7472_v42 = vsel %vm5299_vm3, %v7440_v12, %v11966_v40 }
 0x573   : > { %v7503_v31 = vsel %vm2780_vm8, %v7471_v10, %v11915_v48  ;;  %v7504_v52 = vsel %vm2780_vm8, %v7472_v42, %v11916_v14  ;;  %9908 = vmatmul.mubr.msk.bf16.gmra.mxu0 %vm5465_vm10, %v7584_v27  ;;  %v11969_v29 = vpop.permute.xlu0 %11968  ;;  %v15408_v14 = vld [vmem:[%s16239_s14] ss:$0 sm:$0xff]  ;;  %v7345_v48 = vsel %vm3800_vm4, %v15101_v15, %v11940_v44  ;;  %v7346_v18 = vsel %vm3800_vm4, %v15089_v37, %v11941_v22 }
 0x574   : > { %v11971_v16 = vunpack.i.h.bf16 %v11969_v29  ;;  %v11970_v50 = vunpack.i.l.bf16 %v11969_v29  ;;  %v7535_v35 = vsel %vm5364_vm9, %v7503_v31, %v11920_v34  ;;  %v7536_v54 = vsel %vm5364_vm9, %v7504_v52, %v11921_v30  ;;  %v11944_v47 = vpop.permute.xlu1 %11943  ;;  %v15429_v34 = vld [vmem:[%s16240_s15] ss:$0 sm:$0xff] }
 0x575   : > { %v9885_v7 = vpop.f32.mrf.mxu0  ;;  %v11946_v45 = vunpack.i.h.bf16 %v11944_v47  ;;  %v11945_v51 = vunpack.i.l.bf16 %v11944_v47  ;;  %vm12144_vm4 = vmmov 0  }
 0x576   : > { %v7567_v30 = vsel %vm857_vm0, %v7535_v35, %v11970_v50  ;;  %v7568_v32 = vsel %vm857_vm0, %v7536_v54, %v11971_v16  ;;  %v7828_v15 = vmul.f32 %v9885_v7, %v15408_v14  ;;  %9930 = vmatprep.mubr.msk.f32.mxu1 %vm12144_vm4, %v16341_v63 }
 0x577   : > { %v7692_v0 = vpop.f32.mrf.mxu0  ;;  %v7585_v20 = vpack.c.bf16 %v7568_v32, %v7567_v30  ;;  %v7377_v60 = vsel %vm1345_vm2, %v7345_v48, %v11945_v51  ;;  %v7378_v28 = vsel %vm1345_vm2, %v7346_v18, %v11946_v45 }
 0x578   : > { %v7409_v58 = vsel %vm5234_vm15, %v7377_v60, %v11900_v6  ;;  %v7410_v40 = vsel %vm5234_vm15, %v7378_v28, %v11901_v25  ;;  %v11949_v57 = vpop.permute.xlu1 %11948  ;;  %v7826_v37 = vmul.f32 %v15408_v14, %v7692_v0  ;;  %v7867_v31 = vadd.f32 %v15429_v34, %v7828_v15 }
 0x579   : > { %v9886_v5 = vpop.f32.mrf.mxu0  ;;  %v7441_v23 = vsel %vm2747_vm7, %v7409_v58, %v11905_v46  ;;  %v7442_v59 = vsel %vm2747_vm7, %v7410_v40, %v11906_v53  ;;  %v11951_v62 = vunpack.i.h.bf16 %v11949_v57  ;;  %9911 = vmatprep.mubr.msk.bf16.mxu0 %vm5465_vm10, %v7585_v20  ;;  %v11950_v25 = vunpack.i.l.bf16 %v11949_v57 }
 0x57a   : > { %v7473_v12 = vsel %vm5299_vm3, %v7441_v23, %v11910_v2  ;;  %v7474_v27 = vsel %vm5299_vm3, %v7442_v59, %v11911_v4  ;;  %v7865_v10 = vadd.f32 %v15429_v34, %v7826_v37  ;;  %v7829_v6 = vmul.f32 %v9886_v5, %v15408_v14 }
 0x57b   : > { %v7695_v42 = vpop.f32.mrf.mxu0  ;;  %v7505_v22 = vsel %vm2780_vm8, %v7473_v12, %v11350_v11  ;;  %v7506_v44 = vsel %vm2780_vm8, %v7474_v27, %v11351_v17  ;;  %v7899_v4 = vmax.f32 %v7867_v31, 0.0 }
 0x57c   : > { %v7827_v53 = vmul.f32 %v15408_v14, %v7695_v42  ;;  %v7897_v52 = vmax.f32 %v7865_v10, 0.0  ;;  %v11974_v29 = vpop.permute.xlu1 %11973  ;;  %v7537_v54 = vsel %vm5364_vm9, %v7505_v22, %v11950_v25  ;;  %v7538_v47 = vsel %vm5364_vm9, %v7506_v44, %v11951_v62 }
 0x57d   : > { %v11976_v16 = vunpack.i.h.bf16 %v11974_v29  ;;  %v11975_v50 = vunpack.i.l.bf16 %v11974_v29  ;;  %v7868_v9 = vadd.f32 %v15429_v34, %v7829_v6 }
 0x57e   : > { %v7866_v35 = vadd.f32 %v15429_v34, %v7827_v53  ;;  %7961 = vrot.lane.b32.xlu0 %v7897_v52, %s16314_s24 }
 0x57f   : > { %v7569_v17 = vsel %vm857_vm0, %v7537_v54, %v11975_v50  ;;  %v7570_v7 = vsel %vm857_vm0, %v7538_v47, %v11976_v16  ;;  %v7900_v51 = vmax.f32 %v7868_v9, 0.0 }
 0x580   : > { %v7898_v46 = vmax.f32 %v7866_v35, 0.0  ;;  %v7586_v45 = vpack.c.bf16 %v7570_v7, %v7569_v17 }
 0x582   : > { %7963 = vrot.lane.b32.xlu1 %v7898_v46, %s16314_s24  ;;  %9912 = vmatmul.mubr.msk.bf16.gmra.mxu0 %vm5465_vm10, %v7586_v45 }
 0x583   : > { %7965 = vrot.lane.b32.xlu0 %v7899_v4, %s16314_s24  ;;  %9919 = vmatprep.mubr.msk.f32.mxu0 %vm12144_vm4, %v16341_v63 }
 0x586   : > { %7967 = vrot.lane.b32.xlu1 %v7900_v51, %s16314_s24 }
 0x595   : > { %v9889_v48 = vpop.f32.mrf.mxu0 }
 0x596   : > { %v7832_v30 = vmul.f32 %v9889_v48, %v15408_v14 }
 0x597   : > { %v7708_v18 = vpop.f32.mrf.mxu0 }
 0x598   : > { %v7830_v32 = vmul.f32 %v15408_v14, %v7708_v18  ;;  %v7871_v60 = vadd.f32 %v15429_v34, %v7832_v30 }
 0x599   : > { %v9890_v0 = vpop.f32.mrf.mxu0 }
 0x59a   : > { %v7869_v2 = vadd.f32 %v15429_v34, %v7830_v32  ;;  %v7833_v58 = vmul.f32 %v9890_v0, %v15408_v14  ;;  %v7903_v57 = vmax.f32 %v7871_v60, 0.0  ;;  %v15499_v60 = vld [vmem:[%s16238_s13] ss:$0 sm:$0xff] }
 0x59b   : > { %v7711_v20 = vpop.f32.mrf.mxu0 }
 0x59c   : > { %v7901_v28 = vmax.f32 %v7869_v2, 0.0  ;;  %v7831_v40 = vmul.f32 %v15408_v14, %v7711_v20  ;;  %v7872_v37 = vadd.f32 %v15429_v34, %v7833_v58  ;;  %v15491_v2 = vld [vmem:[%s16237_s12] ss:$0 sm:$0xff] }
 0x59d   : > { %v3250_v20 = vmul.f32 %v15491_v2, %v13471_v36  ;;  %v3252_v58 = vmul.f32 %v13462_v49, %v15491_v2 }
 0x59e   : > { %v7870_v15 = vadd.f32 %v15429_v34, %v7831_v40  ;;  %7969 = vrot.lane.b32.xlu0 %v7901_v28, %s16314_s24  ;;  %v7904_v11 = vmax.f32 %v7872_v37, 0.0  ;;  %v3251_v28 = vmul.f32 %v15491_v2, %v13488_v39 }
 0x59f   : > { %v3289_v40 = vadd.f32 %v15499_v60, %v3250_v20  ;;  %v3291_v36 = vadd.f32 %v15499_v60, %v3252_v58  ;;  %v3254_v58 = vmul.f32 %v15491_v2, %v14203_v21 }
 0x5a0   : > { %v7902_v5 = vmax.f32 %v7870_v15, 0.0  ;;  %v3253_v15 = vmul.f32 %v13478_v55, %v15491_v2 }
 0x5a1   : > { %v3321_v37 = vmax.f32 %v3289_v40, 0.0  ;;  %v3256_v40 = vmul.f32 %v14192_v56, %v15491_v2 }
 0x5a2   : > { %7973 = vrot.lane.b32.xlu0 %v7903_v57, %s16314_s24  ;;  %7971 = vrot.lane.b32.xlu1 %v7902_v5, %s16314_s24  ;;  %v3290_v57 = vadd.f32 %v15499_v60, %v3251_v28 }
 0x5a4   : > { %v3322_v39 = vmax.f32 %v3290_v57, 0.0  ;;  %v3255_v57 = vmul.f32 %v15491_v2, %v14229_v19 }
 0x5a6   : > { %7975 = vrot.lane.b32.xlu1 %v7904_v11, %s16314_s24 }
 0x5b5   : > { %v9893_v23 = vpop.f32.mrf.mxu0 }
 0x5b6   : > { %v7836_v62 = vmul.f32 %v9893_v23, %v15408_v14  ;;  %v3292_v23 = vadd.f32 %v15499_v60, %v3253_v15  ;;  %v3293_v15 = vadd.f32 %v15499_v60, %v3254_v58 }
 0x5b7   : > { %v7724_v59 = vpop.f32.mrf.mxu0 }
 0x5b8   : > { %v7834_v25 = vmul.f32 %v15408_v14, %v7724_v59  ;;  %v7875_v42 = vadd.f32 %v15429_v34, %v7836_v62  ;;  %v3323_v62 = vmax.f32 %v3291_v36, 0.0  ;;  %v3295_v36 = vadd.f32 %v15499_v60, %v3256_v40 }
 0x5b9   : > { %v9894_v12 = vpop.f32.mrf.mxu0  ;;  %v3258_v40 = vmul.f32 %v15491_v2, %v14246_v33 }
 0x5ba   : > { %v7873_v27 = vadd.f32 %v15429_v34, %v7834_v25  ;;  %v7837_v44 = vmul.f32 %v9894_v12, %v15408_v14  ;;  %v7907_v31 = vmax.f32 %v7875_v42, 0.0  ;;  %v3327_v56 = vmax.f32 %v3295_v36, 0.0 }
 0x5bb   : > { %v7727_v10 = vpop.f32.mrf.mxu0  ;;  %v3259_v36 = vmul.f32 %v15491_v2, %v14266_v26 }
 0x5bc   : > { %v7905_v22 = vmax.f32 %v7873_v27, 0.0  ;;  %v7835_v6 = vmul.f32 %v15408_v14, %v7727_v10  ;;  %v7876_v52 = vadd.f32 %v15429_v34, %v7837_v44 }
 0x5be   : > { %v7874_v53 = vadd.f32 %v15429_v34, %v7835_v6  ;;  %7977 = vrot.lane.b32.xlu0 %v7905_v22, %s16314_s24  ;;  %v7908_v16 = vmax.f32 %v7876_v52, 0.0  ;;  %v3324_v22 = vmax.f32 %v3292_v23, 0.0 }
 0x5c0   : > { %v7906_v29 = vmax.f32 %v7874_v53, 0.0 }
 0x5c2   : > { %7981 = vrot.lane.b32.xlu0 %v7907_v31, %s16314_s24  ;;  %7979 = vrot.lane.b32.xlu1 %v7906_v29, %s16314_s24 }
 0x5c6   : > { %7983 = vrot.lane.b32.xlu1 %v7908_v16, %s16314_s24 }
 0x5d5   : > { %v9897_v50 = vpop.f32.mrf.mxu0 }
 0x5d6   : > { %v7840_v54 = vmul.f32 %v9897_v50, %v15408_v14 }
 0x5d7   : > { %v7740_v35 = vpop.f32.mrf.mxu0 }
 0x5d8   : > { %v7838_v47 = vmul.f32 %v15408_v14, %v7740_v35  ;;  %v7879_v46 = vadd.f32 %v15429_v34, %v7840_v54 }
 0x5d9   : > { %v9898_v9 = vpop.f32.mrf.mxu0 }
 0x5da   : > { %v7877_v17 = vadd.f32 %v15429_v34, %v7838_v47  ;;  %v7841_v45 = vmul.f32 %v9898_v9, %v15408_v14  ;;  %v7911_v18 = vmax.f32 %v7879_v46, 0.0 }
 0x5db   : > { %v7743_v7 = vpop.f32.mrf.mxu0 }
 0x5dc   : > { %v7909_v4 = vmax.f32 %v7877_v17, 0.0  ;;  %v7839_v51 = vmul.f32 %v15408_v14, %v7743_v7  ;;  %v7880_v30 = vadd.f32 %v15429_v34, %v7841_v45 }
 0x5de   : > { %v7878_v48 = vadd.f32 %v15429_v34, %v7839_v51  ;;  %7985 = vrot.lane.b32.xlu0 %v7909_v4, %s16314_s24  ;;  %v7912_v0 = vmax.f32 %v7880_v30, 0.0 }
 0x5e0   : > { %v7910_v32 = vmax.f32 %v7878_v48, 0.0 }
 0x5e2   : > { %7989 = vrot.lane.b32.xlu0 %v7911_v18, %s16314_s24  ;;  %7987 = vrot.lane.b32.xlu1 %v7910_v32, %s16314_s24 }
 0x5e6   : > { %7991 = vrot.lane.b32.xlu1 %v7912_v0, %s16314_s24 }
 0x5f0   : > { %v7962_v5 = vpop.permute.xlu0 %7961 }
 0x5f1   : > { %v8057_v11 = vsel %vm1345_vm2, %v3321_v37, %v7962_v5  ;;  %v3325_v37 = vmax.f32 %v3293_v15, 0.0  ;;  %v3257_v5 = vmul.f32 %v14209_v1, %v15491_v2  ;;  %v3260_v15 = vmul.f32 %v14237_v24, %v15491_v2 }
 0x5f2   : > { %v9491_v59 = vpack.c.bf16 %v8057_v11, %v8057_v11  ;;  %v8250_v12 = vsel %vm5234_vm15, %v8057_v11, 0.0  ;;  %v3294_v11 = vadd.f32 %v15499_v60, %v3255_v57  ;;  %v3297_v57 = vadd.f32 %v15499_v60, %v3258_v40 }
 0x5f4   : > { %v7964_v49 = vpop.permute.xlu1 %7963  ;;  %8218 = vst.msk [vmem:[#allocation4] sm:$0xf] %vm8217_vm1, %v9491_v59 }
 0x5f5   : > { %v7966_v25 = vpop.permute.xlu0 %7965  ;;  %v8058_v55 = vsel %vm1345_vm2, %v3322_v39, %v7964_v49  ;;  %v3326_v49 = vmax.f32 %v3294_v11, 0.0  ;;  %v3261_v11 = vmul.f32 %v14258_v38, %v15491_v2 }
 0x5f6   : > { %v8059_v27 = vsel %vm1345_vm2, %v3323_v62, %v7966_v25  ;;  %v9492_v10 = vpack.c.bf16 %v8058_v55, %v8058_v55  ;;  %v8251_v42 = vsel %vm5234_vm15, %v8058_v55, 0.0  ;;  %v3296_v62 = vadd.f32 %v15499_v60, %v3257_v5 }
 0x5f7   : > { %v9493_v44 = vpack.c.bf16 %v8059_v27, %v8059_v27  ;;  %v8252_v6 = vadd.f32 %v8251_v42, %v8250_v12  ;;  %v8253_v53 = vsel %vm5234_vm15, %v8059_v27, 0.0  ;;  %v9901_v31 = vpop.f32.mrf.mxu0  ;;  %v3329_v5 = vmax.f32 %v3297_v57, 0.0 }
 0x5f8   : > { %8219 = vst.msk [vmem:[#allocation4 + $0x4] sm:$0xf] %vm8217_vm1, %v9492_v10  ;;  %v7968_v52 = vpop.permute.xlu1 %7967  ;;  %v7844_v47 = vmul.f32 %v9901_v31, %v15408_v14  ;;  %v3262_v57 = vmul.f32 %v15491_v2, %v14280_v43 }
 0x5f9   : > { %8220 = vst.msk [vmem:[#allocation4 + $0x8] sm:$0xf] %vm8217_vm1, %v9493_v44  ;;  %v8254_v29 = vadd.f32 %v8253_v53, %v8252_v6  ;;  %v8060_v16 = vsel %vm1345_vm2, %v3324_v22, %v7968_v52  ;;  %v7756_v50 = vpop.f32.mrf.mxu0  ;;  %v3328_v22 = vmax.f32 %v3296_v62, 0.0 }
 0x5fa   : > { %v9494_v35 = vpack.c.bf16 %v8060_v16, %v8060_v16  ;;  %v8255_v54 = vsel %vm5234_vm15, %v8060_v16, 0.0  ;;  %v7842_v9 = vmul.f32 %v15408_v14, %v7756_v50  ;;  %v7883_v45 = vadd.f32 %v15429_v34, %v7844_v47 }
 0x5fb   : > { %v8256_v17 = vadd.f32 %v8255_v54, %v8254_v29  ;;  %v9902_v7 = vpop.f32.mrf.mxu0 }
 0x5fc   : > { %8221 = vst.msk [vmem:[#allocation4 + $0xc] sm:$0xf] %vm8217_vm1, %v9494_v35  ;;  %v7881_v46 = vadd.f32 %v15429_v34, %v7842_v9  ;;  %v7845_v48 = vmul.f32 %v9902_v7, %v15408_v14  ;;  %v7915_v32 = vmax.f32 %v7883_v45, 0.0  ;;  %v8322_v9 = vld [vmem:[%s16241_s16 + $0x4] sm:$0x3] }
 0x5fd   : > { %v7759_v4 = vpop.f32.mrf.mxu0 }
 0x5fe   : > { %v7913_v51 = vmax.f32 %v7881_v46, 0.0  ;;  %v7843_v18 = vmul.f32 %v15408_v14, %v7759_v4  ;;  %v7884_v0 = vadd.f32 %v15429_v34, %v7845_v48  ;;  %v8324_v46 = vunpack.c.l.bf16 %v8322_v9 }
 0x600   : > { %v7882_v30 = vadd.f32 %v15429_v34, %v7843_v18  ;;  %7993 = vrot.lane.b32.xlu0 %v7913_v51, %s16314_s24  ;;  %v7916_v28 = vmax.f32 %v7884_v0, 0.0  ;;  %9916 = vmatpush3.msk.msra.mxu0 %vm3078_vm6, %v8324_v46  ;;  %vm8569_vm6 = vcmask 253952  }
 0x601   : > { %9917 = vmatprep.subr.mxu0 %v16341_v63 }
 0x602   : > { %v7914_v20 = vmax.f32 %v7882_v30, 0.0 }
 0x604   : > { %7997 = vrot.lane.b32.xlu0 %v7915_v32, %s16314_s24  ;;  %7995 = vrot.lane.b32.xlu1 %v7914_v20, %s16314_s24 }
 0x608   : > { %7999 = vrot.lane.b32.xlu1 %v7916_v28, %s16314_s24 }
 0x610   : > { %v7970_v23 = vpop.permute.xlu0 %7969 }
 0x611   : > { %v8061_v21 = vsel %vm1345_vm2, %v3325_v37, %v7970_v23  ;;  %v3299_v37 = vadd.f32 %v15499_v60, %v3260_v15  ;;  %v3298_v23 = vadd.f32 %v15499_v60, %v3259_v36 }
 0x612   : > { %v9495_v39 = vpack.c.bf16 %v8061_v21, %v8061_v21  ;;  %v8257_v59 = vsel %vm5234_vm15, %v8061_v21, 0.0 }
 0x613   : > { %v8258_v25 = vadd.f32 %v8257_v59, %v8256_v17  ;;  %v3331_v24 = vmax.f32 %v3299_v37, 0.0  ;;  %v3330_v62 = vmax.f32 %v3298_v23, 0.0 }
 0x614   : > { %8222 = vst.msk [vmem:[#allocation4 + $0x10] sm:$0xf] %vm8217_vm1, %v9495_v39  ;;  %v7974_v19 = vpop.permute.xlu0 %7973  ;;  %v7972_v55 = vpop.permute.xlu1 %7971 }
 0x615   : > { %v8063_v12 = vsel %vm1345_vm2, %v3327_v56, %v7974_v19  ;;  %v8062_v1 = vsel %vm1345_vm2, %v3326_v49, %v7972_v55  ;;  %v3300_v56 = vadd.f32 %v15499_v60, %v3261_v11 }
 0x616   : > { %v9497_v27 = vpack.c.bf16 %v8063_v12, %v8063_v12  ;;  %v9496_v10 = vpack.c.bf16 %v8062_v1, %v8062_v1  ;;  %v8259_v42 = vsel %vm5234_vm15, %v8062_v1, 0.0  ;;  %v8261_v53 = vsel %vm5234_vm15, %v8063_v12, 0.0 }
 0x617   : > { %v8260_v44 = vadd.f32 %v8259_v42, %v8258_v25  ;;  %v9905_v6 = vpop.f32.mrf.mxu0  ;;  %v3332_v42 = vmax.f32 %v3300_v56, 0.0 }
 0x618   : > { %8224 = vst.msk [vmem:[#allocation4 + $0x18] sm:$0xf] %vm8217_vm1, %v9497_v27  ;;  %8223 = vst.msk [vmem:[#allocation4 + $0x14] sm:$0xf] %vm8217_vm1, %v9496_v10  ;;  %v7976_v31 = vpop.permute.xlu1 %7975  ;;  %v7848_v50 = vmul.f32 %v9905_v6, %v15408_v14 }
 0x619   : > { %v7772_v52 = vpop.f32.mrf.mxu0  ;;  %v8262_v29 = vadd.f32 %v8261_v53, %v8260_v44  ;;  %v8064_v16 = vsel %vm1345_vm2, %v3328_v22, %v7976_v31 }
 0x61a   : > { %v7846_v35 = vmul.f32 %v15408_v14, %v7772_v52  ;;  %v9498_v54 = vpack.c.bf16 %v8064_v16, %v8064_v16  ;;  %v8263_v47 = vsel %vm5234_vm15, %v8064_v16, 0.0  ;;  %v7887_v51 = vadd.f32 %v15429_v34, %v7848_v50 }
 0x61b   : > { %v8264_v17 = vadd.f32 %v8263_v47, %v8262_v29  ;;  %v9906_v7 = vpop.f32.mrf.mxu0 }
 0x61c   : > { %v7885_v4 = vadd.f32 %v15429_v34, %v7846_v35  ;;  %8225 = vst.msk [vmem:[#allocation4 + $0x1c] sm:$0xf] %vm8217_vm1, %v9498_v54  ;;  %v7849_v18 = vmul.f32 %v9906_v7, %v15408_v14  ;;  %v7919_v0 = vmax.f32 %v7887_v51, 0.0  ;;  %v8321_v7 = vld [vmem:[%s16241_s16] sm:$0xf] }
 0x61d   : > { %v7775_v45 = vpop.f32.mrf.mxu0 }
 0x61e   : > { %v7917_v48 = vmax.f32 %v7885_v4, 0.0  ;;  %v7847_v30 = vmul.f32 %v15408_v14, %v7775_v45  ;;  %v7888_v20 = vadd.f32 %v15429_v34, %v7849_v18  ;;  %v8323_v45 = vunpack.c.l.bf16 %v8321_v7  ;;  %v8406_v7 = vld [vmem:[%s16244_s19 + $0x8] sm:$0xff] }
 0x620   : > { %v7886_v32 = vadd.f32 %v15429_v34, %v7847_v30  ;;  %8001 = vrot.lane.b32.xlu0 %v7917_v48, %s16314_s24  ;;  %v7920_v58 = vmax.f32 %v7888_v20, 0.0  ;;  %9918 = vmatpush3.msra.mxu0 %v8323_v45  ;;  %v3266_v45 = vmul.f32 %v15491_v2, %v14325_v8 }
 0x622   : > { %v7918_v28 = vmax.f32 %v7886_v32, 0.0 }
 0x624   : > { %8005 = vrot.lane.b32.xlu0 %v7919_v0, %s16314_s24  ;;  %8003 = vrot.lane.b32.xlu1 %v7918_v28, %s16314_s24 }
 0x628   : > { %8007 = vrot.lane.b32.xlu1 %v7920_v58, %s16314_s24 }
 0x630   : > { %v7978_v21 = vpop.permute.xlu0 %7977 }
 0x631   : > { %v8065_v33 = vsel %vm1345_vm2, %v3329_v5, %v7978_v21 }
 0x632   : > { %v9499_v39 = vpack.c.bf16 %v8065_v33, %v8065_v33  ;;  %v8265_v59 = vsel %vm5234_vm15, %v8065_v33, 0.0  ;;  %v3264_v33 = vmul.f32 %v14272_v3, %v15491_v2 }
 0x633   : > { %v8266_v49 = vadd.f32 %v8265_v59, %v8264_v17  ;;  %v9909_v26 = vpop.f32.mrf.mxu0  ;;  %v3263_v59 = vmul.f32 %v15491_v2, %v14297_v61 }
 0x634   : > { %8226 = vst.msk [vmem:[#allocation4 + $0x20] sm:$0xf] %vm8217_vm1, %v9499_v39  ;;  %v7982_v25 = vpop.permute.xlu0 %7981  ;;  %v7980_v19 = vpop.permute.xlu1 %7979  ;;  %v7852_v38 = vmul.f32 %v9909_v26, %v15408_v14  ;;  %v3301_v39 = vadd.f32 %v15499_v60, %v3262_v57 }
 0x635   : > { %v7788_v55 = vpop.f32.mrf.mxu0  ;;  %v8067_v12 = vsel %vm1345_vm2, %v3331_v24, %v7982_v25  ;;  %v8066_v1 = vsel %vm1345_vm2, %v3330_v62, %v7980_v19  ;;  %v3302_v3 = vadd.f32 %v15499_v60, %v3263_v59 }
 0x636   : > { %v7850_v27 = vmul.f32 %v15408_v14, %v7788_v55  ;;  %v9501_v10 = vpack.c.bf16 %v8067_v12, %v8067_v12  ;;  %v9500_v22 = vpack.c.bf16 %v8066_v1, %v8066_v1  ;;  %v8267_v44 = vsel %vm5234_vm15, %v8066_v1, 0.0 }
 0x637   : > { %v9910_v6 = vpop.f32.mrf.mxu0  ;;  %v8268_v31 = vadd.f32 %v8267_v44, %v8266_v49  ;;  %v7891_v29 = vadd.f32 %v15429_v34, %v7852_v38  ;;  %v8269_v16 = vsel %vm5234_vm15, %v8067_v12, 0.0  ;;  %v3303_v49 = vadd.f32 %v15499_v60, %v3264_v33 }
 0x638   : > { %v7889_v53 = vadd.f32 %v15429_v34, %v7850_v27  ;;  %8228 = vst.msk [vmem:[#allocation4 + $0x28] sm:$0xf] %vm8217_vm1, %v9501_v10  ;;  %v7984_v52 = vpop.permute.xlu1 %7983  ;;  %8227 = vst.msk [vmem:[#allocation4 + $0x24] sm:$0xf] %vm8217_vm1, %v9500_v22  ;;  %v7853_v47 = vmul.f32 %v9910_v6, %v15408_v14  ;;  %v3333_v26 = vmax.f32 %v3301_v39, 0.0  ;;  %v3334_v1 = vmax.f32 %v3302_v3, 0.0 }
 0x639   : > { %v7791_v50 = vpop.f32.mrf.mxu0  ;;  %v8068_v35 = vsel %vm1345_vm2, %v3332_v42, %v7984_v52  ;;  %v8270_v17 = vadd.f32 %v8269_v16, %v8268_v31  ;;  %v7923_v18 = vmax.f32 %v7891_v29, 0.0  ;;  %v3335_v55 = vmax.f32 %v3303_v49, 0.0 }
 0x63a   : > { %v7921_v54 = vmax.f32 %v7889_v53, 0.0  ;;  %v7851_v9 = vmul.f32 %v15408_v14, %v7791_v50  ;;  %v9502_v46 = vpack.c.bf16 %v8068_v35, %v8068_v35  ;;  %v8271_v4 = vsel %vm5234_vm15, %v8068_v35, 0.0  ;;  %v8408_v50 = vld [vmem:[%s16244_s19 + $0x18] sm:$0xff]  ;;  %v8407_v35 = vld [vmem:[%s16244_s19 + $0x10] sm:$0xff] }
 0x63b   : > { %v8272_v48 = vadd.f32 %v8271_v4, %v8270_v17  ;;  %v7892_v30 = vadd.f32 %v15429_v34, %v7853_v47  ;;  %9923 = vmatpush3.msra.mxu1 %v8408_v50  ;;  %v8405_v4 = vld [vmem:[%s16244_s19] sm:$0xff] }
 0x63c   : > { %v7890_v51 = vadd.f32 %v15429_v34, %v7851_v9  ;;  %8009 = vrot.lane.b32.xlu0 %v7921_v54, %s16314_s24  ;;  %8229 = vst.msk [vmem:[#allocation4 + $0x2c] sm:$0xf] %vm8217_vm1, %v9502_v46  ;;  %9924 = vmatprep.subr.mxu1 %v16341_v63 }
 0x63d   : > { %v7924_v0 = vmax.f32 %v7892_v30, 0.0  ;;  %9925 = vmatpush3.msra.mxu1 %v8407_v35 }
 0x63e   : > { %v7922_v32 = vmax.f32 %v7890_v51, 0.0  ;;  %9926 = vmatprep.subr.mxu1 %v16341_v63  ;;  %v3268_v51 = vmul.f32 %v14307_v41, %v15491_v2 }
 0x63f   : > { %9927 = vmatpush3.msra.mxu1 %v8406_v7 }
 0x640   : > { %8013 = vrot.lane.b32.xlu0 %v7923_v18, %s16314_s24  ;;  %8011 = vrot.lane.b32.xlu1 %v7922_v32, %s16314_s24  ;;  %v16345_v18 = vld [vmem:[#allocation16_spill] sm:$0xff]  ;;  %v3307_v32 = vadd.f32 %v15499_v60, %v3268_v51 }
 0x641   : > { %9928 = vmatprep.subr.mxu1 %v16341_v63  ;;  %v3267_v30 = vmul.f32 %v15491_v2, %v16345_v18 }
 0x642   : > { %v9913_v20 = vpop.f32.mrf.mxu0  ;;  %9929 = vmatpush3.msra.mxu1 %v8405_v4  ;;  %v3339_v41 = vmax.f32 %v3307_v32, 0.0 }
 0x643   : > { %v7856_v58 = vmul.f32 %v9913_v20, %v15408_v14  ;;  %9933 = vmatprep.subr.mxu1 %v16341_v63  ;;  %v16346_v20 = vld [vmem:[#allocation15_spill] sm:$0xff] }
 0x644   : > { %8015 = vrot.lane.b32.xlu1 %v7924_v0, %s16314_s24  ;;  %v7804_v28 = vpop.f32.mrf.mxu0 }
 0x645   : > { %v7854_v40 = vmul.f32 %v15408_v14, %v7804_v28  ;;  %v7895_v5 = vadd.f32 %v15429_v34, %v7856_v58  ;;  %v3269_v28 = vmul.f32 %v16346_v20, %v15491_v2  ;;  %v3306_v58 = vadd.f32 %v15499_v60, %v3267_v30 }
 0x646   : > { %v9914_v15 = vpop.f32.mrf.mxu0 }
 0x647   : > { %v7893_v36 = vadd.f32 %v15429_v34, %v7854_v40  ;;  %v7857_v23 = vmul.f32 %v9914_v15, %v15408_v14  ;;  %v7927_v24 = vmax.f32 %v7895_v5, 0.0 }
 0x648   : > { %v7807_v37 = vpop.f32.mrf.mxu0 }
 0x649   : > { %v7925_v11 = vmax.f32 %v7893_v36, 0.0  ;;  %v7855_v21 = vmul.f32 %v15408_v14, %v7807_v37  ;;  %v7896_v56 = vadd.f32 %v15429_v34, %v7857_v23  ;;  %v3265_v14 = vmul.f32 %v14291_v13, %v15491_v2 }
 0x64a   : > { %v3308_v36 = vadd.f32 %v15499_v60, %v3269_v28  ;;  %v3338_v37 = vmax.f32 %v3306_v58, 0.0  ;;  %v16351_v58 = vld [vmem:[#allocation22_spill] sm:$0xff] }
 0x64b   : > { %v7894_v43 = vadd.f32 %v15429_v34, %v7855_v21  ;;  %8017 = vrot.lane.b32.xlu0 %v7925_v11, %s16314_s24  ;;  %v7928_v25 = vmax.f32 %v7896_v56, 0.0  ;;  %v3304_v12 = vadd.f32 %v15499_v60, %v3265_v14 }
 0x64d   : > { %v7926_v62 = vmax.f32 %v7894_v43, 0.0  ;;  %v3336_v31 = vmax.f32 %v3304_v12, 0.0 }
 0x64f   : > { %8021 = vrot.lane.b32.xlu0 %v7927_v24, %s16314_s24  ;;  %8019 = vrot.lane.b32.xlu1 %v7926_v62, %s16314_s24  ;;  %v3340_v24 = vmax.f32 %v3308_v36, 0.0 }
 0x650   : > { %v7986_v61 = vpop.permute.xlu0 %7985 }
 0x651   : > { %v8069_v19 = vsel %vm1345_vm2, %v3333_v26, %v7986_v61 }
 0x652   : > { %v9503_v38 = vpack.c.bf16 %v8069_v19, %v8069_v19  ;;  %v8273_v34 = vsel %vm5234_vm15, %v8069_v19, 0.0  ;;  %v16347_v19 = vld [vmem:[#allocation18_spill] sm:$0xff] }
 0x653   : > { %v8274_v27 = vadd.f32 %v8273_v34, %v8272_v48  ;;  %8023 = vrot.lane.b32.xlu1 %v7928_v25, %s16314_s24  ;;  %v3305_v48 = vadd.f32 %v15499_v60, %v3266_v45  ;;  %v16348_v34 = vld [vmem:[#allocation17_spill] sm:$0xff] }
 0x654   : > { %8230 = vst.msk [vmem:[#allocation4 + $0x30] sm:$0xf] %vm8217_vm1, %v9503_v38  ;;  %v7990_v13 = vpop.permute.xlu0 %7989  ;;  %v7988_v10 = vpop.permute.xlu1 %7987  ;;  %v3270_v38 = vmul.f32 %v15491_v2, %v16347_v19 }
 0x655   : > { %v8071_v42 = vsel %vm1345_vm2, %v3335_v55, %v7990_v13  ;;  %v8070_v22 = vsel %vm1345_vm2, %v3334_v1, %v7988_v10  ;;  %v3337_v0 = vmax.f32 %v3305_v48, 0.0  ;;  %v3272_v55 = vmul.f32 %v16348_v34, %v15491_v2  ;;  %v16349_v1 = vld [vmem:[#allocation20_spill] sm:$0xff] }
 0x656   : > { %v9505_v44 = vpack.c.bf16 %v8071_v42, %v8071_v42  ;;  %v9504_v6 = vpack.c.bf16 %v8070_v22, %v8070_v22  ;;  %v8275_v53 = vsel %vm5234_vm15, %v8070_v22, 0.0  ;;  %v8277_v29 = vsel %vm5234_vm15, %v8071_v42, 0.0  ;;  %v16350_v42 = vld [vmem:[#allocation19_spill] sm:$0xff] }
 0x657   : > { %v8276_v52 = vadd.f32 %v8275_v53, %v8274_v27  ;;  %v3309_v12 = vadd.f32 %v15499_v60, %v3270_v38  ;;  %v3271_v27 = vmul.f32 %v15491_v2, %v16349_v1  ;;  %v3311_v13 = vadd.f32 %v15499_v60, %v3272_v55 }
 0x658   : > { %8232 = vst.msk [vmem:[#allocation4 + $0x38] sm:$0xf] %vm8217_vm1, %v9505_v44  ;;  %8231 = vst.msk [vmem:[#allocation4 + $0x34] sm:$0xf] %vm8217_vm1, %v9504_v6  ;;  %v7992_v16 = vpop.permute.xlu1 %7991  ;;  %v3273_v22 = vmul.f32 %v16350_v42, %v15491_v2 }
 0x659   : > { %v8278_v54 = vadd.f32 %v8277_v29, %v8276_v52  ;;  %v8072_v47 = vsel %vm1345_vm2, %v3336_v31, %v7992_v16  ;;  %v3341_v10 = vmax.f32 %v3309_v12, 0.0  ;;  %v3310_v44 = vadd.f32 %v15499_v60, %v3271_v27 }
 0x65a   : > { %v9506_v9 = vpack.c.bf16 %v8072_v47, %v8072_v47  ;;  %v8279_v17 = vsel %vm5234_vm15, %v8072_v47, 0.0  ;;  %v3343_v29 = vmax.f32 %v3311_v13, 0.0  ;;  %v3312_v16 = vadd.f32 %v15499_v60, %v3273_v22 }
 0x65b   : > { %v8280_v46 = vadd.f32 %v8279_v17, %v8278_v54  ;;  %v3342_v50 = vmax.f32 %v3310_v44, 0.0 }
 0x65c   : > { %8233 = vst.msk [vmem:[#allocation4 + $0x3c] sm:$0xf] %vm8217_vm1, %v9506_v9  ;;  %v3344_v45 = vmax.f32 %v3312_v16, 0.0 }
 0x672   : > { %v7994_v40 = vpop.permute.xlu0 %7993 }
 0x673   : > { %v8073_v15 = vsel %vm1345_vm2, %v3337_v0, %v7994_v40  ;;  %v3274_v40 = vmul.f32 %v15491_v2, %v16351_v58 }
 0x674   : > { %v9507_v8 = vpack.c.bf16 %v8073_v15, %v8073_v15  ;;  %v8281_v57 = vsel %vm5234_vm15, %v8073_v15, 0.0  ;;  %v16352_v15 = vld [vmem:[#allocation21_spill] sm:$0xff] }
 0x675   : > { %v8282_v5 = vadd.f32 %v8281_v57, %v8280_v46  ;;  %v3313_v57 = vadd.f32 %v15499_v60, %v3274_v40 }
 0x676   : > { %8234 = vst.msk [vmem:[#allocation4 + $0x40] sm:$0xf] %vm8217_vm1, %v9507_v8  ;;  %v7998_v11 = vpop.permute.xlu0 %7997  ;;  %v7996_v23 = vpop.permute.xlu1 %7995  ;;  %v3276_v8 = vmul.f32 %v16352_v15, %v15491_v2 }
 0x677   : > { %v8075_v21 = vsel %vm1345_vm2, %v3339_v41, %v7998_v11  ;;  %v8074_v33 = vsel %vm1345_vm2, %v3338_v37, %v7996_v23  ;;  %v16353_v41 = vld [vmem:[#allocation24_spill] sm:$0xff]  ;;  %v16354_v11 = vld [vmem:[#allocation23_spill] sm:$0xff] }
 0x678   : > { %v9509_v39 = vpack.c.bf16 %v8075_v21, %v8075_v21  ;;  %v9508_v59 = vpack.c.bf16 %v8074_v33, %v8074_v33  ;;  %v8283_v43 = vsel %vm5234_vm15, %v8074_v33, 0.0  ;;  %v8285_v62 = vsel %vm5234_vm15, %v8075_v21, 0.0 }
 0x679   : > { %v8284_v56 = vadd.f32 %v8283_v43, %v8282_v5  ;;  %v3275_v36 = vmul.f32 %v15491_v2, %v16353_v41  ;;  %v3315_v37 = vadd.f32 %v15499_v60, %v3276_v8  ;;  %v3345_v5 = vmax.f32 %v3313_v57, 0.0 }
 0x67a   : > { %8236 = vst.msk [vmem:[#allocation4 + $0x48] sm:$0xf] %vm8217_vm1, %v9509_v39  ;;  %8235 = vst.msk [vmem:[#allocation4 + $0x44] sm:$0xf] %vm8217_vm1, %v9508_v59  ;;  %v8000_v49 = vpop.permute.xlu1 %7999  ;;  %v3277_v23 = vmul.f32 %v16354_v11, %v15491_v2 }
 0x67b   : > { %v8286_v26 = vadd.f32 %v8285_v62, %v8284_v56  ;;  %v8076_v14 = vsel %vm1345_vm2, %v3340_v24, %v8000_v49  ;;  %v3314_v21 = vadd.f32 %v15499_v60, %v3275_v36  ;;  %v3347_v24 = vmax.f32 %v3315_v37, 0.0 }
 0x67c   : > { %v9510_v3 = vpack.c.bf16 %v8076_v14, %v8076_v14  ;;  %v8287_v61 = vsel %vm5234_vm15, %v8076_v14, 0.0  ;;  %v3316_v56 = vadd.f32 %v15499_v60, %v3277_v23 }
 0x67d   : > { %v8288_v25 = vadd.f32 %v8287_v61, %v8286_v26  ;;  %v3346_v62 = vmax.f32 %v3314_v21, 0.0 }
 0x67e   : > { %8237 = vst.msk [vmem:[#allocation4 + $0x4c] sm:$0xf] %vm8217_vm1, %v9510_v3  ;;  %v3348_v12 = vmax.f32 %v3316_v56, 0.0 }
 0x692   : > { %v8002_v6 = vpop.permute.xlu0 %8001 }
 0x693   : > { %v8077_v53 = vsel %vm1345_vm2, %v3341_v10, %v8002_v6  ;;  %v16356_v10 = vld [vmem:[#allocation25_spill] sm:$0xff] }
 0x694   : > { %v9511_v31 = vpack.c.bf16 %v8077_v53, %v8077_v53  ;;  %v8289_v52 = vsel %vm5234_vm15, %v8077_v53, 0.0  ;;  %v3280_v42 = vmul.f32 %v16356_v10, %v15491_v2  ;;  %v16357_v53 = vld [vmem:[#allocation28_spill] sm:$0xff]  ;;  %v12013_v10 = vld [vmem:[#allocation4 + $0x20] sm:$0xff]  }
 0x695   : > { %v8290_v35 = vadd.f32 %v8289_v52, %v8288_v25  ;;  %v16355_v25 = vld [vmem:[#allocation26_spill] sm:$0xff] }
 0x696   : > { %8238 = vst.msk [vmem:[#allocation4 + $0x50] sm:$0xf] %vm8217_vm1, %v9511_v31  ;;  %v8006_v54 = vpop.permute.xlu0 %8005  ;;  %v8004_v47 = vpop.permute.xlu1 %8003  ;;  %v3278_v19 = vmul.f32 %v15491_v2, %v16355_v25  ;;  %v3279_v31 = vmul.f32 %v15491_v2, %v16357_v53  ;;  %v12018_v53 = vld [vmem:[#allocation4 + $0x48] sm:$0xff]  }
 0x697   : > { %v8079_v9 = vsel %vm1345_vm2, %v3343_v29, %v8006_v54  ;;  %v8078_v17 = vsel %vm1345_vm2, %v3342_v50, %v8004_v47  ;;  %v3319_v50 = vadd.f32 %v15499_v60, %v3280_v42  ;;  %v16358_v54 = vld [vmem:[#allocation27_spill] sm:$0xff] }
 0x698   : > { %v9513_v7 = vpack.c.bf16 %v8079_v9, %v8079_v9  ;;  %v9512_v46 = vpack.c.bf16 %v8078_v17, %v8078_v17  ;;  %v8291_v4 = vsel %vm5234_vm15, %v8078_v17, 0.0  ;;  %v8293_v48 = vsel %vm5234_vm15, %v8079_v9, 0.0  ;;  %v12014_v42 = vld [vmem:[#allocation4 + $0x28] sm:$0xff]  }
 0x699   : > { %v8292_v51 = vadd.f32 %v8291_v4, %v8290_v35  ;;  %v3317_v6 = vadd.f32 %v15499_v60, %v3278_v19  ;;  %v3281_v47 = vmul.f32 %v16358_v54, %v15491_v2  ;;  %v3318_v9 = vadd.f32 %v15499_v60, %v3279_v31  ;;  %v8409_v19 = vld [vmem:[%s16245_s20] sm:$0x1] }
 0x69a   : > { %8240 = vst.msk [vmem:[#allocation4 + $0x58] sm:$0xf] %vm8217_vm1, %v9513_v7  ;;  %8239 = vst.msk [vmem:[#allocation4 + $0x54] sm:$0xf] %vm8217_vm1, %v9512_v46  ;;  %v8008_v18 = vpop.permute.xlu1 %8007  ;;  %v8485_v54 = vld [vmem:[%s16247_s22] sm:$0x1] }
 0x69b   : > { %v8294_v30 = vadd.f32 %v8293_v48, %v8292_v51  ;;  %v8080_v32 = vsel %vm1345_vm2, %v3344_v45, %v8008_v18  ;;  %v3349_v35 = vmax.f32 %v3317_v6, 0.0  ;;  %v3351_v45 = vmax.f32 %v3319_v50, 0.0  ;;  %v12017_v6 = vld [vmem:[#allocation4 + $0x40] sm:$0xff]  }
 0x69c   : > { %v9514_v0 = vpack.c.bf16 %v8080_v32, %v8080_v32  ;;  %v8295_v20 = vsel %vm5234_vm15, %v8080_v32, 0.0  ;;  %v3320_v51 = vadd.f32 %v15499_v60, %v3281_v47  ;;  %v3350_v48 = vmax.f32 %v3318_v9, 0.0 }
 0x69d   : > { %v8296_v28 = vadd.f32 %v8295_v20, %v8294_v30 }
 0x69e   : > { %8241 = vst.msk [vmem:[#allocation4 + $0x5c] sm:$0xf] %vm8217_vm1, %v9514_v0  ;;  %v3352_v40 = vmax.f32 %v3320_v51, 0.0 }
 0x6a1   : > { %v12019_v31 = vld [vmem:[#allocation4 + $0x50] sm:$0xff]  }
 0x6ae   : > { %v8010_v33 = vpop.permute.xlu0 %8009 }
 0x6af   : > { %v8081_v39 = vsel %vm1345_vm2, %v3345_v5, %v8010_v33 }
 0x6b0   : > { %v9515_v59 = vpack.c.bf16 %v8081_v39, %v8081_v39  ;;  %v8297_v43 = vsel %vm5234_vm15, %v8081_v39, 0.0 }
 0x6b1   : > { %v8298_v49 = vadd.f32 %v8297_v43, %v8296_v28 }
 0x6b2   : > { %8242 = vst.msk [vmem:[#allocation4 + $0x60] sm:$0xf] %vm8217_vm1, %v9515_v59  ;;  %v8014_v26 = vpop.permute.xlu0 %8013  ;;  %v8012_v14 = vpop.permute.xlu1 %8011 }
 0x6b3   : > { %v8083_v3 = vsel %vm1345_vm2, %v3347_v24, %v8014_v26  ;;  %v8082_v61 = vsel %vm1345_vm2, %v3346_v62, %v8012_v14  ;;  %v8401_v24 = vld [vmem:[%s16242_s17] sm:$0x1] }
 0x6b4   : > { %v9517_v38 = vpack.c.bf16 %v8083_v3, %v8083_v3  ;;  %v9516_v34 = vpack.c.bf16 %v8082_v61, %v8082_v61  ;;  %v8299_v55 = vsel %vm5234_vm15, %v8082_v61, 0.0  ;;  %v8301_v27 = vsel %vm5234_vm15, %v8083_v3, 0.0  ;;  %v8403_v62 = vld [vmem:[%s16243_s18] sm:$0x1] }
 0x6b5   : > { %v8300_v1 = vadd.f32 %v8299_v55, %v8298_v49  ;;  %v8484_v3 = vld [vmem:[%s16246_s21] sm:$0x3] }
 0x6b6   : > { %8244 = vst.msk [vmem:[#allocation4 + $0x68] sm:$0xf] %vm8217_vm1, %v9517_v38  ;;  %8243 = vst.msk [vmem:[#allocation4 + $0x64] sm:$0xf] %vm8217_vm1, %v9516_v34  ;;  %v8016_v13 = vpop.permute.xlu1 %8015  ;;  %v12008_v61 = vld [vmem:[%s16241_s16] sm:$0x3f]  }
 0x6b7   : > { %v8302_v22 = vadd.f32 %v8301_v27, %v8300_v1  ;;  %v8084_v44 = vsel %vm1345_vm2, %v3348_v12, %v8016_v13  ;;  %v12009_v12 = vld [vmem:[#allocation4] sm:$0xff]   ;;  %v12010_v1 = vld [vmem:[#allocation4 + $0x8] sm:$0xff]   ;;  %v12011_v27 = vld [vmem:[#allocation4 + $0x10] sm:$0xff]  }
 0x6b8   : > { %v9518_v52 = vpack.c.bf16 %v8084_v44, %v8084_v44  ;;  %v8303_v29 = vsel %vm5234_vm15, %v8084_v44, 0.0  ;;  %v12012_v13 = vld [vmem:[#allocation4 + $0x18] sm:$0xff]  }
 0x6b9   : > { %v8304_v16 = vadd.f32 %v8303_v29, %v8302_v22  ;;  %v12015_v22 = vld [vmem:[#allocation4 + $0x30] sm:$0xff]   ;;  %v12016_v44 = vld [vmem:[#allocation4 + $0x38] sm:$0xff]  }
 0x6ba   : > { %8245 = vst.msk [vmem:[#allocation4 + $0x6c] sm:$0xf] %vm8217_vm1, %v9518_v52  ;;  %v12020_v52 = vld [vmem:[#allocation4 + $0x58] sm:$0xff]  }
 0x6bd   : > { %v8018_v17 = vpop.permute.xlu0 %8017  ;;  %v12021_v29 = vld [vmem:[#allocation4 + $0x60] sm:$0xff]  }
 0x6be   : > { %v8085_v7 = vsel %vm1345_vm2, %v3349_v35, %v8018_v17 }
 0x6bf   : > { %v9519_v46 = vpack.c.bf16 %v8085_v7, %v8085_v7  ;;  %v8305_v4 = vsel %vm5234_vm15, %v8085_v7, 0.0 }
 0x6c0   : > { %v8306_v18 = vadd.f32 %v8305_v4, %v8304_v16 }
 0x6c1   : > { %8246 = vst.msk [vmem:[#allocation4 + $0x70] sm:$0xf] %vm8217_vm1, %v9519_v46  ;;  %v8022_v30 = vpop.permute.xlu0 %8021  ;;  %v8020_v32 = vpop.permute.xlu1 %8019  ;;  %v12022_v16 = vld [vmem:[#allocation4 + $0x68] sm:$0xff]  }
 0x6c2   : > { %v8087_v0 = vsel %vm1345_vm2, %v3351_v45, %v8022_v30  ;;  %v8086_v2 = vsel %vm1345_vm2, %v3350_v48, %v8020_v32 }
 0x6c3   : > { %v9521_v20 = vpack.c.bf16 %v8087_v0, %v8087_v0  ;;  %v9520_v28 = vpack.c.bf16 %v8086_v2, %v8086_v2  ;;  %v8307_v58 = vsel %vm5234_vm15, %v8086_v2, 0.0  ;;  %v8309_v60 = vsel %vm5234_vm15, %v8087_v0, 0.0 }
 0x6c4   : > { %v8308_v15 = vadd.f32 %v8307_v58, %v8306_v18  ;;  %v15823_v58 = vld [vmem:[%s12333_s29 + $0x8] sm:$0xff]  }
 0x6c5   : > { %8248 = vst.msk [vmem:[#allocation4 + $0x78] sm:$0xf] %vm8217_vm1, %v9521_v20  ;;  %8247 = vst.msk [vmem:[#allocation4 + $0x74] sm:$0xf] %vm8217_vm1, %v9520_v28  ;;  %v8024_v8 = vpop.permute.xlu1 %8023 }
 0x6c6   : > { %v8088_v57 = vsel %vm1345_vm2, %v3352_v40, %v8024_v8  ;;  %v8310_v41 = vadd.f32 %v8309_v60, %v8308_v15  ;;  %vm8744_vm2 = vcmask 1045504   ;;  %v15826_v40 = vld [vmem:[%s12333_s29] sm:$0xff]   ;;  %v15829_v15 = vld [vmem:[%s12333_s29 + $0x18] sm:$0xff]   ;;  %v15832_v60 = vld [vmem:[%s12333_s29 + $0x10] sm:$0xff]  }
 0x6c7   : > { %v9522_v36 = vpack.c.bf16 %v8088_v57, %v8088_v57  ;;  %v8311_v37 = vsel %vm5234_vm15, %v8088_v57, 0.0  ;;  %v8746_v25 = vsel %vm8744_vm2, %v12008_v61, 0  ;;  %v15837_v57 = vld [vmem:[%s12333_s29 + $0x28] sm:$0xff]  }
 0x6c8   : > { %v8312_v5 = vadd.f32 %v8311_v37, %v8310_v41  ;;  %v15840_v41 = vld [vmem:[%s12333_s29 + $0x20] sm:$0xff]   ;;  %v9526_v37 = vunpack.c.l.bf16 %v15826_v40 }
 0x6c9   : > { %8249 = vst.msk [vmem:[#allocation4 + $0x7c] sm:$0xf] %vm8217_vm1, %v9522_v36  ;;  %v9530_v36 = vunpack.c.l.bf16 %v15823_v58 }
 0x6ca   : > { %v8313_v11 = vrot.slane %v8312_v5, 4 }
 0x6cc   : > { %v8314_v23 = vadd.f32 %v8313_v11, %v8312_v5  ;;  %v12023_v50 = vld [vmem:[#allocation4 + $0x70] sm:$0xff]   ;;  %v9531_v5 = vunpack.c.h.bf16 %v15823_v58  ;;  %v9527_v11 = vunpack.c.h.bf16 %v15826_v40 }
 0x6ce   : > { %v8315_v21 = vrot.slane %v8314_v23, 2 }
 0x6d0   : > { %v8316_v33 = vadd.f32 %v8315_v21, %v8314_v23  ;;  %v12024_v35 = vld [vmem:[#allocation4 + $0x78] sm:$0xff]  }
 0x6d1   : > { %v15847_v21 = vld [vmem:[%s12333_s29 + $0x38] sm:$0xff]  }
 0x6d2   : > { %v8317_v39 = vrot.slane %v8316_v33, 1 }
 0x6d4   : > { %v8318_v59 = vadd.f32 %v8317_v39, %v8316_v33  ;;  %v15850_v33 = vld [vmem:[%s12333_s29 + $0x30] sm:$0xff]   ;;  %v15855_v39 = vld [vmem:[%s16242_s17] ss:$0 sm:$0xff] }
 0x6d6   : > { %v8320_v43 = vmul.f32 0.00390625, %v8318_v59  ;;  %v9538_v59 = vunpack.c.l.bf16 %v15829_v15 }
 0x6d8   : > { %9920 = vmatmul.mubr.msk.f32.vlgmr.msra.gmra.mxu0 %vm5234_vm15, %v8320_v43  ;;  %v9534_v43 = vunpack.c.l.bf16 %v15832_v60 }
 0x798   : > { %v8397_v56 = vpop.f32.mrf.mxu0 }
 0x799   : > { %v8402_v49 = vmul.f32 %v8401_v24, %v8397_v56  ;;  %v9539_v24 = vunpack.c.h.bf16 %v15829_v15  ;;  %v9535_v56 = vunpack.c.h.bf16 %v15832_v60 }
 0x79a   : > { %v9921_v26 = vpop.f32.mrf.mxu0 }
 0x79b   : > { %v8404_v14 = vadd.f32 %v8403_v62, %v8402_v49  ;;  %v15862_v62 = vld [vmem:[%s12333_s29 + $0x48] sm:$0xff]   ;;  %v15865_v49 = vld [vmem:[%s12333_s29 + $0x40] sm:$0xff]   ;;  %v9546_v26 = vunpack.c.l.bf16 %v15837_v57 }
 0x79d   : > { %9931 = vmatmul.mubr.msk.f32.vlgmr.msra.gmra.mxu1 %vm857_vm0, %v8404_v14  ;;  %v9542_v14 = vunpack.c.l.bf16 %v15840_v41 }
 0x79e   : > { %9935 = vmatprep.mubr.msk.f32.mxu1 %vm12144_vm4, %v16341_v63  ;;  %9934 = vmatpush3.msk.msra.mxu1 %vm5514_vm14, %v8484_v3  ;;  %v9547_v3 = vunpack.c.h.bf16 %v15837_v57 }
 0x79f   : > { %9986 = vmatprep.subr.msk.bf16.mxu1 %vm8744_vm2, %v12008_v61  ;;  %v9543_v61 = vunpack.c.h.bf16 %v15840_v41 }
 0x85d   : > { %v8479_v38 = vpop.f32.mrf.mxu1 }
 0x85e   : > { %v8480_v34 = vadd.f32 %v8479_v38, %v8409_v19  ;;  %v15872_v19 = vld [vmem:[%s12333_s29 + $0x58] sm:$0xff]   ;;  %v15875_v38 = vld [vmem:[%s12333_s29 + $0x50] sm:$0xff]  }
 0x85f   : > { %v9932_v63 = vpop.f32.mrf.mxu1 }
 0x860   : > { %v8483_v55 = vmax.f32 %v8480_v34, 0.0  ;;  %v9554_v34 = vunpack.c.l.bf16 %v15847_v21  ;;  %v9550_v63 = vunpack.c.l.bf16 %v15850_v33 }
 0x862   : > { %9936 = vmatmul.mubr.msk.f32.vlgmr.msra.gmra.mxu1 %vm8486_vm5, %v8483_v55  ;;  %v9555_v55 = vunpack.c.h.bf16 %v15847_v21 }
 0x863   : > { %9939 = vmatpush3.bf16.msra.mxu1 %v8746_v25  ;;  %9940 = vmatprep.mubr.msk.bf16.mxu1 %vm5234_vm15, %v12009_v12 }
 0x866   : > { %9941 = vmatmul.mubr.msk.bf16.vlgmr.msra.gmra.mxu1 %vm5234_vm15, %v12010_v1  ;;  %v15882_v1 = vld [vmem:[%s12333_s29 + $0x68] sm:$0xff]  }
 0x867   : > { %9944 = vmatprep.mubr.msk.bf16.mxu1 %vm5234_vm15, %v12011_v27  ;;  %v15885_v27 = vld [vmem:[%s12333_s29 + $0x60] sm:$0xff]  }
 0x86e   : > { %9945 = vmatmul.mubr.msk.bf16.gmra.mxu1 %vm5234_vm15, %v12012_v13 }
 0x86f   : > { %9948 = vmatprep.mubr.msk.bf16.mxu1 %vm5234_vm15, %v12013_v10 }
 0x876   : > { %9949 = vmatmul.mubr.msk.bf16.gmra.mxu1 %vm5234_vm15, %v12014_v42 }
 0x877   : > { %9952 = vmatprep.mubr.msk.bf16.mxu1 %vm5234_vm15, %v12015_v22 }
 0x87e   : > { %9953 = vmatmul.mubr.msk.bf16.gmra.mxu1 %vm5234_vm15, %v12016_v44 }
 0x87f   : > { %9956 = vmatprep.mubr.msk.bf16.mxu1 %vm5234_vm15, %v12017_v6  ;;  %v15892_v6 = vld [vmem:[%s12333_s29 + $0x78] sm:$0xff]  }
 0x886   : > { %9957 = vmatmul.mubr.msk.bf16.gmra.mxu1 %vm5234_vm15, %v12018_v53  ;;  %v15897_v53 = vld [vmem:[%s16243_s18] ss:$0 sm:$0xff] }
 0x887   : > { %9960 = vmatprep.mubr.msk.bf16.mxu1 %vm5234_vm15, %v12019_v31 }
 0x88e   : > { %9961 = vmatmul.mubr.msk.bf16.gmra.mxu1 %vm5234_vm15, %v12020_v52 }
 0x88f   : > { %9964 = vmatprep.mubr.msk.bf16.mxu1 %vm5234_vm15, %v12021_v29 }
 0x896   : > { %9965 = vmatmul.mubr.msk.bf16.gmra.mxu1 %vm5234_vm15, %v12022_v16 }
 0x897   : > { %9968 = vmatprep.mubr.msk.bf16.mxu1 %vm5234_vm15, %v12023_v50  ;;  %v15904_v50 = vld [vmem:[%s12333_s29 + $0x70] sm:$0xff]   ;;  %s715_s29 = sand.u32 1, %s12113_s30  }
 0x898   : > { %s9287_s6 = sshll.u32 %s715_s29, 8  ;;  %s16179_s25 = scalar_lea.sflag [#allocation7], %s715_s29 }
 0x899   : > { %s15999_s26 = scalar_lea.vmem [#allocation6], %s9287_s6  ;;  %s12145_s6 = smov [#allocation6]  }
 0x89a   : > { %s9205_s5 = sshll.u32 %s15999_s26, 4  ;;  %s12057_s0 = sshll.u32 %s12145_s6, 4  ;;  %s16173_s5 = int_to_ptr.vmem [resolvable:$true] %s9205_s5  ;;  %s12058_s0 = int_to_ptr.vmem [resolvable:$false] %s12057_s0 }
 0x89b   : > { %s12053_s4 = scalar_lea.vmem %s16173_s5, 4096  ;;  %s12059_s2 = scalar_lea.vmem %s12058_s0, 8192 }
 0x89c   : > { %p12054_p12 = scmp.ne.s32.totalorder %s16173_s5, %s12053_s4  ;;  %p12060_p1 = scmp.lt.s32.totalorder %s16173_s5, %s12058_s0 }
 0x89d   : > { %p12061_p2 = scmp.lt.s32.totalorder %s12059_s2, %s12053_s4 }
 0x89e   : > { %9969 = vmatmul.mubr.msk.bf16.gmra.mxu1 %vm5234_vm15, %v12024_v35  ;;  %p12055_p13 = pnand %p12054_p12, %p12307_p4 }
 0x89f   : > { %p12062_p3 = por %p12061_p2, %p12060_p1 }
 0x8a0   : > { %p12056_p0 = pneg %p12055_p13 }
 0x8a2   : > { %p12063_p5 = pnand %p12062_p3, %p12056_p0 }
 0x922   : > { %v8559_v47 = vpop.f32.mrf.mxu1 }
 0x923   : > { %v8560_v9 = vadd.f32 %v8559_v47, %v8485_v54 }
 0x924   : > { %v9937_v17 = vpop.f32.mrf.mxu1 }
 0x925   : > { %v9448_v7 = vmul.f32 -1.442695, %v8560_v9 }
 0x926   : > { %v9942_v46 = vpop.f32.mrf.mxu1 }
 0x927   : > { %12025 = vpow2.f32 %v9448_v7  ;;  %v8918_v13 = vmul.f32 %v9942_v46, %v15855_v39 }
 0x928   : > { %v8782_v4 = vpop.f32.mrf.mxu1 }
 0x929   : > { %v8916_v31 = vmul.f32 %v15855_v39, %v8782_v4  ;;  %v8957_v16 = vadd.f32 %v15897_v53, %v8918_v13 }
 0x92a   : > { %v15806_v45 = vpop.f32.mrf.mxu1 }
 0x92b   : > { %v8919_v54 = vmul.f32 %v15806_v45, %v15855_v39  ;;  %v8955_v46 = vadd.f32 %v15897_v53, %v8916_v31 }
 0x92c   : > { %v15808_v51 = vpop.f32.mrf.mxu1 }
 0x92d   : > { %v8917_v47 = vmul.f32 %v15855_v39, %v15808_v51 }
 0x92e   : > { %v15810_v48 = vpop.f32.mrf.mxu1 }
 0x92f   : > { %v8922_v4 = vmul.f32 %v15810_v48, %v15855_v39 }
 0x930   : > { %v15812_v18 = vpop.f32.mrf.mxu1 }
 0x932   : > { %v15814_v30 = vpop.f32.mrf.mxu1 }
 0x933   : > { %v8923_v13 = vmul.f32 %v15814_v30, %v15855_v39 }
 0x934   : > { %v12026_v32 = vpop.eup %12025  ;;  %v15816_v0 = vpop.f32.mrf.mxu1 }
 0x935   : > { %v8566_v2 = vadd.f32 1.0, %v12026_v32  ;;  %v8920_v32 = vmul.f32 %v15855_v39, %v15812_v18  ;;  %v8921_v45 = vmul.f32 %v15855_v39, %v15816_v0  ;;  %v8958_v0 = vadd.f32 %v15897_v53, %v8919_v54 }
 0x936   : > { %v15818_v20 = vpop.f32.mrf.mxu1 }
 0x937   : > { %12027 = vrcp.f32 %v8566_v2  ;;  %v8926_v51 = vmul.f32 %v15818_v20, %v15855_v39  ;;  %v8956_v20 = vadd.f32 %v15897_v53, %v8917_v47  ;;  %v8959_v44 = vadd.f32 %v15897_v53, %v8920_v32 }
 0x938   : > { %v15820_v28 = vpop.f32.mrf.mxu1 }
 0x93a   : > { %v15834_v8 = vpop.f32.mrf.mxu1 }
 0x93b   : > { %v8927_v31 = vmul.f32 %v15834_v8, %v15855_v39  ;;  %v8961_v8 = vadd.f32 %v15897_v53, %v8922_v4 }
 0x93c   : > { %v8817_v23 = vpop.f32.mrf.mxu1 }
 0x93d   : > { %v8925_v17 = vmul.f32 %v15855_v39, %v8817_v23  ;;  %v8962_v23 = vadd.f32 %v15897_v53, %v8923_v13  ;;  %v8966_v47 = vadd.f32 %v15897_v53, %v8927_v31 }
 0x93e   : > { %v9954_v25 = vpop.f32.mrf.mxu1 }
 0x93f   : > { %v8930_v18 = vmul.f32 %v9954_v25, %v15855_v39 }
 0x940   : > { %v8830_v10 = vpop.f32.mrf.mxu1 }
 0x941   : > { %v8928_v30 = vmul.f32 %v15855_v39, %v8830_v10  ;;  %v8960_v10 = vadd.f32 %v15897_v53, %v8921_v45  ;;  %v8969_v4 = vadd.f32 %v15897_v53, %v8930_v18 }
 0x942   : > { %v9955_v35 = vpop.f32.mrf.mxu1 }
 0x943   : > { %v8931_v7 = vmul.f32 %v9955_v35, %v15855_v39  ;;  %v8965_v35 = vadd.f32 %v15897_v53, %v8926_v51  ;;  %v8967_v32 = vadd.f32 %v15897_v53, %v8928_v30 }
 0x944   : > { %v12028_v2 = vpop.eup %12027  ;;  %v8833_v9 = vpop.f32.mrf.mxu1 }
 0x945   : > { %8570 = vst.msk [vmem:[#allocation5] sm:$0x1] %vm8569_vm6, %v12028_v2  ;;  %v8924_v2 = vmul.f32 %v15855_v39, %v15820_v28  ;;  %v8929_v29 = vmul.f32 %v15855_v39, %v8833_v9  ;;  %v8970_v13 = vadd.f32 %v15897_v53, %v8931_v7 }
 0x946   : > { %v9958_v48 = vpop.f32.mrf.mxu1 }
 0x947   : > { %v8934_v28 = vmul.f32 %v9958_v48, %v15855_v39  ;;  %v8963_v54 = vadd.f32 %v15897_v53, %v8924_v2  ;;  %v8964_v48 = vadd.f32 %v15897_v53, %v8925_v17  ;;  %v8968_v22 = vadd.f32 %v15897_v53, %v8929_v29 }
 0x948   : > { %v8846_v52 = vpop.f32.mrf.mxu1 }
 0x949   : > { %v8932_v25 = vmul.f32 %v15855_v39, %v8846_v52  ;;  %v15961_v45 = vadd.f32 %v15897_v53, %v8934_v28 }
 0x94a   : > { %v9959_v9 = vpop.f32.mrf.mxu1 }
 0x94b   : > { %v15964_v51 = vadd.f32 %v15897_v53, %v8932_v25  ;;  %v15967_v2 = vmul.f32 %v9959_v9, %v15855_v39 }
 0x94c   : > { %v15957_v52 = vld [vmem:[#allocation5] ss:$0 sm:$0xff]  ;;  %v15969_v17 = vpop.f32.mrf.mxu1 }
 0x94d   : > { %v9062_v31 = vmul.f32 %v15957_v52, %v8957_v16  ;;  %v9060_v7 = vmul.f32 %v15957_v52, %v8955_v46  ;;  %v9063_v18 = vmul.f32 %v15957_v52, %v8958_v0  ;;  %v9061_v29 = vmul.f32 %v15957_v52, %v8956_v20 }
 0x94e   : > { %v9066_v30 = vmul.f32 %v15957_v52, %v8961_v8  ;;  %v9064_v28 = vmul.f32 %v15957_v52, %v8959_v44  ;;  %v9067_v25 = vmul.f32 %v15957_v52, %v8962_v23  ;;  %v9065_v9 = vmul.f32 %v15957_v52, %v8960_v10  ;;  %v15981_v42 = vpop.f32.mrf.mxu1 }
 0x94f   : > { %v9094_v12 = vadd.f32 %v9530_v36, %v9062_v31  ;;  %v9092_v16 = vadd.f32 %v9526_v37, %v9060_v7  ;;  %v9095_v46 = vadd.f32 %v9531_v5, %v9063_v18  ;;  %v9093_v0 = vadd.f32 %v9527_v11, %v9061_v29 }
 0x950   : > { %v9098_v44 = vadd.f32 %v9538_v59, %v9066_v30  ;;  %v9096_v20 = vadd.f32 %v9534_v43, %v9064_v28  ;;  %v9099_v8 = vadd.f32 %v9539_v24, %v9067_v25  ;;  %v9097_v36 = vadd.f32 %v9535_v56, %v9065_v9  ;;  %v8862_v23 = vpop.f32.mrf.mxu1 }
 0x951   : > { %v9126_v37 = vmax.f32 %v9094_v12, 0.0  ;;  %v9124_v10 = vmax.f32 %v9092_v16, 0.0  ;;  %v9127_v58 = vmax.f32 %v9095_v46, 0.0  ;;  %v9125_v5 = vmax.f32 %v9093_v0, 0.0 }
 0x952   : > { %v9130_v31 = vmax.f32 %v9098_v44, 0.0  ;;  %v9128_v40 = vmax.f32 %v9096_v20, 0.0  ;;  %v9131_v11 = vmax.f32 %v9099_v8, 0.0  ;;  %v9129_v7 = vmax.f32 %v9097_v36, 0.0  ;;  %v9963_v18 = vpop.f32.mrf.mxu1 }
 0x953   : > { %9159 = vst.msk [vmem:[%s15999_s26 + $0x10] sm:$0xff] %vm857_vm0, %v9126_v37  ;;  %9157 = vst.msk [vmem:[%s15999_s26] sm:$0xff] %vm857_vm0, %v9124_v10  ;;  %v9070_v15 = vmul.f32 %v15957_v52, %v8965_v35  ;;  %v9068_v60 = vmul.f32 %v15957_v52, %v8963_v54  ;;  %v9071_v59 = vmul.f32 %v15957_v52, %v8966_v47  ;;  %v16361_v20 = vunpack.c.l.bf16 %v15865_v49 }
 0x954   : > { %9160 = vst.msk [vmem:[%s15999_s26 + $0x18] sm:$0xff] %vm857_vm0, %v9127_v58  ;;  %9158 = vst.msk [vmem:[%s15999_s26 + $0x8] sm:$0xff] %vm857_vm0, %v9125_v5  ;;  %v9069_v43 = vmul.f32 %v15957_v52, %v8964_v48  ;;  %v9074_v24 = vmul.f32 %v15957_v52, %v8969_v4  ;;  %v9072_v56 = vmul.f32 %v15957_v52, %v8967_v32  ;;  %v8865_v54 = vpop.f32.mrf.mxu1 }
 0x955   : > { %9163 = vst.msk [vmem:[%s15999_s26 + $0x30] sm:$0xff] %vm857_vm0, %v9130_v31  ;;  %9161 = vst.msk [vmem:[%s15999_s26 + $0x20] sm:$0xff] %vm857_vm0, %v9128_v40  ;;  %v9075_v12 = vmul.f32 %v15957_v52, %v8970_v13  ;;  %v9073_v35 = vmul.f32 %v15957_v52, %v8968_v22  ;;  %v9102_v47 = vadd.f32 %v9546_v26, %v9070_v15 }
 0x956   : > { %9164 = vst.msk [vmem:[%s15999_s26 + $0x38] sm:$0xff] %vm857_vm0, %v9131_v11  ;;  %9162 = vst.msk [vmem:[%s15999_s26 + $0x28] sm:$0xff] %vm857_vm0, %v9129_v7  ;;  %v9100_v48 = vadd.f32 %v9542_v14, %v9068_v60  ;;  %v9103_v29 = vadd.f32 %v9547_v3, %v9071_v59  ;;  %v9101_v4 = vadd.f32 %v9543_v61, %v9069_v43  ;;  %v16359_v14 = vunpack.c.h.bf16 %v15850_v33  ;;  %v9966_v3 = vpop.f32.mrf.mxu1 }
 0x957   : > { %v9106_v32 = vadd.f32 %v9554_v34, %v9074_v24  ;;  %v9104_v22 = vadd.f32 %v9550_v63, %v9072_v56  ;;  %v9107_v26 = vadd.f32 %v9555_v55, %v9075_v12  ;;  %v9134_v13 = vmax.f32 %v9102_v47, 0.0 }
 0x958   : > { %v9105_v57 = vadd.f32 %v16359_v14, %v9073_v35  ;;  %v9132_v41 = vmax.f32 %v9100_v48, 0.0  ;;  %v9135_v61 = vmax.f32 %v9103_v29, 0.0  ;;  %v9133_v30 = vmax.f32 %v9101_v4, 0.0  ;;  %v8878_v9 = vpop.f32.mrf.mxu1 }
 0x959   : > { %v9138_v34 = vmax.f32 %v9106_v32, 0.0  ;;  %v9136_v28 = vmax.f32 %v9104_v22, 0.0  ;;  %v9139_v25 = vmax.f32 %v9107_v26, 0.0  ;;  %9167 = vst.msk [vmem:[%s15999_s26 + $0x50] sm:$0xff] %vm857_vm0, %v9134_v13  ;;  %v9078_v21 = vmul.f32 %v15957_v52, %v15961_v45 }
 0x95a   : > { %v9137_v63 = vmax.f32 %v9105_v57, 0.0  ;;  %9165 = vst.msk [vmem:[%s15999_s26 + $0x40] sm:$0xff] %vm857_vm0, %v9132_v41  ;;  %9168 = vst.msk [vmem:[%s15999_s26 + $0x58] sm:$0xff] %vm857_vm0, %v9135_v61  ;;  %v9076_v33 = vmul.f32 %v15957_v52, %v15964_v51  ;;  %v8974_v55 = vadd.f32 %v15897_v53, %v15967_v2  ;;  %v8933_v16 = vmul.f32 %v15855_v39, %v15969_v17  ;;  %v9967_v0 = vpop.f32.mrf.mxu1 }
 0x95b   : > { %9166 = vst.msk [vmem:[%s15999_s26 + $0x48] sm:$0xff] %vm857_vm0, %v9133_v30  ;;  %9171 = vst.msk [vmem:[%s15999_s26 + $0x70] sm:$0xff] %vm857_vm0, %v9138_v34  ;;  %v8938_v45 = vmul.f32 %v15981_v42, %v15855_v39  ;;  %v8936_v46 = vmul.f32 %v15855_v39, %v8862_v23  ;;  %v8939_v51 = vmul.f32 %v9963_v18, %v15855_v39  ;;  %v16360_v17 = vunpack.c.l.bf16 %v15862_v62 }
 0x95c   : > { %9169 = vst.msk [vmem:[%s15999_s26 + $0x60] sm:$0xff] %vm857_vm0, %v9136_v28  ;;  %9172 = vst.msk [vmem:[%s15999_s26 + $0x78] sm:$0xff] %vm857_vm0, %v9139_v25  ;;  %v8937_v2 = vmul.f32 %v15855_v39, %v8865_v54  ;;  %v9108_v8 = vadd.f32 %v16361_v20, %v9076_v33  ;;  %v9079_v36 = vmul.f32 %v15957_v52, %v8974_v55  ;;  %v8881_v5 = vpop.f32.mrf.mxu1  ;;  %v16362_v11 = vunpack.c.h.bf16 %v15862_v62 }
 0x95d   : > { %9170 = vst.msk [vmem:[%s15999_s26 + $0x68] sm:$0xff] %vm857_vm0, %v9137_v63  ;;  %v9110_v44 = vadd.f32 %v16360_v17, %v9078_v21  ;;  %v8972_v37 = vadd.f32 %v15897_v53, %v8933_v16  ;;  %v8977_v42 = vadd.f32 %v15897_v53, %v8938_v45  ;;  %v8975_v23 = vadd.f32 %v15897_v53, %v8936_v46 }
 0x95e   : > { %v8978_v10 = vadd.f32 %v15897_v53, %v8939_v51  ;;  %v8976_v58 = vadd.f32 %v15897_v53, %v8937_v2  ;;  %v9140_v40 = vmax.f32 %v9108_v8, 0.0  ;;  %v9111_v7 = vadd.f32 %v16362_v11, %v9079_v36  ;;  %v9970_v24 = vpop.f32.mrf.mxu1 }
 0x95f   : > { %v9142_v31 = vmax.f32 %v9110_v44, 0.0  ;;  %v9077_v18 = vmul.f32 %v15957_v52, %v8972_v37  ;;  %v9082_v15 = vmul.f32 %v15957_v52, %v8977_v42  ;;  %v9080_v60 = vmul.f32 %v15957_v52, %v8975_v23 }
 0x960   : > { %v9083_v59 = vmul.f32 %v15957_v52, %v8978_v10  ;;  %v9081_v43 = vmul.f32 %v15957_v52, %v8976_v58  ;;  %9173 = vst.msk [vmem:[%s15999_s26 + $0x80] sm:$0xff] %vm857_vm0, %v9140_v40  ;;  %v9143_v56 = vmax.f32 %v9111_v7, 0.0  ;;  %v16363_v62 = vunpack.c.h.bf16 %v15865_v49  ;;  %v8894_v57 = vpop.f32.mrf.mxu1 }
 0x961   : > { %9175 = vst.msk [vmem:[%s15999_s26 + $0x90] sm:$0xff] %vm857_vm0, %v9142_v31  ;;  %v8942_v35 = vmul.f32 %v9966_v3, %v15855_v39  ;;  %v8940_v54 = vmul.f32 %v15855_v39, %v8878_v9  ;;  %v16364_v47 = vunpack.c.l.bf16 %v15872_v19  ;;  %v16365_v29 = vunpack.c.l.bf16 %v15875_v38 }
 0x962   : > { %v9109_v12 = vadd.f32 %v16363_v62, %v9077_v18  ;;  %v16366_v32 = vunpack.c.h.bf16 %v15872_v19  ;;  %v16367_v26 = vunpack.c.h.bf16 %v15875_v38  ;;  %9176 = vst.msk [vmem:[%s15999_s26 + $0x98] sm:$0xff] %vm857_vm0, %v9143_v56  ;;  %v8943_v41 = vmul.f32 %v9967_v0, %v15855_v39  ;;  %v9971_v38 = vpop.f32.mrf.mxu1 }
 0x963   : > { %v9114_v48 = vadd.f32 %v16364_v47, %v9082_v15  ;;  %v9112_v4 = vadd.f32 %v16365_v29, %v9080_v60  ;;  %v8981_v3 = vadd.f32 %v15897_v53, %v8942_v35  ;;  %v8979_v13 = vadd.f32 %v15897_v53, %v8940_v54 }
 0x964   : > { %v9115_v22 = vadd.f32 %v16366_v32, %v9083_v59  ;;  %v9113_v14 = vadd.f32 %v16367_v26, %v9081_v43  ;;  %v9141_v49 = vmax.f32 %v9109_v12, 0.0  ;;  %v8982_v63 = vadd.f32 %v15897_v53, %v8943_v41  ;;  %v8897_v16 = vpop.f32.mrf.mxu1 }
 0x965   : > { %v9146_v61 = vmax.f32 %v9114_v48, 0.0  ;;  %v9144_v19 = vmax.f32 %v9112_v4, 0.0  ;;  %v9086_v28 = vmul.f32 %v15957_v52, %v8981_v3  ;;  %v9084_v25 = vmul.f32 %v15957_v52, %v8979_v13 }
 0x966   : > { %v9147_v30 = vmax.f32 %v9115_v22, 0.0  ;;  %v9145_v34 = vmax.f32 %v9113_v14, 0.0  ;;  %9174 = vst.msk [vmem:[%s15999_s26 + $0x88] sm:$0xff] %vm857_vm0, %v9141_v49  ;;  %v8941_v9 = vmul.f32 %v15855_v39, %v8881_v5  ;;  %v8946_v21 = vmul.f32 %v9970_v24, %v15855_v39 }
 0x967   : > { %9179 = vst.msk [vmem:[%s15999_s26 + $0xb0] sm:$0xff] %vm857_vm0, %v9146_v61  ;;  %9177 = vst.msk [vmem:[%s15999_s26 + $0xa0] sm:$0xff] %vm857_vm0, %v9144_v19  ;;  %v8944_v33 = vmul.f32 %v15855_v39, %v8894_v57  ;;  %v8947_v55 = vmul.f32 %v9971_v38, %v15855_v39  ;;  %v9583_v45 = vunpack.c.h.bf16 %v15904_v50  ;;  %v16368_v46 = vunpack.c.l.bf16 %v15882_v1 }
 0x968   : > { %9180 = vst.msk [vmem:[%s15999_s26 + $0xb8] sm:$0xff] %vm857_vm0, %v9147_v30  ;;  %9178 = vst.msk [vmem:[%s15999_s26 + $0xa8] sm:$0xff] %vm857_vm0, %v9145_v34  ;;  %v16369_v2 = vunpack.c.l.bf16 %v15885_v27  ;;  %v9087_v17 = vmul.f32 %v15957_v52, %v8982_v63  ;;  %v8980_v44 = vadd.f32 %v15897_v53, %v8941_v9  ;;  %v8985_v20 = vadd.f32 %v15897_v53, %v8946_v21 }
 0x969   : > { %v9118_v51 = vadd.f32 %v16368_v46, %v9086_v28  ;;  %v8983_v8 = vadd.f32 %v15897_v53, %v8944_v33  ;;  %v8986_v36 = vadd.f32 %v15897_v53, %v8947_v55  ;;  %v8945_v37 = vmul.f32 %v15855_v39, %v8897_v16 }
 0x96a   : > { %v9116_v0 = vadd.f32 %v16369_v2, %v9084_v25  ;;  %v16370_v10 = vunpack.c.h.bf16 %v15882_v1  ;;  %v9085_v5 = vmul.f32 %v15957_v52, %v8980_v44  ;;  %v9090_v31 = vmul.f32 %v15957_v52, %v8985_v20 }
 0x96b   : > { %v9150_v42 = vmax.f32 %v9118_v51, 0.0  ;;  %v9088_v40 = vmul.f32 %v15957_v52, %v8983_v8  ;;  %v9091_v11 = vmul.f32 %v15957_v52, %v8986_v36  ;;  %v8984_v7 = vadd.f32 %v15897_v53, %v8945_v37 }
 0x96c   : > { %v9148_v23 = vmax.f32 %v9116_v0, 0.0  ;;  %v9119_v58 = vadd.f32 %v16370_v10, %v9087_v17  ;;  %v16371_v1 = vunpack.c.h.bf16 %v15885_v27  ;;  %v16372_v15 = vunpack.c.l.bf16 %v15892_v6 }
 0x96d   : > { %9183 = vst.msk [vmem:[%s15999_s26 + $0xd0] sm:$0xff] %vm857_vm0, %v9150_v42  ;;  %v16373_v59 = vunpack.c.l.bf16 %v15904_v50  ;;  %v16374_v53 = vunpack.c.h.bf16 %v15892_v6  ;;  %v9089_v56 = vmul.f32 %v15957_v52, %v8984_v7 }
 0x96e   : > { %9181 = vst.msk [vmem:[%s15999_s26 + $0xc0] sm:$0xff] %vm857_vm0, %v9148_v23  ;;  %v9151_v39 = vmax.f32 %v9119_v58, 0.0  ;;  %v9117_v18 = vadd.f32 %v16371_v1, %v9085_v5  ;;  %v9122_v60 = vadd.f32 %v16372_v15, %v9090_v31 }
 0x96f   : > { %v9120_v43 = vadd.f32 %v16373_v59, %v9088_v40  ;;  %v9123_v24 = vadd.f32 %v16374_v53, %v9091_v11  ;;  %v9121_v54 = vadd.f32 %v9583_v45, %v9089_v56 }
 0x970   : > { %9184 = vst.msk [vmem:[%s15999_s26 + $0xd8] sm:$0xff] %vm857_vm0, %v9151_v39  ;;  %v9149_v27 = vmax.f32 %v9117_v18, 0.0  ;;  %v9154_v62 = vmax.f32 %v9122_v60, 0.0 }
 0x971   : > { %v9152_v12 = vmax.f32 %v9120_v43, 0.0  ;;  %v9155_v35 = vmax.f32 %v9123_v24, 0.0  ;;  %v9153_v6 = vmax.f32 %v9121_v54, 0.0 }
 0x972   : > { %9182 = vst.msk [vmem:[%s15999_s26 + $0xc8] sm:$0xff] %vm857_vm0, %v9149_v27  ;;  %9187 = vst.msk [vmem:[%s15999_s26 + $0xf0] sm:$0xff] %vm857_vm0, %v9154_v62 }
 0x973   : > { %9185 = vst.msk [vmem:[%s15999_s26 + $0xe0] sm:$0xff] %vm857_vm0, %v9152_v12  ;;  %9188 = vst.msk [vmem:[%s15999_s26 + $0xf8] sm:$0xff] %vm857_vm0, %v9155_v35 }
 0x974   : > { %9186 = vst.msk [vmem:[%s15999_s26 + $0xe8] sm:$0xff] %vm857_vm0, %v9153_v6 }
 0x975   : > { %12066 = shalt.err (!%p12063_p5)
}
 0x976   : > { %s12067_s29 = scalar_lea.hbm %s16165_s3, 4096  ;;  %s12071_s6 = scalar_lea.hbm %s16375_s28, 8192 }
 0x977   : > { %p12068_p6 = scmp.ne.s32.totalorder %s16165_s3, %s12067_s29  ;;  %p12072_p10 = scmp.lt.s32.totalorder %s16165_s3, %s16375_s28 }
 0x978   : > { %p12073_p11 = scmp.lt.s32.totalorder %s12071_s6, %s12067_s29 }
 0x979   : > { %p12069_p7 = pnand %p12068_p6, %p12307_p4 }
 0x97a   : > { %p12074_p12 = por %p12073_p11, %p12072_p10 }
 0x97b   : > { %p12070_p9 = pneg %p12069_p7 }
 0x97d   : > { %p12075_p13 = pnand %p12074_p12, %p12070_p9 }
 0x97f   : > { %12078 = shalt.err (!%p12075_p13)
}
 0x980   : > { %s12146_s4 = smov 128  }
 0x981   : > { %9987 = dma.vmem_to_hbm [thread:$0]  (%p12307_p4), %s16173_s5, 4096, %s16165_s3, %s16179_s25, %s12146_s4, %s12146_s4, %s16314_s24  }
 0x982 PF: > { %s16376_s0 = sld [smem:[#allocation9_spill]]  ;;  %p9993_p0 = scmp.ge.s32.totalorder %s12129_s1, 2 }
 0x984   : > { %p9990_p1 = pnand %p9993_p0, %p12314_p8 }
 0x986   : > { %p9991_p2 = pneg %p9990_p1 }
 0x988   : > { %s9220_s26 = sand.u32 1, %s16376_s0  }
 0x989   : > { %s9221_s8 = scalar_lea.sflag [#allocation7], %s9220_s26 }
 0x98a   : > { %12104 = dma.done.wait (%p9991_p2), %s9221_s8, 4096  }
 0x98b   : > { %12106 = vsyncadd (%p9991_p2), %s9221_s8, 4294963200  ;;  %s36_s1 = sadd.s32 1, %s12129_s1   ;;  %s16378_s9 = sld [smem:[#allocation10_spill]] }
 0x98c   : > { %p33_p3 = scmp.ge.s32.totalorder %s36_s1, 4   ;;  %s16379_s24 = sld [smem:[#allocation14_spill]] }
 0x98d   : > { %s16380_s25 = sld [smem:[#allocation11_spill]]  ;;  %s16382_s4 = smov %s12113_s30 }
 0x98e   : > { %s16381_s5 = sld [smem:[#allocation12_spill]]  ;;  %35 = sbr.rel (!%p33_p3) target bundleno = 16 (0x10), region = 157 }
 0x991   : > { %s16383_s30 = smov %s16378_s9 }
 0x993   :  { %9226 = vsyncpa [#allocation7], 1 }
 0x994   :  { %9228 = vsyncpa [#allocation7 + $0x1], 1 }

</bundles_post_ra>
